<compile_context>
chip_gen: v5e
topology: v5e:2x2
jax: 0.10.0
libtpu: 0.0.40
codegen_flags: <defaults>
</compile_context>

<pallas_src>
import math
import functools

import jax
import jax.numpy as jnp
from jax.experimental import pallas as pl
from jax.experimental.pallas import tpu as pltpu


VMEM_LIMIT_BYTES = 32 * 1024 * 1024  # > v5e's 16 MiB scoped default; fits v7x.

# ----------------------------------------------------------------------------
# Static network configuration (PyTorch module spec, use_rough=True)
# ----------------------------------------------------------------------------
CONV_SPECS = {
    # name: (cout, cin, kh, kw, stride, padding)
    "conv1":   (32,  3,   3, 3, 2, 1),
    "conv2":   (64,  32,  3, 3, 2, 1),
    "conv3":   (128, 64,  3, 3, 1, 1),
    "conv4":   (256, 128, 3, 3, 1, 1),
    "conv5":   (128, 256, 3, 3, 1, 1),
    "conv1_s": (32,  6,   3, 3, 2, 1),
    "conv2_s": (64,  32,  3, 3, 2, 1),
    "conv3_s": (128, 64,  3, 3, 1, 1),
    "conv4_s": (256, 128, 3, 3, 1, 1),
    "conv6":   (3,   32,  3, 3, 1, 1),
    "skip1a":  (3,   3,   1, 1, 1, 0),
    "skip1b":  (3,   3,   3, 3, 1, 1),
    "skip1c":  (3,   3,   3, 3, 1, 1),
    "skip2":   (64,  32,  1, 1, 1, 0),
    "skip3":   (128, 64,  3, 3, 1, 1),
}
TCONV_SPECS = {
    # name: (cin, cout, kh, kw, stride, padding, output_padding)
    "tconv1": (128, 64, 3, 3, 2, 1, 1),
    "tconv2": (64,  32, 2, 2, 2, 0, 0),
}


def _round_up(x, m):
    return (x + m - 1) // m * m


# ----------------------------------------------------------------------------
# Pallas kernels
# ----------------------------------------------------------------------------
def _mm_bias_kernel(x_ref, w_ref, b_ref, o_ref, *, act, clamp):
    """out = clamp(act(x @ w + b)); bf16 MXU inputs, f32 epilogue."""
    y = jnp.dot(x_ref[...], w_ref[...], preferred_element_type=jnp.float32)
    y = y + b_ref[...]
    if act == "relu":
        y = jnp.maximum(y, 0.0)
    if clamp is not None:
        y = jnp.clip(y, clamp[0], clamp[1])
    o_ref[...] = y.astype(o_ref.dtype)


def _mm_bias_res_kernel(x_ref, w_ref, b_ref, r_ref, o_ref, *, act, clamp):
    """out = clamp(act(x @ w + b + res))."""
    y = jnp.dot(x_ref[...], w_ref[...], preferred_element_type=jnp.float32)
    y = y + b_ref[...] + r_ref[...].astype(jnp.float32)
    if act == "relu":
        y = jnp.maximum(y, 0.0)
    if clamp is not None:
        y = jnp.clip(y, clamp[0], clamp[1])
    o_ref[...] = y.astype(o_ref.dtype)


def _mask_rough_kernel(x_ref, s_ref, m_ref, xm_ref, xms_ref):
    """xm = x * mask ; xms = (x * mask) * s  (lane-dense, bf16 outputs)."""
    xm = x_ref[...] * m_ref[...]
    xm_ref[...] = xm.astype(xm_ref.dtype)
    xms_ref[...] = (xm * s_ref[...]).astype(xms_ref.dtype)


# ----------------------------------------------------------------------------
# Fused matmul wrapper (single K block, single N block, 1-D grid over M)
# ----------------------------------------------------------------------------
def fused_matmul(cols, w_mat, b_row, res=None, act="relu", clamp=None,
                 out_dtype=jnp.bfloat16):
    """y = clamp(act(cols @ w_mat + b [+ res]))[:M].

    cols:  (M, K)   activation patches (cast to bf16)
    w_mat: (Kp, N)  pre-padded (K only) bf16 weight matrix, N = exact cout
    b_row: (1, N)   f32 bias
    res:   (M, N)   optional residual (added before act/clamp)
    """
    assert act in ("relu", "none"), f"unknown activation {act!r}"
    M, K = cols.shape
    Kp, N = w_mat.shape

    tm = min(512, _round_up(M, 8))
    Mp = _round_up(M, tm)
    grid_m = Mp // tm

    xp = cols.astype(jnp.bfloat16)
    if Mp > M or Kp > K:
        xp = jnp.pad(xp, ((0, Mp - M), (0, Kp - K)))

    x_kwargs = {}
    if grid_m >= 3:
        # Deeper pipelining only when there are enough grid steps to use it.
        x_kwargs["pipeline_mode"] = pl.Buffered(3)

    inputs = [xp, w_mat, b_row]
    in_specs = [
        pl.BlockSpec((tm, Kp), lambda i: (i, 0), **x_kwargs),  # act tile, full K
        pl.BlockSpec((Kp, N), lambda i: (0, 0)),               # resident weight
        pl.BlockSpec((1, N), lambda i: (0, 0)),                # bias row
    ]
    if res is not None:
        rp = res if Mp == M else jnp.pad(res, ((0, Mp - M), (0, 0)))
        inputs.append(rp)
        in_specs.append(pl.BlockSpec((tm, N), lambda i: (i, 0)))
        kernel = functools.partial(_mm_bias_res_kernel, act=act, clamp=clamp)
    else:
        kernel = functools.partial(_mm_bias_kernel, act=act, clamp=clamp)

    out = pl.pallas_call(
        kernel,
        out_shape=jax.ShapeDtypeStruct((Mp, N), out_dtype),
        grid_spec=pltpu.PrefetchScalarGridSpec(
            num_scalar_prefetch=0,
            grid=(grid_m,),
            in_specs=in_specs,
            out_specs=pl.BlockSpec((tm, N), lambda i: (i, 0)),
        ),
        compiler_params=pltpu.CompilerParams(
            dimension_semantics=("parallel",),
            vmem_limit_bytes=VMEM_LIMIT_BYTES),
    )(*inputs)
    return out[:M] if Mp > M else out


# ----------------------------------------------------------------------------
# Elementwise mask / roughness prologue (blocked + pipelined)
# ----------------------------------------------------------------------------
def mask_and_rough(x, s, mask):
    """Returns (x*mask, (x*mask)*s) as bf16, computed in one Pallas call."""
    shp = x.shape
    m = jnp.broadcast_to(mask, shp).astype(x.dtype)
    total = x.size
    lanes = 128
    rows = -(-total // lanes)
    br = min(512, _round_up(rows, 8))
    rows_p = _round_up(rows, br)
    pad = rows_p * lanes - total

    def prep_arr(a):
        return jnp.pad(a.reshape(-1), (0, pad)).reshape(rows_p, lanes)

    spec = pl.BlockSpec((br, lanes), lambda i: (i, 0))
    xm, xms = pl.pallas_call(
        _mask_rough_kernel,
        out_shape=(jax.ShapeDtypeStruct((rows_p, lanes), jnp.bfloat16),
                   jax.ShapeDtypeStruct((rows_p, lanes), jnp.bfloat16)),
        grid_spec=pltpu.PrefetchScalarGridSpec(
            num_scalar_prefetch=0,
            grid=(rows_p // br,),
            in_specs=[spec, spec, spec],
            out_specs=(spec, spec),
        ),
        compiler_params=pltpu.CompilerParams(
            dimension_semantics=("parallel",),
            vmem_limit_bytes=VMEM_LIMIT_BYTES),
    )(prep_arr(x), prep_arr(s), prep_arr(m))
    xm = xm.reshape(-1)[:total].reshape(shp)
    xms = xms.reshape(-1)[:total].reshape(shp)
    return xm, xms


# ----------------------------------------------------------------------------
# Conv glue: im2col (HBM-side for now) + Pallas matmul
# ----------------------------------------------------------------------------
def _im2col(x, kh, kw, stride, padding):
    # TODO(synk): move im2col into the kernel (manual halo-band DMA) to cut the
    # 9x cols HBM traffic on the stride-1 3x3 layers.
    n, h, w, c = x.shape
    xp = jnp.pad(x, ((0, 0), (padding, padding), (padding, padding), (0, 0)))
    ho = (h + 2 * padding - kh) // stride + 1
    wo = (w + 2 * padding - kw) // stride + 1
    cols = []
    for dh in range(kh):
        for dw in range(kw):
            cols.append(xp[:, dh:dh + (ho - 1) * stride + 1:stride,
                           dw:dw + (wo - 1) * stride + 1:stride, :])
    patches = jnp.concatenate(cols, axis=-1)             # (N, Ho, Wo, KH*KW*C)
    return patches.reshape(n * ho * wo, kh * kw * c), (n, ho, wo)


def conv2d(prep, name, x, res=None, act="relu", clamp=None,
           out_dtype=jnp.bfloat16):
    cout, _cin, kh, kw, stride, padding = CONV_SPECS[name]
    cols, (n, ho, wo) = _im2col(x, kh, kw, stride, padding)
    r = None if res is None else res.reshape(n * ho * wo, cout)
    y = fused_matmul(cols, prep[name + "_w"], prep[name + "_b"],
                     res=r, act=act, clamp=clamp, out_dtype=out_dtype)
    return y.reshape(n, ho, wo, cout)


# ----------------------------------------------------------------------------
# Sub-pixel (phase-decomposed) transposed conv: all 4 phases in ONE matmul,
# output written directly in interleave-ready layout (no transpose).
# ----------------------------------------------------------------------------
def _tconv_taps_1d(k, s, p):
    """For each output phase a in [0, s): list of (ki, di) such that
       out[i*s + a] += x[i + di] * w[ki]   (x zero outside its range)."""
    taps = {}
    for a in range(s):
        lst = []
        for ki in range(k):
            if (a + p - ki) % s == 0:
                lst.append((ki, (a + p - ki) // s))
        taps[a] = lst
    return taps


def _tconv_shifts(kh, kw, s, p):
    taps_h = _tconv_taps_1d(kh, s, p)
    taps_w = _tconv_taps_1d(kw, s, p)
    dis = sorted({di for lst in taps_h.values() for (_, di) in lst})
    djs = sorted({dj for lst in taps_w.values() for (_, dj) in lst})
    shifts = [(di, dj) for di in dis for dj in djs]
    return shifts, taps_h, taps_w


def _pick_band(nh, w):
    """Largest R dividing nh with (R*w) % 8 == 0 and R*w ~<= 512."""
    target = max(1, 512 // max(w, 1))
    for r in range(min(target, nh), 0, -1):
        if nh % r == 0 and (r * w) % 8 == 0:
            return r
    return nh  # single band; block first dim == full array dim (always legal)


def conv_transpose2d(prep, name, x, res=None):
    cin, cout, kh, kw, s, p, op = TCONV_SPECS[name]
    assert s == 2, "phase decomposition below assumes stride 2"
    n, h, w_, _ = x.shape
    # For these configs the output is exactly s*h x s*w.
    assert (h - 1) * s - 2 * p + kh + op == s * h
    assert (w_ - 1) * s - 2 * p + kw + op == s * w_

    shifts, _, _ = _tconv_shifts(kh, kw, s, p)
    assert min(d for sh in shifts for d in sh) >= 0
    max_di = max(di for di, _ in shifts)
    max_dj = max(dj for _, dj in shifts)

    # Union-of-shifts cols (tconv1: 4 shifts -> K=4*cin; tconv2: plain reshape).
    if shifts == [(0, 0)]:
        cols = x.reshape(n * h * w_, cin)
    else:
        xp = jnp.pad(x, ((0, 0), (0, max_di), (0, max_dj), (0, 0)))
        cols = jnp.concatenate(
            [xp[:, di:di + h, dj:dj + w_, :] for (di, dj) in shifts], axis=-1)
        cols = cols.reshape(n * h * w_, len(shifts) * cin)
    cols = cols.astype(jnp.bfloat16)
    K = cols.shape[1]

    w_mat = prep[name + "_w"]          # (2, K, 2*cout)  bf16  (phase-a leading)
    b_row = prep[name + "_b"]          # (1, 2*cout)     f32
    two_c = 2 * cout

    R = _pick_band(n * h, w_)
    grid = (n * h // R, 2)
    has_res = res is not None

    def kernel(x_ref, w_ref, b_ref, *rest):
        if has_res:
            r_ref, o_ref = rest
        else:
            (o_ref,) = rest
        y = jnp.dot(x_ref[...], w_ref[0], preferred_element_type=jnp.float32)
        y = (y + b_ref[...]).reshape(R, 1, w_, two_c)
        if has_res:
            y = y + r_ref[...].astype(jnp.float32)
        o_ref[...] = jnp.maximum(y, 0.0).astype(o_ref.dtype)

    inputs = [cols, w_mat, b_row]
    in_specs = [
        pl.BlockSpec((R * w_, K), lambda i, a: (i, 0)),
        pl.BlockSpec((1, K, two_c), lambda i, a: (a, 0, 0)),
        pl.BlockSpec((1, two_c), lambda i, a: (0, 0)),
    ]
    out_spec = pl.BlockSpec((R, 1, w_, two_c), lambda i, a: (i, a, 0, 0))
    if has_res:
        # res is the half-res residual (n, 2h, 2w, cout); its phase-split view
        # (n*h, 2, w, 2*cout) is a pure reshape -> same BlockSpec as the output.
        inputs.append(res.reshape(n * h, 2, w_, two_c))
        in_specs.append(out_spec)

    out = pl.pallas_call(
        kernel,
        out_shape=jax.ShapeDtypeStruct((n * h, 2, w_, two_c), jnp.bfloat16),
        grid_spec=pltpu.PrefetchScalarGridSpec(
            num_scalar_prefetch=0,
            grid=grid,
            in_specs=in_specs,
            out_specs=out_spec,
        ),
        compiler_params=pltpu.CompilerParams(
            dimension_semantics=("parallel", "parallel"),
            vmem_limit_bytes=VMEM_LIMIT_BYTES),
    )(*inputs)
    # (n*h, 2, w, 2*cout) row-major == (n, 2h, 2w, cout): free reshape, no
    # transpose / extra HBM pass for the phase interleave.
    return out.reshape(n, s * h, s * w_, cout)


# ----------------------------------------------------------------------------
# Parameter init (PyTorch-native layouts) + one-time matmul-format preparation
# ----------------------------------------------------------------------------
def init_params(key):
    params = {}
    keys = iter(jax.random.split(key, 2 * (len(CONV_SPECS) + len(TCONV_SPECS))))
    for name, (cout, cin, kh, kw, _s, _p) in CONV_SPECS.items():
        fan_in = cin * kh * kw
        params[name + "_w"] = math.sqrt(2.0 / fan_in) * jax.random.normal(
            next(keys), (cout, cin, kh, kw), jnp.float32)          # kaiming
        bound = 1.0 / math.sqrt(fan_in)
        params[name + "_b"] = jax.random.uniform(
            next(keys), (cout,), jnp.float32, -bound, bound)
    for name, (cin, cout, kh, kw, _s, _p, _op) in TCONV_SPECS.items():
        fan_in = cin * kh * kw
        bound = 1.0 / math.sqrt(fan_in)
        params[name + "_w"] = jax.random.uniform(
            next(keys), (cin, cout, kh, kw), jnp.float32, -bound, bound)
        params[name + "_b"] = jax.random.uniform(
            next(keys), (cout,), jnp.float32, -bound, bound)
    return params


def prepare_params(params):
    """One-time: OIHW -> (KH*KW*Cin, Cout) bf16 matrices (K padded to 128
    multiples only when K > 128, N kept exact), f32 bias rows, and merged
    per-phase weight matrices for the sub-pixel transposed convs."""
    prep = {}
    for name, (cout, cin, kh, kw, _s, _p) in CONV_SPECS.items():
        w = params[name + "_w"]                                  # (cout,cin,kh,kw)
        K = kh * kw * cin
        Kp = K if K <= 128 else _round_up(K, 128)
        wm = jnp.transpose(w, (2, 3, 1, 0)).reshape(K, cout)
        prep[name + "_w"] = jnp.pad(wm, ((0, Kp - K), (0, 0))).astype(jnp.bfloat16)
        prep[name + "_b"] = params[name + "_b"].reshape(1, cout).astype(jnp.float32)
    for name, (cin, cout, kh, kw, s, p, _op) in TCONV_SPECS.items():
        w = params[name + "_w"]                                  # (cin,cout,kh,kw)
        shifts, taps_h, taps_w = _tconv_shifts(kh, kw, s, p)
        K = len(shifts) * cin
        wm = jnp.zeros((s, K, s * cout), jnp.float32)
        for a in range(s):
            dmap_h = {di: ki for (ki, di) in taps_h[a]}
            for b in range(s):
                dmap_w = {dj: kj for (kj, dj) in taps_w[b]}
                for sidx, (di, dj) in enumerate(shifts):
                    if di in dmap_h and dj in dmap_w:
                        wm = wm.at[a, sidx * cin:(sidx + 1) * cin,
                                   b * cout:(b + 1) * cout].set(
                            w[:, :, dmap_h[di], dmap_w[dj]])
        prep[name + "_w"] = wm.astype(jnp.bfloat16)
        prep[name + "_b"] = jnp.tile(params[name + "_b"], s).reshape(
            1, s * cout).astype(jnp.float32)
    return prep


# ----------------------------------------------------------------------------
# Forward pass == PSA_relit_PCNet.forward (use_mask=True, use_rough=True,
# shading-net "_s" buffers None so that branch is recomputed, clamp to [0, 1]).
# ----------------------------------------------------------------------------
def psa_relit_pcnet_forward(prep, x, s, mask, clamp_min=0.0, clamp_max=1.0):
    xm, xms = mask_and_rough(x, s, mask)          # x*mask, (x*mask)*s  (bf16)
    s_bf = s.astype(jnp.bfloat16)
    s_cat = jnp.concatenate([s_bf, xms], axis=-1)  # torch.cat([argv0, argv1], 1)

    conv = functools.partial(conv2d, prep)

    # "_s" branch (ShadingNet simplify path, recomputed)
    res1_s = conv("conv1_s", s_cat)
    res2_s = conv("conv2_s", res1_s)
    res3_s = conv("conv3_s", res2_s)
    res4_s = conv("conv4_s", res3_s)

    # skipConv1(argv[0]): 1x1 conv+relu, 3x3 conv+relu, 3x3 conv+relu
    r1 = conv("skip1a", s_bf)
    r1 = conv("skip1b", r1)
    res1 = conv("skip1c", r1)

    h = conv("conv1", xm, res=res1_s)
    res2 = conv("skip2", h, act="none")
    h = conv("conv2", h, res=res2_s)
    res3 = conv("skip3", h, act="none")
    h = conv("conv3", h, res=res3_s)
    h = conv("conv4", h, res=res4_s)
    h = conv("conv5", h, res=res3)
    h = conv_transpose2d(prep, "tconv1", h, res=res2)   # relu(transConv1(x)+res2)
    h = conv_transpose2d(prep, "tconv2", h)             # relu(transConv2(x))
    # torch.clamp(relu(conv6(x) + res1), min, max)
    out = conv("conv6", h, res=res1, clamp=(clamp_min, clamp_max),
               out_dtype=jnp.float32)
    return out


if __name__ == "__main__":
    key = jax.random.PRNGKey(0)
    kp, kx, ks = jax.random.split(key, 3)
    params = init_params(kp)
    prep = prepare_params(params)      # one-time weight transpose/pad/bf16 cast

    # Small shapes: batch=2, 3 channels, 16x16 spatial (NHWC).
    B, H, W, C = 2, 16, 16, 3
    x = jax.random.uniform(kx, (B, H, W, C), jnp.float32)
    s = jax.random.uniform(ks, (B, H, W, C), jnp.float32)
    mask = jnp.ones((1, H, W, C), jnp.float32)   # PyTorch default mask = ones

    fwd = jax.jit(functools.partial(psa_relit_pcnet_forward,
                                    clamp_min=0.0, clamp_max=1.0))
    out = jax.block_until_ready(fwd(prep, x, s, mask))

    assert out.shape == (B, H, W, C), out.shape
    assert bool(jnp.all(jnp.isfinite(out)))
    assert bool(jnp.all(out >= 0.0)) and bool(jnp.all(out <= 1.0))
    print("KERNEL_OK")
</pallas_src>

<mosaic_0001>
module attributes {stable_mosaic.version = 11 : i64} {
  func.func @_mm_bias_kernel(%arg0: i32, %arg1: memref<512x3xbf16, #tpu.memory_space<vmem>>, %arg2: memref<3x3xbf16, #tpu.memory_space<vmem>>, %arg3: memref<1x3xf32, #tpu.memory_space<vmem>>, %arg4: memref<512x3xbf16, #tpu.memory_space<vmem>>) attributes {dimension_semantics = [#tpu.dimension_semantics<parallel>], iteration_bounds = array<i64: 1>, scalar_prefetch = 0 : i64, scratch_operands = 0 : i64, tpu.core_type = #tpu.core_type<tc>, window_params = [{transform_indices = @transform_0, window_bounds = array<i64: 512, 3>}, {pipeline_mode = #tpu.pipeline_mode<synchronous>, transform_indices = @transform_1, window_bounds = array<i64: 3, 3>}, {pipeline_mode = #tpu.pipeline_mode<synchronous>, transform_indices = @transform_2, window_bounds = array<i64: 1, 3>}, {transform_indices = @transform_3, window_bounds = array<i64: 512, 3>}]} {
    %c0 = arith.constant 0 : index
    %c0_0 = arith.constant 0 : index
    %0 = vector.load %arg1[%c0, %c0_0] : memref<512x3xbf16, #tpu.memory_space<vmem>>, vector<512x3xbf16>
    %c0_1 = arith.constant 0 : index
    %c0_2 = arith.constant 0 : index
    %1 = vector.load %arg2[%c0_1, %c0_2] : memref<3x3xbf16, #tpu.memory_space<vmem>>, vector<3x3xbf16>
    %cst = arith.constant dense<0.000000e+00> : vector<512x3xf32>
    %2 = tpu.matmul %0, %1, %cst {dimension_numbers = #tpu.dot_dimension_numbers<[1], [0], [0], [1], [0, 0, 1, 1], [], []>} : vector<512x3xbf16>, vector<3x3xbf16>, vector<512x3xf32> -> vector<512x3xf32>
    %c0_3 = arith.constant 0 : index
    %c0_4 = arith.constant 0 : index
    %3 = vector.load %arg3[%c0_3, %c0_4] : memref<1x3xf32, #tpu.memory_space<vmem>>, vector<1x3xf32>
    %4 = vector.broadcast %3 : vector<1x3xf32> to vector<512x3xf32>
    %5 = arith.addf %2, %4 : vector<512x3xf32>
    %cst_5 = arith.constant 0.000000e+00 : f32
    %6 = vector.broadcast %cst_5 : f32 to vector<512x3xf32>
    %7 = arith.maximumf %5, %6 : vector<512x3xf32>
    %8 = arith.truncf %7 : vector<512x3xf32> to vector<512x3xbf16>
    %c0_6 = arith.constant 0 : index
    %c0_7 = arith.constant 0 : index
    %9 = vector.load %arg4[%c0_6, %c0_7] : memref<512x3xbf16, #tpu.memory_space<vmem>>, vector<512x3xbf16>
    tpu.vector_store %arg4[%c0_6, %c0_7], %8 {strides = array<i32>} : memref<512x3xbf16, #tpu.memory_space<vmem>>, vector<512x3xbf16>,
    return
  }
  func.func @transform_0(%arg0: i32) -> (i32, i32) {
    %c0_i32 = arith.constant 0 : i32
    %c0_i32_0 = arith.constant 0 : i32
    return %arg0, %c0_i32 : i32, i32
  }
  func.func @transform_1(%arg0: i32) -> (i32, i32) {
    %c0_i32 = arith.constant 0 : i32
    %c0_i32_0 = arith.constant 0 : i32
    %c0_i32_1 = arith.constant 0 : i32
    return %c0_i32, %c0_i32_0 : i32, i32
  }
  func.func @transform_2(%arg0: i32) -> (i32, i32) {
    %c0_i32 = arith.constant 0 : i32
    %c0_i32_0 = arith.constant 0 : i32
    %c0_i32_1 = arith.constant 0 : i32
    return %c0_i32, %c0_i32_0 : i32, i32
  }
  func.func @transform_3(%arg0: i32) -> (i32, i32) {
    %c0_i32 = arith.constant 0 : i32
    %c0_i32_0 = arith.constant 0 : i32
    return %arg0, %c0_i32 : i32, i32
  }
}

module attributes {stable_mosaic.version = 11 : i64} {
  func.func @_mm_bias_kernel(%arg0: i32, %arg1: memref<512x27xbf16, #tpu.memory_space<vmem>>, %arg2: memref<27x3xbf16, #tpu.memory_space<vmem>>, %arg3: memref<1x3xf32, #tpu.memory_space<vmem>>, %arg4: memref<512x3xbf16, #tpu.memory_space<vmem>>) attributes {dimension_semantics = [#tpu.dimension_semantics<parallel>], iteration_bounds = array<i64: 1>, scalar_prefetch = 0 : i64, scratch_operands = 0 : i64, tpu.core_type = #tpu.core_type<tc>, window_params = [{transform_indices = @transform_0, window_bounds = array<i64: 512, 27>}, {pipeline_mode = #tpu.pipeline_mode<synchronous>, transform_indices = @transform_1, window_bounds = array<i64: 27, 3>}, {pipeline_mode = #tpu.pipeline_mode<synchronous>, transform_indices = @transform_2, window_bounds = array<i64: 1, 3>}, {transform_indices = @transform_3, window_bounds = array<i64: 512, 3>}]} {
    %c0 = arith.constant 0 : index
    %c0_0 = arith.constant 0 : index
    %0 = vector.load %arg1[%c0, %c0_0] : memref<512x27xbf16, #tpu.memory_space<vmem>>, vector<512x27xbf16>
    %c0_1 = arith.constant 0 : index
    %c0_2 = arith.constant 0 : index
    %1 = vector.load %arg2[%c0_1, %c0_2] : memref<27x3xbf16, #tpu.memory_space<vmem>>, vector<27x3xbf16>
    %cst = arith.constant dense<0.000000e+00> : vector<512x3xf32>
    %2 = tpu.matmul %0, %1, %cst {dimension_numbers = #tpu.dot_dimension_numbers<[1], [0], [0], [1], [0, 0, 1, 1], [], []>} : vector<512x27xbf16>, vector<27x3xbf16>, vector<512x3xf32> -> vector<512x3xf32>
    %c0_3 = arith.constant 0 : index
    %c0_4 = arith.constant 0 : index
    %3 = vector.load %arg3[%c0_3, %c0_4] : memref<1x3xf32, #tpu.memory_space<vmem>>, vector<1x3xf32>
    %4 = vector.broadcast %3 : vector<1x3xf32> to vector<512x3xf32>
    %5 = arith.addf %2, %4 : vector<512x3xf32>
    %cst_5 = arith.constant 0.000000e+00 : f32
    %6 = vector.broadcast %cst_5 : f32 to vector<512x3xf32>
    %7 = arith.maximumf %5, %6 : vector<512x3xf32>
    %8 = arith.truncf %7 : vector<512x3xf32> to vector<512x3xbf16>
    %c0_6 = arith.constant 0 : index
    %c0_7 = arith.constant 0 : index
    %9 = vector.load %arg4[%c0_6, %c0_7] : memref<512x3xbf16, #tpu.memory_space<vmem>>, vector<512x3xbf16>
    tpu.vector_store %arg4[%c0_6, %c0_7], %8 {strides = array<i32>} : memref<512x3xbf16, #tpu.memory_space<vmem>>, vector<512x3xbf16>,
    return
  }
  func.func @transform_0(%arg0: i32) -> (i32, i32) {
    %c0_i32 = arith.constant 0 : i32
    %c0_i32_0 = arith.constant 0 : i32
    return %arg0, %c0_i32 : i32, i32
  }
  func.func @transform_1(%arg0: i32) -> (i32, i32) {
    %c0_i32 = arith.constant 0 : i32
    %c0_i32_0 = arith.constant 0 : i32
    %c0_i32_1 = arith.constant 0 : i32
    return %c0_i32, %c0_i32_0 : i32, i32
  }
  func.func @transform_2(%arg0: i32) -> (i32, i32) {
    %c0_i32 = arith.constant 0 : i32
    %c0_i32_0 = arith.constant 0 : i32
    %c0_i32_1 = arith.constant 0 : i32
    return %c0_i32, %c0_i32_0 : i32, i32
  }
  func.func @transform_3(%arg0: i32) -> (i32, i32) {
    %c0_i32 = arith.constant 0 : i32
    %c0_i32_0 = arith.constant 0 : i32
    return %arg0, %c0_i32 : i32, i32
  }
}

module attributes {stable_mosaic.version = 11 : i64} {
  func.func @_mask_rough_kernel(%arg0: i32, %arg1: memref<16x128xf32, #tpu.memory_space<vmem>>, %arg2: memref<16x128xf32, #tpu.memory_space<vmem>>, %arg3: memref<16x128xf32, #tpu.memory_space<vmem>>, %arg4: memref<16x128xbf16, #tpu.memory_space<vmem>>, %arg5: memref<16x128xbf16, #tpu.memory_space<vmem>>) attributes {dimension_semantics = [#tpu.dimension_semantics<parallel>], iteration_bounds = array<i64: 1>, scalar_prefetch = 0 : i64, scratch_operands = 0 : i64, tpu.core_type = #tpu.core_type<tc>, window_params = [{transform_indices = @transform_0, window_bounds = array<i64: 16, 128>}, {transform_indices = @transform_1, window_bounds = array<i64: 16, 128>}, {transform_indices = @transform_2, window_bounds = array<i64: 16, 128>}, {transform_indices = @transform_3, window_bounds = array<i64: 16, 128>}, {transform_indices = @transform_4, window_bounds = array<i64: 16, 128>}]} {
    %c0 = arith.constant 0 : index
    %c0_0 = arith.constant 0 : index
    %0 = vector.load %arg1[%c0, %c0_0] : memref<16x128xf32, #tpu.memory_space<vmem>>, vector<16x128xf32>
    %c0_1 = arith.constant 0 : index
    %c0_2 = arith.constant 0 : index
    %1 = vector.load %arg3[%c0_1, %c0_2] : memref<16x128xf32, #tpu.memory_space<vmem>>, vector<16x128xf32>
    %2 = arith.mulf %0, %1 : vector<16x128xf32>
    %3 = arith.truncf %2 : vector<16x128xf32> to vector<16x128xbf16>
    %c0_3 = arith.constant 0 : index
    %c0_4 = arith.constant 0 : index
    %4 = vector.load %arg4[%c0_3, %c0_4] : memref<16x128xbf16, #tpu.memory_space<vmem>>, vector<16x128xbf16>
    tpu.vector_store %arg4[%c0_3, %c0_4], %3 {strides = array<i32>} : memref<16x128xbf16, #tpu.memory_space<vmem>>, vector<16x128xbf16>,
    %c0_5 = arith.constant 0 : index
    %c0_6 = arith.constant 0 : index
    %5 = vector.load %arg2[%c0_5, %c0_6] : memref<16x128xf32, #tpu.memory_space<vmem>>, vector<16x128xf32>
    %6 = arith.mulf %2, %5 : vector<16x128xf32>
    %7 = arith.truncf %6 : vector<16x128xf32> to vector<16x128xbf16>
    %c0_7 = arith.constant 0 : index
    %c0_8 = arith.constant 0 : index
    %8 = vector.load %arg5[%c0_7, %c0_8] : memref<16x128xbf16, #tpu.memory_space<vmem>>, vector<16x128xbf16>
    tpu.vector_store %arg5[%c0_7, %c0_8], %7 {strides = array<i32>} : memref<16x128xbf16, #tpu.memory_space<vmem>>, vector<16x128xbf16>,
    return
  }
  func.func @transform_0(%arg0: i32) -> (i32, i32) {
    %c0_i32 = arith.constant 0 : i32
    %c0_i32_0 = arith.constant 0 : i32
    return %arg0, %c0_i32 : i32, i32
  }
  func.func @transform_1(%arg0: i32) -> (i32, i32) {
    %c0_i32 = arith.constant 0 : i32
    %c0_i32_0 = arith.constant 0 : i32
    return %arg0, %c0_i32 : i32, i32
  }
  func.func @transform_2(%arg0: i32) -> (i32, i32) {
    %c0_i32 = arith.constant 0 : i32
    %c0_i32_0 = arith.constant 0 : i32
    return %arg0, %c0_i32 : i32, i32
  }
  func.func @transform_3(%arg0: i32) -> (i32, i32) {
    %c0_i32 = arith.constant 0 : i32
    %c0_i32_0 = arith.constant 0 : i32
    return %arg0, %c0_i32 : i32, i32
  }
  func.func @transform_4(%arg0: i32) -> (i32, i32) {
    %c0_i32 = arith.constant 0 : i32
    %c0_i32_0 = arith.constant 0 : i32
    return %arg0, %c0_i32 : i32, i32
  }
}

module attributes {stable_mosaic.version = 11 : i64} {
  func.func @_mm_bias_kernel(%arg0: i32, %arg1: memref<128x54xbf16, #tpu.memory_space<vmem>>, %arg2: memref<54x32xbf16, #tpu.memory_space<vmem>>, %arg3: memref<1x32xf32, #tpu.memory_space<vmem>>, %arg4: memref<128x32xbf16, #tpu.memory_space<vmem>>) attributes {dimension_semantics = [#tpu.dimension_semantics<parallel>], iteration_bounds = array<i64: 1>, scalar_prefetch = 0 : i64, scratch_operands = 0 : i64, tpu.core_type = #tpu.core_type<tc>, window_params = [{transform_indices = @transform_0, window_bounds = array<i64: 128, 54>}, {pipeline_mode = #tpu.pipeline_mode<synchronous>, transform_indices = @transform_1, window_bounds = array<i64: 54, 32>}, {pipeline_mode = #tpu.pipeline_mode<synchronous>, transform_indices = @transform_2, window_bounds = array<i64: 1, 32>}, {transform_indices = @transform_3, window_bounds = array<i64: 128, 32>}]} {
    %c0 = arith.constant 0 : index
    %c0_0 = arith.constant 0 : index
    %0 = vector.load %arg1[%c0, %c0_0] : memref<128x54xbf16, #tpu.memory_space<vmem>>, vector<128x54xbf16>
    %c0_1 = arith.constant 0 : index
    %c0_2 = arith.constant 0 : index
    %1 = vector.load %arg2[%c0_1, %c0_2] : memref<54x32xbf16, #tpu.memory_space<vmem>>, vector<54x32xbf16>
    %cst = arith.constant dense<0.000000e+00> : vector<128x32xf32>
    %2 = tpu.matmul %0, %1, %cst {dimension_numbers = #tpu.dot_dimension_numbers<[1], [0], [0], [1], [0, 0, 1, 1], [], []>} : vector<128x54xbf16>, vector<54x32xbf16>, vector<128x32xf32> -> vector<128x32xf32>
    %c0_3 = arith.constant 0 : index
    %c0_4 = arith.constant 0 : index
    %3 = vector.load %arg3[%c0_3, %c0_4] : memref<1x32xf32, #tpu.memory_space<vmem>>, vector<1x32xf32>
    %4 = vector.broadcast %3 : vector<1x32xf32> to vector<128x32xf32>
    %5 = arith.addf %2, %4 : vector<128x32xf32>
    %cst_5 = arith.constant 0.000000e+00 : f32
    %6 = vector.broadcast %cst_5 : f32 to vector<128x32xf32>
    %7 = arith.maximumf %5, %6 : vector<128x32xf32>
    %8 = arith.truncf %7 : vector<128x32xf32> to vector<128x32xbf16>
    %c0_6 = arith.constant 0 : index
    %c0_7 = arith.constant 0 : index
    %9 = vector.load %arg4[%c0_6, %c0_7] : memref<128x32xbf16, #tpu.memory_space<vmem>>, vector<128x32xbf16>
    tpu.vector_store %arg4[%c0_6, %c0_7], %8 {strides = array<i32>} : memref<128x32xbf16, #tpu.memory_space<vmem>>, vector<128x32xbf16>,
    return
  }
  func.func @transform_0(%arg0: i32) -> (i32, i32) {
    %c0_i32 = arith.constant 0 : i32
    %c0_i32_0 = arith.constant 0 : i32
    return %arg0, %c0_i32 : i32, i32
  }
  func.func @transform_1(%arg0: i32) -> (i32, i32) {
    %c0_i32 = arith.constant 0 : i32
    %c0_i32_0 = arith.constant 0 : i32
    %c0_i32_1 = arith.constant 0 : i32
    return %c0_i32, %c0_i32_0 : i32, i32
  }
  func.func @transform_2(%arg0: i32) -> (i32, i32) {
    %c0_i32 = arith.constant 0 : i32
    %c0_i32_0 = arith.constant 0 : i32
    %c0_i32_1 = arith.constant 0 : i32
    return %c0_i32, %c0_i32_0 : i32, i32
  }
  func.func @transform_3(%arg0: i32) -> (i32, i32) {
    %c0_i32 = arith.constant 0 : i32
    %c0_i32_0 = arith.constant 0 : i32
    return %arg0, %c0_i32 : i32, i32
  }
}

module attributes {stable_mosaic.version = 11 : i64} {
  func.func @_mm_bias_kernel(%arg0: i32, %arg1: memref<32x384xbf16, #tpu.memory_space<vmem>>, %arg2: memref<384x64xbf16, #tpu.memory_space<vmem>>, %arg3: memref<1x64xf32, #tpu.memory_space<vmem>>, %arg4: memref<32x64xbf16, #tpu.memory_space<vmem>>) attributes {dimension_semantics = [#tpu.dimension_semantics<parallel>], iteration_bounds = array<i64: 1>, scalar_prefetch = 0 : i64, scratch_operands = 0 : i64, tpu.core_type = #tpu.core_type<tc>, window_params = [{transform_indices = @transform_0, window_bounds = array<i64: 32, 384>}, {pipeline_mode = #tpu.pipeline_mode<synchronous>, transform_indices = @transform_1, window_bounds = array<i64: 384, 64>}, {pipeline_mode = #tpu.pipeline_mode<synchronous>, transform_indices = @transform_2, window_bounds = array<i64: 1, 64>}, {transform_indices = @transform_3, window_bounds = array<i64: 32, 64>}]} {
    %c0 = arith.constant 0 : index
    %c0_0 = arith.constant 0 : index
    %0 = vector.load %arg1[%c0, %c0_0] : memref<32x384xbf16, #tpu.memory_space<vmem>>, vector<32x384xbf16>
    %c0_1 = arith.constant 0 : index
    %c0_2 = arith.constant 0 : index
    %1 = vector.load %arg2[%c0_1, %c0_2] : memref<384x64xbf16, #tpu.memory_space<vmem>>, vector<384x64xbf16>
    %cst = arith.constant dense<0.000000e+00> : vector<32x64xf32>
    %2 = tpu.matmul %0, %1, %cst {dimension_numbers = #tpu.dot_dimension_numbers<[1], [0], [0], [1], [0, 0, 1, 1], [], []>} : vector<32x384xbf16>, vector<384x64xbf16>, vector<32x64xf32> -> vector<32x64xf32>
    %c0_3 = arith.constant 0 : index
    %c0_4 = arith.constant 0 : index
    %3 = vector.load %arg3[%c0_3, %c0_4] : memref<1x64xf32, #tpu.memory_space<vmem>>, vector<1x64xf32>
    %4 = vector.broadcast %3 : vector<1x64xf32> to vector<32x64xf32>
    %5 = arith.addf %2, %4 : vector<32x64xf32>
    %cst_5 = arith.constant 0.000000e+00 : f32
    %6 = vector.broadcast %cst_5 : f32 to vector<32x64xf32>
    %7 = arith.maximumf %5, %6 : vector<32x64xf32>
    %8 = arith.truncf %7 : vector<32x64xf32> to vector<32x64xbf16>
    %c0_6 = arith.constant 0 : index
    %c0_7 = arith.constant 0 : index
    %9 = vector.load %arg4[%c0_6, %c0_7] : memref<32x64xbf16, #tpu.memory_space<vmem>>, vector<32x64xbf16>
    tpu.vector_store %arg4[%c0_6, %c0_7], %8 {strides = array<i32>} : memref<32x64xbf16, #tpu.memory_space<vmem>>, vector<32x64xbf16>,
    return
  }
  func.func @transform_0(%arg0: i32) -> (i32, i32) {
    %c0_i32 = arith.constant 0 : i32
    %c0_i32_0 = arith.constant 0 : i32
    return %arg0, %c0_i32 : i32, i32
  }
  func.func @transform_1(%arg0: i32) -> (i32, i32) {
    %c0_i32 = arith.constant 0 : i32
    %c0_i32_0 = arith.constant 0 : i32
    %c0_i32_1 = arith.constant 0 : i32
    return %c0_i32, %c0_i32_0 : i32, i32
  }
  func.func @transform_2(%arg0: i32) -> (i32, i32) {
    %c0_i32 = arith.constant 0 : i32
    %c0_i32_0 = arith.constant 0 : i32
    %c0_i32_1 = arith.constant 0 : i32
    return %c0_i32, %c0_i32_0 : i32, i32
  }
  func.func @transform_3(%arg0: i32) -> (i32, i32) {
    %c0_i32 = arith.constant 0 : i32
    %c0_i32_0 = arith.constant 0 : i32
    return %arg0, %c0_i32 : i32, i32
  }
}

module attributes {stable_mosaic.version = 11 : i64} {
  func.func @_mm_bias_kernel(%arg0: i32, %arg1: memref<32x640xbf16, #tpu.memory_space<vmem>>, %arg2: memref<640x128xbf16, #tpu.memory_space<vmem>>, %arg3: memref<1x128xf32, #tpu.memory_space<vmem>>, %arg4: memref<32x128xbf16, #tpu.memory_space<vmem>>) attributes {dimension_semantics = [#tpu.dimension_semantics<parallel>], iteration_bounds = array<i64: 1>, scalar_prefetch = 0 : i64, scratch_operands = 0 : i64, tpu.core_type = #tpu.core_type<tc>, window_params = [{transform_indices = @transform_0, window_bounds = array<i64: 32, 640>}, {pipeline_mode = #tpu.pipeline_mode<synchronous>, transform_indices = @transform_1, window_bounds = array<i64: 640, 128>}, {pipeline_mode = #tpu.pipeline_mode<synchronous>, transform_indices = @transform_2, window_bounds = array<i64: 1, 128>}, {transform_indices = @transform_3, window_bounds = array<i64: 32, 128>}]} {
    %c0 = arith.constant 0 : index
    %c0_0 = arith.constant 0 : index
    %0 = vector.load %arg1[%c0, %c0_0] : memref<32x640xbf16, #tpu.memory_space<vmem>>, vector<32x640xbf16>
    %c0_1 = arith.constant 0 : index
    %c0_2 = arith.constant 0 : index
    %1 = vector.load %arg2[%c0_1, %c0_2] : memref<640x128xbf16, #tpu.memory_space<vmem>>, vector<640x128xbf16>
    %cst = arith.constant dense<0.000000e+00> : vector<32x128xf32>
    %2 = tpu.matmul %0, %1, %cst {dimension_numbers = #tpu.dot_dimension_numbers<[1], [0], [0], [1], [0, 0, 1, 1], [], []>} : vector<32x640xbf16>, vector<640x128xbf16>, vector<32x128xf32> -> vector<32x128xf32>
    %c0_3 = arith.constant 0 : index
    %c0_4 = arith.constant 0 : index
    %3 = vector.load %arg3[%c0_3, %c0_4] : memref<1x128xf32, #tpu.memory_space<vmem>>, vector<1x128xf32>
    %4 = vector.broadcast %3 : vector<1x128xf32> to vector<32x128xf32>
    %5 = arith.addf %2, %4 : vector<32x128xf32>
    %cst_5 = arith.constant 0.000000e+00 : f32
    %6 = vector.broadcast %cst_5 : f32 to vector<32x128xf32>
    %7 = arith.maximumf %5, %6 : vector<32x128xf32>
    %8 = arith.truncf %7 : vector<32x128xf32> to vector<32x128xbf16>
    %c0_6 = arith.constant 0 : index
    %c0_7 = arith.constant 0 : index
    %9 = vector.load %arg4[%c0_6, %c0_7] : memref<32x128xbf16, #tpu.memory_space<vmem>>, vector<32x128xbf16>
    tpu.vector_store %arg4[%c0_6, %c0_7], %8 {strides = array<i32>} : memref<32x128xbf16, #tpu.memory_space<vmem>>, vector<32x128xbf16>,
    return
  }
  func.func @transform_0(%arg0: i32) -> (i32, i32) {
    %c0_i32 = arith.constant 0 : i32
    %c0_i32_0 = arith.constant 0 : i32
    return %arg0, %c0_i32 : i32, i32
  }
  func.func @transform_1(%arg0: i32) -> (i32, i32) {
    %c0_i32 = arith.constant 0 : i32
    %c0_i32_0 = arith.constant 0 : i32
    %c0_i32_1 = arith.constant 0 : i32
    return %c0_i32, %c0_i32_0 : i32, i32
  }
  func.func @transform_2(%arg0: i32) -> (i32, i32) {
    %c0_i32 = arith.constant 0 : i32
    %c0_i32_0 = arith.constant 0 : i32
    %c0_i32_1 = arith.constant 0 : i32
    return %c0_i32, %c0_i32_0 : i32, i32
  }
  func.func @transform_3(%arg0: i32) -> (i32, i32) {
    %c0_i32 = arith.constant 0 : i32
    %c0_i32_0 = arith.constant 0 : i32
    return %arg0, %c0_i32 : i32, i32
  }
}

module attributes {stable_mosaic.version = 11 : i64} {
  func.func @_mm_bias_kernel(%arg0: i32, %arg1: memref<32x1152xbf16, #tpu.memory_space<vmem>>, %arg2: memref<1152x256xbf16, #tpu.memory_space<vmem>>, %arg3: memref<1x256xf32, #tpu.memory_space<vmem>>, %arg4: memref<32x256xbf16, #tpu.memory_space<vmem>>) attributes {dimension_semantics = [#tpu.dimension_semantics<parallel>], iteration_bounds = array<i64: 1>, scalar_prefetch = 0 : i64, scratch_operands = 0 : i64, tpu.core_type = #tpu.core_type<tc>, window_params = [{transform_indices = @transform_0, window_bounds = array<i64: 32, 1152>}, {pipeline_mode = #tpu.pipeline_mode<synchronous>, transform_indices = @transform_1, window_bounds = array<i64: 1152, 256>}, {pipeline_mode = #tpu.pipeline_mode<synchronous>, transform_indices = @transform_2, window_bounds = array<i64: 1, 256>}, {transform_indices = @transform_3, window_bounds = array<i64: 32, 256>}]} {
    %c0 = arith.constant 0 : index
    %c0_0 = arith.constant 0 : index
    %0 = vector.load %arg1[%c0, %c0_0] : memref<32x1152xbf16, #tpu.memory_space<vmem>>, vector<32x1152xbf16>
    %c0_1 = arith.constant 0 : index
    %c0_2 = arith.constant 0 : index
    %1 = vector.load %arg2[%c0_1, %c0_2] : memref<1152x256xbf16, #tpu.memory_space<vmem>>, vector<1152x256xbf16>
    %cst = arith.constant dense<0.000000e+00> : vector<32x256xf32>
    %2 = tpu.matmul %0, %1, %cst {dimension_numbers = #tpu.dot_dimension_numbers<[1], [0], [0], [1], [0, 0, 1, 1], [], []>} : vector<32x1152xbf16>, vector<1152x256xbf16>, vector<32x256xf32> -> vector<32x256xf32>
    %c0_3 = arith.constant 0 : index
    %c0_4 = arith.constant 0 : index
    %3 = vector.load %arg3[%c0_3, %c0_4] : memref<1x256xf32, #tpu.memory_space<vmem>>, vector<1x256xf32>
    %4 = vector.broadcast %3 : vector<1x256xf32> to vector<32x256xf32>
    %5 = arith.addf %2, %4 : vector<32x256xf32>
    %cst_5 = arith.constant 0.000000e+00 : f32
    %6 = vector.broadcast %cst_5 : f32 to vector<32x256xf32>
    %7 = arith.maximumf %5, %6 : vector<32x256xf32>
    %8 = arith.truncf %7 : vector<32x256xf32> to vector<32x256xbf16>
    %c0_6 = arith.constant 0 : index
    %c0_7 = arith.constant 0 : index
    %9 = vector.load %arg4[%c0_6, %c0_7] : memref<32x256xbf16, #tpu.memory_space<vmem>>, vector<32x256xbf16>
    tpu.vector_store %arg4[%c0_6, %c0_7], %8 {strides = array<i32>} : memref<32x256xbf16, #tpu.memory_space<vmem>>, vector<32x256xbf16>,
    return
  }
  func.func @transform_0(%arg0: i32) -> (i32, i32) {
    %c0_i32 = arith.constant 0 : i32
    %c0_i32_0 = arith.constant 0 : i32
    return %arg0, %c0_i32 : i32, i32
  }
  func.func @transform_1(%arg0: i32) -> (i32, i32) {
    %c0_i32 = arith.constant 0 : i32
    %c0_i32_0 = arith.constant 0 : i32
    %c0_i32_1 = arith.constant 0 : i32
    return %c0_i32, %c0_i32_0 : i32, i32
  }
  func.func @transform_2(%arg0: i32) -> (i32, i32) {
    %c0_i32 = arith.constant 0 : i32
    %c0_i32_0 = arith.constant 0 : i32
    %c0_i32_1 = arith.constant 0 : i32
    return %c0_i32, %c0_i32_0 : i32, i32
  }
  func.func @transform_3(%arg0: i32) -> (i32, i32) {
    %c0_i32 = arith.constant 0 : i32
    %c0_i32_0 = arith.constant 0 : i32
    return %arg0, %c0_i32 : i32, i32
  }
}

module attributes {stable_mosaic.version = 11 : i64} {
  func.func @_mm_bias_res_kernel(%arg0: i32, %arg1: memref<32x384xbf16, #tpu.memory_space<vmem>>, %arg2: memref<384x64xbf16, #tpu.memory_space<vmem>>, %arg3: memref<1x64xf32, #tpu.memory_space<vmem>>, %arg4: memref<32x64xbf16, #tpu.memory_space<vmem>>, %arg5: memref<32x64xbf16, #tpu.memory_space<vmem>>) attributes {dimension_semantics = [#tpu.dimension_semantics<parallel>], iteration_bounds = array<i64: 1>, scalar_prefetch = 0 : i64, scratch_operands = 0 : i64, tpu.core_type = #tpu.core_type<tc>, window_params = [{transform_indices = @transform_0, window_bounds = array<i64: 32, 384>}, {pipeline_mode = #tpu.pipeline_mode<synchronous>, transform_indices = @transform_1, window_bounds = array<i64: 384, 64>}, {pipeline_mode = #tpu.pipeline_mode<synchronous>, transform_indices = @transform_2, window_bounds = array<i64: 1, 64>}, {transform_indices = @transform_3, window_bounds = array<i64: 32, 64>}, {transform_indices = @transform_4, window_bounds = array<i64: 32, 64>}]} {
    %c0 = arith.constant 0 : index
    %c0_0 = arith.constant 0 : index
    %0 = vector.load %arg1[%c0, %c0_0] : memref<32x384xbf16, #tpu.memory_space<vmem>>, vector<32x384xbf16>
    %c0_1 = arith.constant 0 : index
    %c0_2 = arith.constant 0 : index
    %1 = vector.load %arg2[%c0_1, %c0_2] : memref<384x64xbf16, #tpu.memory_space<vmem>>, vector<384x64xbf16>
    %cst = arith.constant dense<0.000000e+00> : vector<32x64xf32>
    %2 = tpu.matmul %0, %1, %cst {dimension_numbers = #tpu.dot_dimension_numbers<[1], [0], [0], [1], [0, 0, 1, 1], [], []>} : vector<32x384xbf16>, vector<384x64xbf16>, vector<32x64xf32> -> vector<32x64xf32>
    %c0_3 = arith.constant 0 : index
    %c0_4 = arith.constant 0 : index
    %3 = vector.load %arg3[%c0_3, %c0_4] : memref<1x64xf32, #tpu.memory_space<vmem>>, vector<1x64xf32>
    %4 = vector.broadcast %3 : vector<1x64xf32> to vector<32x64xf32>
    %5 = arith.addf %2, %4 : vector<32x64xf32>
    %c0_5 = arith.constant 0 : index
    %c0_6 = arith.constant 0 : index
    %6 = vector.load %arg4[%c0_5, %c0_6] : memref<32x64xbf16, #tpu.memory_space<vmem>>, vector<32x64xbf16>
    %7 = arith.extf %6 : vector<32x64xbf16> to vector<32x64xf32>
    %8 = arith.addf %5, %7 : vector<32x64xf32>
    %cst_7 = arith.constant 0.000000e+00 : f32
    %9 = vector.broadcast %cst_7 : f32 to vector<32x64xf32>
    %10 = arith.maximumf %8, %9 : vector<32x64xf32>
    %11 = arith.truncf %10 : vector<32x64xf32> to vector<32x64xbf16>
    %c0_8 = arith.constant 0 : index
    %c0_9 = arith.constant 0 : index
    %12 = vector.load %arg5[%c0_8, %c0_9] : memref<32x64xbf16, #tpu.memory_space<vmem>>, vector<32x64xbf16>
    tpu.vector_store %arg5[%c0_8, %c0_9], %11 {strides = array<i32>} : memref<32x64xbf16, #tpu.memory_space<vmem>>, vector<32x64xbf16>,
    return
  }
  func.func @transform_0(%arg0: i32) -> (i32, i32) {
    %c0_i32 = arith.constant 0 : i32
    %c0_i32_0 = arith.constant 0 : i32
    return %arg0, %c0_i32 : i32, i32
  }
  func.func @transform_1(%arg0: i32) -> (i32, i32) {
    %c0_i32 = arith.constant 0 : i32
    %c0_i32_0 = arith.constant 0 : i32
    %c0_i32_1 = arith.constant 0 : i32
    return %c0_i32, %c0_i32_0 : i32, i32
  }
  func.func @transform_2(%arg0: i32) -> (i32, i32) {
    %c0_i32 = arith.constant 0 : i32
    %c0_i32_0 = arith.constant 0 : i32
    %c0_i32_1 = arith.constant 0 : i32
    return %c0_i32, %c0_i32_0 : i32, i32
  }
  func.func @transform_3(%arg0: i32) -> (i32, i32) {
    %c0_i32 = arith.constant 0 : i32
    %c0_i32_0 = arith.constant 0 : i32
    return %arg0, %c0_i32 : i32, i32
  }
  func.func @transform_4(%arg0: i32) -> (i32, i32) {
    %c0_i32 = arith.constant 0 : i32
    %c0_i32_0 = arith.constant 0 : i32
    return %arg0, %c0_i32 : i32, i32
  }
}

module attributes {stable_mosaic.version = 11 : i64} {
  func.func @_mm_bias_res_kernel(%arg0: i32, %arg1: memref<128x27xbf16, #tpu.memory_space<vmem>>, %arg2: memref<27x32xbf16, #tpu.memory_space<vmem>>, %arg3: memref<1x32xf32, #tpu.memory_space<vmem>>, %arg4: memref<128x32xbf16, #tpu.memory_space<vmem>>, %arg5: memref<128x32xbf16, #tpu.memory_space<vmem>>) attributes {dimension_semantics = [#tpu.dimension_semantics<parallel>], iteration_bounds = array<i64: 1>, scalar_prefetch = 0 : i64, scratch_operands = 0 : i64, tpu.core_type = #tpu.core_type<tc>, window_params = [{transform_indices = @transform_0, window_bounds = array<i64: 128, 27>}, {pipeline_mode = #tpu.pipeline_mode<synchronous>, transform_indices = @transform_1, window_bounds = array<i64: 27, 32>}, {pipeline_mode = #tpu.pipeline_mode<synchronous>, transform_indices = @transform_2, window_bounds = array<i64: 1, 32>}, {transform_indices = @transform_3, window_bounds = array<i64: 128, 32>}, {transform_indices = @transform_4, window_bounds = array<i64: 128, 32>}]} {
    %c0 = arith.constant 0 : index
    %c0_0 = arith.constant 0 : index
    %0 = vector.load %arg1[%c0, %c0_0] : memref<128x27xbf16, #tpu.memory_space<vmem>>, vector<128x27xbf16>
    %c0_1 = arith.constant 0 : index
    %c0_2 = arith.constant 0 : index
    %1 = vector.load %arg2[%c0_1, %c0_2] : memref<27x32xbf16, #tpu.memory_space<vmem>>, vector<27x32xbf16>
    %cst = arith.constant dense<0.000000e+00> : vector<128x32xf32>
    %2 = tpu.matmul %0, %1, %cst {dimension_numbers = #tpu.dot_dimension_numbers<[1], [0], [0], [1], [0, 0, 1, 1], [], []>} : vector<128x27xbf16>, vector<27x32xbf16>, vector<128x32xf32> -> vector<128x32xf32>
    %c0_3 = arith.constant 0 : index
    %c0_4 = arith.constant 0 : index
    %3 = vector.load %arg3[%c0_3, %c0_4] : memref<1x32xf32, #tpu.memory_space<vmem>>, vector<1x32xf32>
    %4 = vector.broadcast %3 : vector<1x32xf32> to vector<128x32xf32>
    %5 = arith.addf %2, %4 : vector<128x32xf32>
    %c0_5 = arith.constant 0 : index
    %c0_6 = arith.constant 0 : index
    %6 = vector.load %arg4[%c0_5, %c0_6] : memref<128x32xbf16, #tpu.memory_space<vmem>>, vector<128x32xbf16>
    %7 = arith.extf %6 : vector<128x32xbf16> to vector<128x32xf32>
    %8 = arith.addf %5, %7 : vector<128x32xf32>
    %cst_7 = arith.constant 0.000000e+00 : f32
    %9 = vector.broadcast %cst_7 : f32 to vector<128x32xf32>
    %10 = arith.maximumf %8, %9 : vector<128x32xf32>
    %11 = arith.truncf %10 : vector<128x32xf32> to vector<128x32xbf16>
    %c0_8 = arith.constant 0 : index
    %c0_9 = arith.constant 0 : index
    %12 = vector.load %arg5[%c0_8, %c0_9] : memref<128x32xbf16, #tpu.memory_space<vmem>>, vector<128x32xbf16>
    tpu.vector_store %arg5[%c0_8, %c0_9], %11 {strides = array<i32>} : memref<128x32xbf16, #tpu.memory_space<vmem>>, vector<128x32xbf16>,
    return
  }
  func.func @transform_0(%arg0: i32) -> (i32, i32) {
    %c0_i32 = arith.constant 0 : i32
    %c0_i32_0 = arith.constant 0 : i32
    return %arg0, %c0_i32 : i32, i32
  }
  func.func @transform_1(%arg0: i32) -> (i32, i32) {
    %c0_i32 = arith.constant 0 : i32
    %c0_i32_0 = arith.constant 0 : i32
    %c0_i32_1 = arith.constant 0 : i32
    return %c0_i32, %c0_i32_0 : i32, i32
  }
  func.func @transform_2(%arg0: i32) -> (i32, i32) {
    %c0_i32 = arith.constant 0 : i32
    %c0_i32_0 = arith.constant 0 : i32
    %c0_i32_1 = arith.constant 0 : i32
    return %c0_i32, %c0_i32_0 : i32, i32
  }
  func.func @transform_3(%arg0: i32) -> (i32, i32) {
    %c0_i32 = arith.constant 0 : i32
    %c0_i32_0 = arith.constant 0 : i32
    return %arg0, %c0_i32 : i32, i32
  }
  func.func @transform_4(%arg0: i32) -> (i32, i32) {
    %c0_i32 = arith.constant 0 : i32
    %c0_i32_0 = arith.constant 0 : i32
    return %arg0, %c0_i32 : i32, i32
  }
}

module attributes {stable_mosaic.version = 11 : i64} {
  func.func @_mm_bias_res_kernel(%arg0: i32, %arg1: memref<32x640xbf16, #tpu.memory_space<vmem>>, %arg2: memref<640x128xbf16, #tpu.memory_space<vmem>>, %arg3: memref<1x128xf32, #tpu.memory_space<vmem>>, %arg4: memref<32x128xbf16, #tpu.memory_space<vmem>>, %arg5: memref<32x128xbf16, #tpu.memory_space<vmem>>) attributes {dimension_semantics = [#tpu.dimension_semantics<parallel>], iteration_bounds = array<i64: 1>, scalar_prefetch = 0 : i64, scratch_operands = 0 : i64, tpu.core_type = #tpu.core_type<tc>, window_params = [{transform_indices = @transform_0, window_bounds = array<i64: 32, 640>}, {pipeline_mode = #tpu.pipeline_mode<synchronous>, transform_indices = @transform_1, window_bounds = array<i64: 640, 128>}, {pipeline_mode = #tpu.pipeline_mode<synchronous>, transform_indices = @transform_2, window_bounds = array<i64: 1, 128>}, {transform_indices = @transform_3, window_bounds = array<i64: 32, 128>}, {transform_indices = @transform_4, window_bounds = array<i64: 32, 128>}]} {
    %c0 = arith.constant 0 : index
    %c0_0 = arith.constant 0 : index
    %0 = vector.load %arg1[%c0, %c0_0] : memref<32x640xbf16, #tpu.memory_space<vmem>>, vector<32x640xbf16>
    %c0_1 = arith.constant 0 : index
    %c0_2 = arith.constant 0 : index
    %1 = vector.load %arg2[%c0_1, %c0_2] : memref<640x128xbf16, #tpu.memory_space<vmem>>, vector<640x128xbf16>
    %cst = arith.constant dense<0.000000e+00> : vector<32x128xf32>
    %2 = tpu.matmul %0, %1, %cst {dimension_numbers = #tpu.dot_dimension_numbers<[1], [0], [0], [1], [0, 0, 1, 1], [], []>} : vector<32x640xbf16>, vector<640x128xbf16>, vector<32x128xf32> -> vector<32x128xf32>
    %c0_3 = arith.constant 0 : index
    %c0_4 = arith.constant 0 : index
    %3 = vector.load %arg3[%c0_3, %c0_4] : memref<1x128xf32, #tpu.memory_space<vmem>>, vector<1x128xf32>
    %4 = vector.broadcast %3 : vector<1x128xf32> to vector<32x128xf32>
    %5 = arith.addf %2, %4 : vector<32x128xf32>
    %c0_5 = arith.constant 0 : index
    %c0_6 = arith.constant 0 : index
    %6 = vector.load %arg4[%c0_5, %c0_6] : memref<32x128xbf16, #tpu.memory_space<vmem>>, vector<32x128xbf16>
    %7 = arith.extf %6 : vector<32x128xbf16> to vector<32x128xf32>
    %8 = arith.addf %5, %7 : vector<32x128xf32>
    %cst_7 = arith.constant 0.000000e+00 : f32
    %9 = vector.broadcast %cst_7 : f32 to vector<32x128xf32>
    %10 = arith.maximumf %8, %9 : vector<32x128xf32>
    %11 = arith.truncf %10 : vector<32x128xf32> to vector<32x128xbf16>
    %c0_8 = arith.constant 0 : index
    %c0_9 = arith.constant 0 : index
    %12 = vector.load %arg5[%c0_8, %c0_9] : memref<32x128xbf16, #tpu.memory_space<vmem>>, vector<32x128xbf16>
    tpu.vector_store %arg5[%c0_8, %c0_9], %11 {strides = array<i32>} : memref<32x128xbf16, #tpu.memory_space<vmem>>, vector<32x128xbf16>,
    return
  }
  func.func @transform_0(%arg0: i32) -> (i32, i32) {
    %c0_i32 = arith.constant 0 : i32
    %c0_i32_0 = arith.constant 0 : i32
    return %arg0, %c0_i32 : i32, i32
  }
  func.func @transform_1(%arg0: i32) -> (i32, i32) {
    %c0_i32 = arith.constant 0 : i32
    %c0_i32_0 = arith.constant 0 : i32
    %c0_i32_1 = arith.constant 0 : i32
    return %c0_i32, %c0_i32_0 : i32, i32
  }
  func.func @transform_2(%arg0: i32) -> (i32, i32) {
    %c0_i32 = arith.constant 0 : i32
    %c0_i32_0 = arith.constant 0 : i32
    %c0_i32_1 = arith.constant 0 : i32
    return %c0_i32, %c0_i32_0 : i32, i32
  }
  func.func @transform_3(%arg0: i32) -> (i32, i32) {
    %c0_i32 = arith.constant 0 : i32
    %c0_i32_0 = arith.constant 0 : i32
    return %arg0, %c0_i32 : i32, i32
  }
  func.func @transform_4(%arg0: i32) -> (i32, i32) {
    %c0_i32 = arith.constant 0 : i32
    %c0_i32_0 = arith.constant 0 : i32
    return %arg0, %c0_i32 : i32, i32
  }
}

module attributes {stable_mosaic.version = 11 : i64} {
  func.func @_mm_bias_res_kernel(%arg0: i32, %arg1: memref<32x1152xbf16, #tpu.memory_space<vmem>>, %arg2: memref<1152x256xbf16, #tpu.memory_space<vmem>>, %arg3: memref<1x256xf32, #tpu.memory_space<vmem>>, %arg4: memref<32x256xbf16, #tpu.memory_space<vmem>>, %arg5: memref<32x256xbf16, #tpu.memory_space<vmem>>) attributes {dimension_semantics = [#tpu.dimension_semantics<parallel>], iteration_bounds = array<i64: 1>, scalar_prefetch = 0 : i64, scratch_operands = 0 : i64, tpu.core_type = #tpu.core_type<tc>, window_params = [{transform_indices = @transform_0, window_bounds = array<i64: 32, 1152>}, {pipeline_mode = #tpu.pipeline_mode<synchronous>, transform_indices = @transform_1, window_bounds = array<i64: 1152, 256>}, {pipeline_mode = #tpu.pipeline_mode<synchronous>, transform_indices = @transform_2, window_bounds = array<i64: 1, 256>}, {transform_indices = @transform_3, window_bounds = array<i64: 32, 256>}, {transform_indices = @transform_4, window_bounds = array<i64: 32, 256>}]} {
    %c0 = arith.constant 0 : index
    %c0_0 = arith.constant 0 : index
    %0 = vector.load %arg1[%c0, %c0_0] : memref<32x1152xbf16, #tpu.memory_space<vmem>>, vector<32x1152xbf16>
    %c0_1 = arith.constant 0 : index
    %c0_2 = arith.constant 0 : index
    %1 = vector.load %arg2[%c0_1, %c0_2] : memref<1152x256xbf16, #tpu.memory_space<vmem>>, vector<1152x256xbf16>
    %cst = arith.constant dense<0.000000e+00> : vector<32x256xf32>
    %2 = tpu.matmul %0, %1, %cst {dimension_numbers = #tpu.dot_dimension_numbers<[1], [0], [0], [1], [0, 0, 1, 1], [], []>} : vector<32x1152xbf16>, vector<1152x256xbf16>, vector<32x256xf32> -> vector<32x256xf32>
    %c0_3 = arith.constant 0 : index
    %c0_4 = arith.constant 0 : index
    %3 = vector.load %arg3[%c0_3, %c0_4] : memref<1x256xf32, #tpu.memory_space<vmem>>, vector<1x256xf32>
    %4 = vector.broadcast %3 : vector<1x256xf32> to vector<32x256xf32>
    %5 = arith.addf %2, %4 : vector<32x256xf32>
    %c0_5 = arith.constant 0 : index
    %c0_6 = arith.constant 0 : index
    %6 = vector.load %arg4[%c0_5, %c0_6] : memref<32x256xbf16, #tpu.memory_space<vmem>>, vector<32x256xbf16>
    %7 = arith.extf %6 : vector<32x256xbf16> to vector<32x256xf32>
    %8 = arith.addf %5, %7 : vector<32x256xf32>
    %cst_7 = arith.constant 0.000000e+00 : f32
    %9 = vector.broadcast %cst_7 : f32 to vector<32x256xf32>
    %10 = arith.maximumf %8, %9 : vector<32x256xf32>
    %11 = arith.truncf %10 : vector<32x256xf32> to vector<32x256xbf16>
    %c0_8 = arith.constant 0 : index
    %c0_9 = arith.constant 0 : index
    %12 = vector.load %arg5[%c0_8, %c0_9] : memref<32x256xbf16, #tpu.memory_space<vmem>>, vector<32x256xbf16>
    tpu.vector_store %arg5[%c0_8, %c0_9], %11 {strides = array<i32>} : memref<32x256xbf16, #tpu.memory_space<vmem>>, vector<32x256xbf16>,
    return
  }
  func.func @transform_0(%arg0: i32) -> (i32, i32) {
    %c0_i32 = arith.constant 0 : i32
    %c0_i32_0 = arith.constant 0 : i32
    return %arg0, %c0_i32 : i32, i32
  }
  func.func @transform_1(%arg0: i32) -> (i32, i32) {
    %c0_i32 = arith.constant 0 : i32
    %c0_i32_0 = arith.constant 0 : i32
    %c0_i32_1 = arith.constant 0 : i32
    return %c0_i32, %c0_i32_0 : i32, i32
  }
  func.func @transform_2(%arg0: i32) -> (i32, i32) {
    %c0_i32 = arith.constant 0 : i32
    %c0_i32_0 = arith.constant 0 : i32
    %c0_i32_1 = arith.constant 0 : i32
    return %c0_i32, %c0_i32_0 : i32, i32
  }
  func.func @transform_3(%arg0: i32) -> (i32, i32) {
    %c0_i32 = arith.constant 0 : i32
    %c0_i32_0 = arith.constant 0 : i32
    return %arg0, %c0_i32 : i32, i32
  }
  func.func @transform_4(%arg0: i32) -> (i32, i32) {
    %c0_i32 = arith.constant 0 : i32
    %c0_i32_0 = arith.constant 0 : i32
    return %arg0, %c0_i32 : i32, i32
  }
}

module attributes {stable_mosaic.version = 11 : i64} {
  func.func @_mm_bias_kernel(%arg0: i32, %arg1: memref<32x640xbf16, #tpu.memory_space<vmem>>, %arg2: memref<640x128xbf16, #tpu.memory_space<vmem>>, %arg3: memref<1x128xf32, #tpu.memory_space<vmem>>, %arg4: memref<32x128xbf16, #tpu.memory_space<vmem>>) attributes {dimension_semantics = [#tpu.dimension_semantics<parallel>], iteration_bounds = array<i64: 1>, scalar_prefetch = 0 : i64, scratch_operands = 0 : i64, tpu.core_type = #tpu.core_type<tc>, window_params = [{transform_indices = @transform_0, window_bounds = array<i64: 32, 640>}, {pipeline_mode = #tpu.pipeline_mode<synchronous>, transform_indices = @transform_1, window_bounds = array<i64: 640, 128>}, {pipeline_mode = #tpu.pipeline_mode<synchronous>, transform_indices = @transform_2, window_bounds = array<i64: 1, 128>}, {transform_indices = @transform_3, window_bounds = array<i64: 32, 128>}]} {
    %c0 = arith.constant 0 : index
    %c0_0 = arith.constant 0 : index
    %0 = vector.load %arg1[%c0, %c0_0] : memref<32x640xbf16, #tpu.memory_space<vmem>>, vector<32x640xbf16>
    %c0_1 = arith.constant 0 : index
    %c0_2 = arith.constant 0 : index
    %1 = vector.load %arg2[%c0_1, %c0_2] : memref<640x128xbf16, #tpu.memory_space<vmem>>, vector<640x128xbf16>
    %cst = arith.constant dense<0.000000e+00> : vector<32x128xf32>
    %2 = tpu.matmul %0, %1, %cst {dimension_numbers = #tpu.dot_dimension_numbers<[1], [0], [0], [1], [0, 0, 1, 1], [], []>} : vector<32x640xbf16>, vector<640x128xbf16>, vector<32x128xf32> -> vector<32x128xf32>
    %c0_3 = arith.constant 0 : index
    %c0_4 = arith.constant 0 : index
    %3 = vector.load %arg3[%c0_3, %c0_4] : memref<1x128xf32, #tpu.memory_space<vmem>>, vector<1x128xf32>
    %4 = vector.broadcast %3 : vector<1x128xf32> to vector<32x128xf32>
    %5 = arith.addf %2, %4 : vector<32x128xf32>
    %6 = arith.truncf %5 : vector<32x128xf32> to vector<32x128xbf16>
    %c0_5 = arith.constant 0 : index
    %c0_6 = arith.constant 0 : index
    %7 = vector.load %arg4[%c0_5, %c0_6] : memref<32x128xbf16, #tpu.memory_space<vmem>>, vector<32x128xbf16>
    tpu.vector_store %arg4[%c0_5, %c0_6], %6 {strides = array<i32>} : memref<32x128xbf16, #tpu.memory_space<vmem>>, vector<32x128xbf16>,
    return
  }
  func.func @transform_0(%arg0: i32) -> (i32, i32) {
    %c0_i32 = arith.constant 0 : i32
    %c0_i32_0 = arith.constant 0 : i32
    return %arg0, %c0_i32 : i32, i32
  }
  func.func @transform_1(%arg0: i32) -> (i32, i32) {
    %c0_i32 = arith.constant 0 : i32
    %c0_i32_0 = arith.constant 0 : i32
    %c0_i32_1 = arith.constant 0 : i32
    return %c0_i32, %c0_i32_0 : i32, i32
  }
  func.func @transform_2(%arg0: i32) -> (i32, i32) {
    %c0_i32 = arith.constant 0 : i32
    %c0_i32_0 = arith.constant 0 : i32
    %c0_i32_1 = arith.constant 0 : i32
    return %c0_i32, %c0_i32_0 : i32, i32
  }
  func.func @transform_3(%arg0: i32) -> (i32, i32) {
    %c0_i32 = arith.constant 0 : i32
    %c0_i32_0 = arith.constant 0 : i32
    return %arg0, %c0_i32 : i32, i32
  }
}

module attributes {stable_mosaic.version = 11 : i64} {
  func.func @_mm_bias_res_kernel(%arg0: i32, %arg1: memref<32x2304xbf16, #tpu.memory_space<vmem>>, %arg2: memref<2304x128xbf16, #tpu.memory_space<vmem>>, %arg3: memref<1x128xf32, #tpu.memory_space<vmem>>, %arg4: memref<32x128xbf16, #tpu.memory_space<vmem>>, %arg5: memref<32x128xbf16, #tpu.memory_space<vmem>>) attributes {dimension_semantics = [#tpu.dimension_semantics<parallel>], iteration_bounds = array<i64: 1>, scalar_prefetch = 0 : i64, scratch_operands = 0 : i64, tpu.core_type = #tpu.core_type<tc>, window_params = [{transform_indices = @transform_0, window_bounds = array<i64: 32, 2304>}, {pipeline_mode = #tpu.pipeline_mode<synchronous>, transform_indices = @transform_1, window_bounds = array<i64: 2304, 128>}, {pipeline_mode = #tpu.pipeline_mode<synchronous>, transform_indices = @transform_2, window_bounds = array<i64: 1, 128>}, {transform_indices = @transform_3, window_bounds = array<i64: 32, 128>}, {transform_indices = @transform_4, window_bounds = array<i64: 32, 128>}]} {
    %c0 = arith.constant 0 : index
    %c0_0 = arith.constant 0 : index
    %0 = vector.load %arg1[%c0, %c0_0] : memref<32x2304xbf16, #tpu.memory_space<vmem>>, vector<32x2304xbf16>
    %c0_1 = arith.constant 0 : index
    %c0_2 = arith.constant 0 : index
    %1 = vector.load %arg2[%c0_1, %c0_2] : memref<2304x128xbf16, #tpu.memory_space<vmem>>, vector<2304x128xbf16>
    %cst = arith.constant dense<0.000000e+00> : vector<32x128xf32>
    %2 = tpu.matmul %0, %1, %cst {dimension_numbers = #tpu.dot_dimension_numbers<[1], [0], [0], [1], [0, 0, 1, 1], [], []>} : vector<32x2304xbf16>, vector<2304x128xbf16>, vector<32x128xf32> -> vector<32x128xf32>
    %c0_3 = arith.constant 0 : index
    %c0_4 = arith.constant 0 : index
    %3 = vector.load %arg3[%c0_3, %c0_4] : memref<1x128xf32, #tpu.memory_space<vmem>>, vector<1x128xf32>
    %4 = vector.broadcast %3 : vector<1x128xf32> to vector<32x128xf32>
    %5 = arith.addf %2, %4 : vector<32x128xf32>
    %c0_5 = arith.constant 0 : index
    %c0_6 = arith.constant 0 : index
    %6 = vector.load %arg4[%c0_5, %c0_6] : memref<32x128xbf16, #tpu.memory_space<vmem>>, vector<32x128xbf16>
    %7 = arith.extf %6 : vector<32x128xbf16> to vector<32x128xf32>
    %8 = arith.addf %5, %7 : vector<32x128xf32>
    %cst_7 = arith.constant 0.000000e+00 : f32
    %9 = vector.broadcast %cst_7 : f32 to vector<32x128xf32>
    %10 = arith.maximumf %8, %9 : vector<32x128xf32>
    %11 = arith.truncf %10 : vector<32x128xf32> to vector<32x128xbf16>
    %c0_8 = arith.constant 0 : index
    %c0_9 = arith.constant 0 : index
    %12 = vector.load %arg5[%c0_8, %c0_9] : memref<32x128xbf16, #tpu.memory_space<vmem>>, vector<32x128xbf16>
    tpu.vector_store %arg5[%c0_8, %c0_9], %11 {strides = array<i32>} : memref<32x128xbf16, #tpu.memory_space<vmem>>, vector<32x128xbf16>,
    return
  }
  func.func @transform_0(%arg0: i32) -> (i32, i32) {
    %c0_i32 = arith.constant 0 : i32
    %c0_i32_0 = arith.constant 0 : i32
    return %arg0, %c0_i32 : i32, i32
  }
  func.func @transform_1(%arg0: i32) -> (i32, i32) {
    %c0_i32 = arith.constant 0 : i32
    %c0_i32_0 = arith.constant 0 : i32
    %c0_i32_1 = arith.constant 0 : i32
    return %c0_i32, %c0_i32_0 : i32, i32
  }
  func.func @transform_2(%arg0: i32) -> (i32, i32) {
    %c0_i32 = arith.constant 0 : i32
    %c0_i32_0 = arith.constant 0 : i32
    %c0_i32_1 = arith.constant 0 : i32
    return %c0_i32, %c0_i32_0 : i32, i32
  }
  func.func @transform_3(%arg0: i32) -> (i32, i32) {
    %c0_i32 = arith.constant 0 : i32
    %c0_i32_0 = arith.constant 0 : i32
    return %arg0, %c0_i32 : i32, i32
  }
  func.func @transform_4(%arg0: i32) -> (i32, i32) {
    %c0_i32 = arith.constant 0 : i32
    %c0_i32_0 = arith.constant 0 : i32
    return %arg0, %c0_i32 : i32, i32
  }
}

module attributes {stable_mosaic.version = 11 : i64} {
  func.func @_mm_bias_kernel(%arg0: i32, %arg1: memref<128x32xbf16, #tpu.memory_space<vmem>>, %arg2: memref<32x64xbf16, #tpu.memory_space<vmem>>, %arg3: memref<1x64xf32, #tpu.memory_space<vmem>>, %arg4: memref<128x64xbf16, #tpu.memory_space<vmem>>) attributes {dimension_semantics = [#tpu.dimension_semantics<parallel>], iteration_bounds = array<i64: 1>, scalar_prefetch = 0 : i64, scratch_operands = 0 : i64, tpu.core_type = #tpu.core_type<tc>, window_params = [{transform_indices = @transform_0, window_bounds = array<i64: 128, 32>}, {pipeline_mode = #tpu.pipeline_mode<synchronous>, transform_indices = @transform_1, window_bounds = array<i64: 32, 64>}, {pipeline_mode = #tpu.pipeline_mode<synchronous>, transform_indices = @transform_2, window_bounds = array<i64: 1, 64>}, {transform_indices = @transform_3, window_bounds = array<i64: 128, 64>}]} {
    %c0 = arith.constant 0 : index
    %c0_0 = arith.constant 0 : index
    %0 = vector.load %arg1[%c0, %c0_0] : memref<128x32xbf16, #tpu.memory_space<vmem>>, vector<128x32xbf16>
    %c0_1 = arith.constant 0 : index
    %c0_2 = arith.constant 0 : index
    %1 = vector.load %arg2[%c0_1, %c0_2] : memref<32x64xbf16, #tpu.memory_space<vmem>>, vector<32x64xbf16>
    %cst = arith.constant dense<0.000000e+00> : vector<128x64xf32>
    %2 = tpu.matmul %0, %1, %cst {dimension_numbers = #tpu.dot_dimension_numbers<[1], [0], [0], [1], [0, 0, 1, 1], [], []>} : vector<128x32xbf16>, vector<32x64xbf16>, vector<128x64xf32> -> vector<128x64xf32>
    %c0_3 = arith.constant 0 : index
    %c0_4 = arith.constant 0 : index
    %3 = vector.load %arg3[%c0_3, %c0_4] : memref<1x64xf32, #tpu.memory_space<vmem>>, vector<1x64xf32>
    %4 = vector.broadcast %3 : vector<1x64xf32> to vector<128x64xf32>
    %5 = arith.addf %2, %4 : vector<128x64xf32>
    %6 = arith.truncf %5 : vector<128x64xf32> to vector<128x64xbf16>
    %c0_5 = arith.constant 0 : index
    %c0_6 = arith.constant 0 : index
    %7 = vector.load %arg4[%c0_5, %c0_6] : memref<128x64xbf16, #tpu.memory_space<vmem>>, vector<128x64xbf16>
    tpu.vector_store %arg4[%c0_5, %c0_6], %6 {strides = array<i32>} : memref<128x64xbf16, #tpu.memory_space<vmem>>, vector<128x64xbf16>,
    return
  }
  func.func @transform_0(%arg0: i32) -> (i32, i32) {
    %c0_i32 = arith.constant 0 : i32
    %c0_i32_0 = arith.constant 0 : i32
    return %arg0, %c0_i32 : i32, i32
  }
  func.func @transform_1(%arg0: i32) -> (i32, i32) {
    %c0_i32 = arith.constant 0 : i32
    %c0_i32_0 = arith.constant 0 : i32
    %c0_i32_1 = arith.constant 0 : i32
    return %c0_i32, %c0_i32_0 : i32, i32
  }
  func.func @transform_2(%arg0: i32) -> (i32, i32) {
    %c0_i32 = arith.constant 0 : i32
    %c0_i32_0 = arith.constant 0 : i32
    %c0_i32_1 = arith.constant 0 : i32
    return %c0_i32, %c0_i32_0 : i32, i32
  }
  func.func @transform_3(%arg0: i32) -> (i32, i32) {
    %c0_i32 = arith.constant 0 : i32
    %c0_i32_0 = arith.constant 0 : i32
    return %arg0, %c0_i32 : i32, i32
  }
}

module attributes {stable_mosaic.version = 11 : i64} {
  func.func @kernel(%arg0: i32, %arg1: i32, %arg2: memref<128x64xbf16, #tpu.memory_space<vmem>>, %arg3: memref<1x64x64xbf16, #tpu.memory_space<vmem>>, %arg4: memref<1x64xf32, #tpu.memory_space<vmem>>, %arg5: memref<16x1x8x64xbf16, #tpu.memory_space<vmem>>) attributes {dimension_semantics = [#tpu.dimension_semantics<parallel>, #tpu.dimension_semantics<parallel>], iteration_bounds = array<i64: 1, 2>, scalar_prefetch = 0 : i64, scratch_operands = 0 : i64, tpu.core_type = #tpu.core_type<tc>, window_params = [{transform_indices = @transform_0, window_bounds = array<i64: 128, 64>}, {transform_indices = @transform_1, window_bounds = array<i64: 1, 64, 64>}, {pipeline_mode = #tpu.pipeline_mode<synchronous>, transform_indices = @transform_2, window_bounds = array<i64: 1, 64>}, {transform_indices = @transform_3, window_bounds = array<i64: 16, 1, 8, 64>}]} {
    %c0 = arith.constant 0 : index
    %c0_0 = arith.constant 0 : index
    %0 = vector.load %arg2[%c0, %c0_0] : memref<128x64xbf16, #tpu.memory_space<vmem>>, vector<128x64xbf16>
    %c0_1 = arith.constant 0 : index
    %c0_2 = arith.constant 0 : index
    %c0_3 = arith.constant 0 : index
    %1 = vector.load %arg3[%c0_1, %c0_2, %c0_3] : memref<1x64x64xbf16, #tpu.memory_space<vmem>>, vector<1x64x64xbf16>
    %2 = vector.shape_cast %1 : vector<1x64x64xbf16> to vector<64x64xbf16>
    %cst = arith.constant dense<0.000000e+00> : vector<128x64xf32>
    %3 = tpu.matmul %0, %2, %cst {dimension_numbers = #tpu.dot_dimension_numbers<[1], [0], [0], [1], [0, 0, 1, 1], [], []>} : vector<128x64xbf16>, vector<64x64xbf16>, vector<128x64xf32> -> vector<128x64xf32>
    %c0_4 = arith.constant 0 : index
    %c0_5 = arith.constant 0 : index
    %4 = vector.load %arg4[%c0_4, %c0_5] : memref<1x64xf32, #tpu.memory_space<vmem>>, vector<1x64xf32>
    %5 = vector.broadcast %4 : vector<1x64xf32> to vector<128x64xf32>
    %6 = arith.addf %3, %5 : vector<128x64xf32>
    %7 = vector.shape_cast %6 : vector<128x64xf32> to vector<16x1x8x64xf32>
    %cst_6 = arith.constant 0.000000e+00 : f32
    %8 = vector.broadcast %cst_6 : f32 to vector<16x1x8x64xf32>
    %9 = arith.maximumf %7, %8 : vector<16x1x8x64xf32>
    %10 = arith.truncf %9 : vector<16x1x8x64xf32> to vector<16x1x8x64xbf16>
    %c0_7 = arith.constant 0 : index
    %c0_8 = arith.constant 0 : index
    %c0_9 = arith.constant 0 : index
    %c0_10 = arith.constant 0 : index
    %11 = vector.load %arg5[%c0_7, %c0_8, %c0_9, %c0_10] : memref<16x1x8x64xbf16, #tpu.memory_space<vmem>>, vector<16x1x8x64xbf16>
    tpu.vector_store %arg5[%c0_7, %c0_8, %c0_9, %c0_10], %10 {strides = array<i32>} : memref<16x1x8x64xbf16, #tpu.memory_space<vmem>>, vector<16x1x8x64xbf16>,
    return
  }
  func.func @transform_0(%arg0: i32, %arg1: i32) -> (i32, i32) {
    %c0_i32 = arith.constant 0 : i32
    %c0_i32_0 = arith.constant 0 : i32
    return %arg0, %c0_i32 : i32, i32
  }
  func.func @transform_1(%arg0: i32, %arg1: i32) -> (i32, i32, i32) {
    %c0_i32 = arith.constant 0 : i32
    %c0_i32_0 = arith.constant 0 : i32
    %c0_i32_1 = arith.constant 0 : i32
    return %arg1, %c0_i32, %c0_i32_0 : i32, i32, i32
  }
  func.func @transform_2(%arg0: i32, %arg1: i32) -> (i32, i32) {
    %c0_i32 = arith.constant 0 : i32
    %c0_i32_0 = arith.constant 0 : i32
    %c0_i32_1 = arith.constant 0 : i32
    return %c0_i32, %c0_i32_0 : i32, i32
  }
  func.func @transform_3(%arg0: i32, %arg1: i32) -> (i32, i32, i32, i32) {
    %c0_i32 = arith.constant 0 : i32
    %c0_i32_0 = arith.constant 0 : i32
    %c0_i32_1 = arith.constant 0 : i32
    return %arg0, %arg1, %c0_i32, %c0_i32_0 : i32, i32, i32, i32
  }
}

module attributes {stable_mosaic.version = 11 : i64} {
  func.func @kernel(%arg0: i32, %arg1: i32, %arg2: memref<32x512xbf16, #tpu.memory_space<vmem>>, %arg3: memref<1x512x128xbf16, #tpu.memory_space<vmem>>, %arg4: memref<1x128xf32, #tpu.memory_space<vmem>>, %arg5: memref<8x1x4x128xbf16, #tpu.memory_space<vmem>>, %arg6: memref<8x1x4x128xbf16, #tpu.memory_space<vmem>>) attributes {dimension_semantics = [#tpu.dimension_semantics<parallel>, #tpu.dimension_semantics<parallel>], iteration_bounds = array<i64: 1, 2>, scalar_prefetch = 0 : i64, scratch_operands = 0 : i64, tpu.core_type = #tpu.core_type<tc>, window_params = [{transform_indices = @transform_0, window_bounds = array<i64: 32, 512>}, {transform_indices = @transform_1, window_bounds = array<i64: 1, 512, 128>}, {pipeline_mode = #tpu.pipeline_mode<synchronous>, transform_indices = @transform_2, window_bounds = array<i64: 1, 128>}, {transform_indices = @transform_3, window_bounds = array<i64: 8, 1, 4, 128>}, {transform_indices = @transform_4, window_bounds = array<i64: 8, 1, 4, 128>}]} {
    %c0 = arith.constant 0 : index
    %c0_0 = arith.constant 0 : index
    %0 = vector.load %arg2[%c0, %c0_0] : memref<32x512xbf16, #tpu.memory_space<vmem>>, vector<32x512xbf16>
    %c0_1 = arith.constant 0 : index
    %c0_2 = arith.constant 0 : index
    %c0_3 = arith.constant 0 : index
    %1 = vector.load %arg3[%c0_1, %c0_2, %c0_3] : memref<1x512x128xbf16, #tpu.memory_space<vmem>>, vector<1x512x128xbf16>
    %2 = vector.shape_cast %1 : vector<1x512x128xbf16> to vector<512x128xbf16>
    %cst = arith.constant dense<0.000000e+00> : vector<32x128xf32>
    %3 = tpu.matmul %0, %2, %cst {dimension_numbers = #tpu.dot_dimension_numbers<[1], [0], [0], [1], [0, 0, 1, 1], [], []>} : vector<32x512xbf16>, vector<512x128xbf16>, vector<32x128xf32> -> vector<32x128xf32>
    %c0_4 = arith.constant 0 : index
    %c0_5 = arith.constant 0 : index
    %4 = vector.load %arg4[%c0_4, %c0_5] : memref<1x128xf32, #tpu.memory_space<vmem>>, vector<1x128xf32>
    %5 = vector.broadcast %4 : vector<1x128xf32> to vector<32x128xf32>
    %6 = arith.addf %3, %5 : vector<32x128xf32>
    %7 = vector.shape_cast %6 : vector<32x128xf32> to vector<8x1x4x128xf32>
    %c0_6 = arith.constant 0 : index
    %c0_7 = arith.constant 0 : index
    %c0_8 = arith.constant 0 : index
    %c0_9 = arith.constant 0 : index
    %8 = vector.load %arg5[%c0_6, %c0_7, %c0_8, %c0_9] : memref<8x1x4x128xbf16, #tpu.memory_space<vmem>>, vector<8x1x4x128xbf16>
    %9 = arith.extf %8 : vector<8x1x4x128xbf16> to vector<8x1x4x128xf32>
    %10 = arith.addf %7, %9 : vector<8x1x4x128xf32>
    %cst_10 = arith.constant 0.000000e+00 : f32
    %11 = vector.broadcast %cst_10 : f32 to vector<8x1x4x128xf32>
    %12 = arith.maximumf %10, %11 : vector<8x1x4x128xf32>
    %13 = arith.truncf %12 : vector<8x1x4x128xf32> to vector<8x1x4x128xbf16>
    %c0_11 = arith.constant 0 : index
    %c0_12 = arith.constant 0 : index
    %c0_13 = arith.constant 0 : index
    %c0_14 = arith.constant 0 : index
    %14 = vector.load %arg6[%c0_11, %c0_12, %c0_13, %c0_14] : memref<8x1x4x128xbf16, #tpu.memory_space<vmem>>, vector<8x1x4x128xbf16>
    tpu.vector_store %arg6[%c0_11, %c0_12, %c0_13, %c0_14], %13 {strides = array<i32>} : memref<8x1x4x128xbf16, #tpu.memory_space<vmem>>, vector<8x1x4x128xbf16>,
    return
  }
  func.func @transform_0(%arg0: i32, %arg1: i32) -> (i32, i32) {
    %c0_i32 = arith.constant 0 : i32
    %c0_i32_0 = arith.constant 0 : i32
    return %arg0, %c0_i32 : i32, i32
  }
  func.func @transform_1(%arg0: i32, %arg1: i32) -> (i32, i32, i32) {
    %c0_i32 = arith.constant 0 : i32
    %c0_i32_0 = arith.constant 0 : i32
    %c0_i32_1 = arith.constant 0 : i32
    return %arg1, %c0_i32, %c0_i32_0 : i32, i32, i32
  }
  func.func @transform_2(%arg0: i32, %arg1: i32) -> (i32, i32) {
    %c0_i32 = arith.constant 0 : i32
    %c0_i32_0 = arith.constant 0 : i32
    %c0_i32_1 = arith.constant 0 : i32
    return %c0_i32, %c0_i32_0 : i32, i32
  }
  func.func @transform_3(%arg0: i32, %arg1: i32) -> (i32, i32, i32, i32) {
    %c0_i32 = arith.constant 0 : i32
    %c0_i32_0 = arith.constant 0 : i32
    %c0_i32_1 = arith.constant 0 : i32
    return %arg0, %arg1, %c0_i32, %c0_i32_0 : i32, i32, i32, i32
  }
  func.func @transform_4(%arg0: i32, %arg1: i32) -> (i32, i32, i32, i32) {
    %c0_i32 = arith.constant 0 : i32
    %c0_i32_0 = arith.constant 0 : i32
    %c0_i32_1 = arith.constant 0 : i32
    return %arg0, %arg1, %c0_i32, %c0_i32_0 : i32, i32, i32, i32
  }
}

module attributes {stable_mosaic.version = 11 : i64} {
  func.func @_mm_bias_res_kernel(%arg0: i32, %arg1: memref<512x384xbf16, #tpu.memory_space<vmem>>, %arg2: memref<384x3xbf16, #tpu.memory_space<vmem>>, %arg3: memref<1x3xf32, #tpu.memory_space<vmem>>, %arg4: memref<512x3xbf16, #tpu.memory_space<vmem>>, %arg5: memref<512x3xf32, #tpu.memory_space<vmem>>) attributes {dimension_semantics = [#tpu.dimension_semantics<parallel>], iteration_bounds = array<i64: 1>, scalar_prefetch = 0 : i64, scratch_operands = 0 : i64, tpu.core_type = #tpu.core_type<tc>, window_params = [{transform_indices = @transform_0, window_bounds = array<i64: 512, 384>}, {pipeline_mode = #tpu.pipeline_mode<synchronous>, transform_indices = @transform_1, window_bounds = array<i64: 384, 3>}, {pipeline_mode = #tpu.pipeline_mode<synchronous>, transform_indices = @transform_2, window_bounds = array<i64: 1, 3>}, {transform_indices = @transform_3, window_bounds = array<i64: 512, 3>}, {transform_indices = @transform_4, window_bounds = array<i64: 512, 3>}]} {
    %c0 = arith.constant 0 : index
    %c0_0 = arith.constant 0 : index
    %0 = vector.load %arg1[%c0, %c0_0] : memref<512x384xbf16, #tpu.memory_space<vmem>>, vector<512x384xbf16>
    %c0_1 = arith.constant 0 : index
    %c0_2 = arith.constant 0 : index
    %1 = vector.load %arg2[%c0_1, %c0_2] : memref<384x3xbf16, #tpu.memory_space<vmem>>, vector<384x3xbf16>
    %cst = arith.constant dense<0.000000e+00> : vector<512x3xf32>
    %2 = tpu.matmul %0, %1, %cst {dimension_numbers = #tpu.dot_dimension_numbers<[1], [0], [0], [1], [0, 0, 1, 1], [], []>} : vector<512x384xbf16>, vector<384x3xbf16>, vector<512x3xf32> -> vector<512x3xf32>
    %c0_3 = arith.constant 0 : index
    %c0_4 = arith.constant 0 : index
    %3 = vector.load %arg3[%c0_3, %c0_4] : memref<1x3xf32, #tpu.memory_space<vmem>>, vector<1x3xf32>
    %4 = vector.broadcast %3 : vector<1x3xf32> to vector<512x3xf32>
    %5 = arith.addf %2, %4 : vector<512x3xf32>
    %c0_5 = arith.constant 0 : index
    %c0_6 = arith.constant 0 : index
    %6 = vector.load %arg4[%c0_5, %c0_6] : memref<512x3xbf16, #tpu.memory_space<vmem>>, vector<512x3xbf16>
    %7 = arith.extf %6 : vector<512x3xbf16> to vector<512x3xf32>
    %8 = arith.addf %5, %7 : vector<512x3xf32>
    %cst_7 = arith.constant 0.000000e+00 : f32
    %9 = vector.broadcast %cst_7 : f32 to vector<512x3xf32>
    %10 = arith.maximumf %8, %9 : vector<512x3xf32>
    %cst_8 = arith.constant 0.000000e+00 : f32
    %cst_9 = arith.constant 1.000000e+00 : f32
    %11 = vector.broadcast %cst_8 : f32 to vector<512x3xf32>
    %12 = arith.maximumf %11, %10 : vector<512x3xf32>
    %13 = vector.broadcast %cst_9 : f32 to vector<512x3xf32>
    %14 = arith.minimumf %13, %12 : vector<512x3xf32>
    %c0_10 = arith.constant 0 : index
    %c0_11 = arith.constant 0 : index
    %15 = vector.load %arg5[%c0_10, %c0_11] : memref<512x3xf32, #tpu.memory_space<vmem>>, vector<512x3xf32>
    tpu.vector_store %arg5[%c0_10, %c0_11], %14 {strides = array<i32>} : memref<512x3xf32, #tpu.memory_space<vmem>>, vector<512x3xf32>,
    return
  }
  func.func @transform_0(%arg0: i32) -> (i32, i32) {
    %c0_i32 = arith.constant 0 : i32
    %c0_i32_0 = arith.constant 0 : i32
    return %arg0, %c0_i32 : i32, i32
  }
  func.func @transform_1(%arg0: i32) -> (i32, i32) {
    %c0_i32 = arith.constant 0 : i32
    %c0_i32_0 = arith.constant 0 : i32
    %c0_i32_1 = arith.constant 0 : i32
    return %c0_i32, %c0_i32_0 : i32, i32
  }
  func.func @transform_2(%arg0: i32) -> (i32, i32) {
    %c0_i32 = arith.constant 0 : i32
    %c0_i32_0 = arith.constant 0 : i32
    %c0_i32_1 = arith.constant 0 : i32
    return %c0_i32, %c0_i32_0 : i32, i32
  }
  func.func @transform_3(%arg0: i32) -> (i32, i32) {
    %c0_i32 = arith.constant 0 : i32
    %c0_i32_0 = arith.constant 0 : i32
    return %arg0, %c0_i32 : i32, i32
  }
  func.func @transform_4(%arg0: i32) -> (i32, i32) {
    %c0_i32 = arith.constant 0 : i32
    %c0_i32_0 = arith.constant 0 : i32
    return %arg0, %c0_i32 : i32, i32
  }
}

</mosaic_0001>

<bundles_post_ra>
// kernel: psa_relit_pcnet_forward.23
= control target key start
LH: loop header
LB: loop body
LE: loop exit
PB: predicated region body
PF: predicated region fallthrough
CT: control target
= control target key end

     0   :  { %vm341_vm0 = vcmask 1040384   ;;  %vm342_vm1 = vcmask 1041408   ;;  %v911_v1 = vmov 65535   ;;  %vm244_vm2 = vcmask 23552   ;;  %s1388_s1 = inlined_call_operand.vmem [shape: bf16[3,3], index: 1, kind: input, shape index: {}]   ;;  %s1389_s0 = inlined_call_operand.vmem [shape: bf16[512,3], index: 0, kind: input, shape index: {}]   ;;  %s1390_s2 = inlined_call_operand.vmem [shape: f32[1,3], index: 2, kind: input, shape index: {}]   ;;  %s1391_s3 = inlined_call_operand.vmem [shape: bf16[512,3], index: 3, kind: output, shape index: {}]  }
   0x1   :  { %v79_v0 = vld [vmem:[%s1388_s1] sm:$0x3]  ;;  %v343_v2 = vsel %vm341_vm0, 4294967295, %v911_v1  ;;  %v875_v9 = vld [vmem:[%s1389_s0 + $0x8] sm:$0xff]  ;;  %v876_v13 = vld [vmem:[%s1389_s0 + $0x10] sm:$0xff]  ;;  %vm645_vm3 = vcmask 19456  }
   0x2   :  { %v344_v3 = vsel %vm342_vm1, %v343_v2, 0  ;;  %v874_v5 = vld [vmem:[%s1389_s0] sm:$0xff]  ;;  %v883_v10 = vld [vmem:[%s1389_s0 + $0x48] sm:$0xff]  ;;  %v884_v14 = vld [vmem:[%s1389_s0 + $0x50] sm:$0xff] }
   0x3   :  { %v346_v4 = vand.u32 %v344_v3, %v79_v0  ;;  %v882_v6 = vld [vmem:[%s1389_s0 + $0x40] sm:$0xff]  ;;  %v891_v11 = vld [vmem:[%s1389_s0 + $0x88] sm:$0xff]  ;;  %v892_v15 = vld [vmem:[%s1389_s0 + $0x90] sm:$0xff] }
   0x4   :  { %v890_v7 = vld [vmem:[%s1389_s0 + $0x80] sm:$0xff]  ;;  %v899_v12 = vld [vmem:[%s1389_s0 + $0xc8] sm:$0xff]  ;;  %v900_v16 = vld [vmem:[%s1389_s0 + $0xd0] sm:$0xff] }
   0x5   :  { %355 = vmatpush.bf16.msra.mxu0 %v346_v4  ;;  %906 = vmatpush.bf16.msra.mxu1 %v346_v4  ;;  %v898_v8 = vld [vmem:[%s1389_s0 + $0xc0] sm:$0xff]  ;;  %v877_v17 = vld [vmem:[%s1389_s0 + $0x18] sm:$0xff]  ;;  %v879_v25 = vld [vmem:[%s1389_s0 + $0x28] sm:$0xff] }
   0x6   :  { %907 = vmatpush.bf16.msra.mxu2 %v346_v4  ;;  %908 = vmatpush.bf16.msra.mxu3 %v346_v4  ;;  %v885_v18 = vld [vmem:[%s1389_s0 + $0x58] sm:$0xff]  ;;  %v878_v21 = vld [vmem:[%s1389_s0 + $0x20] sm:$0xff]  ;;  %v887_v26 = vld [vmem:[%s1389_s0 + $0x68] sm:$0xff] }
   0x7   :  { %v893_v19 = vld [vmem:[%s1389_s0 + $0x98] sm:$0xff]  ;;  %v886_v22 = vld [vmem:[%s1389_s0 + $0x60] sm:$0xff]  ;;  %v895_v27 = vld [vmem:[%s1389_s0 + $0xa8] sm:$0xff] }
   0x8   :  { %842 = vmatmul.msk.bf16.vlgmr.msra.gmra.mxu0 %vm244_vm2, %v874_v5  ;;  %850 = vmatmul.msk.bf16.vlgmr.msra.gmra.mxu1 %vm244_vm2, %v882_v6  ;;  %v901_v20 = vld [vmem:[%s1389_s0 + $0xd8] sm:$0xff]  ;;  %v894_v23 = vld [vmem:[%s1389_s0 + $0xa0] sm:$0xff]  ;;  %v903_v28 = vld [vmem:[%s1389_s0 + $0xe8] sm:$0xff] }
   0x9   :  { %858 = vmatmul.msk.bf16.vlgmr.msra.gmra.mxu2 %vm244_vm2, %v890_v7  ;;  %866 = vmatmul.msk.bf16.vlgmr.msra.gmra.mxu3 %vm244_vm2, %v898_v8  ;;  %v902_v24 = vld [vmem:[%s1389_s0 + $0xe0] sm:$0xff]  ;;  %v880_v29 = vld [vmem:[%s1389_s0 + $0x30] sm:$0xff]  ;;  %v881_v33 = vld [vmem:[%s1389_s0 + $0x38] sm:$0xff] }
   0xa   :  { %v888_v30 = vld [vmem:[%s1389_s0 + $0x70] sm:$0xff]  ;;  %v889_v34 = vld [vmem:[%s1389_s0 + $0x78] sm:$0xff]  ;;  %v1066_v37 = vld [vmem:[%s1390_s2] ss:$0 sm:$0xff] }
   0xb   :  { %v896_v31 = vld [vmem:[%s1389_s0 + $0xb0] sm:$0xff]  ;;  %v897_v35 = vld [vmem:[%s1389_s0 + $0xb8] sm:$0xff] }
   0xc   :  { %v904_v32 = vld [vmem:[%s1389_s0 + $0xf0] sm:$0xff]  ;;  %v905_v36 = vld [vmem:[%s1389_s0 + $0xf8] sm:$0xff] }
  0x18   :  { %843 = vmatmul.msk.bf16.gmra.mxu0 %vm244_vm2, %v875_v9  ;;  %851 = vmatmul.msk.bf16.gmra.mxu1 %vm244_vm2, %v883_v10 }
  0x19   :  { %859 = vmatmul.msk.bf16.gmra.mxu2 %vm244_vm2, %v891_v11  ;;  %867 = vmatmul.msk.bf16.gmra.mxu3 %vm244_vm2, %v899_v12 }
  0x28   :  { %844 = vmatmul.msk.bf16.gmra.mxu0 %vm244_vm2, %v876_v13  ;;  %852 = vmatmul.msk.bf16.gmra.mxu1 %vm244_vm2, %v884_v14 }
  0x29   :  { %860 = vmatmul.msk.bf16.gmra.mxu2 %vm244_vm2, %v892_v15  ;;  %868 = vmatmul.msk.bf16.gmra.mxu3 %vm244_vm2, %v900_v16 }
  0x38   :  { %845 = vmatmul.msk.bf16.gmra.mxu0 %vm244_vm2, %v877_v17  ;;  %853 = vmatmul.msk.bf16.gmra.mxu1 %vm244_vm2, %v885_v18 }
  0x39   :  { %861 = vmatmul.msk.bf16.gmra.mxu2 %vm244_vm2, %v893_v19  ;;  %869 = vmatmul.msk.bf16.gmra.mxu3 %vm244_vm2, %v901_v20 }
  0x48   :  { %846 = vmatmul.msk.bf16.gmra.mxu0 %vm244_vm2, %v878_v21  ;;  %854 = vmatmul.msk.bf16.gmra.mxu1 %vm244_vm2, %v886_v22 }
  0x49   :  { %862 = vmatmul.msk.bf16.gmra.mxu2 %vm244_vm2, %v894_v23  ;;  %870 = vmatmul.msk.bf16.gmra.mxu3 %vm244_vm2, %v902_v24 }
  0x58   :  { %847 = vmatmul.msk.bf16.gmra.mxu0 %vm244_vm2, %v879_v25  ;;  %855 = vmatmul.msk.bf16.gmra.mxu1 %vm244_vm2, %v887_v26 }
  0x59   :  { %863 = vmatmul.msk.bf16.gmra.mxu2 %vm244_vm2, %v895_v27  ;;  %871 = vmatmul.msk.bf16.gmra.mxu3 %vm244_vm2, %v903_v28 }
  0x68   :  { %848 = vmatmul.msk.bf16.gmra.mxu0 %vm244_vm2, %v880_v29  ;;  %856 = vmatmul.msk.bf16.gmra.mxu1 %vm244_vm2, %v888_v30 }
  0x69   :  { %864 = vmatmul.msk.bf16.gmra.mxu2 %vm244_vm2, %v896_v31  ;;  %872 = vmatmul.msk.bf16.gmra.mxu3 %vm244_vm2, %v904_v32 }
  0x78   :  { %849 = vmatmul.msk.bf16.gmra.mxu0 %vm244_vm2, %v881_v33  ;;  %857 = vmatmul.msk.bf16.gmra.mxu1 %vm244_vm2, %v889_v34 }
  0x79   :  { %865 = vmatmul.msk.bf16.gmra.mxu2 %vm244_vm2, %v897_v35  ;;  %873 = vmatmul.msk.bf16.gmra.mxu3 %vm244_vm2, %v905_v36 }
  0x85   :  { %v357_v38 = vpop.f32.mrf.mxu0  ;;  %v397_v39 = vpop.f32.mrf.mxu1 }
  0x86   :  { %v358_v40 = vadd.f32 %v1066_v37, %v357_v38  ;;  %v398_v41 = vadd.f32 %v1066_v37, %v397_v39 }
  0x88   :  { %v517_v42 = vmax.f32 %v358_v40, 0.0  ;;  %v533_v43 = vmax.f32 %v398_v41, 0.0 }
  0x8a   :  { %v581_v44 = vpack.c.bf16 %v517_v42, %v517_v42  ;;  %v597_v45 = vpack.c.bf16 %v533_v43, %v533_v43 }
  0x8c   :  { %646 = vst.msk [vmem:[%s1391_s3] sm:$0xf] %vm645_vm3, %v581_v44  ;;  %v437_v46 = vpop.f32.mrf.mxu2  ;;  %v477_v47 = vpop.f32.mrf.mxu3 }
  0x8d   :  { %662 = vst.msk [vmem:[%s1391_s3 + $0x40] sm:$0xf] %vm645_vm3, %v597_v45  ;;  %v438_v48 = vadd.f32 %v1066_v37, %v437_v46  ;;  %v478_v49 = vadd.f32 %v1066_v37, %v477_v47  ;;  %v359_v50 = vpop.f32.mrf.mxu0  ;;  %v399_v51 = vpop.f32.mrf.mxu1 }
  0x8e   :  { %v360_v52 = vadd.f32 %v1066_v37, %v359_v50  ;;  %v400_v53 = vadd.f32 %v1066_v37, %v399_v51 }
  0x8f   :  { %v549_v54 = vmax.f32 %v438_v48, 0.0  ;;  %v565_v55 = vmax.f32 %v478_v49, 0.0 }
  0x90   :  { %v518_v56 = vmax.f32 %v360_v52, 0.0  ;;  %v534_v57 = vmax.f32 %v400_v53, 0.0 }
  0x91   :  { %v613_v58 = vpack.c.bf16 %v549_v54, %v549_v54  ;;  %v629_v59 = vpack.c.bf16 %v565_v55, %v565_v55 }
  0x92   :  { %v582_v60 = vpack.c.bf16 %v518_v56, %v518_v56  ;;  %v598_v61 = vpack.c.bf16 %v534_v57, %v534_v57 }
  0x93   :  { %678 = vst.msk [vmem:[%s1391_s3 + $0x80] sm:$0xf] %vm645_vm3, %v613_v58 }
  0x94   :  { %694 = vst.msk [vmem:[%s1391_s3 + $0xc0] sm:$0xf] %vm645_vm3, %v629_v59  ;;  %v439_v62 = vpop.f32.mrf.mxu2  ;;  %v479_v63 = vpop.f32.mrf.mxu3 }
  0x95   :  { %647 = vst.msk [vmem:[%s1391_s3 + $0x4] sm:$0xf] %vm645_vm3, %v582_v60  ;;  %v440_v0 = vadd.f32 %v1066_v37, %v439_v62  ;;  %v480_v1 = vadd.f32 %v1066_v37, %v479_v63  ;;  %v362_v2 = vpop.f32.mrf.mxu0  ;;  %v402_v3 = vpop.f32.mrf.mxu1 }
  0x96   :  { %663 = vst.msk [vmem:[%s1391_s3 + $0x44] sm:$0xf] %vm645_vm3, %v598_v61  ;;  %v363_v4 = vadd.f32 %v1066_v37, %v362_v2  ;;  %v403_v5 = vadd.f32 %v1066_v37, %v402_v3 }
  0x97   :  { %v550_v6 = vmax.f32 %v440_v0, 0.0  ;;  %v566_v7 = vmax.f32 %v480_v1, 0.0 }
  0x98   :  { %v519_v8 = vmax.f32 %v363_v4, 0.0  ;;  %v535_v9 = vmax.f32 %v403_v5, 0.0 }
  0x99   :  { %v614_v10 = vpack.c.bf16 %v550_v6, %v550_v6  ;;  %v630_v11 = vpack.c.bf16 %v566_v7, %v566_v7 }
  0x9a   :  { %v583_v12 = vpack.c.bf16 %v519_v8, %v519_v8  ;;  %v599_v13 = vpack.c.bf16 %v535_v9, %v535_v9 }
  0x9b   :  { %679 = vst.msk [vmem:[%s1391_s3 + $0x84] sm:$0xf] %vm645_vm3, %v614_v10 }
  0x9c   :  { %695 = vst.msk [vmem:[%s1391_s3 + $0xc4] sm:$0xf] %vm645_vm3, %v630_v11  ;;  %v442_v14 = vpop.f32.mrf.mxu2  ;;  %v482_v15 = vpop.f32.mrf.mxu3 }
  0x9d   :  { %648 = vst.msk [vmem:[%s1391_s3 + $0x8] sm:$0xf] %vm645_vm3, %v583_v12  ;;  %v443_v16 = vadd.f32 %v1066_v37, %v442_v14  ;;  %v483_v17 = vadd.f32 %v1066_v37, %v482_v15  ;;  %v364_v18 = vpop.f32.mrf.mxu0  ;;  %v404_v19 = vpop.f32.mrf.mxu1 }
  0x9e   :  { %664 = vst.msk [vmem:[%s1391_s3 + $0x48] sm:$0xf] %vm645_vm3, %v599_v13  ;;  %v365_v20 = vadd.f32 %v1066_v37, %v364_v18  ;;  %v405_v21 = vadd.f32 %v1066_v37, %v404_v19 }
  0x9f   :  { %v551_v22 = vmax.f32 %v443_v16, 0.0  ;;  %v567_v23 = vmax.f32 %v483_v17, 0.0 }
  0xa0   :  { %v520_v24 = vmax.f32 %v365_v20, 0.0  ;;  %v536_v25 = vmax.f32 %v405_v21, 0.0 }
  0xa1   :  { %v615_v26 = vpack.c.bf16 %v551_v22, %v551_v22  ;;  %v631_v27 = vpack.c.bf16 %v567_v23, %v567_v23 }
  0xa2   :  { %v584_v28 = vpack.c.bf16 %v520_v24, %v520_v24  ;;  %v600_v29 = vpack.c.bf16 %v536_v25, %v536_v25 }
  0xa3   :  { %680 = vst.msk [vmem:[%s1391_s3 + $0x88] sm:$0xf] %vm645_vm3, %v615_v26 }
  0xa4   :  { %696 = vst.msk [vmem:[%s1391_s3 + $0xc8] sm:$0xf] %vm645_vm3, %v631_v27  ;;  %v444_v30 = vpop.f32.mrf.mxu2  ;;  %v484_v31 = vpop.f32.mrf.mxu3 }
  0xa5   :  { %649 = vst.msk [vmem:[%s1391_s3 + $0xc] sm:$0xf] %vm645_vm3, %v584_v28  ;;  %v445_v32 = vadd.f32 %v1066_v37, %v444_v30  ;;  %v485_v33 = vadd.f32 %v1066_v37, %v484_v31  ;;  %v367_v34 = vpop.f32.mrf.mxu0  ;;  %v407_v35 = vpop.f32.mrf.mxu1 }
  0xa6   :  { %665 = vst.msk [vmem:[%s1391_s3 + $0x4c] sm:$0xf] %vm645_vm3, %v600_v29  ;;  %v368_v36 = vadd.f32 %v1066_v37, %v367_v34  ;;  %v408_v38 = vadd.f32 %v1066_v37, %v407_v35 }
  0xa7   :  { %v552_v39 = vmax.f32 %v445_v32, 0.0  ;;  %v568_v40 = vmax.f32 %v485_v33, 0.0 }
  0xa8   :  { %v521_v41 = vmax.f32 %v368_v36, 0.0  ;;  %v537_v42 = vmax.f32 %v408_v38, 0.0 }
  0xa9   :  { %v616_v43 = vpack.c.bf16 %v552_v39, %v552_v39  ;;  %v632_v44 = vpack.c.bf16 %v568_v40, %v568_v40 }
  0xaa   :  { %v585_v45 = vpack.c.bf16 %v521_v41, %v521_v41  ;;  %v601_v46 = vpack.c.bf16 %v537_v42, %v537_v42 }
  0xab   :  { %681 = vst.msk [vmem:[%s1391_s3 + $0x8c] sm:$0xf] %vm645_vm3, %v616_v43 }
  0xac   :  { %697 = vst.msk [vmem:[%s1391_s3 + $0xcc] sm:$0xf] %vm645_vm3, %v632_v44  ;;  %v447_v47 = vpop.f32.mrf.mxu2  ;;  %v487_v48 = vpop.f32.mrf.mxu3 }
  0xad   :  { %650 = vst.msk [vmem:[%s1391_s3 + $0x10] sm:$0xf] %vm645_vm3, %v585_v45  ;;  %v448_v49 = vadd.f32 %v1066_v37, %v447_v47  ;;  %v488_v50 = vadd.f32 %v1066_v37, %v487_v48  ;;  %v369_v51 = vpop.f32.mrf.mxu0  ;;  %v409_v52 = vpop.f32.mrf.mxu1 }
  0xae   :  { %666 = vst.msk [vmem:[%s1391_s3 + $0x50] sm:$0xf] %vm645_vm3, %v601_v46  ;;  %v370_v53 = vadd.f32 %v1066_v37, %v369_v51  ;;  %v410_v54 = vadd.f32 %v1066_v37, %v409_v52 }
  0xaf   :  { %v553_v55 = vmax.f32 %v448_v49, 0.0  ;;  %v569_v56 = vmax.f32 %v488_v50, 0.0 }
  0xb0   :  { %v522_v57 = vmax.f32 %v370_v53, 0.0  ;;  %v538_v58 = vmax.f32 %v410_v54, 0.0 }
  0xb1   :  { %v617_v59 = vpack.c.bf16 %v553_v55, %v553_v55  ;;  %v633_v60 = vpack.c.bf16 %v569_v56, %v569_v56 }
  0xb2   :  { %v586_v61 = vpack.c.bf16 %v522_v57, %v522_v57  ;;  %v602_v62 = vpack.c.bf16 %v538_v58, %v538_v58 }
  0xb3   :  { %682 = vst.msk [vmem:[%s1391_s3 + $0x90] sm:$0xf] %vm645_vm3, %v617_v59 }
  0xb4   :  { %698 = vst.msk [vmem:[%s1391_s3 + $0xd0] sm:$0xf] %vm645_vm3, %v633_v60  ;;  %v449_v63 = vpop.f32.mrf.mxu2  ;;  %v489_v0 = vpop.f32.mrf.mxu3 }
  0xb5   :  { %651 = vst.msk [vmem:[%s1391_s3 + $0x14] sm:$0xf] %vm645_vm3, %v586_v61  ;;  %v450_v1 = vadd.f32 %v1066_v37, %v449_v63  ;;  %v490_v2 = vadd.f32 %v1066_v37, %v489_v0  ;;  %v372_v3 = vpop.f32.mrf.mxu0  ;;  %v412_v4 = vpop.f32.mrf.mxu1 }
  0xb6   :  { %667 = vst.msk [vmem:[%s1391_s3 + $0x54] sm:$0xf] %vm645_vm3, %v602_v62  ;;  %v373_v5 = vadd.f32 %v1066_v37, %v372_v3  ;;  %v413_v6 = vadd.f32 %v1066_v37, %v412_v4 }
  0xb7   :  { %v554_v7 = vmax.f32 %v450_v1, 0.0  ;;  %v570_v8 = vmax.f32 %v490_v2, 0.0 }
  0xb8   :  { %v523_v9 = vmax.f32 %v373_v5, 0.0  ;;  %v539_v10 = vmax.f32 %v413_v6, 0.0 }
  0xb9   :  { %v618_v11 = vpack.c.bf16 %v554_v7, %v554_v7  ;;  %v634_v12 = vpack.c.bf16 %v570_v8, %v570_v8 }
  0xba   :  { %v587_v13 = vpack.c.bf16 %v523_v9, %v523_v9  ;;  %v603_v14 = vpack.c.bf16 %v539_v10, %v539_v10 }
  0xbb   :  { %683 = vst.msk [vmem:[%s1391_s3 + $0x94] sm:$0xf] %vm645_vm3, %v618_v11 }
  0xbc   :  { %699 = vst.msk [vmem:[%s1391_s3 + $0xd4] sm:$0xf] %vm645_vm3, %v634_v12  ;;  %v452_v15 = vpop.f32.mrf.mxu2  ;;  %v492_v16 = vpop.f32.mrf.mxu3 }
  0xbd   :  { %652 = vst.msk [vmem:[%s1391_s3 + $0x18] sm:$0xf] %vm645_vm3, %v587_v13  ;;  %v453_v17 = vadd.f32 %v1066_v37, %v452_v15  ;;  %v493_v18 = vadd.f32 %v1066_v37, %v492_v16  ;;  %v374_v19 = vpop.f32.mrf.mxu0  ;;  %v414_v20 = vpop.f32.mrf.mxu1 }
  0xbe   :  { %668 = vst.msk [vmem:[%s1391_s3 + $0x58] sm:$0xf] %vm645_vm3, %v603_v14  ;;  %v375_v21 = vadd.f32 %v1066_v37, %v374_v19  ;;  %v415_v22 = vadd.f32 %v1066_v37, %v414_v20 }
  0xbf   :  { %v555_v23 = vmax.f32 %v453_v17, 0.0  ;;  %v571_v24 = vmax.f32 %v493_v18, 0.0 }
  0xc0   :  { %v524_v25 = vmax.f32 %v375_v21, 0.0  ;;  %v540_v26 = vmax.f32 %v415_v22, 0.0 }
  0xc1   :  { %v619_v27 = vpack.c.bf16 %v555_v23, %v555_v23  ;;  %v635_v28 = vpack.c.bf16 %v571_v24, %v571_v24 }
  0xc2   :  { %v588_v29 = vpack.c.bf16 %v524_v25, %v524_v25  ;;  %v604_v30 = vpack.c.bf16 %v540_v26, %v540_v26 }
  0xc3   :  { %684 = vst.msk [vmem:[%s1391_s3 + $0x98] sm:$0xf] %vm645_vm3, %v619_v27 }
  0xc4   :  { %700 = vst.msk [vmem:[%s1391_s3 + $0xd8] sm:$0xf] %vm645_vm3, %v635_v28  ;;  %v454_v31 = vpop.f32.mrf.mxu2  ;;  %v494_v32 = vpop.f32.mrf.mxu3 }
  0xc5   :  { %653 = vst.msk [vmem:[%s1391_s3 + $0x1c] sm:$0xf] %vm645_vm3, %v588_v29  ;;  %v455_v33 = vadd.f32 %v1066_v37, %v454_v31  ;;  %v495_v34 = vadd.f32 %v1066_v37, %v494_v32  ;;  %v377_v35 = vpop.f32.mrf.mxu0  ;;  %v417_v36 = vpop.f32.mrf.mxu1 }
  0xc6   :  { %669 = vst.msk [vmem:[%s1391_s3 + $0x5c] sm:$0xf] %vm645_vm3, %v604_v30  ;;  %v378_v38 = vadd.f32 %v1066_v37, %v377_v35  ;;  %v418_v39 = vadd.f32 %v1066_v37, %v417_v36 }
  0xc7   :  { %v556_v40 = vmax.f32 %v455_v33, 0.0  ;;  %v572_v41 = vmax.f32 %v495_v34, 0.0 }
  0xc8   :  { %v525_v42 = vmax.f32 %v378_v38, 0.0  ;;  %v541_v43 = vmax.f32 %v418_v39, 0.0 }
  0xc9   :  { %v620_v44 = vpack.c.bf16 %v556_v40, %v556_v40  ;;  %v636_v45 = vpack.c.bf16 %v572_v41, %v572_v41 }
  0xca   :  { %v589_v46 = vpack.c.bf16 %v525_v42, %v525_v42  ;;  %v605_v47 = vpack.c.bf16 %v541_v43, %v541_v43 }
  0xcb   :  { %685 = vst.msk [vmem:[%s1391_s3 + $0x9c] sm:$0xf] %vm645_vm3, %v620_v44 }
  0xcc   :  { %701 = vst.msk [vmem:[%s1391_s3 + $0xdc] sm:$0xf] %vm645_vm3, %v636_v45  ;;  %v457_v48 = vpop.f32.mrf.mxu2  ;;  %v497_v49 = vpop.f32.mrf.mxu3 }
  0xcd   :  { %654 = vst.msk [vmem:[%s1391_s3 + $0x20] sm:$0xf] %vm645_vm3, %v589_v46  ;;  %v458_v50 = vadd.f32 %v1066_v37, %v457_v48  ;;  %v498_v51 = vadd.f32 %v1066_v37, %v497_v49  ;;  %v379_v52 = vpop.f32.mrf.mxu0  ;;  %v419_v53 = vpop.f32.mrf.mxu1 }
  0xce   :  { %670 = vst.msk [vmem:[%s1391_s3 + $0x60] sm:$0xf] %vm645_vm3, %v605_v47  ;;  %v380_v54 = vadd.f32 %v1066_v37, %v379_v52  ;;  %v420_v55 = vadd.f32 %v1066_v37, %v419_v53 }
  0xcf   :  { %v557_v56 = vmax.f32 %v458_v50, 0.0  ;;  %v573_v57 = vmax.f32 %v498_v51, 0.0 }
  0xd0   :  { %v526_v58 = vmax.f32 %v380_v54, 0.0  ;;  %v542_v59 = vmax.f32 %v420_v55, 0.0 }
  0xd1   :  { %v621_v60 = vpack.c.bf16 %v557_v56, %v557_v56  ;;  %v637_v61 = vpack.c.bf16 %v573_v57, %v573_v57 }
  0xd2   :  { %v590_v62 = vpack.c.bf16 %v526_v58, %v526_v58  ;;  %v606_v63 = vpack.c.bf16 %v542_v59, %v542_v59 }
  0xd3   :  { %686 = vst.msk [vmem:[%s1391_s3 + $0xa0] sm:$0xf] %vm645_vm3, %v621_v60 }
  0xd4   :  { %702 = vst.msk [vmem:[%s1391_s3 + $0xe0] sm:$0xf] %vm645_vm3, %v637_v61  ;;  %v459_v0 = vpop.f32.mrf.mxu2  ;;  %v499_v1 = vpop.f32.mrf.mxu3 }
  0xd5   :  { %655 = vst.msk [vmem:[%s1391_s3 + $0x24] sm:$0xf] %vm645_vm3, %v590_v62  ;;  %v460_v2 = vadd.f32 %v1066_v37, %v459_v0  ;;  %v500_v3 = vadd.f32 %v1066_v37, %v499_v1  ;;  %v382_v4 = vpop.f32.mrf.mxu0  ;;  %v422_v5 = vpop.f32.mrf.mxu1 }
  0xd6   :  { %671 = vst.msk [vmem:[%s1391_s3 + $0x64] sm:$0xf] %vm645_vm3, %v606_v63  ;;  %v383_v6 = vadd.f32 %v1066_v37, %v382_v4  ;;  %v423_v7 = vadd.f32 %v1066_v37, %v422_v5 }
  0xd7   :  { %v558_v8 = vmax.f32 %v460_v2, 0.0  ;;  %v574_v9 = vmax.f32 %v500_v3, 0.0 }
  0xd8   :  { %v527_v10 = vmax.f32 %v383_v6, 0.0  ;;  %v543_v11 = vmax.f32 %v423_v7, 0.0 }
  0xd9   :  { %v622_v12 = vpack.c.bf16 %v558_v8, %v558_v8  ;;  %v638_v13 = vpack.c.bf16 %v574_v9, %v574_v9 }
  0xda   :  { %v591_v14 = vpack.c.bf16 %v527_v10, %v527_v10  ;;  %v607_v15 = vpack.c.bf16 %v543_v11, %v543_v11 }
  0xdb   :  { %687 = vst.msk [vmem:[%s1391_s3 + $0xa4] sm:$0xf] %vm645_vm3, %v622_v12 }
  0xdc   :  { %703 = vst.msk [vmem:[%s1391_s3 + $0xe4] sm:$0xf] %vm645_vm3, %v638_v13  ;;  %v462_v16 = vpop.f32.mrf.mxu2  ;;  %v502_v17 = vpop.f32.mrf.mxu3 }
  0xdd   :  { %656 = vst.msk [vmem:[%s1391_s3 + $0x28] sm:$0xf] %vm645_vm3, %v591_v14  ;;  %v463_v18 = vadd.f32 %v1066_v37, %v462_v16  ;;  %v503_v19 = vadd.f32 %v1066_v37, %v502_v17  ;;  %v384_v20 = vpop.f32.mrf.mxu0  ;;  %v424_v21 = vpop.f32.mrf.mxu1 }
  0xde   :  { %672 = vst.msk [vmem:[%s1391_s3 + $0x68] sm:$0xf] %vm645_vm3, %v607_v15  ;;  %v385_v22 = vadd.f32 %v1066_v37, %v384_v20  ;;  %v425_v23 = vadd.f32 %v1066_v37, %v424_v21 }
  0xdf   :  { %v559_v24 = vmax.f32 %v463_v18, 0.0  ;;  %v575_v25 = vmax.f32 %v503_v19, 0.0 }
  0xe0   :  { %v528_v26 = vmax.f32 %v385_v22, 0.0  ;;  %v544_v27 = vmax.f32 %v425_v23, 0.0 }
  0xe1   :  { %v623_v28 = vpack.c.bf16 %v559_v24, %v559_v24  ;;  %v639_v29 = vpack.c.bf16 %v575_v25, %v575_v25 }
  0xe2   :  { %v592_v30 = vpack.c.bf16 %v528_v26, %v528_v26  ;;  %v608_v31 = vpack.c.bf16 %v544_v27, %v544_v27 }
  0xe3   :  { %688 = vst.msk [vmem:[%s1391_s3 + $0xa8] sm:$0xf] %vm645_vm3, %v623_v28 }
  0xe4   :  { %704 = vst.msk [vmem:[%s1391_s3 + $0xe8] sm:$0xf] %vm645_vm3, %v639_v29  ;;  %v464_v32 = vpop.f32.mrf.mxu2  ;;  %v504_v33 = vpop.f32.mrf.mxu3 }
  0xe5   :  { %657 = vst.msk [vmem:[%s1391_s3 + $0x2c] sm:$0xf] %vm645_vm3, %v592_v30  ;;  %v465_v34 = vadd.f32 %v1066_v37, %v464_v32  ;;  %v505_v35 = vadd.f32 %v1066_v37, %v504_v33  ;;  %v387_v36 = vpop.f32.mrf.mxu0  ;;  %v427_v38 = vpop.f32.mrf.mxu1 }
  0xe6   :  { %673 = vst.msk [vmem:[%s1391_s3 + $0x6c] sm:$0xf] %vm645_vm3, %v608_v31  ;;  %v388_v39 = vadd.f32 %v1066_v37, %v387_v36  ;;  %v428_v40 = vadd.f32 %v1066_v37, %v427_v38 }
  0xe7   :  { %v560_v41 = vmax.f32 %v465_v34, 0.0  ;;  %v576_v42 = vmax.f32 %v505_v35, 0.0 }
  0xe8   :  { %v529_v43 = vmax.f32 %v388_v39, 0.0  ;;  %v545_v44 = vmax.f32 %v428_v40, 0.0 }
  0xe9   :  { %v624_v45 = vpack.c.bf16 %v560_v41, %v560_v41  ;;  %v640_v46 = vpack.c.bf16 %v576_v42, %v576_v42 }
  0xea   :  { %v593_v47 = vpack.c.bf16 %v529_v43, %v529_v43  ;;  %v609_v48 = vpack.c.bf16 %v545_v44, %v545_v44 }
  0xeb   :  { %689 = vst.msk [vmem:[%s1391_s3 + $0xac] sm:$0xf] %vm645_vm3, %v624_v45 }
  0xec   :  { %705 = vst.msk [vmem:[%s1391_s3 + $0xec] sm:$0xf] %vm645_vm3, %v640_v46  ;;  %v467_v49 = vpop.f32.mrf.mxu2  ;;  %v507_v50 = vpop.f32.mrf.mxu3 }
  0xed   :  { %658 = vst.msk [vmem:[%s1391_s3 + $0x30] sm:$0xf] %vm645_vm3, %v593_v47  ;;  %v468_v51 = vadd.f32 %v1066_v37, %v467_v49  ;;  %v508_v52 = vadd.f32 %v1066_v37, %v507_v50  ;;  %v389_v53 = vpop.f32.mrf.mxu0  ;;  %v429_v54 = vpop.f32.mrf.mxu1 }
  0xee   :  { %674 = vst.msk [vmem:[%s1391_s3 + $0x70] sm:$0xf] %vm645_vm3, %v609_v48  ;;  %v390_v55 = vadd.f32 %v1066_v37, %v389_v53  ;;  %v430_v56 = vadd.f32 %v1066_v37, %v429_v54 }
  0xef   :  { %v561_v57 = vmax.f32 %v468_v51, 0.0  ;;  %v577_v58 = vmax.f32 %v508_v52, 0.0 }
  0xf0   :  { %v530_v59 = vmax.f32 %v390_v55, 0.0  ;;  %v546_v60 = vmax.f32 %v430_v56, 0.0 }
  0xf1   :  { %v625_v61 = vpack.c.bf16 %v561_v57, %v561_v57  ;;  %v641_v62 = vpack.c.bf16 %v577_v58, %v577_v58 }
  0xf2   :  { %v594_v63 = vpack.c.bf16 %v530_v59, %v530_v59  ;;  %v610_v0 = vpack.c.bf16 %v546_v60, %v546_v60 }
  0xf3   :  { %690 = vst.msk [vmem:[%s1391_s3 + $0xb0] sm:$0xf] %vm645_vm3, %v625_v61 }
  0xf4   :  { %706 = vst.msk [vmem:[%s1391_s3 + $0xf0] sm:$0xf] %vm645_vm3, %v641_v62  ;;  %v469_v1 = vpop.f32.mrf.mxu2  ;;  %v509_v2 = vpop.f32.mrf.mxu3 }
  0xf5   :  { %659 = vst.msk [vmem:[%s1391_s3 + $0x34] sm:$0xf] %vm645_vm3, %v594_v63  ;;  %v470_v3 = vadd.f32 %v1066_v37, %v469_v1  ;;  %v510_v4 = vadd.f32 %v1066_v37, %v509_v2  ;;  %v392_v5 = vpop.f32.mrf.mxu0  ;;  %v432_v6 = vpop.f32.mrf.mxu1 }
  0xf6   :  { %675 = vst.msk [vmem:[%s1391_s3 + $0x74] sm:$0xf] %vm645_vm3, %v610_v0  ;;  %v393_v7 = vadd.f32 %v1066_v37, %v392_v5  ;;  %v433_v8 = vadd.f32 %v1066_v37, %v432_v6 }
  0xf7   :  { %v562_v9 = vmax.f32 %v470_v3, 0.0  ;;  %v578_v10 = vmax.f32 %v510_v4, 0.0 }
  0xf8   :  { %v531_v11 = vmax.f32 %v393_v7, 0.0  ;;  %v547_v12 = vmax.f32 %v433_v8, 0.0 }
  0xf9   :  { %v626_v13 = vpack.c.bf16 %v562_v9, %v562_v9  ;;  %v642_v14 = vpack.c.bf16 %v578_v10, %v578_v10 }
  0xfa   :  { %v595_v15 = vpack.c.bf16 %v531_v11, %v531_v11  ;;  %v611_v16 = vpack.c.bf16 %v547_v12, %v547_v12 }
  0xfb   :  { %691 = vst.msk [vmem:[%s1391_s3 + $0xb4] sm:$0xf] %vm645_vm3, %v626_v13 }
  0xfc   :  { %707 = vst.msk [vmem:[%s1391_s3 + $0xf4] sm:$0xf] %vm645_vm3, %v642_v14  ;;  %v472_v17 = vpop.f32.mrf.mxu2  ;;  %v512_v18 = vpop.f32.mrf.mxu3 }
  0xfd   :  { %660 = vst.msk [vmem:[%s1391_s3 + $0x38] sm:$0xf] %vm645_vm3, %v595_v15  ;;  %v473_v19 = vadd.f32 %v1066_v37, %v472_v17  ;;  %v513_v20 = vadd.f32 %v1066_v37, %v512_v18  ;;  %v394_v21 = vpop.f32.mrf.mxu0  ;;  %v434_v22 = vpop.f32.mrf.mxu1 }
  0xfe   :  { %676 = vst.msk [vmem:[%s1391_s3 + $0x78] sm:$0xf] %vm645_vm3, %v611_v16  ;;  %v395_v23 = vadd.f32 %v1066_v37, %v394_v21  ;;  %v435_v24 = vadd.f32 %v1066_v37, %v434_v22 }
  0xff   :  { %v563_v25 = vmax.f32 %v473_v19, 0.0  ;;  %v579_v26 = vmax.f32 %v513_v20, 0.0 }
 0x100   :  { %v532_v27 = vmax.f32 %v395_v23, 0.0  ;;  %v548_v28 = vmax.f32 %v435_v24, 0.0 }
 0x101   :  { %v627_v29 = vpack.c.bf16 %v563_v25, %v563_v25  ;;  %v643_v30 = vpack.c.bf16 %v579_v26, %v579_v26 }
 0x102   :  { %v596_v31 = vpack.c.bf16 %v532_v27, %v532_v27  ;;  %v612_v32 = vpack.c.bf16 %v548_v28, %v548_v28 }
 0x103   :  { %692 = vst.msk [vmem:[%s1391_s3 + $0xb8] sm:$0xf] %vm645_vm3, %v627_v29 }
 0x104   :  { %708 = vst.msk [vmem:[%s1391_s3 + $0xf8] sm:$0xf] %vm645_vm3, %v643_v30  ;;  %v474_v33 = vpop.f32.mrf.mxu2  ;;  %v514_v34 = vpop.f32.mrf.mxu3 }
 0x105   :  { %661 = vst.msk [vmem:[%s1391_s3 + $0x3c] sm:$0xf] %vm645_vm3, %v596_v31  ;;  %v475_v35 = vadd.f32 %v1066_v37, %v474_v33  ;;  %v515_v36 = vadd.f32 %v1066_v37, %v514_v34 }
 0x106   :  { %677 = vst.msk [vmem:[%s1391_s3 + $0x7c] sm:$0xf] %vm645_vm3, %v612_v32 }
 0x107   :  { %v564_v38 = vmax.f32 %v475_v35, 0.0  ;;  %v580_v39 = vmax.f32 %v515_v36, 0.0 }
 0x109   :  { %v628_v40 = vpack.c.bf16 %v564_v38, %v564_v38  ;;  %v644_v41 = vpack.c.bf16 %v580_v39, %v580_v39 }
 0x10b   :  { %693 = vst.msk [vmem:[%s1391_s3 + $0xbc] sm:$0xf] %vm645_vm3, %v628_v40 }
 0x10c   :  { %709 = vst.msk [vmem:[%s1391_s3 + $0xfc] sm:$0xf] %vm645_vm3, %v644_v41 }

// kernel: psa_relit_pcnet_forward.24
= control target key start
LH: loop header
LB: loop body
LE: loop exit
PB: predicated region body
PF: predicated region fallthrough
CT: control target
= control target key end

     0   :  { %vm355_vm0 = vcmask 1044480   ;;  %vm356_vm1 = vcmask 1045504   ;;  %v938_v2 = vmov 65535   ;;  %vm258_vm2 = vcmask 220160   ;;  %s1421_s1 = inlined_call_operand.vmem [shape: bf16[27,3], index: 1, kind: input, shape index: {}]   ;;  %s1422_s2 = inlined_call_operand.vmem [shape: f32[1,3], index: 2, kind: input, shape index: {}]   ;;  %s1423_s0 = inlined_call_operand.vmem [shape: bf16[512,27], index: 0, kind: input, shape index: {}]   ;;  %s1424_s3 = inlined_call_operand.vmem [shape: bf16[512,3], index: 3, kind: output, shape index: {}]  }
   0x1   :  { %v862_v0 = vld [vmem:[%s1421_s1 + $0x8] sm:$0xf]  ;;  %v929_v1 = vld [vmem:[%s1421_s1 + $0x8] sm:$0x30]  ;;  %v357_v3 = vsel %vm355_vm0, 4294967295, %v938_v2  ;;  %v928_v7 = vld [vmem:[%s1421_s1] sm:$0xff] }
   0x2   :  { %v863_v4 = vor.u32 %v929_v1, %v862_v0  ;;  %v358_v5 = vsel %vm356_vm1, %v357_v3, 0  ;;  %v896_v8 = vld [vmem:[%s1423_s0] sm:$0xff]  ;;  %v897_v12 = vld [vmem:[%s1423_s0 + $0x8] sm:$0xff]  ;;  %v898_v16 = vld [vmem:[%s1423_s0 + $0x10] sm:$0xff]  ;;  %vm659_vm3 = vcmask 19456  }
   0x3   :  { %v904_v9 = vld [vmem:[%s1423_s0 + $0x40] sm:$0xff]  ;;  %v905_v13 = vld [vmem:[%s1423_s0 + $0x48] sm:$0xff]  ;;  %v906_v17 = vld [vmem:[%s1423_s0 + $0x50] sm:$0xff] }
   0x4   :  { %v360_v6 = vand.u32 %v863_v4, %v358_v5  ;;  %v912_v10 = vld [vmem:[%s1423_s0 + $0x80] sm:$0xff]  ;;  %v913_v14 = vld [vmem:[%s1423_s0 + $0x88] sm:$0xff]  ;;  %v914_v18 = vld [vmem:[%s1423_s0 + $0x90] sm:$0xff] }
   0x5   :  { %v920_v11 = vld [vmem:[%s1423_s0 + $0xc0] sm:$0xff]  ;;  %v921_v15 = vld [vmem:[%s1423_s0 + $0xc8] sm:$0xff]  ;;  %v922_v19 = vld [vmem:[%s1423_s0 + $0xd0] sm:$0xff] }
   0x6   :  { %368 = vmatpush.bf16.msra.mxu0 %v360_v6  ;;  %930 = vmatpush.bf16.msra.mxu1 %v360_v6  ;;  %v899_v20 = vld [vmem:[%s1423_s0 + $0x18] sm:$0xff]  ;;  %v900_v24 = vld [vmem:[%s1423_s0 + $0x20] sm:$0xff]  ;;  %v901_v28 = vld [vmem:[%s1423_s0 + $0x28] sm:$0xff] }
   0x7   :  { %931 = vmatpush.bf16.msra.mxu2 %v360_v6  ;;  %932 = vmatpush.bf16.msra.mxu3 %v360_v6  ;;  %v907_v21 = vld [vmem:[%s1423_s0 + $0x58] sm:$0xff]  ;;  %v908_v25 = vld [vmem:[%s1423_s0 + $0x60] sm:$0xff]  ;;  %v909_v29 = vld [vmem:[%s1423_s0 + $0x68] sm:$0xff] }
   0x8   :  { %v915_v22 = vld [vmem:[%s1423_s0 + $0x98] sm:$0xff]  ;;  %v916_v26 = vld [vmem:[%s1423_s0 + $0xa0] sm:$0xff]  ;;  %v917_v30 = vld [vmem:[%s1423_s0 + $0xa8] sm:$0xff] }
   0x9   :  { %v923_v23 = vld [vmem:[%s1423_s0 + $0xd8] sm:$0xff]  ;;  %v924_v27 = vld [vmem:[%s1423_s0 + $0xe0] sm:$0xff]  ;;  %v925_v31 = vld [vmem:[%s1423_s0 + $0xe8] sm:$0xff] }
   0xa   :  { %369 = vmatpush.bf16.msra.mxu0 %v928_v7  ;;  %933 = vmatpush.bf16.msra.mxu1 %v928_v7  ;;  %v902_v32 = vld [vmem:[%s1423_s0 + $0x30] sm:$0xff]  ;;  %v903_v36 = vld [vmem:[%s1423_s0 + $0x38] sm:$0xff]  ;;  %v1099_v40 = vld [vmem:[%s1422_s2] ss:$0 sm:$0xff] }
   0xb   :  { %934 = vmatpush.bf16.msra.mxu2 %v928_v7  ;;  %935 = vmatpush.bf16.msra.mxu3 %v928_v7  ;;  %v910_v33 = vld [vmem:[%s1423_s0 + $0x70] sm:$0xff]  ;;  %v911_v37 = vld [vmem:[%s1423_s0 + $0x78] sm:$0xff] }
   0xc   :  { %v918_v34 = vld [vmem:[%s1423_s0 + $0xb0] sm:$0xff]  ;;  %v919_v38 = vld [vmem:[%s1423_s0 + $0xb8] sm:$0xff] }
   0xd   :  { %864 = vmatmul.msk.bf16.vlgmr.msra.gmra.mxu0 %vm258_vm2, %v896_v8  ;;  %872 = vmatmul.msk.bf16.vlgmr.msra.gmra.mxu1 %vm258_vm2, %v904_v9  ;;  %v926_v35 = vld [vmem:[%s1423_s0 + $0xf0] sm:$0xff]  ;;  %v927_v39 = vld [vmem:[%s1423_s0 + $0xf8] sm:$0xff] }
   0xe   :  { %880 = vmatmul.msk.bf16.vlgmr.msra.gmra.mxu2 %vm258_vm2, %v912_v10  ;;  %888 = vmatmul.msk.bf16.vlgmr.msra.gmra.mxu3 %vm258_vm2, %v920_v11 }
  0x1d   :  { %865 = vmatmul.msk.bf16.gmra.mxu0 %vm258_vm2, %v897_v12  ;;  %873 = vmatmul.msk.bf16.gmra.mxu1 %vm258_vm2, %v905_v13 }
  0x1e   :  { %881 = vmatmul.msk.bf16.gmra.mxu2 %vm258_vm2, %v913_v14  ;;  %889 = vmatmul.msk.bf16.gmra.mxu3 %vm258_vm2, %v921_v15 }
  0x2d   :  { %866 = vmatmul.msk.bf16.gmra.mxu0 %vm258_vm2, %v898_v16  ;;  %874 = vmatmul.msk.bf16.gmra.mxu1 %vm258_vm2, %v906_v17 }
  0x2e   :  { %882 = vmatmul.msk.bf16.gmra.mxu2 %vm258_vm2, %v914_v18  ;;  %890 = vmatmul.msk.bf16.gmra.mxu3 %vm258_vm2, %v922_v19 }
  0x3d   :  { %867 = vmatmul.msk.bf16.gmra.mxu0 %vm258_vm2, %v899_v20  ;;  %875 = vmatmul.msk.bf16.gmra.mxu1 %vm258_vm2, %v907_v21 }
  0x3e   :  { %883 = vmatmul.msk.bf16.gmra.mxu2 %vm258_vm2, %v915_v22  ;;  %891 = vmatmul.msk.bf16.gmra.mxu3 %vm258_vm2, %v923_v23 }
  0x4d   :  { %868 = vmatmul.msk.bf16.gmra.mxu0 %vm258_vm2, %v900_v24  ;;  %876 = vmatmul.msk.bf16.gmra.mxu1 %vm258_vm2, %v908_v25 }
  0x4e   :  { %884 = vmatmul.msk.bf16.gmra.mxu2 %vm258_vm2, %v916_v26  ;;  %892 = vmatmul.msk.bf16.gmra.mxu3 %vm258_vm2, %v924_v27 }
  0x5d   :  { %869 = vmatmul.msk.bf16.gmra.mxu0 %vm258_vm2, %v901_v28  ;;  %877 = vmatmul.msk.bf16.gmra.mxu1 %vm258_vm2, %v909_v29 }
  0x5e   :  { %885 = vmatmul.msk.bf16.gmra.mxu2 %vm258_vm2, %v917_v30  ;;  %893 = vmatmul.msk.bf16.gmra.mxu3 %vm258_vm2, %v925_v31 }
  0x6d   :  { %870 = vmatmul.msk.bf16.gmra.mxu0 %vm258_vm2, %v902_v32  ;;  %878 = vmatmul.msk.bf16.gmra.mxu1 %vm258_vm2, %v910_v33 }
  0x6e   :  { %886 = vmatmul.msk.bf16.gmra.mxu2 %vm258_vm2, %v918_v34  ;;  %894 = vmatmul.msk.bf16.gmra.mxu3 %vm258_vm2, %v926_v35 }
  0x7d   :  { %871 = vmatmul.msk.bf16.gmra.mxu0 %vm258_vm2, %v903_v36  ;;  %879 = vmatmul.msk.bf16.gmra.mxu1 %vm258_vm2, %v911_v37 }
  0x7e   :  { %887 = vmatmul.msk.bf16.gmra.mxu2 %vm258_vm2, %v919_v38  ;;  %895 = vmatmul.msk.bf16.gmra.mxu3 %vm258_vm2, %v927_v39 }
  0x8a   :  { %v371_v41 = vpop.f32.mrf.mxu0  ;;  %v411_v42 = vpop.f32.mrf.mxu1 }
  0x8b   :  { %v372_v43 = vadd.f32 %v1099_v40, %v371_v41  ;;  %v412_v44 = vadd.f32 %v1099_v40, %v411_v42 }
  0x8d   :  { %v531_v45 = vmax.f32 %v372_v43, 0.0  ;;  %v547_v46 = vmax.f32 %v412_v44, 0.0 }
  0x8f   :  { %v595_v47 = vpack.c.bf16 %v531_v45, %v531_v45  ;;  %v611_v48 = vpack.c.bf16 %v547_v46, %v547_v46 }
  0x91   :  { %660 = vst.msk [vmem:[%s1424_s3] sm:$0xf] %vm659_vm3, %v595_v47  ;;  %v451_v49 = vpop.f32.mrf.mxu2  ;;  %v491_v50 = vpop.f32.mrf.mxu3 }
  0x92   :  { %676 = vst.msk [vmem:[%s1424_s3 + $0x40] sm:$0xf] %vm659_vm3, %v611_v48  ;;  %v452_v51 = vadd.f32 %v1099_v40, %v451_v49  ;;  %v492_v52 = vadd.f32 %v1099_v40, %v491_v50  ;;  %v373_v53 = vpop.f32.mrf.mxu0  ;;  %v413_v54 = vpop.f32.mrf.mxu1 }
  0x93   :  { %v374_v55 = vadd.f32 %v1099_v40, %v373_v53  ;;  %v414_v56 = vadd.f32 %v1099_v40, %v413_v54 }
  0x94   :  { %v563_v57 = vmax.f32 %v452_v51, 0.0  ;;  %v579_v58 = vmax.f32 %v492_v52, 0.0 }
  0x95   :  { %v532_v59 = vmax.f32 %v374_v55, 0.0  ;;  %v548_v60 = vmax.f32 %v414_v56, 0.0 }
  0x96   :  { %v627_v61 = vpack.c.bf16 %v563_v57, %v563_v57  ;;  %v643_v62 = vpack.c.bf16 %v579_v58, %v579_v58 }
  0x97   :  { %v596_v63 = vpack.c.bf16 %v532_v59, %v532_v59  ;;  %v612_v0 = vpack.c.bf16 %v548_v60, %v548_v60 }
  0x98   :  { %692 = vst.msk [vmem:[%s1424_s3 + $0x80] sm:$0xf] %vm659_vm3, %v627_v61 }
  0x99   :  { %708 = vst.msk [vmem:[%s1424_s3 + $0xc0] sm:$0xf] %vm659_vm3, %v643_v62  ;;  %v453_v1 = vpop.f32.mrf.mxu2  ;;  %v493_v2 = vpop.f32.mrf.mxu3 }
  0x9a   :  { %661 = vst.msk [vmem:[%s1424_s3 + $0x4] sm:$0xf] %vm659_vm3, %v596_v63  ;;  %v454_v3 = vadd.f32 %v1099_v40, %v453_v1  ;;  %v494_v4 = vadd.f32 %v1099_v40, %v493_v2  ;;  %v376_v5 = vpop.f32.mrf.mxu0  ;;  %v416_v6 = vpop.f32.mrf.mxu1 }
  0x9b   :  { %677 = vst.msk [vmem:[%s1424_s3 + $0x44] sm:$0xf] %vm659_vm3, %v612_v0  ;;  %v377_v7 = vadd.f32 %v1099_v40, %v376_v5  ;;  %v417_v8 = vadd.f32 %v1099_v40, %v416_v6 }
  0x9c   :  { %v564_v9 = vmax.f32 %v454_v3, 0.0  ;;  %v580_v10 = vmax.f32 %v494_v4, 0.0 }
  0x9d   :  { %v533_v11 = vmax.f32 %v377_v7, 0.0  ;;  %v549_v12 = vmax.f32 %v417_v8, 0.0 }
  0x9e   :  { %v628_v13 = vpack.c.bf16 %v564_v9, %v564_v9  ;;  %v644_v14 = vpack.c.bf16 %v580_v10, %v580_v10 }
  0x9f   :  { %v597_v15 = vpack.c.bf16 %v533_v11, %v533_v11  ;;  %v613_v16 = vpack.c.bf16 %v549_v12, %v549_v12 }
  0xa0   :  { %693 = vst.msk [vmem:[%s1424_s3 + $0x84] sm:$0xf] %vm659_vm3, %v628_v13 }
  0xa1   :  { %709 = vst.msk [vmem:[%s1424_s3 + $0xc4] sm:$0xf] %vm659_vm3, %v644_v14  ;;  %v456_v17 = vpop.f32.mrf.mxu2  ;;  %v496_v18 = vpop.f32.mrf.mxu3 }
  0xa2   :  { %662 = vst.msk [vmem:[%s1424_s3 + $0x8] sm:$0xf] %vm659_vm3, %v597_v15  ;;  %v457_v19 = vadd.f32 %v1099_v40, %v456_v17  ;;  %v497_v20 = vadd.f32 %v1099_v40, %v496_v18  ;;  %v378_v21 = vpop.f32.mrf.mxu0  ;;  %v418_v22 = vpop.f32.mrf.mxu1 }
  0xa3   :  { %678 = vst.msk [vmem:[%s1424_s3 + $0x48] sm:$0xf] %vm659_vm3, %v613_v16  ;;  %v379_v23 = vadd.f32 %v1099_v40, %v378_v21  ;;  %v419_v24 = vadd.f32 %v1099_v40, %v418_v22 }
  0xa4   :  { %v565_v25 = vmax.f32 %v457_v19, 0.0  ;;  %v581_v26 = vmax.f32 %v497_v20, 0.0 }
  0xa5   :  { %v534_v27 = vmax.f32 %v379_v23, 0.0  ;;  %v550_v28 = vmax.f32 %v419_v24, 0.0 }
  0xa6   :  { %v629_v29 = vpack.c.bf16 %v565_v25, %v565_v25  ;;  %v645_v30 = vpack.c.bf16 %v581_v26, %v581_v26 }
  0xa7   :  { %v598_v31 = vpack.c.bf16 %v534_v27, %v534_v27  ;;  %v614_v32 = vpack.c.bf16 %v550_v28, %v550_v28 }
  0xa8   :  { %694 = vst.msk [vmem:[%s1424_s3 + $0x88] sm:$0xf] %vm659_vm3, %v629_v29 }
  0xa9   :  { %710 = vst.msk [vmem:[%s1424_s3 + $0xc8] sm:$0xf] %vm659_vm3, %v645_v30  ;;  %v458_v33 = vpop.f32.mrf.mxu2  ;;  %v498_v34 = vpop.f32.mrf.mxu3 }
  0xaa   :  { %663 = vst.msk [vmem:[%s1424_s3 + $0xc] sm:$0xf] %vm659_vm3, %v598_v31  ;;  %v459_v35 = vadd.f32 %v1099_v40, %v458_v33  ;;  %v499_v36 = vadd.f32 %v1099_v40, %v498_v34  ;;  %v381_v37 = vpop.f32.mrf.mxu0  ;;  %v421_v38 = vpop.f32.mrf.mxu1 }
  0xab   :  { %679 = vst.msk [vmem:[%s1424_s3 + $0x4c] sm:$0xf] %vm659_vm3, %v614_v32  ;;  %v382_v39 = vadd.f32 %v1099_v40, %v381_v37  ;;  %v422_v41 = vadd.f32 %v1099_v40, %v421_v38 }
  0xac   :  { %v566_v42 = vmax.f32 %v459_v35, 0.0  ;;  %v582_v43 = vmax.f32 %v499_v36, 0.0 }
  0xad   :  { %v535_v44 = vmax.f32 %v382_v39, 0.0  ;;  %v551_v45 = vmax.f32 %v422_v41, 0.0 }
  0xae   :  { %v630_v46 = vpack.c.bf16 %v566_v42, %v566_v42  ;;  %v646_v47 = vpack.c.bf16 %v582_v43, %v582_v43 }
  0xaf   :  { %v599_v48 = vpack.c.bf16 %v535_v44, %v535_v44  ;;  %v615_v49 = vpack.c.bf16 %v551_v45, %v551_v45 }
  0xb0   :  { %695 = vst.msk [vmem:[%s1424_s3 + $0x8c] sm:$0xf] %vm659_vm3, %v630_v46 }
  0xb1   :  { %711 = vst.msk [vmem:[%s1424_s3 + $0xcc] sm:$0xf] %vm659_vm3, %v646_v47  ;;  %v461_v50 = vpop.f32.mrf.mxu2  ;;  %v501_v51 = vpop.f32.mrf.mxu3 }
  0xb2   :  { %664 = vst.msk [vmem:[%s1424_s3 + $0x10] sm:$0xf] %vm659_vm3, %v599_v48  ;;  %v462_v52 = vadd.f32 %v1099_v40, %v461_v50  ;;  %v502_v53 = vadd.f32 %v1099_v40, %v501_v51  ;;  %v383_v54 = vpop.f32.mrf.mxu0  ;;  %v423_v55 = vpop.f32.mrf.mxu1 }
  0xb3   :  { %680 = vst.msk [vmem:[%s1424_s3 + $0x50] sm:$0xf] %vm659_vm3, %v615_v49  ;;  %v384_v56 = vadd.f32 %v1099_v40, %v383_v54  ;;  %v424_v57 = vadd.f32 %v1099_v40, %v423_v55 }
  0xb4   :  { %v567_v58 = vmax.f32 %v462_v52, 0.0  ;;  %v583_v59 = vmax.f32 %v502_v53, 0.0 }
  0xb5   :  { %v536_v60 = vmax.f32 %v384_v56, 0.0  ;;  %v552_v61 = vmax.f32 %v424_v57, 0.0 }
  0xb6   :  { %v631_v62 = vpack.c.bf16 %v567_v58, %v567_v58  ;;  %v647_v63 = vpack.c.bf16 %v583_v59, %v583_v59 }
  0xb7   :  { %v600_v0 = vpack.c.bf16 %v536_v60, %v536_v60  ;;  %v616_v1 = vpack.c.bf16 %v552_v61, %v552_v61 }
  0xb8   :  { %696 = vst.msk [vmem:[%s1424_s3 + $0x90] sm:$0xf] %vm659_vm3, %v631_v62 }
  0xb9   :  { %712 = vst.msk [vmem:[%s1424_s3 + $0xd0] sm:$0xf] %vm659_vm3, %v647_v63  ;;  %v463_v2 = vpop.f32.mrf.mxu2  ;;  %v503_v3 = vpop.f32.mrf.mxu3 }
  0xba   :  { %665 = vst.msk [vmem:[%s1424_s3 + $0x14] sm:$0xf] %vm659_vm3, %v600_v0  ;;  %v464_v4 = vadd.f32 %v1099_v40, %v463_v2  ;;  %v504_v5 = vadd.f32 %v1099_v40, %v503_v3  ;;  %v386_v6 = vpop.f32.mrf.mxu0  ;;  %v426_v7 = vpop.f32.mrf.mxu1 }
  0xbb   :  { %681 = vst.msk [vmem:[%s1424_s3 + $0x54] sm:$0xf] %vm659_vm3, %v616_v1  ;;  %v387_v8 = vadd.f32 %v1099_v40, %v386_v6  ;;  %v427_v9 = vadd.f32 %v1099_v40, %v426_v7 }
  0xbc   :  { %v568_v10 = vmax.f32 %v464_v4, 0.0  ;;  %v584_v11 = vmax.f32 %v504_v5, 0.0 }
  0xbd   :  { %v537_v12 = vmax.f32 %v387_v8, 0.0  ;;  %v553_v13 = vmax.f32 %v427_v9, 0.0 }
  0xbe   :  { %v632_v14 = vpack.c.bf16 %v568_v10, %v568_v10  ;;  %v648_v15 = vpack.c.bf16 %v584_v11, %v584_v11 }
  0xbf   :  { %v601_v16 = vpack.c.bf16 %v537_v12, %v537_v12  ;;  %v617_v17 = vpack.c.bf16 %v553_v13, %v553_v13 }
  0xc0   :  { %697 = vst.msk [vmem:[%s1424_s3 + $0x94] sm:$0xf] %vm659_vm3, %v632_v14 }
  0xc1   :  { %713 = vst.msk [vmem:[%s1424_s3 + $0xd4] sm:$0xf] %vm659_vm3, %v648_v15  ;;  %v466_v18 = vpop.f32.mrf.mxu2  ;;  %v506_v19 = vpop.f32.mrf.mxu3 }
  0xc2   :  { %666 = vst.msk [vmem:[%s1424_s3 + $0x18] sm:$0xf] %vm659_vm3, %v601_v16  ;;  %v467_v20 = vadd.f32 %v1099_v40, %v466_v18  ;;  %v507_v21 = vadd.f32 %v1099_v40, %v506_v19  ;;  %v388_v22 = vpop.f32.mrf.mxu0  ;;  %v428_v23 = vpop.f32.mrf.mxu1 }
  0xc3   :  { %682 = vst.msk [vmem:[%s1424_s3 + $0x58] sm:$0xf] %vm659_vm3, %v617_v17  ;;  %v389_v24 = vadd.f32 %v1099_v40, %v388_v22  ;;  %v429_v25 = vadd.f32 %v1099_v40, %v428_v23 }
  0xc4   :  { %v569_v26 = vmax.f32 %v467_v20, 0.0  ;;  %v585_v27 = vmax.f32 %v507_v21, 0.0 }
  0xc5   :  { %v538_v28 = vmax.f32 %v389_v24, 0.0  ;;  %v554_v29 = vmax.f32 %v429_v25, 0.0 }
  0xc6   :  { %v633_v30 = vpack.c.bf16 %v569_v26, %v569_v26  ;;  %v649_v31 = vpack.c.bf16 %v585_v27, %v585_v27 }
  0xc7   :  { %v602_v32 = vpack.c.bf16 %v538_v28, %v538_v28  ;;  %v618_v33 = vpack.c.bf16 %v554_v29, %v554_v29 }
  0xc8   :  { %698 = vst.msk [vmem:[%s1424_s3 + $0x98] sm:$0xf] %vm659_vm3, %v633_v30 }
  0xc9   :  { %714 = vst.msk [vmem:[%s1424_s3 + $0xd8] sm:$0xf] %vm659_vm3, %v649_v31  ;;  %v468_v34 = vpop.f32.mrf.mxu2  ;;  %v508_v35 = vpop.f32.mrf.mxu3 }
  0xca   :  { %667 = vst.msk [vmem:[%s1424_s3 + $0x1c] sm:$0xf] %vm659_vm3, %v602_v32  ;;  %v469_v36 = vadd.f32 %v1099_v40, %v468_v34  ;;  %v509_v37 = vadd.f32 %v1099_v40, %v508_v35  ;;  %v391_v38 = vpop.f32.mrf.mxu0  ;;  %v431_v39 = vpop.f32.mrf.mxu1 }
  0xcb   :  { %683 = vst.msk [vmem:[%s1424_s3 + $0x5c] sm:$0xf] %vm659_vm3, %v618_v33  ;;  %v392_v41 = vadd.f32 %v1099_v40, %v391_v38  ;;  %v432_v42 = vadd.f32 %v1099_v40, %v431_v39 }
  0xcc   :  { %v570_v43 = vmax.f32 %v469_v36, 0.0  ;;  %v586_v44 = vmax.f32 %v509_v37, 0.0 }
  0xcd   :  { %v539_v45 = vmax.f32 %v392_v41, 0.0  ;;  %v555_v46 = vmax.f32 %v432_v42, 0.0 }
  0xce   :  { %v634_v47 = vpack.c.bf16 %v570_v43, %v570_v43  ;;  %v650_v48 = vpack.c.bf16 %v586_v44, %v586_v44 }
  0xcf   :  { %v603_v49 = vpack.c.bf16 %v539_v45, %v539_v45  ;;  %v619_v50 = vpack.c.bf16 %v555_v46, %v555_v46 }
  0xd0   :  { %699 = vst.msk [vmem:[%s1424_s3 + $0x9c] sm:$0xf] %vm659_vm3, %v634_v47 }
  0xd1   :  { %715 = vst.msk [vmem:[%s1424_s3 + $0xdc] sm:$0xf] %vm659_vm3, %v650_v48  ;;  %v471_v51 = vpop.f32.mrf.mxu2  ;;  %v511_v52 = vpop.f32.mrf.mxu3 }
  0xd2   :  { %668 = vst.msk [vmem:[%s1424_s3 + $0x20] sm:$0xf] %vm659_vm3, %v603_v49  ;;  %v472_v53 = vadd.f32 %v1099_v40, %v471_v51  ;;  %v512_v54 = vadd.f32 %v1099_v40, %v511_v52  ;;  %v393_v55 = vpop.f32.mrf.mxu0  ;;  %v433_v56 = vpop.f32.mrf.mxu1 }
  0xd3   :  { %684 = vst.msk [vmem:[%s1424_s3 + $0x60] sm:$0xf] %vm659_vm3, %v619_v50  ;;  %v394_v57 = vadd.f32 %v1099_v40, %v393_v55  ;;  %v434_v58 = vadd.f32 %v1099_v40, %v433_v56 }
  0xd4   :  { %v571_v59 = vmax.f32 %v472_v53, 0.0  ;;  %v587_v60 = vmax.f32 %v512_v54, 0.0 }
  0xd5   :  { %v540_v61 = vmax.f32 %v394_v57, 0.0  ;;  %v556_v62 = vmax.f32 %v434_v58, 0.0 }
  0xd6   :  { %v635_v63 = vpack.c.bf16 %v571_v59, %v571_v59  ;;  %v651_v0 = vpack.c.bf16 %v587_v60, %v587_v60 }
  0xd7   :  { %v604_v1 = vpack.c.bf16 %v540_v61, %v540_v61  ;;  %v620_v2 = vpack.c.bf16 %v556_v62, %v556_v62 }
  0xd8   :  { %700 = vst.msk [vmem:[%s1424_s3 + $0xa0] sm:$0xf] %vm659_vm3, %v635_v63 }
  0xd9   :  { %716 = vst.msk [vmem:[%s1424_s3 + $0xe0] sm:$0xf] %vm659_vm3, %v651_v0  ;;  %v473_v3 = vpop.f32.mrf.mxu2  ;;  %v513_v4 = vpop.f32.mrf.mxu3 }
  0xda   :  { %669 = vst.msk [vmem:[%s1424_s3 + $0x24] sm:$0xf] %vm659_vm3, %v604_v1  ;;  %v474_v5 = vadd.f32 %v1099_v40, %v473_v3  ;;  %v514_v6 = vadd.f32 %v1099_v40, %v513_v4  ;;  %v396_v7 = vpop.f32.mrf.mxu0  ;;  %v436_v8 = vpop.f32.mrf.mxu1 }
  0xdb   :  { %685 = vst.msk [vmem:[%s1424_s3 + $0x64] sm:$0xf] %vm659_vm3, %v620_v2  ;;  %v397_v9 = vadd.f32 %v1099_v40, %v396_v7  ;;  %v437_v10 = vadd.f32 %v1099_v40, %v436_v8 }
  0xdc   :  { %v572_v11 = vmax.f32 %v474_v5, 0.0  ;;  %v588_v12 = vmax.f32 %v514_v6, 0.0 }
  0xdd   :  { %v541_v13 = vmax.f32 %v397_v9, 0.0  ;;  %v557_v14 = vmax.f32 %v437_v10, 0.0 }
  0xde   :  { %v636_v15 = vpack.c.bf16 %v572_v11, %v572_v11  ;;  %v652_v16 = vpack.c.bf16 %v588_v12, %v588_v12 }
  0xdf   :  { %v605_v17 = vpack.c.bf16 %v541_v13, %v541_v13  ;;  %v621_v18 = vpack.c.bf16 %v557_v14, %v557_v14 }
  0xe0   :  { %701 = vst.msk [vmem:[%s1424_s3 + $0xa4] sm:$0xf] %vm659_vm3, %v636_v15 }
  0xe1   :  { %717 = vst.msk [vmem:[%s1424_s3 + $0xe4] sm:$0xf] %vm659_vm3, %v652_v16  ;;  %v476_v19 = vpop.f32.mrf.mxu2  ;;  %v516_v20 = vpop.f32.mrf.mxu3 }
  0xe2   :  { %670 = vst.msk [vmem:[%s1424_s3 + $0x28] sm:$0xf] %vm659_vm3, %v605_v17  ;;  %v477_v21 = vadd.f32 %v1099_v40, %v476_v19  ;;  %v517_v22 = vadd.f32 %v1099_v40, %v516_v20  ;;  %v398_v23 = vpop.f32.mrf.mxu0  ;;  %v438_v24 = vpop.f32.mrf.mxu1 }
  0xe3   :  { %686 = vst.msk [vmem:[%s1424_s3 + $0x68] sm:$0xf] %vm659_vm3, %v621_v18  ;;  %v399_v25 = vadd.f32 %v1099_v40, %v398_v23  ;;  %v439_v26 = vadd.f32 %v1099_v40, %v438_v24 }
  0xe4   :  { %v573_v27 = vmax.f32 %v477_v21, 0.0  ;;  %v589_v28 = vmax.f32 %v517_v22, 0.0 }
  0xe5   :  { %v542_v29 = vmax.f32 %v399_v25, 0.0  ;;  %v558_v30 = vmax.f32 %v439_v26, 0.0 }
  0xe6   :  { %v637_v31 = vpack.c.bf16 %v573_v27, %v573_v27  ;;  %v653_v32 = vpack.c.bf16 %v589_v28, %v589_v28 }
  0xe7   :  { %v606_v33 = vpack.c.bf16 %v542_v29, %v542_v29  ;;  %v622_v34 = vpack.c.bf16 %v558_v30, %v558_v30 }
  0xe8   :  { %702 = vst.msk [vmem:[%s1424_s3 + $0xa8] sm:$0xf] %vm659_vm3, %v637_v31 }
  0xe9   :  { %718 = vst.msk [vmem:[%s1424_s3 + $0xe8] sm:$0xf] %vm659_vm3, %v653_v32  ;;  %v478_v35 = vpop.f32.mrf.mxu2  ;;  %v518_v36 = vpop.f32.mrf.mxu3 }
  0xea   :  { %671 = vst.msk [vmem:[%s1424_s3 + $0x2c] sm:$0xf] %vm659_vm3, %v606_v33  ;;  %v479_v37 = vadd.f32 %v1099_v40, %v478_v35  ;;  %v519_v38 = vadd.f32 %v1099_v40, %v518_v36  ;;  %v401_v39 = vpop.f32.mrf.mxu0  ;;  %v441_v41 = vpop.f32.mrf.mxu1 }
  0xeb   :  { %687 = vst.msk [vmem:[%s1424_s3 + $0x6c] sm:$0xf] %vm659_vm3, %v622_v34  ;;  %v402_v42 = vadd.f32 %v1099_v40, %v401_v39  ;;  %v442_v43 = vadd.f32 %v1099_v40, %v441_v41 }
  0xec   :  { %v574_v44 = vmax.f32 %v479_v37, 0.0  ;;  %v590_v45 = vmax.f32 %v519_v38, 0.0 }
  0xed   :  { %v543_v46 = vmax.f32 %v402_v42, 0.0  ;;  %v559_v47 = vmax.f32 %v442_v43, 0.0 }
  0xee   :  { %v638_v48 = vpack.c.bf16 %v574_v44, %v574_v44  ;;  %v654_v49 = vpack.c.bf16 %v590_v45, %v590_v45 }
  0xef   :  { %v607_v50 = vpack.c.bf16 %v543_v46, %v543_v46  ;;  %v623_v51 = vpack.c.bf16 %v559_v47, %v559_v47 }
  0xf0   :  { %703 = vst.msk [vmem:[%s1424_s3 + $0xac] sm:$0xf] %vm659_vm3, %v638_v48 }
  0xf1   :  { %719 = vst.msk [vmem:[%s1424_s3 + $0xec] sm:$0xf] %vm659_vm3, %v654_v49  ;;  %v481_v52 = vpop.f32.mrf.mxu2  ;;  %v521_v53 = vpop.f32.mrf.mxu3 }
  0xf2   :  { %672 = vst.msk [vmem:[%s1424_s3 + $0x30] sm:$0xf] %vm659_vm3, %v607_v50  ;;  %v482_v54 = vadd.f32 %v1099_v40, %v481_v52  ;;  %v522_v55 = vadd.f32 %v1099_v40, %v521_v53  ;;  %v403_v56 = vpop.f32.mrf.mxu0  ;;  %v443_v57 = vpop.f32.mrf.mxu1 }
  0xf3   :  { %688 = vst.msk [vmem:[%s1424_s3 + $0x70] sm:$0xf] %vm659_vm3, %v623_v51  ;;  %v404_v58 = vadd.f32 %v1099_v40, %v403_v56  ;;  %v444_v59 = vadd.f32 %v1099_v40, %v443_v57 }
  0xf4   :  { %v575_v60 = vmax.f32 %v482_v54, 0.0  ;;  %v591_v61 = vmax.f32 %v522_v55, 0.0 }
  0xf5   :  { %v544_v62 = vmax.f32 %v404_v58, 0.0  ;;  %v560_v63 = vmax.f32 %v444_v59, 0.0 }
  0xf6   :  { %v639_v0 = vpack.c.bf16 %v575_v60, %v575_v60  ;;  %v655_v1 = vpack.c.bf16 %v591_v61, %v591_v61 }
  0xf7   :  { %v608_v2 = vpack.c.bf16 %v544_v62, %v544_v62  ;;  %v624_v3 = vpack.c.bf16 %v560_v63, %v560_v63 }
  0xf8   :  { %704 = vst.msk [vmem:[%s1424_s3 + $0xb0] sm:$0xf] %vm659_vm3, %v639_v0 }
  0xf9   :  { %720 = vst.msk [vmem:[%s1424_s3 + $0xf0] sm:$0xf] %vm659_vm3, %v655_v1  ;;  %v483_v4 = vpop.f32.mrf.mxu2  ;;  %v523_v5 = vpop.f32.mrf.mxu3 }
  0xfa   :  { %673 = vst.msk [vmem:[%s1424_s3 + $0x34] sm:$0xf] %vm659_vm3, %v608_v2  ;;  %v484_v6 = vadd.f32 %v1099_v40, %v483_v4  ;;  %v524_v7 = vadd.f32 %v1099_v40, %v523_v5  ;;  %v406_v8 = vpop.f32.mrf.mxu0  ;;  %v446_v9 = vpop.f32.mrf.mxu1 }
  0xfb   :  { %689 = vst.msk [vmem:[%s1424_s3 + $0x74] sm:$0xf] %vm659_vm3, %v624_v3  ;;  %v407_v10 = vadd.f32 %v1099_v40, %v406_v8  ;;  %v447_v11 = vadd.f32 %v1099_v40, %v446_v9 }
  0xfc   :  { %v576_v12 = vmax.f32 %v484_v6, 0.0  ;;  %v592_v13 = vmax.f32 %v524_v7, 0.0 }
  0xfd   :  { %v545_v14 = vmax.f32 %v407_v10, 0.0  ;;  %v561_v15 = vmax.f32 %v447_v11, 0.0 }
  0xfe   :  { %v640_v16 = vpack.c.bf16 %v576_v12, %v576_v12  ;;  %v656_v17 = vpack.c.bf16 %v592_v13, %v592_v13 }
  0xff   :  { %v609_v18 = vpack.c.bf16 %v545_v14, %v545_v14  ;;  %v625_v19 = vpack.c.bf16 %v561_v15, %v561_v15 }
 0x100   :  { %705 = vst.msk [vmem:[%s1424_s3 + $0xb4] sm:$0xf] %vm659_vm3, %v640_v16 }
 0x101   :  { %721 = vst.msk [vmem:[%s1424_s3 + $0xf4] sm:$0xf] %vm659_vm3, %v656_v17  ;;  %v486_v20 = vpop.f32.mrf.mxu2  ;;  %v526_v21 = vpop.f32.mrf.mxu3 }
 0x102   :  { %674 = vst.msk [vmem:[%s1424_s3 + $0x38] sm:$0xf] %vm659_vm3, %v609_v18  ;;  %v487_v22 = vadd.f32 %v1099_v40, %v486_v20  ;;  %v527_v23 = vadd.f32 %v1099_v40, %v526_v21  ;;  %v408_v24 = vpop.f32.mrf.mxu0  ;;  %v448_v25 = vpop.f32.mrf.mxu1 }
 0x103   :  { %690 = vst.msk [vmem:[%s1424_s3 + $0x78] sm:$0xf] %vm659_vm3, %v625_v19  ;;  %v409_v26 = vadd.f32 %v1099_v40, %v408_v24  ;;  %v449_v27 = vadd.f32 %v1099_v40, %v448_v25 }
 0x104   :  { %v577_v28 = vmax.f32 %v487_v22, 0.0  ;;  %v593_v29 = vmax.f32 %v527_v23, 0.0 }
 0x105   :  { %v546_v30 = vmax.f32 %v409_v26, 0.0  ;;  %v562_v31 = vmax.f32 %v449_v27, 0.0 }
 0x106   :  { %v641_v32 = vpack.c.bf16 %v577_v28, %v577_v28  ;;  %v657_v33 = vpack.c.bf16 %v593_v29, %v593_v29 }
 0x107   :  { %v610_v34 = vpack.c.bf16 %v546_v30, %v546_v30  ;;  %v626_v35 = vpack.c.bf16 %v562_v31, %v562_v31 }
 0x108   :  { %706 = vst.msk [vmem:[%s1424_s3 + $0xb8] sm:$0xf] %vm659_vm3, %v641_v32 }
 0x109   :  { %722 = vst.msk [vmem:[%s1424_s3 + $0xf8] sm:$0xf] %vm659_vm3, %v657_v33  ;;  %v488_v36 = vpop.f32.mrf.mxu2  ;;  %v528_v37 = vpop.f32.mrf.mxu3 }
 0x10a   :  { %675 = vst.msk [vmem:[%s1424_s3 + $0x3c] sm:$0xf] %vm659_vm3, %v610_v34  ;;  %v489_v38 = vadd.f32 %v1099_v40, %v488_v36  ;;  %v529_v39 = vadd.f32 %v1099_v40, %v528_v37 }
 0x10b   :  { %691 = vst.msk [vmem:[%s1424_s3 + $0x7c] sm:$0xf] %vm659_vm3, %v626_v35 }
 0x10c   :  { %v578_v41 = vmax.f32 %v489_v38, 0.0  ;;  %v594_v42 = vmax.f32 %v529_v39, 0.0 }
 0x10e   :  { %v642_v43 = vpack.c.bf16 %v578_v41, %v578_v41  ;;  %v658_v44 = vpack.c.bf16 %v594_v42, %v594_v42 }
 0x110   :  { %707 = vst.msk [vmem:[%s1424_s3 + $0xbc] sm:$0xf] %vm659_vm3, %v642_v43 }
 0x111   :  { %723 = vst.msk [vmem:[%s1424_s3 + $0xfc] sm:$0xf] %vm659_vm3, %v658_v44 }

// kernel: psa_relit_pcnet_forward.18
= control target key start
LH: loop header
LB: loop body
LE: loop exit
PB: predicated region body
PF: predicated region fallthrough
CT: control target
= control target key end

     0   :  { %s101_s0 = inlined_call_operand.vmem [shape: f32[16,128], index: 0, kind: input, shape index: {}]   ;;  %s102_s2 = inlined_call_operand.vmem [shape: f32[16,128], index: 2, kind: input, shape index: {}]   ;;  %s103_s1 = inlined_call_operand.vmem [shape: f32[16,128], index: 1, kind: input, shape index: {}]   ;;  %s104_s3 = inlined_call_operand.vmem [shape: bf16[16,128], index: 3, kind: output, shape index: {0}]   ;;  %s105_s4 = inlined_call_operand.vmem [shape: bf16[16,128], index: 4, kind: output, shape index: {1}]  }
   0x1   :  { %v16_v0 = vld [vmem:[%s101_s0] sm:$0xff]  ;;  %v17_v1 = vld [vmem:[%s101_s0 + $0x8] sm:$0xff] }
   0x2   :  { %v18_v2 = vld [vmem:[%s102_s2] sm:$0xff]  ;;  %v19_v3 = vld [vmem:[%s102_s2 + $0x8] sm:$0xff] }
   0x3   :  { %v20_v4 = vmul.f32 %v18_v2, %v16_v0  ;;  %v26_v5 = vld [vmem:[%s103_s1] sm:$0xff]  ;;  %v27_v6 = vld [vmem:[%s103_s1 + $0x8] sm:$0xff]  ;;  %v21_v7 = vmul.f32 %v19_v3, %v17_v1 }
   0x5   :  { %v28_v8 = vmul.f32 %v26_v5, %v20_v4  ;;  %v45_v9 = vpack.c.bf16 %v21_v7, %v20_v4  ;;  %v29_v10 = vmul.f32 %v27_v6, %v21_v7 }
   0x7   :  { %46 = vst [vmem:[%s104_s3] sm:$0xff] %v45_v9   ;;  %v50_v11 = vpack.c.bf16 %v29_v10, %v28_v8 }
   0x9   :  { %51 = vst [vmem:[%s105_s4] sm:$0xff] %v50_v11  }

// kernel: psa_relit_pcnet_forward.19
= control target key start
LH: loop header
LB: loop body
LE: loop exit
PB: predicated region body
PF: predicated region fallthrough
CT: control target
= control target key end

     0   :  { %vm128_vm0 = vcmask 1042432   ;;  %vm103_vm1 = vcmask 441344   ;;  %vm213_vm2 = vcmask 257024   ;;  %s459_s1 = inlined_call_operand.vmem [shape: bf16[54,32], index: 1, kind: input, shape index: {}]   ;;  %s460_s2 = inlined_call_operand.vmem [shape: f32[1,32], index: 2, kind: input, shape index: {}]   ;;  %s461_s0 = inlined_call_operand.vmem [shape: bf16[128,54], index: 0, kind: input, shape index: {}]   ;;  %s462_s3 = inlined_call_operand.vmem [shape: bf16[128,32], index: 3, kind: output, shape index: {}]  }
   0x1   :  { %v37_v0 = vld [vmem:[%s459_s1 + $0x18] sm:$0x7]  ;;  %v296_v4 = vld [vmem:[%s459_s1 + $0x10] sm:$0xff]  ;;  %v295_v5 = vld [vmem:[%s459_s1 + $0x8] sm:$0xff] }
   0x2   :  { %v95_v1 = vunpack.c.l.b16 %v37_v0  ;;  %v294_v6 = vld [vmem:[%s459_s1] sm:$0xff]  ;;  %v288_v8 = vld [vmem:[%s461_s0 + $0x10] sm:$0xff]  ;;  %v287_v11 = vld [vmem:[%s461_s0 + $0x8] sm:$0xff] }
   0x3   :  { %v286_v7 = vld [vmem:[%s461_s0] sm:$0xff]  ;;  %v292_v10 = vld [vmem:[%s461_s0 + $0x30] sm:$0xff]  ;;  %v289_v12 = vld [vmem:[%s461_s0 + $0x18] sm:$0xff] }
   0x4   :  { %v99_v2 = vpack.c.b16 %v95_v1, %v95_v1  ;;  %v290_v9 = vld [vmem:[%s461_s0 + $0x20] sm:$0xff]  ;;  %v291_v13 = vld [vmem:[%s461_s0 + $0x28] sm:$0xff]  ;;  %v293_v14 = vld [vmem:[%s461_s0 + $0x38] sm:$0xff] }
   0x5   :  { %v377_v15 = vld [vmem:[%s460_s2] ss:$0 sm:$0xff] }
   0x6   :  { %v130_v3 = vsel %vm128_vm0, %v99_v2, 0 }
   0x7   :  { %136 = vmatpush.bf16.msra.mxu0 %v130_v3  ;;  %297 = vmatpush.bf16.msra.mxu1 %v130_v3 }
   0x8   :  { %298 = vmatpush.bf16.msra.mxu2 %v130_v3  ;;  %299 = vmatpush.bf16.msra.mxu3 %v130_v3 }
   0xb   :  { %137 = vmatpush.bf16.msra.mxu0 %v296_v4  ;;  %300 = vmatpush.bf16.msra.mxu1 %v296_v4 }
   0xc   :  { %301 = vmatpush.bf16.msra.mxu2 %v296_v4  ;;  %302 = vmatpush.bf16.msra.mxu3 %v296_v4 }
   0xf   :  { %138 = vmatpush.bf16.msra.mxu0 %v295_v5  ;;  %303 = vmatpush.bf16.msra.mxu1 %v295_v5 }
  0x10   :  { %304 = vmatpush.bf16.msra.mxu2 %v295_v5  ;;  %305 = vmatpush.bf16.msra.mxu3 %v295_v5 }
  0x13   :  { %139 = vmatpush.bf16.msra.mxu0 %v294_v6  ;;  %306 = vmatpush.bf16.msra.mxu1 %v294_v6 }
  0x14   :  { %307 = vmatpush.bf16.msra.mxu2 %v294_v6  ;;  %308 = vmatpush.bf16.msra.mxu3 %v294_v6 }
  0x16   :  { %278 = vmatmul.msk.bf16.vlgmr.msra.gmra.mxu0 %vm103_vm1, %v286_v7  ;;  %280 = vmatmul.msk.bf16.vlgmr.msra.gmra.mxu1 %vm103_vm1, %v288_v8 }
  0x17   :  { %282 = vmatmul.msk.bf16.vlgmr.msra.gmra.mxu2 %vm103_vm1, %v290_v9  ;;  %284 = vmatmul.msk.bf16.vlgmr.msra.gmra.mxu3 %vm103_vm1, %v292_v10 }
  0x26   :  { %279 = vmatmul.msk.bf16.gmra.mxu0 %vm103_vm1, %v287_v11  ;;  %281 = vmatmul.msk.bf16.gmra.mxu1 %vm103_vm1, %v289_v12 }
  0x27   :  { %283 = vmatmul.msk.bf16.gmra.mxu2 %vm103_vm1, %v291_v13  ;;  %285 = vmatmul.msk.bf16.gmra.mxu3 %vm103_vm1, %v293_v14 }
  0x93   :  { %v141_v16 = vpop.f32.mrf.mxu0  ;;  %v151_v17 = vpop.f32.mrf.mxu1 }
  0x94   :  { %v142_v18 = vadd.f32 %v377_v15, %v141_v16  ;;  %v152_v19 = vadd.f32 %v377_v15, %v151_v17 }
  0x96   :  { %v181_v20 = vmax.f32 %v142_v18, 0.0  ;;  %v185_v21 = vmax.f32 %v152_v19, 0.0 }
  0x98   :  { %v197_v22 = vpack.c.bf16 %v181_v20, %v181_v20  ;;  %v201_v23 = vpack.c.bf16 %v185_v21, %v185_v21 }
  0x9a   :  { %214 = vst.msk [vmem:[%s462_s3] sm:$0xf] %vm213_vm2, %v197_v22  ;;  %v161_v24 = vpop.f32.mrf.mxu2  ;;  %v171_v25 = vpop.f32.mrf.mxu3 }
  0x9b   :  { %218 = vst.msk [vmem:[%s462_s3 + $0x10] sm:$0xf] %vm213_vm2, %v201_v23  ;;  %v162_v26 = vadd.f32 %v377_v15, %v161_v24  ;;  %v172_v27 = vadd.f32 %v377_v15, %v171_v25  ;;  %v143_v28 = vpop.f32.mrf.mxu0  ;;  %v153_v29 = vpop.f32.mrf.mxu1 }
  0x9c   :  { %v144_v30 = vadd.f32 %v377_v15, %v143_v28  ;;  %v154_v31 = vadd.f32 %v377_v15, %v153_v29 }
  0x9d   :  { %v189_v32 = vmax.f32 %v162_v26, 0.0  ;;  %v193_v33 = vmax.f32 %v172_v27, 0.0 }
  0x9e   :  { %v182_v34 = vmax.f32 %v144_v30, 0.0  ;;  %v186_v35 = vmax.f32 %v154_v31, 0.0 }
  0x9f   :  { %v205_v36 = vpack.c.bf16 %v189_v32, %v189_v32  ;;  %v209_v37 = vpack.c.bf16 %v193_v33, %v193_v33 }
  0xa0   :  { %v198_v38 = vpack.c.bf16 %v182_v34, %v182_v34  ;;  %v202_v39 = vpack.c.bf16 %v186_v35, %v186_v35 }
  0xa1   :  { %222 = vst.msk [vmem:[%s462_s3 + $0x20] sm:$0xf] %vm213_vm2, %v205_v36 }
  0xa2   :  { %226 = vst.msk [vmem:[%s462_s3 + $0x30] sm:$0xf] %vm213_vm2, %v209_v37  ;;  %v163_v40 = vpop.f32.mrf.mxu2  ;;  %v173_v41 = vpop.f32.mrf.mxu3 }
  0xa3   :  { %215 = vst.msk [vmem:[%s462_s3 + $0x4] sm:$0xf] %vm213_vm2, %v198_v38  ;;  %v164_v42 = vadd.f32 %v377_v15, %v163_v40  ;;  %v174_v43 = vadd.f32 %v377_v15, %v173_v41  ;;  %v146_v44 = vpop.f32.mrf.mxu0  ;;  %v156_v45 = vpop.f32.mrf.mxu1 }
  0xa4   :  { %219 = vst.msk [vmem:[%s462_s3 + $0x14] sm:$0xf] %vm213_vm2, %v202_v39  ;;  %v147_v46 = vadd.f32 %v377_v15, %v146_v44  ;;  %v157_v47 = vadd.f32 %v377_v15, %v156_v45 }
  0xa5   :  { %v190_v48 = vmax.f32 %v164_v42, 0.0  ;;  %v194_v49 = vmax.f32 %v174_v43, 0.0 }
  0xa6   :  { %v183_v50 = vmax.f32 %v147_v46, 0.0  ;;  %v187_v51 = vmax.f32 %v157_v47, 0.0 }
  0xa7   :  { %v206_v52 = vpack.c.bf16 %v190_v48, %v190_v48  ;;  %v210_v53 = vpack.c.bf16 %v194_v49, %v194_v49 }
  0xa8   :  { %v199_v54 = vpack.c.bf16 %v183_v50, %v183_v50  ;;  %v203_v55 = vpack.c.bf16 %v187_v51, %v187_v51 }
  0xa9   :  { %223 = vst.msk [vmem:[%s462_s3 + $0x24] sm:$0xf] %vm213_vm2, %v206_v52 }
  0xaa   :  { %227 = vst.msk [vmem:[%s462_s3 + $0x34] sm:$0xf] %vm213_vm2, %v210_v53  ;;  %v166_v56 = vpop.f32.mrf.mxu2  ;;  %v176_v57 = vpop.f32.mrf.mxu3 }
  0xab   :  { %216 = vst.msk [vmem:[%s462_s3 + $0x8] sm:$0xf] %vm213_vm2, %v199_v54  ;;  %v167_v58 = vadd.f32 %v377_v15, %v166_v56  ;;  %v177_v59 = vadd.f32 %v377_v15, %v176_v57  ;;  %v148_v60 = vpop.f32.mrf.mxu0  ;;  %v158_v61 = vpop.f32.mrf.mxu1 }
  0xac   :  { %220 = vst.msk [vmem:[%s462_s3 + $0x18] sm:$0xf] %vm213_vm2, %v203_v55  ;;  %v149_v62 = vadd.f32 %v377_v15, %v148_v60  ;;  %v159_v63 = vadd.f32 %v377_v15, %v158_v61 }
  0xad   :  { %v191_v0 = vmax.f32 %v167_v58, 0.0  ;;  %v195_v1 = vmax.f32 %v177_v59, 0.0 }
  0xae   :  { %v184_v2 = vmax.f32 %v149_v62, 0.0  ;;  %v188_v3 = vmax.f32 %v159_v63, 0.0 }
  0xaf   :  { %v207_v4 = vpack.c.bf16 %v191_v0, %v191_v0  ;;  %v211_v5 = vpack.c.bf16 %v195_v1, %v195_v1 }
  0xb0   :  { %v200_v6 = vpack.c.bf16 %v184_v2, %v184_v2  ;;  %v204_v7 = vpack.c.bf16 %v188_v3, %v188_v3 }
  0xb1   :  { %224 = vst.msk [vmem:[%s462_s3 + $0x28] sm:$0xf] %vm213_vm2, %v207_v4 }
  0xb2   :  { %228 = vst.msk [vmem:[%s462_s3 + $0x38] sm:$0xf] %vm213_vm2, %v211_v5  ;;  %v168_v8 = vpop.f32.mrf.mxu2  ;;  %v178_v9 = vpop.f32.mrf.mxu3 }
  0xb3   :  { %217 = vst.msk [vmem:[%s462_s3 + $0xc] sm:$0xf] %vm213_vm2, %v200_v6  ;;  %v169_v10 = vadd.f32 %v377_v15, %v168_v8  ;;  %v179_v11 = vadd.f32 %v377_v15, %v178_v9 }
  0xb4   :  { %221 = vst.msk [vmem:[%s462_s3 + $0x1c] sm:$0xf] %vm213_vm2, %v204_v7 }
  0xb5   :  { %v192_v12 = vmax.f32 %v169_v10, 0.0  ;;  %v196_v13 = vmax.f32 %v179_v11, 0.0 }
  0xb7   :  { %v208_v14 = vpack.c.bf16 %v192_v12, %v192_v12  ;;  %v212_v16 = vpack.c.bf16 %v196_v13, %v196_v13 }
  0xb9   :  { %225 = vst.msk [vmem:[%s462_s3 + $0x2c] sm:$0xf] %vm213_vm2, %v208_v14 }
  0xba   :  { %229 = vst.msk [vmem:[%s462_s3 + $0x3c] sm:$0xf] %vm213_vm2, %v212_v16 }

// kernel: psa_relit_pcnet_forward.20
= control target key start
LH: loop header
LB: loop body
LE: loop exit
PB: predicated region body
PF: predicated region fallthrough
CT: control target
= control target key end

     0   :  { %vm315_vm0 = vcmask 519168   ;;  %s630_s1 = inlined_call_operand.vmem [shape: bf16[384,64], index: 1, kind: input, shape index: {}]   ;;  %s631_s2 = inlined_call_operand.vmem [shape: f32[1,64], index: 2, kind: input, shape index: {}]   ;;  %s632_s0 = inlined_call_operand.vmem [shape: bf16[32,384], index: 0, kind: input, shape index: {}]   ;;  %s633_s3 = inlined_call_operand.vmem [shape: bf16[32,64], index: 3, kind: output, shape index: {}]  }
   0x1   :  { %v457_v0 = vld [vmem:[%s630_s1 + $0x38] sm:$0xff]  ;;  %v456_v3 = vld [vmem:[%s630_s1 + $0x30] sm:$0xff]  ;;  %v455_v6 = vld [vmem:[%s630_s1 + $0x28] sm:$0xff] }
   0x2   :  { %v465_v1 = vld [vmem:[%s630_s1 + $0x78] sm:$0xff]  ;;  %250 = vmatpush.bf16.msra.mxu0 %v457_v0  ;;  %v464_v4 = vld [vmem:[%s630_s1 + $0x70] sm:$0xff]  ;;  %474 = vmatpush.bf16.msra.mxu3 %v457_v0  ;;  %v463_v7 = vld [vmem:[%s630_s1 + $0x68] sm:$0xff] }
   0x3   :  { %v473_v2 = vld [vmem:[%s630_s1 + $0xb8] sm:$0xff]  ;;  %269 = vmatpush.bf16.msra.mxu1 %v465_v1  ;;  %v472_v5 = vld [vmem:[%s630_s1 + $0xb0] sm:$0xff]  ;;  %v471_v8 = vld [vmem:[%s630_s1 + $0xa8] sm:$0xff] }
   0x4   :  { %288 = vmatpush.bf16.msra.mxu2 %v473_v2  ;;  %v454_v9 = vld [vmem:[%s630_s1 + $0x20] sm:$0xff]  ;;  %v453_v12 = vld [vmem:[%s630_s1 + $0x18] sm:$0xff]  ;;  %v452_v15 = vld [vmem:[%s630_s1 + $0x10] sm:$0xff] }
   0x5   :  { %v462_v10 = vld [vmem:[%s630_s1 + $0x60] sm:$0xff]  ;;  %v461_v13 = vld [vmem:[%s630_s1 + $0x58] sm:$0xff]  ;;  %v460_v16 = vld [vmem:[%s630_s1 + $0x50] sm:$0xff] }
   0x6   :  { %251 = vmatpush.bf16.msra.mxu0 %v456_v3  ;;  %475 = vmatpush.bf16.msra.mxu3 %v456_v3  ;;  %v470_v11 = vld [vmem:[%s630_s1 + $0xa0] sm:$0xff]  ;;  %v469_v14 = vld [vmem:[%s630_s1 + $0x98] sm:$0xff]  ;;  %v468_v17 = vld [vmem:[%s630_s1 + $0x90] sm:$0xff] }
   0x7   :  { %270 = vmatpush.bf16.msra.mxu1 %v464_v4  ;;  %v451_v18 = vld [vmem:[%s630_s1 + $0x8] sm:$0xff]  ;;  %v450_v21 = vld [vmem:[%s630_s1] sm:$0xff]  ;;  %v328_v27 = vld [vmem:[%s632_s0 + $0xc] sm:$0xf0] }
   0x8   :  { %289 = vmatpush.bf16.msra.mxu2 %v472_v5  ;;  %v459_v19 = vld [vmem:[%s630_s1 + $0x48] sm:$0xff]  ;;  %v458_v22 = vld [vmem:[%s630_s1 + $0x40] sm:$0xff]  ;;  %v446_v29 = vld [vmem:[%s632_s0 + $0x10] sm:$0xf0] }
   0x9   :  { %v467_v20 = vld [vmem:[%s630_s1 + $0x88] sm:$0xff]  ;;  %v466_v23 = vld [vmem:[%s630_s1 + $0x80] sm:$0xff]  ;;  %v338_v30 = vld [vmem:[%s632_s0 + $0x18] sm:$0xf] }
   0xa   :  { %252 = vmatpush.bf16.msra.mxu0 %v455_v6  ;;  %476 = vmatpush.bf16.msra.mxu3 %v455_v6  ;;  %v326_v24 = vld [vmem:[%s632_s0] sm:$0xf]  ;;  %v445_v25 = vld [vmem:[%s632_s0 + $0x8] sm:$0xf0]  ;;  %v444_v26 = vld [vmem:[%s632_s0 + $0x4] sm:$0xf] }
   0xb   :  { %271 = vmatpush.bf16.msra.mxu1 %v463_v7  ;;  %v334_v28 = vld [vmem:[%s632_s0 + $0x8] sm:$0xf]  ;;  %v448_v31 = vld [vmem:[%s632_s0 + $0x20] sm:$0xf0]  ;;  %v327_v32 = vor.u32 %v445_v25, %v326_v24  ;;  %v331_v33 = vor.u32 %v444_v26, %v328_v27  ;;  %v447_v36 = vld [vmem:[%s632_s0 + $0x1c] sm:$0xf] }
   0xc   :  { %290 = vmatpush.bf16.msra.mxu2 %v471_v8  ;;  %v335_v34 = vor.u32 %v446_v29, %v334_v28  ;;  %v339_v35 = vor.u32 %v448_v31, %v338_v30  ;;  %v340_v37 = vld [vmem:[%s632_s0 + $0x24] sm:$0xf0]  ;;  %v346_v38 = vld [vmem:[%s632_s0 + $0x20] sm:$0xf]  ;;  %v449_v39 = vld [vmem:[%s632_s0 + $0x28] sm:$0xf0] }
   0xd   :  { %v343_v40 = vor.u32 %v447_v36, %v340_v37  ;;  %v347_v41 = vor.u32 %v449_v39, %v346_v38  ;;  %v482_v42 = vld [vmem:[%s631_s2] ss:$0 sm:$0xff] }
   0xe   :  { %253 = vmatpush.bf16.msra.mxu0 %v454_v9  ;;  %477 = vmatpush.bf16.msra.mxu3 %v454_v9 }
   0xf   :  { %272 = vmatpush.bf16.msra.mxu1 %v462_v10 }
  0x10   :  { %291 = vmatpush.bf16.msra.mxu2 %v470_v11 }
  0x12   :  { %254 = vmatpush.bf16.msra.mxu0 %v453_v12  ;;  %478 = vmatpush.bf16.msra.mxu3 %v453_v12 }
  0x13   :  { %273 = vmatpush.bf16.msra.mxu1 %v461_v13 }
  0x14   :  { %292 = vmatpush.bf16.msra.mxu2 %v469_v14 }
  0x16   :  { %255 = vmatpush.bf16.msra.mxu0 %v452_v15  ;;  %479 = vmatpush.bf16.msra.mxu3 %v452_v15 }
  0x17   :  { %274 = vmatpush.bf16.msra.mxu1 %v460_v16 }
  0x18   :  { %293 = vmatpush.bf16.msra.mxu2 %v468_v17 }
  0x1a   :  { %256 = vmatpush.bf16.msra.mxu0 %v451_v18  ;;  %480 = vmatpush.bf16.msra.mxu3 %v451_v18 }
  0x1b   :  { %275 = vmatpush.bf16.msra.mxu1 %v459_v19 }
  0x1c   :  { %294 = vmatpush.bf16.msra.mxu2 %v467_v20 }
  0x1e   :  { %257 = vmatpush.bf16.msra.mxu0 %v450_v21  ;;  %481 = vmatpush.bf16.msra.mxu3 %v450_v21 }
  0x1f   :  { %276 = vmatpush.bf16.msra.mxu1 %v458_v22 }
  0x20   :  { %295 = vmatpush.bf16.msra.mxu2 %v466_v23 }
  0x21   :  { %258 = vmatmul.bf16.vlgmr.msra.gmra.mxu0 %v327_v32  ;;  %263 = vmatmul.bf16.vlgmr.msra.gmra.mxu3 %v339_v35 }
  0x22   :  { %277 = vmatmul.bf16.vlgmr.msra.gmra.mxu1 %v331_v33 }
  0x23   :  { %296 = vmatmul.bf16.vlgmr.msra.gmra.mxu2 %v335_v34 }
  0x32   :  { %282 = vmatmul.bf16.gmra.mxu1 %v343_v40 }
  0x33   :  { %301 = vmatmul.bf16.gmra.mxu2 %v347_v41 }
  0x9e   :  { %v259_v43 = vpop.f32.mrf.mxu0 }
  0x9f   :  { %v278_v44 = vpop.f32.mrf.mxu1  ;;  %v260_v45 = vadd.f32 %v482_v42, %v259_v43 }
  0xa1   :  { %v279_v46 = vadd.f32 %v278_v44, %v260_v45 }
  0xa4   :  { %v264_v55 = vpop.f32.mrf.mxu3 }
  0xa5   :  { %v265_v57 = vadd.f32 %v482_v42, %v264_v55 }
  0xa6   :  { %v297_v47 = vpop.f32.mrf.mxu2  ;;  %v261_v49 = vpop.f32.mrf.mxu0 }
  0xa7   :  { %v298_v48 = vadd.f32 %v297_v47, %v279_v46  ;;  %v280_v50 = vpop.f32.mrf.mxu1  ;;  %v262_v52 = vadd.f32 %v482_v42, %v261_v49 }
  0xa9   :  { %v307_v51 = vmax.f32 %v298_v48, 0.0  ;;  %v281_v54 = vadd.f32 %v280_v50, %v262_v52 }
  0xab   :  { %v311_v53 = vpack.c.bf16 %v307_v51, %v307_v51 }
  0xac   :  { %v266_v1 = vpop.f32.mrf.mxu3 }
  0xad   :  { %316 = vst.msk [vmem:[%s633_s3] sm:$0xf] %vm315_vm0, %v311_v53  ;;  %v267_v4 = vadd.f32 %v482_v42, %v266_v1 }
  0xae   :  { %v299_v56 = vpop.f32.mrf.mxu2 }
  0xaf   :  { %v300_v58 = vadd.f32 %v299_v56, %v281_v54  ;;  %v283_v59 = vpop.f32.mrf.mxu1 }
  0xb0   :  { %v284_v62 = vadd.f32 %v283_v59, %v265_v57 }
  0xb1   :  { %v308_v60 = vmax.f32 %v300_v58, 0.0 }
  0xb3   :  { %v312_v61 = vpack.c.bf16 %v308_v60, %v308_v60 }
  0xb5   :  { %317 = vst.msk [vmem:[%s633_s3 + $0x4] sm:$0xf] %vm315_vm0, %v312_v61 }
  0xb6   :  { %v302_v63 = vpop.f32.mrf.mxu2 }
  0xb7   :  { %v303_v0 = vadd.f32 %v302_v63, %v284_v62  ;;  %v285_v3 = vpop.f32.mrf.mxu1 }
  0xb8   :  { %v286_v6 = vadd.f32 %v285_v3, %v267_v4 }
  0xb9   :  { %v309_v2 = vmax.f32 %v303_v0, 0.0 }
  0xbb   :  { %v313_v5 = vpack.c.bf16 %v309_v2, %v309_v2 }
  0xbd   :  { %318 = vst.msk [vmem:[%s633_s3 + $0x8] sm:$0xf] %vm315_vm0, %v313_v5 }
  0xbe   :  { %v304_v7 = vpop.f32.mrf.mxu2 }
  0xbf   :  { %v305_v8 = vadd.f32 %v304_v7, %v286_v6 }
  0xc1   :  { %v310_v9 = vmax.f32 %v305_v8, 0.0 }
  0xc3   :  { %v314_v10 = vpack.c.bf16 %v310_v9, %v310_v9 }
  0xc5   :  { %319 = vst.msk [vmem:[%s633_s3 + $0xc] sm:$0xf] %vm315_vm0, %v314_v10 }

// kernel: psa_relit_pcnet_forward.21
= control target key start
LH: loop header
LB: loop body
LE: loop exit
PB: predicated region body
PF: predicated region fallthrough
CT: control target
= control target key end

     0   :  { %s992_s1 = inlined_call_operand.vmem [shape: bf16[640,128], index: 1, kind: input, shape index: {}]   ;;  %s993_s2 = inlined_call_operand.vmem [shape: f32[1,128], index: 2, kind: input, shape index: {}]   ;;  %s994_s0 = inlined_call_operand.vmem [shape: bf16[32,640], index: 0, kind: input, shape index: {}]   ;;  %s995_s3 = inlined_call_operand.vmem [shape: bf16[32,128], index: 3, kind: output, shape index: {}]  }
   0x1   :  { %v730_v0 = vld [vmem:[%s992_s1 + $0x38] sm:$0xff]  ;;  %v729_v4 = vld [vmem:[%s992_s1 + $0x30] sm:$0xff]  ;;  %v728_v8 = vld [vmem:[%s992_s1 + $0x28] sm:$0xff] }
   0x2   :  { %v738_v1 = vld [vmem:[%s992_s1 + $0x78] sm:$0xff]  ;;  %402 = vmatpush.bf16.msra.mxu0 %v730_v0  ;;  %v737_v5 = vld [vmem:[%s992_s1 + $0x70] sm:$0xff]  ;;  %v736_v9 = vld [vmem:[%s992_s1 + $0x68] sm:$0xff] }
   0x3   :  { %v746_v2 = vld [vmem:[%s992_s1 + $0xb8] sm:$0xff]  ;;  %421 = vmatpush.bf16.msra.mxu1 %v738_v1  ;;  %v745_v6 = vld [vmem:[%s992_s1 + $0xb0] sm:$0xff]  ;;  %v744_v10 = vld [vmem:[%s992_s1 + $0xa8] sm:$0xff] }
   0x4   :  { %v754_v3 = vld [vmem:[%s992_s1 + $0xf8] sm:$0xff]  ;;  %440 = vmatpush.bf16.msra.mxu2 %v746_v2  ;;  %v753_v7 = vld [vmem:[%s992_s1 + $0xf0] sm:$0xff]  ;;  %v752_v11 = vld [vmem:[%s992_s1 + $0xe8] sm:$0xff] }
   0x5   :  { %459 = vmatpush.bf16.msra.mxu3 %v754_v3  ;;  %v727_v12 = vld [vmem:[%s992_s1 + $0x20] sm:$0xff]  ;;  %v726_v16 = vld [vmem:[%s992_s1 + $0x18] sm:$0xff]  ;;  %v725_v20 = vld [vmem:[%s992_s1 + $0x10] sm:$0xff] }
   0x6   :  { %403 = vmatpush.bf16.msra.mxu0 %v729_v4  ;;  %v735_v13 = vld [vmem:[%s992_s1 + $0x60] sm:$0xff]  ;;  %v734_v17 = vld [vmem:[%s992_s1 + $0x58] sm:$0xff]  ;;  %v733_v21 = vld [vmem:[%s992_s1 + $0x50] sm:$0xff] }
   0x7   :  { %422 = vmatpush.bf16.msra.mxu1 %v737_v5  ;;  %v743_v14 = vld [vmem:[%s992_s1 + $0xa0] sm:$0xff]  ;;  %v742_v18 = vld [vmem:[%s992_s1 + $0x98] sm:$0xff]  ;;  %v741_v22 = vld [vmem:[%s992_s1 + $0x90] sm:$0xff] }
   0x8   :  { %441 = vmatpush.bf16.msra.mxu2 %v745_v6  ;;  %v751_v15 = vld [vmem:[%s992_s1 + $0xe0] sm:$0xff]  ;;  %v750_v19 = vld [vmem:[%s992_s1 + $0xd8] sm:$0xff]  ;;  %v749_v23 = vld [vmem:[%s992_s1 + $0xd0] sm:$0xff] }
   0x9   :  { %460 = vmatpush.bf16.msra.mxu3 %v753_v7  ;;  %v724_v24 = vld [vmem:[%s992_s1 + $0x8] sm:$0xff]  ;;  %v723_v28 = vld [vmem:[%s992_s1] sm:$0xff]  ;;  %v715_v33 = vld [vmem:[%s994_s0 + $0x10] sm:$0xf0] }
   0xa   :  { %404 = vmatpush.bf16.msra.mxu0 %v728_v8  ;;  %v732_v25 = vld [vmem:[%s992_s1 + $0x48] sm:$0xff]  ;;  %v731_v29 = vld [vmem:[%s992_s1 + $0x40] sm:$0xff]  ;;  %v517_v35 = vld [vmem:[%s994_s0 + $0x14] sm:$0xf0] }
   0xb   :  { %423 = vmatpush.bf16.msra.mxu1 %v736_v9  ;;  %v740_v26 = vld [vmem:[%s992_s1 + $0x88] sm:$0xff]  ;;  %v739_v30 = vld [vmem:[%s992_s1 + $0x80] sm:$0xff]  ;;  %v716_v37 = vld [vmem:[%s994_s0 + $0x18] sm:$0xf0] }
   0xc   :  { %442 = vmatpush.bf16.msra.mxu2 %v744_v10  ;;  %v748_v27 = vld [vmem:[%s992_s1 + $0xc8] sm:$0xff]  ;;  %v747_v31 = vld [vmem:[%s992_s1 + $0xc0] sm:$0xff]  ;;  %v762_v40 = vld [vmem:[%s992_s1 + $0x138] sm:$0xff] }
   0xd   :  { %461 = vmatpush.bf16.msra.mxu3 %v752_v11  ;;  %v515_v32 = vld [vmem:[%s994_s0] sm:$0xf]  ;;  %v713_v34 = vld [vmem:[%s994_s0 + $0x4] sm:$0xf]  ;;  %v523_v36 = vld [vmem:[%s994_s0 + $0x8] sm:$0xf] }
   0xe   :  { %405 = vmatpush.bf16.msra.mxu0 %v727_v12  ;;  %v714_v38 = vld [vmem:[%s994_s0 + $0xc] sm:$0xf]  ;;  %v525_v39 = vld [vmem:[%s994_s0 + $0x1c] sm:$0xf0]  ;;  %v516_v41 = vor.u32 %v715_v33, %v515_v32  ;;  %v520_v42 = vor.u32 %v713_v34, %v517_v35  ;;  %v524_v43 = vor.u32 %v716_v37, %v523_v36  ;;  %v761_v45 = vld [vmem:[%s992_s1 + $0x130] sm:$0xff] }
   0xf   :  { %424 = vmatpush.bf16.msra.mxu1 %v735_v13  ;;  %v528_v44 = vor.u32 %v714_v38, %v525_v39  ;;  %v760_v46 = vld [vmem:[%s992_s1 + $0x128] sm:$0xff]  ;;  %v759_v47 = vld [vmem:[%s992_s1 + $0x120] sm:$0xff]  ;;  %v720_v49 = vld [vmem:[%s994_s0 + $0x38] sm:$0xf0] }
  0x10   :  { %443 = vmatpush.bf16.msra.mxu2 %v743_v14  ;;  %v535_v48 = vld [vmem:[%s994_s0 + $0x28] sm:$0xf]  ;;  %v718_v50 = vld [vmem:[%s994_s0 + $0x2c] sm:$0xf]  ;;  %v537_v51 = vld [vmem:[%s994_s0 + $0x3c] sm:$0xf0] }
  0x11   :  { %462 = vmatpush.bf16.msra.mxu3 %v751_v15  ;;  %v543_v52 = vld [vmem:[%s994_s0 + $0x30] sm:$0xf]  ;;  %v721_v53 = vld [vmem:[%s994_s0 + $0x40] sm:$0xf0]  ;;  %v719_v54 = vld [vmem:[%s994_s0 + $0x34] sm:$0xf]  ;;  %v536_v57 = vor.u32 %v720_v49, %v535_v48  ;;  %v540_v58 = vor.u32 %v718_v50, %v537_v51 }
  0x12   :  { %406 = vmatpush.bf16.msra.mxu0 %v726_v16  ;;  %v545_v55 = vld [vmem:[%s994_s0 + $0x44] sm:$0xf0]  ;;  %v758_v56 = vld [vmem:[%s992_s1 + $0x118] sm:$0xff]  ;;  %v544_v59 = vor.u32 %v721_v53, %v543_v52  ;;  %v757_v61 = vld [vmem:[%s992_s1 + $0x110] sm:$0xff] }
  0x13   :  { %425 = vmatpush.bf16.msra.mxu1 %v734_v17  ;;  %v548_v60 = vor.u32 %v719_v54, %v545_v55  ;;  %v756_v62 = vld [vmem:[%s992_s1 + $0x108] sm:$0xff]  ;;  %v755_v63 = vld [vmem:[%s992_s1 + $0x100] sm:$0xff]  ;;  %v531_v0 = vld [vmem:[%s994_s0 + $0x10] sm:$0xf] }
  0x14   :  { %444 = vmatpush.bf16.msra.mxu2 %v742_v18  ;;  %v717_v1 = vld [vmem:[%s994_s0 + $0x20] sm:$0xf0]  ;;  %v551_v2 = vld [vmem:[%s994_s0 + $0x38] sm:$0xf]  ;;  %v722_v3 = vld [vmem:[%s994_s0 + $0x48] sm:$0xf0] }
  0x15   :  { %463 = vmatpush.bf16.msra.mxu3 %v750_v19  ;;  %v532_v4 = vor.u32 %v717_v1, %v531_v0  ;;  %v552_v5 = vor.u32 %v722_v3, %v551_v2  ;;  %v782_v16 = vld [vmem:[%s993_s2] ss:$0 sm:$0xff] }
  0x16   :  { %407 = vmatpush.bf16.msra.mxu0 %v725_v20 }
  0x17   :  { %426 = vmatpush.bf16.msra.mxu1 %v733_v21 }
  0x18   :  { %445 = vmatpush.bf16.msra.mxu2 %v741_v22 }
  0x19   :  { %464 = vmatpush.bf16.msra.mxu3 %v749_v23 }
  0x1a   :  { %408 = vmatpush.bf16.msra.mxu0 %v724_v24 }
  0x1b   :  { %427 = vmatpush.bf16.msra.mxu1 %v732_v25 }
  0x1c   :  { %446 = vmatpush.bf16.msra.mxu2 %v740_v26 }
  0x1d   :  { %465 = vmatpush.bf16.msra.mxu3 %v748_v27 }
  0x1e   :  { %409 = vmatpush.bf16.msra.mxu0 %v723_v28 }
  0x1f   :  { %428 = vmatpush.bf16.msra.mxu1 %v731_v29 }
  0x20   :  { %447 = vmatpush.bf16.msra.mxu2 %v739_v30 }
  0x21   :  { %466 = vmatpush.bf16.msra.mxu3 %v747_v31  ;;  %410 = vmatmul.bf16.vlgmr.msra.gmra.mxu0 %v516_v41 }
  0x22   :  { %478 = vmatpush.bf16.msrb.mxu0 %v762_v40  ;;  %429 = vmatmul.bf16.vlgmr.msra.gmra.mxu1 %v520_v42 }
  0x23   :  { %774 = vmatpush.bf16.msrb.mxu1 %v762_v40  ;;  %448 = vmatmul.bf16.vlgmr.msra.gmra.mxu2 %v524_v43 }
  0x24   :  { %467 = vmatmul.bf16.vlgmr.msra.gmra.mxu3 %v528_v44 }
  0x26   :  { %479 = vmatpush.bf16.msrb.mxu0 %v761_v45 }
  0x27   :  { %775 = vmatpush.bf16.msrb.mxu1 %v761_v45 }
  0x2a   :  { %480 = vmatpush.bf16.msrb.mxu0 %v760_v46 }
  0x2b   :  { %776 = vmatpush.bf16.msrb.mxu1 %v760_v46 }
  0x2e   :  { %481 = vmatpush.bf16.msrb.mxu0 %v759_v47 }
  0x2f   :  { %777 = vmatpush.bf16.msrb.mxu1 %v759_v47 }
  0x31   :  { %415 = vmatmul.bf16.gmra.mxu0 %v536_v57 }
  0x32   :  { %482 = vmatpush.bf16.msrb.mxu0 %v758_v56  ;;  %434 = vmatmul.bf16.gmra.mxu1 %v540_v58 }
  0x33   :  { %778 = vmatpush.bf16.msrb.mxu1 %v758_v56  ;;  %453 = vmatmul.bf16.gmra.mxu2 %v544_v59 }
  0x34   :  { %472 = vmatmul.bf16.gmra.mxu3 %v548_v60 }
  0x36   :  { %483 = vmatpush.bf16.msrb.mxu0 %v757_v61 }
  0x37   :  { %779 = vmatpush.bf16.msrb.mxu1 %v757_v61 }
  0x3a   :  { %484 = vmatpush.bf16.msrb.mxu0 %v756_v62 }
  0x3b   :  { %780 = vmatpush.bf16.msrb.mxu1 %v756_v62 }
  0x3e   :  { %485 = vmatpush.bf16.msrb.mxu0 %v755_v63 }
  0x3f   :  { %781 = vmatpush.bf16.msrb.mxu1 %v755_v63 }
  0x41   :  { %486 = vmatmul.bf16.vlgmr.msrb.gmra.mxu0 %v532_v4 }
  0x42   :  { %491 = vmatmul.bf16.vlgmr.msrb.gmra.mxu1 %v552_v5 }
  0x9e   :  { %v411_v6 = vpop.f32.mrf.mxu0 }
  0x9f   :  { %v430_v7 = vpop.f32.mrf.mxu1  ;;  %v412_v20 = vadd.f32 %v782_v16, %v411_v6 }
  0xa1   :  { %v431_v25 = vadd.f32 %v430_v7, %v412_v20 }
  0xa6   :  { %v449_v8 = vpop.f32.mrf.mxu2  ;;  %v413_v10 = vpop.f32.mrf.mxu0 }
  0xa7   :  { %v468_v9 = vpop.f32.mrf.mxu3  ;;  %v432_v11 = vpop.f32.mrf.mxu1  ;;  %v414_v23 = vadd.f32 %v782_v16, %v413_v10  ;;  %v450_v30 = vadd.f32 %v449_v8, %v431_v25 }
  0xa9   :  { %v433_v31 = vadd.f32 %v432_v11, %v414_v23  ;;  %v469_v36 = vadd.f32 %v468_v9, %v450_v30 }
  0xae   :  { %v451_v12 = vpop.f32.mrf.mxu2  ;;  %v416_v13 = vpop.f32.mrf.mxu0 }
  0xaf   :  { %v435_v14 = vpop.f32.mrf.mxu1  ;;  %v470_v15 = vpop.f32.mrf.mxu3  ;;  %v417_v21 = vadd.f32 %v782_v16, %v416_v13  ;;  %v452_v34 = vadd.f32 %v451_v12, %v433_v31 }
  0xb1   :  { %v436_v26 = vadd.f32 %v435_v14, %v417_v21  ;;  %v471_v39 = vadd.f32 %v470_v15, %v452_v34 }
  0xb6   :  { %v454_v17 = vpop.f32.mrf.mxu2  ;;  %v418_v18 = vpop.f32.mrf.mxu0 }
  0xb7   :  { %v437_v19 = vpop.f32.mrf.mxu1  ;;  %v473_v22 = vpop.f32.mrf.mxu3  ;;  %v419_v24 = vadd.f32 %v782_v16, %v418_v18  ;;  %v455_v32 = vadd.f32 %v454_v17, %v436_v26 }
  0xb9   :  { %v438_v33 = vadd.f32 %v437_v19, %v419_v24  ;;  %v474_v37 = vadd.f32 %v473_v22, %v455_v32 }
  0xbe   :  { %v456_v27 = vpop.f32.mrf.mxu2  ;;  %v487_v28 = vpop.f32.mrf.mxu0 }
  0xbf   :  { %v492_v29 = vpop.f32.mrf.mxu1  ;;  %v457_v35 = vadd.f32 %v456_v27, %v438_v33  ;;  %v475_v38 = vpop.f32.mrf.mxu3  ;;  %v488_v41 = vadd.f32 %v487_v28, %v469_v36 }
  0xc0   :  { %v493_v42 = vadd.f32 %v492_v29, %v474_v37 }
  0xc1   :  { %v476_v40 = vadd.f32 %v475_v38, %v457_v35  ;;  %v497_v47 = vmax.f32 %v488_v41, 0.0 }
  0xc2   :  { %v499_v48 = vmax.f32 %v493_v42, 0.0 }
  0xc6   :  { %v489_v43 = vpop.f32.mrf.mxu0 }
  0xc7   :  { %v494_v44 = vpop.f32.mrf.mxu1  ;;  %v490_v45 = vadd.f32 %v489_v43, %v471_v39 }
  0xc8   :  { %v495_v46 = vadd.f32 %v494_v44, %v476_v40 }
  0xc9   :  { %v498_v49 = vmax.f32 %v490_v45, 0.0 }
  0xca   :  { %v500_v50 = vmax.f32 %v495_v46, 0.0 }
  0xcb   :  { %v766_v51 = vpack.c.bf16 %v498_v49, %v497_v47 }
  0xcc   :  { %v771_v52 = vpack.c.bf16 %v500_v50, %v499_v48 }
  0xcd   :  { %767 = vst [vmem:[%s995_s3] sm:$0xff] %v766_v51  }
  0xce   :  { %773 = vst [vmem:[%s995_s3 + $0x8] sm:$0xff] %v771_v52  }

// kernel: psa_relit_pcnet_forward.28
= control target key start
LH: loop header
LB: loop body
LE: loop exit
PB: predicated region body
PF: predicated region fallthrough
CT: control target
= control target key end

     0   :  { %vm330_vm0 = vcmask 519168   ;;  %s665_s1 = inlined_call_operand.vmem [shape: bf16[384,64], index: 1, kind: input, shape index: {}]   ;;  %s666_s2 = inlined_call_operand.vmem [shape: f32[1,64], index: 2, kind: input, shape index: {}]   ;;  %s667_s0 = inlined_call_operand.vmem [shape: bf16[32,384], index: 0, kind: input, shape index: {}]   ;;  %s668_s3 = inlined_call_operand.vmem [shape: bf16[32,64], index: 3, kind: input, shape index: {}]   ;;  %s669_s4 = inlined_call_operand.vmem [shape: bf16[32,64], index: 4, kind: output, shape index: {}]  }
   0x1   :  { %v472_v0 = vld [vmem:[%s665_s1 + $0x38] sm:$0xff]  ;;  %v471_v3 = vld [vmem:[%s665_s1 + $0x30] sm:$0xff]  ;;  %v470_v6 = vld [vmem:[%s665_s1 + $0x28] sm:$0xff] }
   0x2   :  { %v480_v1 = vld [vmem:[%s665_s1 + $0x78] sm:$0xff]  ;;  %253 = vmatpush.bf16.msra.mxu0 %v472_v0  ;;  %v479_v4 = vld [vmem:[%s665_s1 + $0x70] sm:$0xff]  ;;  %498 = vmatpush.bf16.msra.mxu3 %v472_v0  ;;  %v478_v7 = vld [vmem:[%s665_s1 + $0x68] sm:$0xff] }
   0x3   :  { %v488_v2 = vld [vmem:[%s665_s1 + $0xb8] sm:$0xff]  ;;  %272 = vmatpush.bf16.msra.mxu1 %v480_v1  ;;  %v487_v5 = vld [vmem:[%s665_s1 + $0xb0] sm:$0xff]  ;;  %v486_v8 = vld [vmem:[%s665_s1 + $0xa8] sm:$0xff] }
   0x4   :  { %291 = vmatpush.bf16.msra.mxu2 %v488_v2  ;;  %v469_v9 = vld [vmem:[%s665_s1 + $0x20] sm:$0xff]  ;;  %v468_v12 = vld [vmem:[%s665_s1 + $0x18] sm:$0xff]  ;;  %v467_v15 = vld [vmem:[%s665_s1 + $0x10] sm:$0xff] }
   0x5   :  { %v477_v10 = vld [vmem:[%s665_s1 + $0x60] sm:$0xff]  ;;  %v476_v13 = vld [vmem:[%s665_s1 + $0x58] sm:$0xff]  ;;  %v475_v16 = vld [vmem:[%s665_s1 + $0x50] sm:$0xff] }
   0x6   :  { %254 = vmatpush.bf16.msra.mxu0 %v471_v3  ;;  %499 = vmatpush.bf16.msra.mxu3 %v471_v3  ;;  %v485_v11 = vld [vmem:[%s665_s1 + $0xa0] sm:$0xff]  ;;  %v484_v14 = vld [vmem:[%s665_s1 + $0x98] sm:$0xff]  ;;  %v483_v17 = vld [vmem:[%s665_s1 + $0x90] sm:$0xff] }
   0x7   :  { %273 = vmatpush.bf16.msra.mxu1 %v479_v4  ;;  %v466_v18 = vld [vmem:[%s665_s1 + $0x8] sm:$0xff]  ;;  %v465_v21 = vld [vmem:[%s665_s1] sm:$0xff]  ;;  %v343_v27 = vld [vmem:[%s667_s0 + $0xc] sm:$0xf0] }
   0x8   :  { %292 = vmatpush.bf16.msra.mxu2 %v487_v5  ;;  %v474_v19 = vld [vmem:[%s665_s1 + $0x48] sm:$0xff]  ;;  %v473_v22 = vld [vmem:[%s665_s1 + $0x40] sm:$0xff]  ;;  %v461_v29 = vld [vmem:[%s667_s0 + $0x10] sm:$0xf0] }
   0x9   :  { %v482_v20 = vld [vmem:[%s665_s1 + $0x88] sm:$0xff]  ;;  %v481_v23 = vld [vmem:[%s665_s1 + $0x80] sm:$0xff]  ;;  %v353_v30 = vld [vmem:[%s667_s0 + $0x18] sm:$0xf] }
   0xa   :  { %255 = vmatpush.bf16.msra.mxu0 %v470_v6  ;;  %500 = vmatpush.bf16.msra.mxu3 %v470_v6  ;;  %v341_v24 = vld [vmem:[%s667_s0] sm:$0xf]  ;;  %v460_v25 = vld [vmem:[%s667_s0 + $0x8] sm:$0xf0]  ;;  %v459_v26 = vld [vmem:[%s667_s0 + $0x4] sm:$0xf] }
   0xb   :  { %274 = vmatpush.bf16.msra.mxu1 %v478_v7  ;;  %v349_v28 = vld [vmem:[%s667_s0 + $0x8] sm:$0xf]  ;;  %v463_v31 = vld [vmem:[%s667_s0 + $0x20] sm:$0xf0]  ;;  %v342_v32 = vor.u32 %v460_v25, %v341_v24  ;;  %v346_v33 = vor.u32 %v459_v26, %v343_v27  ;;  %v462_v36 = vld [vmem:[%s667_s0 + $0x1c] sm:$0xf] }
   0xc   :  { %293 = vmatpush.bf16.msra.mxu2 %v486_v8  ;;  %v350_v34 = vor.u32 %v461_v29, %v349_v28  ;;  %v354_v35 = vor.u32 %v463_v31, %v353_v30  ;;  %v355_v37 = vld [vmem:[%s667_s0 + $0x24] sm:$0xf0]  ;;  %v361_v38 = vld [vmem:[%s667_s0 + $0x20] sm:$0xf]  ;;  %v464_v39 = vld [vmem:[%s667_s0 + $0x28] sm:$0xf0] }
   0xd   :  { %v358_v40 = vor.u32 %v462_v36, %v355_v37  ;;  %v362_v41 = vor.u32 %v464_v39, %v361_v38  ;;  %v506_v42 = vld [vmem:[%s666_s2] ss:$0 sm:$0xff]  ;;  %v497_v1 = vld [vmem:[%s668_s3 + $0x8] sm:$0xff]  }
   0xe   :  { %256 = vmatpush.bf16.msra.mxu0 %v469_v9  ;;  %501 = vmatpush.bf16.msra.mxu3 %v469_v9  ;;  %v490_v46 = vld [vmem:[%s668_s3] sm:$0xff]   ;;  %v495_v5 = vunpack.c.l.bf16 %v497_v1 }
   0xf   :  { %275 = vmatpush.bf16.msra.mxu1 %v477_v10  ;;  %v491_v48 = vunpack.c.l.bf16 %v490_v46  ;;  %v492_v58 = vunpack.c.h.bf16 %v490_v46 }
  0x10   :  { %294 = vmatpush.bf16.msra.mxu2 %v485_v11 }
  0x12   :  { %257 = vmatpush.bf16.msra.mxu0 %v468_v12  ;;  %502 = vmatpush.bf16.msra.mxu3 %v468_v12 }
  0x13   :  { %276 = vmatpush.bf16.msra.mxu1 %v476_v13 }
  0x14   :  { %295 = vmatpush.bf16.msra.mxu2 %v484_v14 }
  0x16   :  { %258 = vmatpush.bf16.msra.mxu0 %v467_v15  ;;  %503 = vmatpush.bf16.msra.mxu3 %v467_v15  ;;  %v496_v15 = vunpack.c.h.bf16 %v497_v1 }
  0x17   :  { %277 = vmatpush.bf16.msra.mxu1 %v475_v16 }
  0x18   :  { %296 = vmatpush.bf16.msra.mxu2 %v483_v17 }
  0x1a   :  { %259 = vmatpush.bf16.msra.mxu0 %v466_v18  ;;  %504 = vmatpush.bf16.msra.mxu3 %v466_v18 }
  0x1b   :  { %278 = vmatpush.bf16.msra.mxu1 %v474_v19 }
  0x1c   :  { %297 = vmatpush.bf16.msra.mxu2 %v482_v20 }
  0x1e   :  { %260 = vmatpush.bf16.msra.mxu0 %v465_v21  ;;  %505 = vmatpush.bf16.msra.mxu3 %v465_v21 }
  0x1f   :  { %279 = vmatpush.bf16.msra.mxu1 %v473_v22 }
  0x20   :  { %298 = vmatpush.bf16.msra.mxu2 %v481_v23 }
  0x21   :  { %261 = vmatmul.bf16.vlgmr.msra.gmra.mxu0 %v342_v32  ;;  %266 = vmatmul.bf16.vlgmr.msra.gmra.mxu3 %v354_v35 }
  0x22   :  { %280 = vmatmul.bf16.vlgmr.msra.gmra.mxu1 %v346_v33 }
  0x23   :  { %299 = vmatmul.bf16.vlgmr.msra.gmra.mxu2 %v350_v34 }
  0x32   :  { %285 = vmatmul.bf16.gmra.mxu1 %v358_v40 }
  0x33   :  { %304 = vmatmul.bf16.gmra.mxu2 %v362_v41 }
  0x9e   :  { %v262_v43 = vpop.f32.mrf.mxu0 }
  0x9f   :  { %v281_v44 = vpop.f32.mrf.mxu1  ;;  %v263_v45 = vadd.f32 %v506_v42, %v262_v43 }
  0xa1   :  { %v282_v47 = vadd.f32 %v281_v44, %v263_v45 }
  0xa4   :  { %v267_v59 = vpop.f32.mrf.mxu3 }
  0xa5   :  { %v268_v61 = vadd.f32 %v506_v42, %v267_v59 }
  0xa6   :  { %v300_v49 = vpop.f32.mrf.mxu2  ;;  %v264_v51 = vpop.f32.mrf.mxu0 }
  0xa7   :  { %v301_v50 = vadd.f32 %v300_v49, %v282_v47  ;;  %v283_v52 = vpop.f32.mrf.mxu1  ;;  %v265_v54 = vadd.f32 %v506_v42, %v264_v51 }
  0xa9   :  { %v318_v53 = vadd.f32 %v491_v48, %v301_v50  ;;  %v284_v57 = vadd.f32 %v283_v52, %v265_v54 }
  0xab   :  { %v322_v55 = vmax.f32 %v318_v53, 0.0 }
  0xac   :  { %v269_v8 = vpop.f32.mrf.mxu3 }
  0xad   :  { %v326_v56 = vpack.c.bf16 %v322_v55, %v322_v55  ;;  %v270_v11 = vadd.f32 %v506_v42, %v269_v8 }
  0xae   :  { %v302_v60 = vpop.f32.mrf.mxu2 }
  0xaf   :  { %331 = vst.msk [vmem:[%s669_s4] sm:$0xf] %vm330_vm0, %v326_v56  ;;  %v303_v62 = vadd.f32 %v302_v60, %v284_v57  ;;  %v286_v63 = vpop.f32.mrf.mxu1 }
  0xb0   :  { %v287_v3 = vadd.f32 %v286_v63, %v268_v61 }
  0xb1   :  { %v319_v0 = vadd.f32 %v492_v58, %v303_v62 }
  0xb3   :  { %v323_v2 = vmax.f32 %v319_v0, 0.0 }
  0xb5   :  { %v327_v4 = vpack.c.bf16 %v323_v2, %v323_v2 }
  0xb6   :  { %v305_v6 = vpop.f32.mrf.mxu2 }
  0xb7   :  { %332 = vst.msk [vmem:[%s669_s4 + $0x4] sm:$0xf] %vm330_vm0, %v327_v4  ;;  %v306_v7 = vadd.f32 %v305_v6, %v287_v3  ;;  %v288_v10 = vpop.f32.mrf.mxu1 }
  0xb8   :  { %v289_v14 = vadd.f32 %v288_v10, %v270_v11 }
  0xb9   :  { %v320_v9 = vadd.f32 %v495_v5, %v306_v7 }
  0xbb   :  { %v324_v12 = vmax.f32 %v320_v9, 0.0 }
  0xbd   :  { %v328_v13 = vpack.c.bf16 %v324_v12, %v324_v12 }
  0xbe   :  { %v307_v16 = vpop.f32.mrf.mxu2 }
  0xbf   :  { %333 = vst.msk [vmem:[%s669_s4 + $0x8] sm:$0xf] %vm330_vm0, %v328_v13  ;;  %v308_v17 = vadd.f32 %v307_v16, %v289_v14 }
  0xc1   :  { %v321_v18 = vadd.f32 %v496_v15, %v308_v17 }
  0xc3   :  { %v325_v19 = vmax.f32 %v321_v18, 0.0 }
  0xc5   :  { %v329_v20 = vpack.c.bf16 %v325_v19, %v325_v19 }
  0xc7   :  { %334 = vst.msk [vmem:[%s669_s4 + $0xc] sm:$0xf] %vm330_vm0, %v329_v20 }

// kernel: psa_relit_pcnet_forward.22
= control target key start
LH: loop header
LB: loop body
LE: loop exit
PB: predicated region body
PF: predicated region fallthrough
CT: control target
= control target key end

     0   :  { %s3282_s1 = inlined_call_operand.vmem [shape: bf16[1152,256], index: 1, kind: input, shape index: {}]   ;;  %s3283_s0 = inlined_call_operand.vmem [shape: bf16[32,1152], index: 0, kind: input, shape index: {}]   ;;  %s3284_s2 = inlined_call_operand.vmem [shape: f32[1,256], index: 2, kind: input, shape index: {}]   ;;  %s3285_s3 = inlined_call_operand.vmem [shape: bf16[32,256], index: 3, kind: output, shape index: {}]  }
   0x1   :  { %v1488_v0 = vld [vmem:[%s3282_s1 + $0x70] sm:$0xf]  ;;  %v2039_v1 = vld [vmem:[%s3282_s1 + $0x74] sm:$0xf0]  ;;  %v1480_v11 = vld [vmem:[%s3282_s1 + $0x60] sm:$0xf] }
   0x2   :  { %v1552_v2 = vld [vmem:[%s3282_s1 + $0xf0] sm:$0xf]  ;;  %v1489_v3 = vor.u32 %v2039_v1, %v1488_v0  ;;  %v2055_v4 = vld [vmem:[%s3282_s1 + $0xf4] sm:$0xf0]  ;;  %v2037_v13 = vld [vmem:[%s3282_s1 + $0x64] sm:$0xf0] }
   0x3   :  { %v1616_v5 = vld [vmem:[%s3282_s1 + $0x170] sm:$0xf]  ;;  %v2071_v6 = vld [vmem:[%s3282_s1 + $0x174] sm:$0xf0]  ;;  %v1553_v7 = vor.u32 %v2055_v4, %v1552_v2  ;;  %v1544_v14 = vld [vmem:[%s3282_s1 + $0xe0] sm:$0xf]  ;;  %v1481_v16 = vor.u32 %v2037_v13, %v1480_v11 }
   0x4   :  { %v1617_v8 = vor.u32 %v2071_v6, %v1616_v5  ;;  %v1680_v9 = vld [vmem:[%s3282_s1 + $0x1f0] sm:$0xf]  ;;  %v2087_v10 = vld [vmem:[%s3282_s1 + $0x1f4] sm:$0xf0]  ;;  %996 = vmatpush.bf16.msra.mxu0 %v1489_v3  ;;  %v2053_v15 = vld [vmem:[%s3282_s1 + $0xe4] sm:$0xf0] }
   0x5   :  { %v1681_v12 = vor.u32 %v2087_v10, %v1680_v9  ;;  %1015 = vmatpush.bf16.msra.mxu1 %v1553_v7  ;;  %v1545_v17 = vor.u32 %v2053_v15, %v1544_v14  ;;  %v1608_v18 = vld [vmem:[%s3282_s1 + $0x160] sm:$0xf]  ;;  %v2069_v19 = vld [vmem:[%s3282_s1 + $0x164] sm:$0xf0]  ;;  %v1472_v23 = vld [vmem:[%s3282_s1 + $0x50] sm:$0xf] }
   0x6   :  { %1034 = vmatpush.bf16.msra.mxu2 %v1617_v8  ;;  %v1672_v20 = vld [vmem:[%s3282_s1 + $0x1e0] sm:$0xf]  ;;  %v1609_v21 = vor.u32 %v2069_v19, %v1608_v18  ;;  %v2085_v22 = vld [vmem:[%s3282_s1 + $0x1e4] sm:$0xf0]  ;;  %v2035_v24 = vld [vmem:[%s3282_s1 + $0x54] sm:$0xf0] }
   0x7   :  { %1053 = vmatpush.bf16.msra.mxu3 %v1681_v12  ;;  %v1673_v25 = vor.u32 %v2085_v22, %v1672_v20  ;;  %v1536_v26 = vld [vmem:[%s3282_s1 + $0xd0] sm:$0xf]  ;;  %v2051_v27 = vld [vmem:[%s3282_s1 + $0xd4] sm:$0xf0]  ;;  %v1473_v29 = vor.u32 %v2035_v24, %v1472_v23  ;;  %v1464_v35 = vld [vmem:[%s3282_s1 + $0x40] sm:$0xf] }
   0x8   :  { %v1600_v28 = vld [vmem:[%s3282_s1 + $0x150] sm:$0xf]  ;;  %997 = vmatpush.bf16.msra.mxu0 %v1481_v16  ;;  %v2067_v30 = vld [vmem:[%s3282_s1 + $0x154] sm:$0xf0]  ;;  %v1537_v33 = vor.u32 %v2051_v27, %v1536_v26  ;;  %v2033_v36 = vld [vmem:[%s3282_s1 + $0x44] sm:$0xf0] }
   0x9   :  { %v1664_v31 = vld [vmem:[%s3282_s1 + $0x1d0] sm:$0xf]  ;;  %v2083_v32 = vld [vmem:[%s3282_s1 + $0x1d4] sm:$0xf0]  ;;  %1016 = vmatpush.bf16.msra.mxu1 %v1545_v17  ;;  %v1601_v34 = vor.u32 %v2067_v30, %v1600_v28  ;;  %v1528_v37 = vld [vmem:[%s3282_s1 + $0xc0] sm:$0xf]  ;;  %v1465_v44 = vor.u32 %v2033_v36, %v1464_v35 }
   0xa   :  { %1035 = vmatpush.bf16.msra.mxu2 %v1609_v21  ;;  %v1665_v38 = vor.u32 %v2083_v32, %v1664_v31  ;;  %v2049_v39 = vld [vmem:[%s3282_s1 + $0xc4] sm:$0xf0]  ;;  %v1592_v40 = vld [vmem:[%s3282_s1 + $0x140] sm:$0xf]  ;;  %v1456_v47 = vld [vmem:[%s3282_s1 + $0x30] sm:$0xf] }
   0xb   :  { %1054 = vmatpush.bf16.msra.mxu3 %v1673_v25  ;;  %v2065_v41 = vld [vmem:[%s3282_s1 + $0x144] sm:$0xf0]  ;;  %v1656_v42 = vld [vmem:[%s3282_s1 + $0x1c0] sm:$0xf]  ;;  %v1529_v45 = vor.u32 %v2049_v39, %v1528_v37  ;;  %v2031_v48 = vld [vmem:[%s3282_s1 + $0x34] sm:$0xf0] }
   0xc   :  { %v2081_v43 = vld [vmem:[%s3282_s1 + $0x1c4] sm:$0xf0]  ;;  %998 = vmatpush.bf16.msra.mxu0 %v1473_v29  ;;  %v1593_v46 = vor.u32 %v2065_v41, %v1592_v40  ;;  %v1520_v49 = vld [vmem:[%s3282_s1 + $0xb0] sm:$0xf]  ;;  %v2047_v51 = vld [vmem:[%s3282_s1 + $0xb4] sm:$0xf0]  ;;  %v1457_v56 = vor.u32 %v2031_v48, %v1456_v47 }
   0xd   :  { %1017 = vmatpush.bf16.msra.mxu1 %v1537_v33  ;;  %v1657_v50 = vor.u32 %v2081_v43, %v1656_v42  ;;  %v1584_v52 = vld [vmem:[%s3282_s1 + $0x130] sm:$0xf]  ;;  %v2063_v53 = vld [vmem:[%s3282_s1 + $0x134] sm:$0xf0]  ;;  %v1521_v57 = vor.u32 %v2047_v51, %v1520_v49  ;;  %v1448_v59 = vld [vmem:[%s3282_s1 + $0x20] sm:$0xf] }
   0xe   :  { %1036 = vmatpush.bf16.msra.mxu2 %v1601_v34  ;;  %v1648_v54 = vld [vmem:[%s3282_s1 + $0x1b0] sm:$0xf]  ;;  %v2079_v55 = vld [vmem:[%s3282_s1 + $0x1b4] sm:$0xf0]  ;;  %v1585_v58 = vor.u32 %v2063_v53, %v1584_v52  ;;  %v2029_v60 = vld [vmem:[%s3282_s1 + $0x24] sm:$0xf0] }
   0xf   :  { %1055 = vmatpush.bf16.msra.mxu3 %v1665_v38  ;;  %v1512_v61 = vld [vmem:[%s3282_s1 + $0xa0] sm:$0xf]  ;;  %v1649_v62 = vor.u32 %v2079_v55, %v1648_v54  ;;  %v2045_v63 = vld [vmem:[%s3282_s1 + $0xa4] sm:$0xf0]  ;;  %v1449_v4 = vor.u32 %v2029_v60, %v1448_v59  ;;  %v1440_v7 = vld [vmem:[%s3282_s1 + $0x10] sm:$0xf] }
  0x10   :  { %999 = vmatpush.bf16.msra.mxu0 %v1465_v44  ;;  %v1576_v0 = vld [vmem:[%s3282_s1 + $0x120] sm:$0xf]  ;;  %v2061_v1 = vld [vmem:[%s3282_s1 + $0x124] sm:$0xf0]  ;;  %v1513_v5 = vor.u32 %v2045_v63, %v1512_v61  ;;  %v2027_v8 = vld [vmem:[%s3282_s1 + $0x14] sm:$0xf0] }
  0x11   :  { %1018 = vmatpush.bf16.msra.mxu1 %v1529_v45  ;;  %v1640_v2 = vld [vmem:[%s3282_s1 + $0x1a0] sm:$0xf]  ;;  %v2077_v3 = vld [vmem:[%s3282_s1 + $0x1a4] sm:$0xf0]  ;;  %v1577_v6 = vor.u32 %v2061_v1, %v1576_v0  ;;  %v1504_v9 = vld [vmem:[%s3282_s1 + $0x90] sm:$0xf]  ;;  %v1441_v17 = vor.u32 %v2027_v8, %v1440_v7 }
  0x12   :  { %1037 = vmatpush.bf16.msra.mxu2 %v1593_v46  ;;  %v1641_v10 = vor.u32 %v2077_v3, %v1640_v2  ;;  %v2043_v11 = vld [vmem:[%s3282_s1 + $0x94] sm:$0xf0]  ;;  %v1568_v12 = vld [vmem:[%s3282_s1 + $0x110] sm:$0xf]  ;;  %v1432_v16 = vld [vmem:[%s3282_s1] sm:$0xf] }
  0x13   :  { %1056 = vmatpush.bf16.msra.mxu3 %v1657_v50  ;;  %v2059_v13 = vld [vmem:[%s3282_s1 + $0x114] sm:$0xf0]  ;;  %v1632_v14 = vld [vmem:[%s3282_s1 + $0x190] sm:$0xf]  ;;  %v2025_v18 = vld [vmem:[%s3282_s1 + $0x4] sm:$0xf0]  ;;  %v1505_v21 = vor.u32 %v2043_v11, %v1504_v9 }
  0x14   :  { %1000 = vmatpush.bf16.msra.mxu0 %v1457_v56  ;;  %v2075_v15 = vld [vmem:[%s3282_s1 + $0x194] sm:$0xf0]  ;;  %v1496_v19 = vld [vmem:[%s3282_s1 + $0x80] sm:$0xf]  ;;  %v2041_v20 = vld [vmem:[%s3282_s1 + $0x84] sm:$0xf0]  ;;  %v1569_v22 = vor.u32 %v2059_v13, %v1568_v12  ;;  %v1433_v34 = vor.u32 %v2025_v18, %v1432_v16 }
  0x15   :  { %1019 = vmatpush.bf16.msra.mxu1 %v1521_v57  ;;  %v1560_v23 = vld [vmem:[%s3282_s1 + $0x100] sm:$0xf]  ;;  %v2057_v24 = vld [vmem:[%s3282_s1 + $0x104] sm:$0xf0]  ;;  %v1633_v26 = vor.u32 %v2075_v15, %v1632_v14  ;;  %v2010_v29 = vld [vmem:[%s3283_s0 + $0x20] sm:$0xf0]  ;;  %v1497_v38 = vor.u32 %v2041_v20, %v1496_v19 }
  0x16   :  { %1038 = vmatpush.bf16.msra.mxu2 %v1585_v58  ;;  %v1624_v25 = vld [vmem:[%s3282_s1 + $0x180] sm:$0xf]  ;;  %v2073_v27 = vld [vmem:[%s3282_s1 + $0x184] sm:$0xf0]  ;;  %v2006_v30 = vld [vmem:[%s3283_s0 + $0x4] sm:$0xf]  ;;  %v1561_v39 = vor.u32 %v2057_v24, %v1560_v23 }
  0x17   :  { %1057 = vmatpush.bf16.msra.mxu3 %v1649_v62  ;;  %v1360_v28 = vld [vmem:[%s3283_s0] sm:$0xf]  ;;  %v1362_v31 = vld [vmem:[%s3283_s0 + $0x24] sm:$0xf0]  ;;  %v1872_v32 = vld [vmem:[%s3282_s1 + $0x370] sm:$0xf]  ;;  %v1625_v43 = vor.u32 %v2073_v27, %v1624_v25 }
  0x18   :  { %1001 = vmatpush.bf16.msra.mxu0 %v1449_v4  ;;  %v2135_v33 = vld [vmem:[%s3282_s1 + $0x374] sm:$0xf0]  ;;  %v1368_v35 = vld [vmem:[%s3283_s0 + $0x8] sm:$0xf]  ;;  %v1808_v36 = vld [vmem:[%s3282_s1 + $0x2f0] sm:$0xf]  ;;  %v2441_v48 = vor.u32 %v2010_v29, %v1360_v28  ;;  %v2452_v53 = vor.u32 %v2006_v30, %v1362_v31 }
  0x19   :  { %1020 = vmatpush.bf16.msra.mxu1 %v1513_v5  ;;  %v2119_v37 = vld [vmem:[%s3282_s1 + $0x2f4] sm:$0xf0]  ;;  %v2011_v40 = vld [vmem:[%s3283_s0 + $0x28] sm:$0xf0]  ;;  %v1370_v42 = vld [vmem:[%s3283_s0 + $0x2c] sm:$0xf0]  ;;  %v1873_v44 = vor.u32 %v2135_v33, %v1872_v32 }
  0x1a   :  { %1039 = vmatpush.bf16.msra.mxu2 %v1577_v6  ;;  %v2007_v41 = vld [vmem:[%s3283_s0 + $0xc] sm:$0xf]  ;;  %v1744_v45 = vld [vmem:[%s3282_s1 + $0x270] sm:$0xf]  ;;  %v2103_v46 = vld [vmem:[%s3282_s1 + $0x274] sm:$0xf0]  ;;  %v1809_v49 = vor.u32 %v2119_v37, %v1808_v36  ;;  %v2454_v54 = vor.u32 %v2011_v40, %v1368_v35 }
  0x1b   :  { %1058 = vmatpush.bf16.msra.mxu3 %v1641_v10  ;;  %v1936_v47 = vld [vmem:[%s3282_s1 + $0x3f0] sm:$0xf]  ;;  %v2151_v50 = vld [vmem:[%s3282_s1 + $0x3f4] sm:$0xf0]  ;;  %v1864_v51 = vld [vmem:[%s3282_s1 + $0x360] sm:$0xf]  ;;  %v2462_v57 = vor.u32 %v2007_v41, %v1370_v42  ;;  %v1745_v58 = vor.u32 %v2103_v46, %v1744_v45 }
  0x1c   :  { %1002 = vmatpush.bf16.msra.mxu0 %v1441_v17  ;;  %v2133_v52 = vld [vmem:[%s3282_s1 + $0x364] sm:$0xf0]  ;;  %v1800_v55 = vld [vmem:[%s3282_s1 + $0x2e0] sm:$0xf]  ;;  %v1937_v59 = vor.u32 %v2151_v50, %v1936_v47  ;;  %v1856_v2 = vld [vmem:[%s3282_s1 + $0x350] sm:$0xf] }
  0x1d   :  { %1021 = vmatpush.bf16.msra.mxu1 %v1505_v21  ;;  %v2117_v56 = vld [vmem:[%s3282_s1 + $0x2e4] sm:$0xf0]  ;;  %v1865_v60 = vor.u32 %v2133_v52, %v1864_v51  ;;  %v1736_v61 = vld [vmem:[%s3282_s1 + $0x260] sm:$0xf]  ;;  %v2131_v3 = vld [vmem:[%s3282_s1 + $0x354] sm:$0xf0] }
  0x1e   :  { %1040 = vmatpush.bf16.msra.mxu2 %v1569_v22  ;;  %v2101_v62 = vld [vmem:[%s3282_s1 + $0x264] sm:$0xf0]  ;;  %v1928_v63 = vld [vmem:[%s3282_s1 + $0x3e0] sm:$0xf]  ;;  %v1801_v0 = vor.u32 %v2117_v56, %v1800_v55  ;;  %v1792_v4 = vld [vmem:[%s3282_s1 + $0x2d0] sm:$0xf]  ;;  %v1857_v8 = vor.u32 %v2131_v3, %v1856_v2 }
  0x1f   :  { %1059 = vmatpush.bf16.msra.mxu3 %v1633_v26  ;;  %v2149_v1 = vld [vmem:[%s3282_s1 + $0x3e4] sm:$0xf0]  ;;  %v2115_v5 = vld [vmem:[%s3282_s1 + $0x2d4] sm:$0xf0]  ;;  %v1737_v6 = vor.u32 %v2101_v62, %v1736_v61  ;;  %v1728_v9 = vld [vmem:[%s3282_s1 + $0x250] sm:$0xf] }
  0x20   :  { %1003 = vmatpush.bf16.msra.mxu0 %v1433_v34  ;;  %v1929_v7 = vor.u32 %v2149_v1, %v1928_v63  ;;  %v2099_v10 = vld [vmem:[%s3282_s1 + $0x254] sm:$0xf0]  ;;  %v1920_v11 = vld [vmem:[%s3282_s1 + $0x3d0] sm:$0xf]  ;;  %v1793_v12 = vor.u32 %v2115_v5, %v1792_v4  ;;  %v1848_v14 = vld [vmem:[%s3282_s1 + $0x340] sm:$0xf] }
  0x21   :  { %1022 = vmatpush.bf16.msra.mxu1 %v1497_v38  ;;  %v2147_v13 = vld [vmem:[%s3282_s1 + $0x3d4] sm:$0xf0]  ;;  %v2129_v15 = vld [vmem:[%s3282_s1 + $0x344] sm:$0xf0]  ;;  %v1784_v16 = vld [vmem:[%s3282_s1 + $0x2c0] sm:$0xf]  ;;  %v1729_v18 = vor.u32 %v2099_v10, %v1728_v9 }
  0x22   :  { %1041 = vmatpush.bf16.msra.mxu2 %v1561_v39  ;;  %v2113_v17 = vld [vmem:[%s3282_s1 + $0x2c4] sm:$0xf0]  ;;  %v1720_v19 = vld [vmem:[%s3282_s1 + $0x240] sm:$0xf]  ;;  %v1921_v22 = vor.u32 %v2147_v13, %v1920_v11  ;;  %v1849_v23 = vor.u32 %v2129_v15, %v1848_v14  ;;  %v2019_v26 = vld [vmem:[%s3283_s0 + $0x68] sm:$0xf0] }
  0x23   :  { %1060 = vmatpush.bf16.msra.mxu3 %v1625_v43  ;;  %1004 = vmatmul.bf16.vlgmr.msra.gmra.mxu0 %v2441_v48  ;;  %v2097_v20 = vld [vmem:[%s3282_s1 + $0x244] sm:$0xf0]  ;;  %v1912_v21 = vld [vmem:[%s3282_s1 + $0x3c0] sm:$0xf]  ;;  %v1785_v27 = vor.u32 %v2113_v17, %v1784_v16  ;;  %v2015_v28 = vld [vmem:[%s3283_s0 + $0x4c] sm:$0xf] }
  0x24   :  { %1023 = vmatmul.bf16.vlgmr.msra.gmra.mxu1 %v2452_v53  ;;  %1072 = vmatpush.bf16.msrb.mxu0 %v1745_v58  ;;  %v2145_v24 = vld [vmem:[%s3282_s1 + $0x3c4] sm:$0xf0]  ;;  %v1398_v29 = vld [vmem:[%s3283_s0 + $0x6c] sm:$0xf0]  ;;  %v2127_v31 = vld [vmem:[%s3282_s1 + $0x334] sm:$0xf0]  ;;  %v1721_v35 = vor.u32 %v2097_v20, %v1720_v19 }
  0x25   :  { %1091 = vmatpush.bf16.msrb.mxu1 %v1809_v49  ;;  %1042 = vmatmul.bf16.vlgmr.msra.gmra.mxu2 %v2454_v54  ;;  %v1396_v25 = vld [vmem:[%s3283_s0 + $0x48] sm:$0xf]  ;;  %v1840_v30 = vld [vmem:[%s3282_s1 + $0x330] sm:$0xf]  ;;  %v2111_v34 = vld [vmem:[%s3282_s1 + $0x2b4] sm:$0xf0]  ;;  %v1913_v39 = vor.u32 %v2145_v24, %v1912_v21  ;;  %v2584_v50 = vor.u32 %v2015_v28, %v1398_v29 }
  0x26   :  { %1110 = vmatpush.bf16.msrb.mxu2 %v1873_v44  ;;  %1061 = vmatmul.bf16.vlgmr.msra.gmra.mxu3 %v2462_v57  ;;  %v1404_v32 = vld [vmem:[%s3283_s0 + $0x50] sm:$0xf]  ;;  %v2020_v36 = vld [vmem:[%s3283_s0 + $0x70] sm:$0xf0]  ;;  %v1406_v38 = vld [vmem:[%s3283_s0 + $0x74] sm:$0xf0]  ;;  %v1841_v40 = vor.u32 %v2127_v31, %v1840_v30  ;;  %v2573_v44 = vor.u32 %v2019_v26, %v1396_v25 }
  0x27   :  { %1129 = vmatpush.bf16.msrb.mxu3 %v1937_v59  ;;  %v1776_v33 = vld [vmem:[%s3282_s1 + $0x2b0] sm:$0xf]  ;;  %v2016_v37 = vld [vmem:[%s3283_s0 + $0x54] sm:$0xf]  ;;  %v2095_v42 = vld [vmem:[%s3282_s1 + $0x234] sm:$0xf0]  ;;  %v2586_v51 = vor.u32 %v2020_v36, %v1404_v32 }
  0x28   :  { %1073 = vmatpush.bf16.msrb.mxu0 %v1737_v6  ;;  %v1712_v41 = vld [vmem:[%s3282_s1 + $0x230] sm:$0xf]  ;;  %v1777_v45 = vor.u32 %v2111_v34, %v1776_v33  ;;  %v2143_v46 = vld [vmem:[%s3282_s1 + $0x3b4] sm:$0xf0]  ;;  %v1832_v47 = vld [vmem:[%s3282_s1 + $0x320] sm:$0xf]  ;;  %v2594_v56 = vor.u32 %v2016_v37, %v1406_v38 }
  0x29   :  { %1092 = vmatpush.bf16.msrb.mxu1 %v1801_v0  ;;  %v1904_v43 = vld [vmem:[%s3282_s1 + $0x3b0] sm:$0xf]  ;;  %v2125_v49 = vld [vmem:[%s3282_s1 + $0x324] sm:$0xf0]  ;;  %v1768_v52 = vld [vmem:[%s3282_s1 + $0x2a0] sm:$0xf]  ;;  %v1713_v58 = vor.u32 %v2095_v42, %v1712_v41 }
  0x2a   :  { %1111 = vmatpush.bf16.msrb.mxu2 %v1865_v60  ;;  %v2109_v55 = vld [vmem:[%s3282_s1 + $0x2a4] sm:$0xf0]  ;;  %v1905_v59 = vor.u32 %v2143_v46, %v1904_v43  ;;  %v1833_v60 = vor.u32 %v2125_v49, %v1832_v47  ;;  %v1704_v61 = vld [vmem:[%s3282_s1 + $0x220] sm:$0xf]  ;;  %v1824_v2 = vld [vmem:[%s3282_s1 + $0x310] sm:$0xf] }
  0x2b   :  { %1130 = vmatpush.bf16.msrb.mxu3 %v1929_v7  ;;  %v2093_v62 = vld [vmem:[%s3282_s1 + $0x224] sm:$0xf0]  ;;  %v1896_v63 = vld [vmem:[%s3282_s1 + $0x3a0] sm:$0xf]  ;;  %v1769_v0 = vor.u32 %v2109_v55, %v1768_v52  ;;  %v2123_v3 = vld [vmem:[%s3282_s1 + $0x314] sm:$0xf0] }
  0x2c   :  { %1074 = vmatpush.bf16.msrb.mxu0 %v1729_v18  ;;  %v2141_v1 = vld [vmem:[%s3282_s1 + $0x3a4] sm:$0xf0]  ;;  %v1760_v4 = vld [vmem:[%s3282_s1 + $0x290] sm:$0xf]  ;;  %v2107_v5 = vld [vmem:[%s3282_s1 + $0x294] sm:$0xf0]  ;;  %v1705_v6 = vor.u32 %v2093_v62, %v1704_v61  ;;  %v1825_v9 = vor.u32 %v2123_v3, %v1824_v2 }
  0x2d   :  { %1093 = vmatpush.bf16.msrb.mxu1 %v1793_v12  ;;  %v1696_v7 = vld [vmem:[%s3282_s1 + $0x210] sm:$0xf]  ;;  %v2091_v10 = vld [vmem:[%s3282_s1 + $0x214] sm:$0xf0]  ;;  %v1761_v13 = vor.u32 %v2107_v5, %v1760_v4  ;;  %v1816_v14 = vld [vmem:[%s3282_s1 + $0x300] sm:$0xf] }
  0x2e   :  { %1112 = vmatpush.bf16.msrb.mxu2 %v1857_v8  ;;  %v1897_v8 = vor.u32 %v2141_v1, %v1896_v63  ;;  %v1888_v11 = vld [vmem:[%s3282_s1 + $0x390] sm:$0xf]  ;;  %v2139_v12 = vld [vmem:[%s3282_s1 + $0x394] sm:$0xf0]  ;;  %v2121_v15 = vld [vmem:[%s3282_s1 + $0x304] sm:$0xf0]  ;;  %v1697_v20 = vor.u32 %v2091_v10, %v1696_v7 }
  0x2f   :  { %1131 = vmatpush.bf16.msrb.mxu3 %v1921_v22  ;;  %v1752_v16 = vld [vmem:[%s3282_s1 + $0x280] sm:$0xf]  ;;  %v2105_v17 = vld [vmem:[%s3282_s1 + $0x284] sm:$0xf0]  ;;  %v2054_v18 = vld [vmem:[%s3282_s1 + $0xf4] sm:$0xf]  ;;  %v1889_v24 = vor.u32 %v2139_v12, %v1888_v11  ;;  %v1817_v25 = vor.u32 %v2121_v15, %v1816_v14 }
  0x30   :  { %1075 = vmatpush.bf16.msrb.mxu0 %v1721_v35  ;;  %v1554_v19 = vld [vmem:[%s3282_s1 + $0xf8] sm:$0xf0]  ;;  %v1688_v21 = vld [vmem:[%s3282_s1 + $0x200] sm:$0xf]  ;;  %v2038_v22 = vld [vmem:[%s3282_s1 + $0x74] sm:$0xf]  ;;  %v1753_v29 = vor.u32 %v2105_v17, %v1752_v16 }
  0x31   :  { %1094 = vmatpush.bf16.msrb.mxu1 %v1785_v27  ;;  %v2089_v26 = vld [vmem:[%s3282_s1 + $0x204] sm:$0xf0]  ;;  %v1880_v27 = vld [vmem:[%s3282_s1 + $0x380] sm:$0xf]  ;;  %v1376_v30 = vld [vmem:[%s3283_s0 + $0x10] sm:$0xf]  ;;  %v1557_v34 = vor.u32 %v2054_v18, %v1554_v19 }
  0x32   :  { %1113 = vmatpush.bf16.msrb.mxu2 %v1849_v23  ;;  %v1490_v23 = vld [vmem:[%s3282_s1 + $0x78] sm:$0xf0]  ;;  %v2137_v28 = vld [vmem:[%s3282_s1 + $0x384] sm:$0xf0]  ;;  %v2012_v31 = vld [vmem:[%s3283_s0 + $0x30] sm:$0xf0]  ;;  %v1689_v42 = vor.u32 %v2089_v26, %v1688_v21 }
  0x33   :  { %1132 = vmatpush.bf16.msrb.mxu3 %v1913_v39  ;;  %1009 = vmatmul.bf16.gmra.mxu0 %v2573_v44  ;;  %v2008_v32 = vld [vmem:[%s3283_s0 + $0x14] sm:$0xf]  ;;  %v1378_v33 = vld [vmem:[%s3283_s0 + $0x34] sm:$0xf0]  ;;  %v2000_v35 = vld [vmem:[%s3282_s1 + $0x470] sm:$0xf]  ;;  %v1493_v38 = vor.u32 %v2038_v22, %v1490_v23  ;;  %v1881_v47 = vor.u32 %v2137_v28, %v1880_v27 }
  0x34   :  { %1028 = vmatmul.bf16.gmra.mxu1 %v2584_v50  ;;  %1076 = vmatpush.bf16.msrb.mxu0 %v1713_v58  ;;  %v2167_v36 = vld [vmem:[%s3282_s1 + $0x474] sm:$0xf0]  ;;  %v2070_v37 = vld [vmem:[%s3282_s1 + $0x174] sm:$0xf]  ;;  %v1618_v39 = vld [vmem:[%s3282_s1 + $0x178] sm:$0xf0]  ;;  %v2731_v1 = vor.u32 %v2008_v32, %v1378_v33 }
  0x35   :  { %1095 = vmatpush.bf16.msrb.mxu1 %v1777_v45  ;;  %1047 = vmatmul.bf16.gmra.mxu2 %v2586_v51  ;;  %v1546_v41 = vld [vmem:[%s3282_s1 + $0xe8] sm:$0xf0]  ;;  %v1384_v43 = vld [vmem:[%s3283_s0 + $0x18] sm:$0xf]  ;;  %v2013_v45 = vld [vmem:[%s3283_s0 + $0x38] sm:$0xf0]  ;;  %v2001_v52 = vor.u32 %v2167_v36, %v2000_v35 }
  0x36   :  { %1114 = vmatpush.bf16.msrb.mxu2 %v1841_v40  ;;  %1066 = vmatmul.bf16.gmra.mxu3 %v2594_v56  ;;  %v2052_v40 = vld [vmem:[%s3282_s1 + $0xe4] sm:$0xf]  ;;  %v2009_v46 = vld [vmem:[%s3283_s0 + $0x1c] sm:$0xf]  ;;  %v1386_v49 = vld [vmem:[%s3283_s0 + $0x3c] sm:$0xf0]  ;;  %v2742_v5 = vor.u32 %v2013_v45, %v1384_v43 }
  0x37   :  { %1133 = vmatpush.bf16.msrb.mxu3 %v1905_v59  ;;  %v1992_v55 = vld [vmem:[%s3282_s1 + $0x460] sm:$0xf]  ;;  %v2165_v58 = vld [vmem:[%s3282_s1 + $0x464] sm:$0xf0]  ;;  %v1621_v59 = vor.u32 %v2070_v37, %v1618_v39  ;;  %v2036_v61 = vld [vmem:[%s3282_s1 + $0x64] sm:$0xf] }
  0x38   :  { %1077 = vmatpush.bf16.msrb.mxu0 %v1705_v6  ;;  %v1482_v62 = vld [vmem:[%s3282_s1 + $0x68] sm:$0xf0]  ;;  %v2068_v63 = vld [vmem:[%s3282_s1 + $0x164] sm:$0xf]  ;;  %v2050_v3 = vld [vmem:[%s3282_s1 + $0xd4] sm:$0xf]  ;;  %v2744_v6 = vor.u32 %v2009_v46, %v1386_v49  ;;  %v1993_v7 = vor.u32 %v2165_v58, %v1992_v55 }
  0x39   :  { %1096 = vmatpush.bf16.msrb.mxu1 %v1769_v0  ;;  %v2729_v0 = vor.u32 %v2012_v31, %v1376_v30  ;;  %v1610_v2 = vld [vmem:[%s3282_s1 + $0x168] sm:$0xf0]  ;;  %v1538_v4 = vld [vmem:[%s3282_s1 + $0xd8] sm:$0xf0]  ;;  %v2163_v10 = vld [vmem:[%s3282_s1 + $0x454] sm:$0xf0] }
  0x3a   :  { %1115 = vmatpush.bf16.msrb.mxu2 %v1833_v60  ;;  %v1549_v60 = vor.u32 %v2052_v40, %v1546_v41  ;;  %v1613_v11 = vor.u32 %v2068_v63, %v1610_v2  ;;  %v1541_v12 = vor.u32 %v2050_v3, %v1538_v4  ;;  %v1474_v14 = vld [vmem:[%s3282_s1 + $0x58] sm:$0xf0]  ;;  %v2066_v15 = vld [vmem:[%s3282_s1 + $0x154] sm:$0xf]  ;;  %v2048_v17 = vld [vmem:[%s3282_s1 + $0xc4] sm:$0xf] }
  0x3b   :  { %1134 = vmatpush.bf16.msrb.mxu3 %v1897_v8  ;;  %v1485_v8 = vor.u32 %v2036_v61, %v1482_v62  ;;  %v1602_v16 = vld [vmem:[%s3282_s1 + $0x158] sm:$0xf0]  ;;  %v1530_v18 = vld [vmem:[%s3282_s1 + $0xc8] sm:$0xf0]  ;;  %v1976_v21 = vld [vmem:[%s3282_s1 + $0x440] sm:$0xf] }
  0x3c   :  { %1078 = vmatpush.bf16.msrb.mxu0 %v1697_v20  ;;  %v2161_v22 = vld [vmem:[%s3282_s1 + $0x444] sm:$0xf0]  ;;  %v1605_v23 = vor.u32 %v2066_v15, %v1602_v16  ;;  %v1466_v26 = vld [vmem:[%s3282_s1 + $0x48] sm:$0xf0]  ;;  %v2064_v27 = vld [vmem:[%s3282_s1 + $0x144] sm:$0xf] }
  0x3d   :  { %1097 = vmatpush.bf16.msrb.mxu1 %v1761_v13  ;;  %v2034_v13 = vld [vmem:[%s3282_s1 + $0x54] sm:$0xf]  ;;  %v1594_v28 = vld [vmem:[%s3282_s1 + $0x148] sm:$0xf0]  ;;  %v1522_v30 = vld [vmem:[%s3282_s1 + $0xb8] sm:$0xf0]  ;;  %v1977_v31 = vor.u32 %v2161_v22, %v1976_v21 }
  0x3e   :  { %1116 = vmatpush.bf16.msrb.mxu2 %v1825_v9  ;;  %v1984_v9 = vld [vmem:[%s3282_s1 + $0x450] sm:$0xf]  ;;  %v1477_v20 = vor.u32 %v2034_v13, %v1474_v14  ;;  %v1597_v35 = vor.u32 %v2064_v27, %v1594_v28  ;;  %v1412_v36 = vld [vmem:[%s3283_s0 + $0x58] sm:$0xf]  ;;  %v2021_v37 = vld [vmem:[%s3283_s0 + $0x78] sm:$0xf0] }
  0x3f   :  { %1135 = vmatpush.bf16.msrb.mxu3 %v1889_v24  ;;  %v1985_v19 = vor.u32 %v2163_v10, %v1984_v9  ;;  %v1533_v24 = vor.u32 %v2048_v17, %v1530_v18  ;;  %v1968_v33 = vld [vmem:[%s3282_s1 + $0x430] sm:$0xf]  ;;  %v1414_v39 = vld [vmem:[%s3283_s0 + $0x7c] sm:$0xf0]  ;;  %v2030_v41 = vld [vmem:[%s3282_s1 + $0x34] sm:$0xf] }
  0x40   :  { %1079 = vmatpush.bf16.msrb.mxu0 %v1689_v42  ;;  %v1458_v42 = vld [vmem:[%s3282_s1 + $0x38] sm:$0xf0]  ;;  %v2062_v43 = vld [vmem:[%s3282_s1 + $0x134] sm:$0xf]  ;;  %v2044_v46 = vld [vmem:[%s3282_s1 + $0xa4] sm:$0xf] }
  0x41   :  { %1098 = vmatpush.bf16.msrb.mxu1 %v1753_v29  ;;  %v2046_v29 = vld [vmem:[%s3282_s1 + $0xb4] sm:$0xf]  ;;  %v1586_v45 = vld [vmem:[%s3282_s1 + $0x138] sm:$0xf0]  ;;  %v1420_v49 = vld [vmem:[%s3283_s0 + $0x60] sm:$0xf] }
  0x42   :  { %1117 = vmatpush.bf16.msrb.mxu2 %v1817_v25  ;;  %v2032_v25 = vld [vmem:[%s3282_s1 + $0x44] sm:$0xf]  ;;  %v1525_v40 = vor.u32 %v2046_v29, %v1522_v30  ;;  %v1422_v58 = vld [vmem:[%s3283_s0 + $0x84] sm:$0xf0]  ;;  %v1960_v61 = vld [vmem:[%s3282_s1 + $0x420] sm:$0xf]  ;;  %v1589_v63 = vor.u32 %v2062_v43, %v1586_v45 }
  0x43   :  { %1136 = vmatpush.bf16.msrb.mxu3 %v1881_v47  ;;  %1080 = vmatmul.bf16.vlgmr.msrb.gmra.mxu0 %v2729_v0  ;;  %v1469_v32 = vor.u32 %v2032_v25, %v1466_v26  ;;  %v1514_v47 = vld [vmem:[%s3282_s1 + $0xa8] sm:$0xf0]  ;;  %v2018_v55 = vld [vmem:[%s3283_s0 + $0x64] sm:$0xf]  ;;  %v2157_v62 = vld [vmem:[%s3282_s1 + $0x424] sm:$0xf0] }
  0x44   :  { %1148 = vmatpush.bf16.msra.mxu0 %v2001_v52  ;;  %1099 = vmatmul.bf16.vlgmr.msrb.gmra.mxu1 %v2731_v1  ;;  %v2022_v52 = vld [vmem:[%s3283_s0 + $0x80] sm:$0xf0]  ;;  %v1517_v2 = vor.u32 %v2044_v46, %v1514_v47  ;;  %v1450_v4 = vld [vmem:[%s3282_s1 + $0x28] sm:$0xf0]  ;;  %v2876_v14 = vor.u32 %v2018_v55, %v1422_v58  ;;  %v1961_v15 = vor.u32 %v2157_v62, %v1960_v61  ;;  %v1952_v17 = vld [vmem:[%s3282_s1 + $0x410] sm:$0xf] }
  0x45   :  { %1167 = vmatpush.bf16.msra.mxu1 %v1493_v38  ;;  %1118 = vmatmul.bf16.vlgmr.msrb.gmra.mxu2 %v2742_v5  ;;  %v2017_v38 = vld [vmem:[%s3283_s0 + $0x5c] sm:$0xf]  ;;  %v2028_v3 = vld [vmem:[%s3282_s1 + $0x24] sm:$0xf]  ;;  %v1578_v10 = vld [vmem:[%s3282_s1 + $0x128] sm:$0xf0]  ;;  %v2874_v13 = vor.u32 %v2022_v52, %v1420_v49 }
  0x46   :  { %1186 = vmatpush.bf16.msra.mxu2 %v1557_v34  ;;  %1137 = vmatmul.bf16.vlgmr.msrb.gmra.mxu3 %v2744_v6  ;;  %v2159_v34 = vld [vmem:[%s3282_s1 + $0x434] sm:$0xf0]  ;;  %v2863_v9 = vor.u32 %v2017_v38, %v1414_v39  ;;  %v1453_v16 = vor.u32 %v2028_v3, %v1450_v4  ;;  %v2026_v21 = vld [vmem:[%s3282_s1 + $0x14] sm:$0xf]  ;;  %v1442_v22 = vld [vmem:[%s3282_s1 + $0x18] sm:$0xf0] }
  0x47   :  { %1205 = vmatpush.bf16.msra.mxu3 %v1621_v59  ;;  %v1969_v59 = vor.u32 %v2159_v34, %v1968_v33  ;;  %v2155_v18 = vld [vmem:[%s3282_s1 + $0x414] sm:$0xf0]  ;;  %v2040_v25 = vld [vmem:[%s3282_s1 + $0x84] sm:$0xf]  ;;  %v1498_v26 = vld [vmem:[%s3282_s1 + $0x88] sm:$0xf0]  ;;  %v1445_v30 = vor.u32 %v2026_v21, %v1442_v22 }
  0x48   :  { %1149 = vmatpush.bf16.msra.mxu0 %v1993_v7  ;;  %v2060_v7 = vld [vmem:[%s3282_s1 + $0x124] sm:$0xf]  ;;  %v2118_v27 = vld [vmem:[%s3282_s1 + $0x2f4] sm:$0xf]  ;;  %v1810_v28 = vld [vmem:[%s3282_s1 + $0x2f8] sm:$0xf0]  ;;  %v1953_v29 = vor.u32 %v2155_v18, %v1952_v17 }
  0x49   :  { %1168 = vmatpush.bf16.msra.mxu1 %v1485_v8  ;;  %v2861_v8 = vor.u32 %v2021_v37, %v1412_v36  ;;  %v2024_v33 = vld [vmem:[%s3282_s1 + $0x4] sm:$0xf]  ;;  %v1434_v36 = vld [vmem:[%s3282_s1 + $0x8] sm:$0xf0]  ;;  %v1813_v39 = vor.u32 %v2118_v27, %v1810_v28  ;;  %v1746_v43 = vld [vmem:[%s3282_s1 + $0x278] sm:$0xf0] }
  0x4a   :  { %1187 = vmatpush.bf16.msra.mxu2 %v1549_v60  ;;  %v1461_v60 = vor.u32 %v2030_v41, %v1458_v42  ;;  %v2056_v37 = vld [vmem:[%s3282_s1 + $0x104] sm:$0xf]  ;;  %v1562_v38 = vld [vmem:[%s3282_s1 + $0x108] sm:$0xf0]  ;;  %v1682_v41 = vld [vmem:[%s3282_s1 + $0x1f8] sm:$0xf0]  ;;  %v1437_v49 = vor.u32 %v2024_v33, %v1434_v36 }
  0x4b   :  { %1206 = vmatpush.bf16.msra.mxu3 %v1613_v11  ;;  %v2042_v11 = vld [vmem:[%s3282_s1 + $0x94] sm:$0xf]  ;;  %v1874_v46 = vld [vmem:[%s3282_s1 + $0x378] sm:$0xf0]  ;;  %v2116_v52 = vld [vmem:[%s3282_s1 + $0x2e4] sm:$0xf]  ;;  %v1565_v58 = vor.u32 %v2056_v37, %v1562_v38 }
  0x4c   :  { %1150 = vmatpush.bf16.msra.mxu0 %v1985_v19  ;;  %v1581_v19 = vor.u32 %v2060_v7, %v1578_v10  ;;  %v2102_v42 = vld [vmem:[%s3282_s1 + $0x274] sm:$0xf]  ;;  %v1802_v55 = vld [vmem:[%s3282_s1 + $0x2e8] sm:$0xf0]  ;;  %v2084_v62 = vld [vmem:[%s3282_s1 + $0x1e4] sm:$0xf] }
  0x4d   :  { %1169 = vmatpush.bf16.msra.mxu1 %v1477_v20  ;;  %v2134_v45 = vld [vmem:[%s3282_s1 + $0x374] sm:$0xf]  ;;  %v2014_v3 = vld [vmem:[%s3283_s0 + $0x40] sm:$0xf0]  ;;  %v1805_v4 = vor.u32 %v2116_v52, %v1802_v55  ;;  %v1738_v10 = vld [vmem:[%s3282_s1 + $0x268] sm:$0xf0] }
  0x4e   :  { %1188 = vmatpush.bf16.msra.mxu2 %v1541_v12  ;;  %v1506_v12 = vld [vmem:[%s3282_s1 + $0x98] sm:$0xf0]  ;;  %v1877_v61 = vor.u32 %v2134_v45, %v1874_v46  ;;  %v2100_v7 = vld [vmem:[%s3282_s1 + $0x264] sm:$0xf]  ;;  %v2130_v27 = vld [vmem:[%s3282_s1 + $0x354] sm:$0xf] }
  0x4f   :  { %1207 = vmatpush.bf16.msra.mxu3 %v1605_v23  ;;  %v1509_v20 = vor.u32 %v2042_v11, %v1506_v12  ;;  %v2058_v23 = vld [vmem:[%s3282_s1 + $0x114] sm:$0xf]  ;;  %v2132_v12 = vld [vmem:[%s3282_s1 + $0x364] sm:$0xf]  ;;  %v1794_v18 = vld [vmem:[%s3282_s1 + $0x2d8] sm:$0xf0]  ;;  %v1741_v21 = vor.u32 %v2100_v7, %v1738_v10 }
  0x50   :  { %1151 = vmatpush.bf16.msra.mxu0 %v1977_v31  ;;  %v1944_v31 = vld [vmem:[%s3282_s1 + $0x400] sm:$0xf]  ;;  %v1858_v28 = vld [vmem:[%s3282_s1 + $0x358] sm:$0xf0]  ;;  %v2110_v38 = vld [vmem:[%s3282_s1 + $0x2b4] sm:$0xf] }
  0x51   :  { %1170 = vmatpush.bf16.msra.mxu1 %v1469_v32  ;;  %v2153_v32 = vld [vmem:[%s3282_s1 + $0x404] sm:$0xf0]  ;;  %v2094_v45 = vld [vmem:[%s3282_s1 + $0x234] sm:$0xf]  ;;  %v1714_v46 = vld [vmem:[%s3282_s1 + $0x238] sm:$0xf0] }
  0x52   :  { %1189 = vmatpush.bf16.msra.mxu2 %v1533_v24  ;;  %v1570_v24 = vld [vmem:[%s3282_s1 + $0x118] sm:$0xf0]  ;;  %v1945_v47 = vor.u32 %v2153_v32, %v1944_v31  ;;  %v2080_v31 = vld [vmem:[%s3282_s1 + $0x1c4] sm:$0xf]  ;;  %v1658_v32 = vld [vmem:[%s3282_s1 + $0x1c8] sm:$0xf0] }
  0x53   :  { %1208 = vmatpush.bf16.msra.mxu3 %v1597_v35  ;;  %1085 = vmatmul.bf16.gmra.mxu0 %v2861_v8  ;;  %v1573_v34 = vor.u32 %v2058_v23, %v1570_v24  ;;  %v1501_v35 = vor.u32 %v2040_v25, %v1498_v26  ;;  %v2098_v23 = vld [vmem:[%s3282_s1 + $0x254] sm:$0xf]  ;;  %v1730_v24 = vld [vmem:[%s3282_s1 + $0x258] sm:$0xf0]  ;;  %v1661_v37 = vor.u32 %v2080_v31, %v1658_v32  ;;  %v1706_v7 = vld [vmem:[%s3282_s1 + $0x228] sm:$0xf0] }
  0x54   :  { %1152 = vmatpush.bf16.msra.mxu0 %v1969_v59  ;;  %1104 = vmatmul.bf16.gmra.mxu1 %v2863_v9  ;;  %v1733_v33 = vor.u32 %v2098_v23, %v1730_v24  ;;  %v2126_v52 = vld [vmem:[%s3282_s1 + $0x334] sm:$0xf]  ;;  %v1842_v55 = vld [vmem:[%s3282_s1 + $0x338] sm:$0xf0]  ;;  %v1754_v31 = vld [vmem:[%s3282_s1 + $0x288] sm:$0xf0] }
  0x55   :  { %1171 = vmatpush.bf16.msra.mxu1 %v1461_v60  ;;  %1123 = vmatmul.bf16.gmra.mxu2 %v2874_v13  ;;  %v1749_v60 = vor.u32 %v2102_v42, %v1746_v43  ;;  %v2090_v24 = vld [vmem:[%s3282_s1 + $0x214] sm:$0xf]  ;;  %v2072_v32 = vld [vmem:[%s3282_s1 + $0x184] sm:$0xf] }
  0x56   :  { %1190 = vmatpush.bf16.msra.mxu2 %v1525_v40  ;;  %1142 = vmatmul.bf16.gmra.mxu3 %v2876_v14  ;;  %v2086_v40 = vld [vmem:[%s3282_s1 + $0x1f4] sm:$0xf] }
  0x57   :  { %1209 = vmatpush.bf16.msra.mxu3 %v1589_v63  ;;  %v1685_v59 = vor.u32 %v2086_v40, %v1682_v41  ;;  %v1674_v63 = vld [vmem:[%s3282_s1 + $0x1e8] sm:$0xf0]  ;;  %v2078_v40 = vld [vmem:[%s3282_s1 + $0x1b4] sm:$0xf]  ;;  %v1650_v41 = vld [vmem:[%s3282_s1 + $0x1b8] sm:$0xf0] }
  0x58   :  { %1153 = vmatpush.bf16.msra.mxu0 %v1961_v15  ;;  %v1677_v11 = vor.u32 %v2084_v62, %v1674_v63  ;;  %v1866_v15 = vld [vmem:[%s3282_s1 + $0x368] sm:$0xf0]  ;;  %v1428_v62 = vld [vmem:[%s3283_s0 + $0x68] sm:$0xf] }
  0x59   :  { %1172 = vmatpush.bf16.msra.mxu1 %v1453_v16  ;;  %v2114_v16 = vld [vmem:[%s3282_s1 + $0x2d4] sm:$0xf]  ;;  %v1869_v22 = vor.u32 %v2132_v12, %v1866_v15  ;;  %v2023_v63 = vld [vmem:[%s3283_s0 + $0x88] sm:$0xf0]  ;;  %v2124_v12 = vld [vmem:[%s3282_s1 + $0x324] sm:$0xf] }
  0x5a   :  { %1191 = vmatpush.bf16.msra.mxu2 %v1517_v2  ;;  %v1392_v2 = vld [vmem:[%s3283_s0 + $0x20] sm:$0xf]  ;;  %v1797_v25 = vor.u32 %v2114_v16, %v1794_v18  ;;  %v1834_v15 = vld [vmem:[%s3282_s1 + $0x328] sm:$0xf0]  ;;  %v2106_v16 = vld [vmem:[%s3282_s1 + $0x294] sm:$0xf]  ;;  %v3089_v18 = vor.u32 %v2023_v63, %v1428_v62 }
  0x5b   :  { %1210 = vmatpush.bf16.msra.mxu3 %v1581_v19  ;;  %v2981_v17 = vor.u32 %v2014_v3, %v1392_v2  ;;  %v2082_v19 = vld [vmem:[%s3282_s1 + $0x1d4] sm:$0xf]  ;;  %v1717_v2 = vor.u32 %v2094_v45, %v1714_v46  ;;  %v1845_v3 = vor.u32 %v2126_v52, %v1842_v55  ;;  %v1837_v23 = vor.u32 %v2124_v12, %v1834_v15  ;;  %v1994_v52 = vld [vmem:[%s3282_s1 + $0x468] sm:$0xf0] }
  0x5c   :  { %1154 = vmatpush.bf16.msra.mxu0 %v1953_v29  ;;  %v2112_v29 = vld [vmem:[%s3282_s1 + $0x2c4] sm:$0xf] }
  0x5d   :  { %1173 = vmatpush.bf16.msra.mxu1 %v1445_v30  ;;  %v1786_v30 = vld [vmem:[%s3282_s1 + $0x2c8] sm:$0xf0] }
  0x5e   :  { %1192 = vmatpush.bf16.msra.mxu2 %v1509_v20  ;;  %v1666_v20 = vld [vmem:[%s3282_s1 + $0x1d8] sm:$0xf0]  ;;  %v1789_v36 = vor.u32 %v2112_v29, %v1786_v30  ;;  %v2104_v30 = vld [vmem:[%s3282_s1 + $0x284] sm:$0xf] }
  0x5f   :  { %1211 = vmatpush.bf16.msra.mxu3 %v1573_v34  ;;  %v1669_v26 = vor.u32 %v2082_v19, %v1666_v20  ;;  %v2096_v34 = vld [vmem:[%s3282_s1 + $0x244] sm:$0xf]  ;;  %v1762_v19 = vld [vmem:[%s3282_s1 + $0x298] sm:$0xf0]  ;;  %v2074_v20 = vld [vmem:[%s3282_s1 + $0x194] sm:$0xf] }
  0x60   :  { %1155 = vmatpush.bf16.msra.mxu0 %v1945_v47  ;;  %v1826_v29 = vld [vmem:[%s3282_s1 + $0x318] sm:$0xf0] }
  0x61   :  { %1174 = vmatpush.bf16.msra.mxu1 %v1437_v49  ;;  %v1653_v49 = vor.u32 %v2078_v40, %v1650_v41  ;;  %v2002_v40 = vld [vmem:[%s3282_s1 + $0x478] sm:$0xf0]  ;;  %v2148_v41 = vld [vmem:[%s3282_s1 + $0x3e4] sm:$0xf] }
  0x62   :  { %1193 = vmatpush.bf16.msra.mxu2 %v1501_v35  ;;  %v1722_v35 = vld [vmem:[%s3282_s1 + $0x248] sm:$0xf0] }
  0x63   :  { %1212 = vmatpush.bf16.msra.mxu3 %v1565_v58  ;;  %1156 = vmatmul.bf16.vlgmr.msra.gmra.mxu0 %v2981_v17  ;;  %v1725_v42 = vor.u32 %v2096_v34, %v1722_v35  ;;  %v2108_v58 = vld [vmem:[%s3282_s1 + $0x2a4] sm:$0xf] }
  0x64   :  { %1224 = vmatpush.bf16.msrb.mxu0 %v1685_v59  ;;  %1175 = vmatmul.bf16.vlgmr.msra.gmra.mxu1 %v2441_v48  ;;  %v1861_v48 = vor.u32 %v2130_v27, %v1858_v28  ;;  %v1770_v59 = vld [vmem:[%s3282_s1 + $0x2a8] sm:$0xf0]  ;;  %v2122_v28 = vld [vmem:[%s3282_s1 + $0x314] sm:$0xf] }
  0x65   :  { %1243 = vmatpush.bf16.msrb.mxu1 %v1749_v60  ;;  %1194 = vmatmul.bf16.vlgmr.msra.gmra.mxu2 %v2452_v53  ;;  %v2128_v53 = vld [vmem:[%s3282_s1 + $0x344] sm:$0xf]  ;;  %v1773_v10 = vor.u32 %v2108_v58, %v1770_v59  ;;  %v1829_v35 = vor.u32 %v2122_v28, %v1826_v29  ;;  %v2146_v58 = vld [vmem:[%s3282_s1 + $0x3d4] sm:$0xf]  ;;  %v1922_v59 = vld [vmem:[%s3282_s1 + $0x3d8] sm:$0xf0] }
  0x66   :  { %1262 = vmatpush.bf16.msrb.mxu2 %v1813_v39  ;;  %1213 = vmatmul.bf16.vlgmr.msra.gmra.mxu3 %v2454_v54  ;;  %v1850_v54 = vld [vmem:[%s3282_s1 + $0x348] sm:$0xf0]  ;;  %v1778_v39 = vld [vmem:[%s3282_s1 + $0x2b8] sm:$0xf0]  ;;  %v2076_v60 = vld [vmem:[%s3282_s1 + $0x1a4] sm:$0xf]  ;;  %v1925_v62 = vor.u32 %v2146_v58, %v1922_v59 }
  0x67   :  { %1281 = vmatpush.bf16.msrb.mxu3 %v1877_v61  ;;  %v1853_v43 = vor.u32 %v2128_v53, %v1850_v54  ;;  %v1781_v47 = vor.u32 %v2110_v38, %v1778_v39  ;;  %v1642_v61 = vld [vmem:[%s3282_s1 + $0x1a8] sm:$0xf0]  ;;  %v2120_v53 = vld [vmem:[%s3282_s1 + $0x304] sm:$0xf]  ;;  %v2166_v39 = vld [vmem:[%s3282_s1 + $0x474] sm:$0xf] }
  0x68   :  { %1225 = vmatpush.bf16.msrb.mxu0 %v1677_v11  ;;  %v1645_v11 = vor.u32 %v2076_v60, %v1642_v61  ;;  %v1818_v54 = vld [vmem:[%s3282_s1 + $0x308] sm:$0xf0]  ;;  %v2005_v46 = vor.u32 %v2166_v39, %v2002_v40  ;;  %v2162_v60 = vld [vmem:[%s3282_s1 + $0x454] sm:$0xf]  ;;  %v1986_v61 = vld [vmem:[%s3282_s1 + $0x458] sm:$0xf0] }
  0x69   :  { %1244 = vmatpush.bf16.msrb.mxu1 %v1741_v21  ;;  %v1634_v21 = vld [vmem:[%s3282_s1 + $0x198] sm:$0xf0]  ;;  %v1821_v45 = vor.u32 %v2120_v53, %v1818_v54  ;;  %v1989_v63 = vor.u32 %v2162_v60, %v1986_v61 }
  0x6a   :  { %1263 = vmatpush.bf16.msrb.mxu2 %v1805_v4  ;;  %v2092_v4 = vld [vmem:[%s3282_s1 + $0x224] sm:$0xf]  ;;  %v1637_v27 = vor.u32 %v2074_v20, %v1634_v21  ;;  %v1962_v21 = vld [vmem:[%s3282_s1 + $0x428] sm:$0xf0] }
  0x6b   :  { %1282 = vmatpush.bf16.msrb.mxu3 %v1869_v22  ;;  %v1709_v22 = vor.u32 %v2092_v4, %v1706_v7  ;;  %v2160_v4 = vld [vmem:[%s3282_s1 + $0x444] sm:$0xf]  ;;  %v1978_v7 = vld [vmem:[%s3282_s1 + $0x448] sm:$0xf0] }
  0x6c   :  { %1226 = vmatpush.bf16.msrb.mxu0 %v1669_v26  ;;  %v1765_v26 = vor.u32 %v2106_v16, %v1762_v19  ;;  %v2140_v16 = vld [vmem:[%s3282_s1 + $0x3a4] sm:$0xf]  ;;  %v1898_v19 = vld [vmem:[%s3282_s1 + $0x3a8] sm:$0xf0] }
  0x6d   :  { %1245 = vmatpush.bf16.msrb.mxu1 %v1733_v33  ;;  %v1626_v33 = vld [vmem:[%s3282_s1 + $0x188] sm:$0xf0]  ;;  %v2156_v20 = vld [vmem:[%s3282_s1 + $0x424] sm:$0xf] }
  0x6e   :  { %1264 = vmatpush.bf16.msrb.mxu2 %v1797_v25  ;;  %v1698_v25 = vld [vmem:[%s3282_s1 + $0x218] sm:$0xf0] }
  0x6f   :  { %1283 = vmatpush.bf16.msrb.mxu3 %v1861_v48  ;;  %v1938_v48 = vld [vmem:[%s3282_s1 + $0x3f8] sm:$0xf0]  ;;  %v1701_v34 = vor.u32 %v2090_v24, %v1698_v25  ;;  %v2138_v24 = vld [vmem:[%s3282_s1 + $0x394] sm:$0xf] }
  0x70   :  { %1227 = vmatpush.bf16.msrb.mxu0 %v1661_v37  ;;  %v1690_v37 = vld [vmem:[%s3282_s1 + $0x208] sm:$0xf0]  ;;  %v1890_v25 = vld [vmem:[%s3282_s1 + $0x398] sm:$0xf0] }
  0x71   :  { %1246 = vmatpush.bf16.msrb.mxu1 %v1725_v42  ;;  %v1930_v42 = vld [vmem:[%s3282_s1 + $0x3e8] sm:$0xf0]  ;;  %v1893_v28 = vor.u32 %v2138_v24, %v1890_v25 }
  0x72   :  { %1265 = vmatpush.bf16.msrb.mxu2 %v1789_v36  ;;  %v2088_v36 = vld [vmem:[%s3282_s1 + $0x204] sm:$0xf] }
  0x73   :  { %1284 = vmatpush.bf16.msrb.mxu3 %v1853_v43  ;;  %1161 = vmatmul.bf16.gmra.mxu0 %v3089_v18  ;;  %v1693_v43 = vor.u32 %v2088_v36, %v1690_v37 }
  0x74   :  { %1228 = vmatpush.bf16.msrb.mxu0 %v1653_v49  ;;  %1180 = vmatmul.bf16.gmra.mxu1 %v2573_v44  ;;  %v2150_v44 = vld [vmem:[%s3282_s1 + $0x3f4] sm:$0xf]  ;;  %v2164_v49 = vld [vmem:[%s3282_s1 + $0x464] sm:$0xf] }
  0x75   :  { %1247 = vmatpush.bf16.msrb.mxu1 %v1717_v2  ;;  %1199 = vmatmul.bf16.gmra.mxu2 %v2584_v50  ;;  %v1757_v50 = vor.u32 %v2104_v30, %v1754_v31  ;;  %v1941_v38 = vor.u32 %v2150_v44, %v1938_v48  ;;  %v1997_v55 = vor.u32 %v2164_v49, %v1994_v52  ;;  %v2144_v2 = vld [vmem:[%s3282_s1 + $0x3c4] sm:$0xf]  ;;  %v1882_v31 = vld [vmem:[%s3282_s1 + $0x388] sm:$0xf0] }
  0x76   :  { %1266 = vmatpush.bf16.msrb.mxu2 %v1781_v47  ;;  %1218 = vmatmul.bf16.gmra.mxu3 %v2586_v51  ;;  %v1629_v51 = vor.u32 %v2072_v32, %v1626_v33  ;;  %v1933_v47 = vor.u32 %v2148_v41, %v1930_v42  ;;  %v2136_v30 = vld [vmem:[%s3282_s1 + $0x384] sm:$0xf]  ;;  %v1946_v33 = vld [vmem:[%s3282_s1 + $0x408] sm:$0xf0] }
  0x77   :  { %1285 = vmatpush.bf16.msrb.mxu3 %v1845_v3  ;;  %v1914_v3 = vld [vmem:[%s3282_s1 + $0x3c8] sm:$0xf0]  ;;  %v2152_v32 = vld [vmem:[%s3282_s1 + $0x404] sm:$0xf]  ;;  %v1885_v44 = vor.u32 %v2136_v30, %v1882_v31 }
  0x78   :  { %1229 = vmatpush.bf16.msrb.mxu0 %v1645_v11  ;;  %v1906_v11 = vld [vmem:[%s3282_s1 + $0x3b8] sm:$0xf0] }
  0x79   :  { %1248 = vmatpush.bf16.msrb.mxu1 %v1709_v22  ;;  %v1901_v22 = vor.u32 %v2140_v16, %v1898_v19 }
  0x7a   :  { %1267 = vmatpush.bf16.msrb.mxu2 %v1773_v10  ;;  %v1917_v10 = vor.u32 %v2144_v2, %v1914_v3 }
  0x7b   :  { %1286 = vmatpush.bf16.msrb.mxu3 %v1837_v23  ;;  %v1965_v23 = vor.u32 %v2156_v20, %v1962_v21 }
  0x7c   :  { %1230 = vmatpush.bf16.msrb.mxu0 %v1637_v27  ;;  %v1954_v27 = vld [vmem:[%s3282_s1 + $0x418] sm:$0xf0] }
  0x7d   :  { %1249 = vmatpush.bf16.msrb.mxu1 %v1701_v34 }
  0x7e   :  { %1268 = vmatpush.bf16.msrb.mxu2 %v1765_v26  ;;  %v2154_v26 = vld [vmem:[%s3282_s1 + $0x414] sm:$0xf] }
  0x7f   :  { %1287 = vmatpush.bf16.msrb.mxu3 %v1829_v35  ;;  %v1957_v29 = vor.u32 %v2154_v26, %v1954_v27 }
  0x80   :  { %1231 = vmatpush.bf16.msrb.mxu0 %v1629_v51 }
  0x81   :  { %1250 = vmatpush.bf16.msrb.mxu1 %v1693_v43 }
  0x82   :  { %1269 = vmatpush.bf16.msrb.mxu2 %v1757_v50 }
  0x83   :  { %1288 = vmatpush.bf16.msrb.mxu3 %v1821_v45  ;;  %1232 = vmatmul.bf16.vlgmr.msrb.gmra.mxu0 %v2462_v57  ;;  %v1981_v57 = vor.u32 %v2160_v4, %v1978_v7 }
  0x84   :  { %1300 = vmatpush.bf16.msra.mxu0 %v1941_v38  ;;  %1251 = vmatmul.bf16.vlgmr.msrb.gmra.mxu1 %v2729_v0  ;;  %v2142_v0 = vld [vmem:[%s3282_s1 + $0x3b4] sm:$0xf] }
  0x85   :  { %1319 = vmatpush.bf16.msra.mxu1 %v2005_v46  ;;  %1270 = vmatmul.bf16.vlgmr.msrb.gmra.mxu2 %v2731_v1  ;;  %v2158_v1 = vld [vmem:[%s3282_s1 + $0x434] sm:$0xf]  ;;  %v1909_v12 = vor.u32 %v2142_v0, %v1906_v11 }
  0x86   :  { %2168 = vmatpush.bf16.msra.mxu2 %v1941_v38  ;;  %1289 = vmatmul.bf16.vlgmr.msrb.gmra.mxu3 %v2742_v5  ;;  %v1970_v5 = vld [vmem:[%s3282_s1 + $0x438] sm:$0xf0] }
  0x87   :  { %2176 = vmatpush.bf16.msra.mxu3 %v2005_v46  ;;  %v1973_v15 = vor.u32 %v2158_v1, %v1970_v5 }
  0x88   :  { %1301 = vmatpush.bf16.msra.mxu0 %v1933_v47 }
  0x89   :  { %1320 = vmatpush.bf16.msra.mxu1 %v1997_v55 }
  0x8a   :  { %2169 = vmatpush.bf16.msra.mxu2 %v1933_v47 }
  0x8b   :  { %2177 = vmatpush.bf16.msra.mxu3 %v1997_v55 }
  0x8c   :  { %1302 = vmatpush.bf16.msra.mxu0 %v1925_v62 }
  0x8d   :  { %1321 = vmatpush.bf16.msra.mxu1 %v1989_v63 }
  0x8e   :  { %2170 = vmatpush.bf16.msra.mxu2 %v1925_v62 }
  0x8f   :  { %2178 = vmatpush.bf16.msra.mxu3 %v1989_v63 }
  0x90   :  { %1303 = vmatpush.bf16.msra.mxu0 %v1917_v10 }
  0x91   :  { %1322 = vmatpush.bf16.msra.mxu1 %v1981_v57 }
  0x92   :  { %2171 = vmatpush.bf16.msra.mxu2 %v1917_v10 }
  0x93   :  { %2179 = vmatpush.bf16.msra.mxu3 %v1981_v57  ;;  %1237 = vmatmul.bf16.gmra.mxu0 %v2594_v56  ;;  %v1949_v56 = vor.u32 %v2152_v32, %v1946_v33 }
  0x94   :  { %1304 = vmatpush.bf16.msra.mxu0 %v1909_v12  ;;  %1256 = vmatmul.bf16.gmra.mxu1 %v2861_v8  ;;  %v3247_v8 = vld [vmem:[%s3284_s2] sm:$0x3] }
  0x95   :  { %1323 = vmatpush.bf16.msra.mxu1 %v1973_v15  ;;  %1275 = vmatmul.bf16.gmra.mxu2 %v2863_v9  ;;  %v180_v48 = vperm.slane %v3247_v8, 0 }
  0x96   :  { %2172 = vmatpush.bf16.msra.mxu2 %v1909_v12  ;;  %1294 = vmatmul.bf16.gmra.mxu3 %v2874_v13 }
  0x97   :  { %2180 = vmatpush.bf16.msra.mxu3 %v1973_v15 }
  0x98   :  { %1305 = vmatpush.bf16.msra.mxu0 %v1901_v22 }
  0x99   :  { %1324 = vmatpush.bf16.msra.mxu1 %v1965_v23 }
  0x9a   :  { %2173 = vmatpush.bf16.msra.mxu2 %v1901_v22 }
  0x9b   :  { %2181 = vmatpush.bf16.msra.mxu3 %v1965_v23 }
  0x9c   :  { %1306 = vmatpush.bf16.msra.mxu0 %v1893_v28 }
  0x9d   :  { %1325 = vmatpush.bf16.msra.mxu1 %v1957_v29 }
  0x9e   :  { %2174 = vmatpush.bf16.msra.mxu2 %v1893_v28 }
  0x9f   :  { %2182 = vmatpush.bf16.msra.mxu3 %v1957_v29 }
  0xa0   :  { %1307 = vmatpush.bf16.msra.mxu0 %v1885_v44  ;;  %v1005_v9 = vpop.f32.mrf.mxu0 }
  0xa1   :  { %1326 = vmatpush.bf16.msra.mxu1 %v1949_v56  ;;  %v1006_v34 = vadd.f32 %v1005_v9, %v180_v48  ;;  %v1024_v13 = vpop.f32.mrf.mxu1 }
  0xa2   :  { %2175 = vmatpush.bf16.msra.mxu2 %v1885_v44 }
  0xa3   :  { %2183 = vmatpush.bf16.msra.mxu3 %v1949_v56  ;;  %v1025_v35 = vadd.f32 %v1024_v13, %v1006_v34  ;;  %1308 = vmatmul.bf16.vlgmr.msra.gmra.mxu0 %v2744_v6 }
  0xa4   :  { %1327 = vmatmul.bf16.vlgmr.msra.gmra.mxu1 %v2981_v17 }
  0xa5   :  { %1313 = vmatmul.bf16.vlgmr.msra.gmra.mxu2 %v2876_v14 }
  0xa6   :  { %1332 = vmatmul.bf16.vlgmr.msra.gmra.mxu3 %v3089_v18 }
  0xa8   :  { %v1043_v36 = vpop.f32.mrf.mxu2  ;;  %v1007_v37 = vpop.f32.mrf.mxu0 }
  0xa9   :  { %v1044_v50 = vadd.f32 %v1043_v36, %v1025_v35  ;;  %v1062_v51 = vpop.f32.mrf.mxu3  ;;  %v1008_v53 = vadd.f32 %v1007_v37, %v180_v48  ;;  %v1026_v54 = vpop.f32.mrf.mxu1 }
  0xab   :  { %v1063_v38 = vadd.f32 %v1062_v51, %v1044_v50  ;;  %v1027_v39 = vadd.f32 %v1026_v54, %v1008_v53 }
  0xb0   :  { %v1045_v40 = vpop.f32.mrf.mxu2  ;;  %v1010_v43 = vpop.f32.mrf.mxu0 }
  0xb1   :  { %v1046_v41 = vadd.f32 %v1045_v40, %v1027_v39  ;;  %v1064_v42 = vpop.f32.mrf.mxu3  ;;  %v1011_v45 = vadd.f32 %v1010_v43, %v180_v48  ;;  %v1029_v6 = vpop.f32.mrf.mxu1 }
  0xb3   :  { %v1065_v46 = vadd.f32 %v1064_v42, %v1046_v41  ;;  %v1030_v17 = vadd.f32 %v1029_v6, %v1011_v45 }
  0xb8   :  { %v1048_v47 = vpop.f32.mrf.mxu2  ;;  %v1012_v18 = vpop.f32.mrf.mxu0 }
  0xb9   :  { %v1049_v14 = vadd.f32 %v1048_v47, %v1030_v17  ;;  %v1067_v49 = vpop.f32.mrf.mxu3  ;;  %v1013_v52 = vadd.f32 %v1012_v18, %v180_v48  ;;  %v1031_v55 = vpop.f32.mrf.mxu1 }
  0xbb   :  { %v1068_v58 = vadd.f32 %v1067_v49, %v1049_v14  ;;  %v1032_v59 = vadd.f32 %v1031_v55, %v1013_v52  ;;  %v181_v14 = vperm.slane %v3247_v8, 1 }
  0xc0   :  { %v1050_v60 = vpop.f32.mrf.mxu2  ;;  %v1081_v63 = vpop.f32.mrf.mxu0 }
  0xc1   :  { %v1051_v61 = vadd.f32 %v1050_v60, %v1032_v59  ;;  %v1069_v62 = vpop.f32.mrf.mxu3  ;;  %v1100_v2 = vpop.f32.mrf.mxu1  ;;  %v1082_v4 = vadd.f32 %v1081_v63, %v1063_v38 }
  0xc3   :  { %v1070_v3 = vadd.f32 %v1069_v62, %v1051_v61  ;;  %v1101_v7 = vadd.f32 %v1100_v2, %v1082_v4 }
  0xc8   :  { %v1119_v10 = vpop.f32.mrf.mxu2  ;;  %v1083_v11 = vpop.f32.mrf.mxu0 }
  0xc9   :  { %v1138_v57 = vpop.f32.mrf.mxu3  ;;  %v1120_v0 = vadd.f32 %v1119_v10, %v1101_v7  ;;  %v1102_v1 = vpop.f32.mrf.mxu1  ;;  %v1084_v5 = vadd.f32 %v1083_v11, %v1065_v46 }
  0xcb   :  { %v1139_v12 = vadd.f32 %v1138_v57, %v1120_v0  ;;  %v1103_v15 = vadd.f32 %v1102_v1, %v1084_v5 }
  0xd0   :  { %v1121_v16 = vpop.f32.mrf.mxu2  ;;  %v1086_v21 = vpop.f32.mrf.mxu0 }
  0xd1   :  { %v1140_v19 = vpop.f32.mrf.mxu3  ;;  %v1122_v20 = vadd.f32 %v1121_v16, %v1103_v15  ;;  %v1105_v22 = vpop.f32.mrf.mxu1  ;;  %v1087_v23 = vadd.f32 %v1086_v21, %v1068_v58 }
  0xd3   :  { %v1141_v24 = vadd.f32 %v1140_v19, %v1122_v20  ;;  %v1106_v25 = vadd.f32 %v1105_v22, %v1087_v23 }
  0xd8   :  { %v1124_v26 = vpop.f32.mrf.mxu2  ;;  %v1088_v29 = vpop.f32.mrf.mxu0 }
  0xd9   :  { %v1143_v27 = vpop.f32.mrf.mxu3  ;;  %v1125_v28 = vadd.f32 %v1124_v26, %v1106_v25  ;;  %v1107_v30 = vpop.f32.mrf.mxu1  ;;  %v1089_v31 = vadd.f32 %v1088_v29, %v1070_v3 }
  0xdb   :  { %v3254_v32 = vadd.f32 %v1143_v27, %v1125_v28  ;;  %v1108_v33 = vadd.f32 %v1107_v30, %v1089_v31 }
  0xe0   :  { %v1126_v44 = vpop.f32.mrf.mxu2  ;;  %v1157_v9 = vpop.f32.mrf.mxu0 }
  0xe1   :  { %v1145_v56 = vpop.f32.mrf.mxu3  ;;  %v1127_v48 = vadd.f32 %v1126_v44, %v1108_v33  ;;  %v1176_v34 = vpop.f32.mrf.mxu1  ;;  %v3256_v13 = vadd.f32 %v1157_v9, %v1139_v12 }
  0xe2   :  { %v1177_v58 = vadd.f32 %v1176_v34, %v181_v14 }
  0xe3   :  { %v3258_v35 = vadd.f32 %v1145_v56, %v1127_v48  ;;  %v1338_v9 = vmax.f32 %v3256_v13, 0.0 }
  0xe8   :  { %v1195_v36 = vpop.f32.mrf.mxu2  ;;  %v1159_v51 = vpop.f32.mrf.mxu0 }
  0xe9   :  { %v1214_v50 = vpop.f32.mrf.mxu3  ;;  %v1178_v37 = vpop.f32.mrf.mxu1  ;;  %v3260_v53 = vadd.f32 %v1159_v51, %v1141_v24  ;;  %v1196_v59 = vadd.f32 %v1195_v36, %v1177_v58 }
  0xea   :  { %v1179_v4 = vadd.f32 %v1178_v37, %v181_v14 }
  0xeb   :  { %v1215_v3 = vadd.f32 %v1214_v50, %v1196_v59 }
  0xf0   :  { %v1197_v54 = vpop.f32.mrf.mxu2  ;;  %v1162_v39 = vpop.f32.mrf.mxu0 }
  0xf1   :  { %v1216_v38 = vpop.f32.mrf.mxu3  ;;  %v1181_v40 = vpop.f32.mrf.mxu1  ;;  %v1198_v57 = vadd.f32 %v1197_v54, %v1179_v4 }
  0xf2   :  { %v1182_v2 = vadd.f32 %v1181_v40, %v181_v14 }
  0xf3   :  { %v1217_v15 = vadd.f32 %v1216_v38, %v1198_v57  ;;  %v1163_v38 = vadd.f32 %v1162_v39, %v3254_v32 }
  0xf8   :  { %v1200_v41 = vpop.f32.mrf.mxu2  ;;  %v3262_v43 = vpop.f32.mrf.mxu0 }
  0xf9   :  { %v1219_v42 = vpop.f32.mrf.mxu3  ;;  %v1183_v45 = vpop.f32.mrf.mxu1  ;;  %v1201_v10 = vadd.f32 %v1200_v41, %v1182_v2  ;;  %v1165_v58 = vadd.f32 %v3262_v43, %v3258_v35 }
  0xfa   :  { %v1184_v19 = vadd.f32 %v1183_v45, %v181_v14 }
  0xfb   :  { %v1220_v12 = vadd.f32 %v1219_v42, %v1201_v10 }
 0x100   :  { %v1202_v6 = vpop.f32.mrf.mxu2  ;;  %v1233_v17 = vpop.f32.mrf.mxu0 }
 0x101   :  { %v1221_v46 = vpop.f32.mrf.mxu3  ;;  %v1252_v47 = vpop.f32.mrf.mxu1  ;;  %v1234_v7 = vadd.f32 %v1233_v17, %v1215_v3  ;;  %v1203_v22 = vadd.f32 %v1202_v6, %v1184_v19 }
 0x103   :  { %v1253_v5 = vadd.f32 %v1252_v47, %v1234_v7  ;;  %v1222_v31 = vadd.f32 %v1221_v46, %v1203_v22  ;;  %v1342_v47 = vmax.f32 %v1163_v38, 0.0 }
 0x108   :  { %v1271_v49 = vpop.f32.mrf.mxu2  ;;  %v1235_v52 = vpop.f32.mrf.mxu0 }
 0x109   :  { %v1290_v18 = vpop.f32.mrf.mxu3  ;;  %v1254_v55 = vpop.f32.mrf.mxu1  ;;  %v1272_v16 = vadd.f32 %v1271_v49, %v1253_v5  ;;  %v1236_v21 = vadd.f32 %v1235_v52, %v1217_v15  ;;  %v1340_v49 = vmax.f32 %v3260_v53, 0.0  ;;  %v1344_v53 = vmax.f32 %v1165_v58, 0.0 }
 0x10b   :  { %v1291_v23 = vadd.f32 %v1290_v18, %v1272_v16  ;;  %v1255_v29 = vadd.f32 %v1254_v55, %v1236_v21 }
 0x110   :  { %v1273_v60 = vpop.f32.mrf.mxu2  ;;  %v1238_v62 = vpop.f32.mrf.mxu0 }
 0x111   :  { %v1292_v61 = vpop.f32.mrf.mxu3  ;;  %v1257_v63 = vpop.f32.mrf.mxu1  ;;  %v1239_v20 = vadd.f32 %v1238_v62, %v1220_v12  ;;  %v1274_v44 = vadd.f32 %v1273_v60, %v1255_v29 }
 0x113   :  { %v1258_v26 = vadd.f32 %v1257_v63, %v1239_v20  ;;  %v1293_v50 = vadd.f32 %v1292_v61, %v1274_v44 }
 0x118   :  { %v1276_v0 = vpop.f32.mrf.mxu2  ;;  %v1240_v1 = vpop.f32.mrf.mxu0 }
 0x119   :  { %v1295_v11 = vpop.f32.mrf.mxu3  ;;  %v1259_v8 = vpop.f32.mrf.mxu1  ;;  %v1277_v33 = vadd.f32 %v1276_v0, %v1258_v26  ;;  %v1241_v48 = vadd.f32 %v1240_v1, %v1222_v31 }
 0x11b   :  { %v1296_v36 = vadd.f32 %v1295_v11, %v1277_v33  ;;  %v1260_v40 = vadd.f32 %v1259_v8, %v1241_v48 }
 0x120   :  { %v1278_v24 = vpop.f32.mrf.mxu2  ;;  %v1309_v27 = vpop.f32.mrf.mxu0 }
 0x121   :  { %v1297_v25 = vpop.f32.mrf.mxu3  ;;  %v1328_v28 = vpop.f32.mrf.mxu1  ;;  %v1310_v30 = vadd.f32 %v1309_v27, %v1291_v23  ;;  %v1279_v6 = vadd.f32 %v1278_v24, %v1260_v40 }
 0x123   :  { %v1329_v56 = vadd.f32 %v1328_v28, %v1310_v30  ;;  %v1298_v52 = vadd.f32 %v1297_v25, %v1279_v6 }
 0x125   :  { %v1339_v34 = vmax.f32 %v1329_v56, 0.0 }
 0x127   :  { %v1346_v51 = vpack.c.bf16 %v1339_v34, %v1338_v9 }
 0x128   :  { %v1314_v37 = vpop.f32.mrf.mxu2  ;;  %v1311_v42 = vpop.f32.mrf.mxu0 }
 0x129   :  { %v1333_v54 = vpop.f32.mrf.mxu3  ;;  %v1315_v41 = vadd.f32 %v1314_v37, %v1296_v36  ;;  %1350 = vst [vmem:[%s3285_s3] sm:$0xff] %v1346_v51  ;;  %v1312_v45 = vadd.f32 %v1311_v42, %v1293_v50  ;;  %v1330_v17 = vpop.f32.mrf.mxu1 }
 0x12b   :  { %v1334_v46 = vadd.f32 %v1333_v54, %v1315_v41  ;;  %v1331_v13 = vadd.f32 %v1330_v17, %v1312_v45 }
 0x12d   :  { %v1343_v14 = vmax.f32 %v1334_v46, 0.0  ;;  %v1341_v18 = vmax.f32 %v1331_v13, 0.0 }
 0x12f   :  { %v1348_v55 = vpack.c.bf16 %v1343_v14, %v1342_v47  ;;  %v1347_v32 = vpack.c.bf16 %v1341_v18, %v1340_v49 }
 0x130   :  { %v1316_v39 = vpop.f32.mrf.mxu2 }
 0x131   :  { %1352 = vst [vmem:[%s3285_s3 + $0x10] sm:$0xff] %v1348_v55  ;;  %v1317_v59 = vadd.f32 %v1316_v39, %v1298_v52  ;;  %v1335_v60 = vpop.f32.mrf.mxu3 }
 0x132   :  { %1351 = vst [vmem:[%s3285_s3 + $0x8] sm:$0xff] %v1347_v32 }
 0x133   :  { %v1336_v61 = vadd.f32 %v1335_v60, %v1317_v59 }
 0x135   :  { %v1345_v62 = vmax.f32 %v1336_v61, 0.0 }
 0x137   :  { %v1349_v63 = vpack.c.bf16 %v1345_v62, %v1344_v53 }
 0x139   :  { %1353 = vst [vmem:[%s3285_s3 + $0x18] sm:$0xff] %v1349_v63 }

// kernel: psa_relit_pcnet_forward.26
= control target key start
LH: loop header
LB: loop body
LE: loop exit
PB: predicated region body
PF: predicated region fallthrough
CT: control target
= control target key end

     0   :  { %vm118_vm0 = vcmask 1044480   ;;  %vm119_vm1 = vcmask 1045504   ;;  %v380_v2 = vmov 65535   ;;  %vm93_vm2 = vcmask 220160   ;;  %s556_s1 = inlined_call_operand.vmem [shape: bf16[27,32], index: 1, kind: input, shape index: {}]   ;;  %s557_s2 = inlined_call_operand.vmem [shape: f32[1,32], index: 2, kind: input, shape index: {}]   ;;  %s558_s0 = inlined_call_operand.vmem [shape: bf16[128,27], index: 0, kind: input, shape index: {}]   ;;  %s559_s3 = inlined_call_operand.vmem [shape: bf16[128,32], index: 3, kind: input, shape index: {}]   ;;  %s560_s4 = inlined_call_operand.vmem [shape: bf16[128,32], index: 4, kind: output, shape index: {}]  }
   0x1   :  { %v313_v0 = vld [vmem:[%s556_s1 + $0x8] sm:$0xf]  ;;  %v332_v1 = vld [vmem:[%s556_s1 + $0x8] sm:$0x30]  ;;  %v120_v3 = vsel %vm118_vm0, 4294967295, %v380_v2  ;;  %v331_v7 = vld [vmem:[%s556_s1] sm:$0xff] }
   0x2   :  { %v314_v4 = vor.u32 %v332_v1, %v313_v0  ;;  %v121_v5 = vsel %vm119_vm1, %v120_v3, 0  ;;  %v323_v8 = vld [vmem:[%s558_s0] sm:$0xff]  ;;  %v325_v9 = vld [vmem:[%s558_s0 + $0x10] sm:$0xff]  ;;  %v324_v12 = vld [vmem:[%s558_s0 + $0x8] sm:$0xff]  ;;  %vm254_vm3 = vcmask 257024  }
   0x3   :  { %v327_v10 = vld [vmem:[%s558_s0 + $0x20] sm:$0xff]  ;;  %v329_v11 = vld [vmem:[%s558_s0 + $0x30] sm:$0xff]  ;;  %v326_v13 = vld [vmem:[%s558_s0 + $0x18] sm:$0xff] }
   0x4   :  { %v123_v6 = vand.u32 %v314_v4, %v121_v5  ;;  %v328_v14 = vld [vmem:[%s558_s0 + $0x28] sm:$0xff]  ;;  %v330_v15 = vld [vmem:[%s558_s0 + $0x38] sm:$0xff]  ;;  %v334_v16 = vld [vmem:[%s559_s3] sm:$0xff]  }
   0x5   :  { %v366_v17 = vld [vmem:[%s559_s3 + $0x10] sm:$0xff]   ;;  %v456_v18 = vld [vmem:[%s557_s2] ss:$0 sm:$0xff]  ;;  %v335_v19 = vunpack.c.l.bf16 %v334_v16  ;;  %v336_v37 = vunpack.c.h.bf16 %v334_v16  ;;  %v365_v51 = vld [vmem:[%s559_s3 + $0x8] sm:$0xff]  }
   0x6   :  { %131 = vmatpush.bf16.msra.mxu0 %v123_v6  ;;  %372 = vmatpush.bf16.msra.mxu1 %v123_v6  ;;  %v343_v20 = vunpack.c.l.bf16 %v366_v17  ;;  %v368_v27 = vld [vmem:[%s559_s3 + $0x20] sm:$0xff]   ;;  %v370_v28 = vld [vmem:[%s559_s3 + $0x30] sm:$0xff]   ;;  %v344_v38 = vunpack.c.h.bf16 %v366_v17  ;;  %v367_v52 = vld [vmem:[%s559_s3 + $0x18] sm:$0xff]   ;;  %v339_v63 = vunpack.c.l.bf16 %v365_v51 }
   0x7   :  { %373 = vmatpush.bf16.msra.mxu2 %v123_v6  ;;  %374 = vmatpush.bf16.msra.mxu3 %v123_v6  ;;  %v351_v31 = vunpack.c.l.bf16 %v368_v27  ;;  %v359_v32 = vunpack.c.l.bf16 %v370_v28  ;;  %v352_v57 = vunpack.c.h.bf16 %v368_v27  ;;  %v360_v58 = vunpack.c.h.bf16 %v370_v28 }
   0x8   :  { %v347_v0 = vunpack.c.l.bf16 %v367_v52  ;;  %v348_v27 = vunpack.c.h.bf16 %v367_v52 }
   0xa   :  { %132 = vmatpush.bf16.msra.mxu0 %v331_v7  ;;  %375 = vmatpush.bf16.msra.mxu1 %v331_v7 }
   0xb   :  { %376 = vmatpush.bf16.msra.mxu2 %v331_v7  ;;  %377 = vmatpush.bf16.msra.mxu3 %v331_v7 }
   0xd   :  { %315 = vmatmul.msk.bf16.vlgmr.msra.gmra.mxu0 %vm93_vm2, %v323_v8  ;;  %317 = vmatmul.msk.bf16.vlgmr.msra.gmra.mxu1 %vm93_vm2, %v325_v9 }
   0xe   :  { %319 = vmatmul.msk.bf16.vlgmr.msra.gmra.mxu2 %vm93_vm2, %v327_v10  ;;  %321 = vmatmul.msk.bf16.vlgmr.msra.gmra.mxu3 %vm93_vm2, %v329_v11  ;;  %v369_v11 = vld [vmem:[%s559_s3 + $0x28] sm:$0xff]  }
  0x1d   :  { %316 = vmatmul.msk.bf16.gmra.mxu0 %vm93_vm2, %v324_v12  ;;  %318 = vmatmul.msk.bf16.gmra.mxu1 %vm93_vm2, %v326_v13  ;;  %v371_v12 = vld [vmem:[%s559_s3 + $0x38] sm:$0xff]  }
  0x1e   :  { %320 = vmatmul.msk.bf16.gmra.mxu2 %vm93_vm2, %v328_v14  ;;  %322 = vmatmul.msk.bf16.gmra.mxu3 %vm93_vm2, %v330_v15 }
  0x8a   :  { %v134_v21 = vpop.f32.mrf.mxu0  ;;  %v144_v22 = vpop.f32.mrf.mxu1 }
  0x8b   :  { %v135_v23 = vadd.f32 %v456_v18, %v134_v21  ;;  %v145_v24 = vadd.f32 %v456_v18, %v144_v22  ;;  %v363_v21 = vunpack.c.l.bf16 %v371_v12 }
  0x8d   :  { %v206_v25 = vadd.f32 %v335_v19, %v135_v23  ;;  %v210_v26 = vadd.f32 %v343_v20, %v145_v24  ;;  %v355_v20 = vunpack.c.l.bf16 %v369_v11 }
  0x8f   :  { %v222_v29 = vmax.f32 %v206_v25, 0.0  ;;  %v226_v30 = vmax.f32 %v210_v26, 0.0  ;;  %v340_v26 = vunpack.c.h.bf16 %v365_v51 }
  0x91   :  { %v238_v33 = vpack.c.bf16 %v222_v29, %v222_v29  ;;  %v242_v34 = vpack.c.bf16 %v226_v30, %v226_v30  ;;  %v154_v35 = vpop.f32.mrf.mxu2  ;;  %v164_v36 = vpop.f32.mrf.mxu3 }
  0x92   :  { %v155_v39 = vadd.f32 %v456_v18, %v154_v35  ;;  %v165_v40 = vadd.f32 %v456_v18, %v164_v36  ;;  %v136_v41 = vpop.f32.mrf.mxu0  ;;  %v146_v42 = vpop.f32.mrf.mxu1 }
  0x93   :  { %255 = vst.msk [vmem:[%s560_s4] sm:$0xf] %vm254_vm3, %v238_v33  ;;  %v137_v43 = vadd.f32 %v456_v18, %v136_v41  ;;  %v147_v44 = vadd.f32 %v456_v18, %v146_v42 }
  0x94   :  { %259 = vst.msk [vmem:[%s560_s4 + $0x10] sm:$0xf] %vm254_vm3, %v242_v34  ;;  %v214_v45 = vadd.f32 %v351_v31, %v155_v39  ;;  %v218_v46 = vadd.f32 %v359_v32, %v165_v40 }
  0x95   :  { %v207_v47 = vadd.f32 %v336_v37, %v137_v43  ;;  %v211_v48 = vadd.f32 %v344_v38, %v147_v44  ;;  %v356_v44 = vunpack.c.h.bf16 %v369_v11 }
  0x96   :  { %v230_v49 = vmax.f32 %v214_v45, 0.0  ;;  %v234_v50 = vmax.f32 %v218_v46, 0.0  ;;  %v364_v45 = vunpack.c.h.bf16 %v371_v12 }
  0x97   :  { %v223_v53 = vmax.f32 %v207_v47, 0.0  ;;  %v227_v54 = vmax.f32 %v211_v48, 0.0 }
  0x98   :  { %v246_v55 = vpack.c.bf16 %v230_v49, %v230_v49  ;;  %v250_v56 = vpack.c.bf16 %v234_v50, %v234_v50 }
  0x99   :  { %v239_v59 = vpack.c.bf16 %v223_v53, %v223_v53  ;;  %v243_v60 = vpack.c.bf16 %v227_v54, %v227_v54  ;;  %v156_v61 = vpop.f32.mrf.mxu2  ;;  %v166_v62 = vpop.f32.mrf.mxu3 }
  0x9a   :  { %263 = vst.msk [vmem:[%s560_s4 + $0x20] sm:$0xf] %vm254_vm3, %v246_v55  ;;  %v157_v1 = vadd.f32 %v456_v18, %v156_v61  ;;  %v167_v2 = vadd.f32 %v456_v18, %v166_v62  ;;  %v139_v3 = vpop.f32.mrf.mxu0  ;;  %v149_v4 = vpop.f32.mrf.mxu1 }
  0x9b   :  { %267 = vst.msk [vmem:[%s560_s4 + $0x30] sm:$0xf] %vm254_vm3, %v250_v56  ;;  %v140_v5 = vadd.f32 %v456_v18, %v139_v3  ;;  %v150_v6 = vadd.f32 %v456_v18, %v149_v4 }
  0x9c   :  { %256 = vst.msk [vmem:[%s560_s4 + $0x4] sm:$0xf] %vm254_vm3, %v239_v59  ;;  %v215_v7 = vadd.f32 %v352_v57, %v157_v1  ;;  %v219_v8 = vadd.f32 %v360_v58, %v167_v2 }
  0x9d   :  { %260 = vst.msk [vmem:[%s560_s4 + $0x14] sm:$0xf] %vm254_vm3, %v243_v60  ;;  %v208_v9 = vadd.f32 %v339_v63, %v140_v5  ;;  %v212_v10 = vadd.f32 %v347_v0, %v150_v6 }
  0x9e   :  { %v231_v13 = vmax.f32 %v215_v7, 0.0  ;;  %v235_v14 = vmax.f32 %v219_v8, 0.0 }
  0x9f   :  { %v224_v15 = vmax.f32 %v208_v9, 0.0  ;;  %v228_v16 = vmax.f32 %v212_v10, 0.0 }
  0xa0   :  { %v247_v17 = vpack.c.bf16 %v231_v13, %v231_v13  ;;  %v251_v19 = vpack.c.bf16 %v235_v14, %v235_v14 }
  0xa1   :  { %v240_v22 = vpack.c.bf16 %v224_v15, %v224_v15  ;;  %v244_v23 = vpack.c.bf16 %v228_v16, %v228_v16  ;;  %v159_v24 = vpop.f32.mrf.mxu2  ;;  %v169_v25 = vpop.f32.mrf.mxu3 }
  0xa2   :  { %264 = vst.msk [vmem:[%s560_s4 + $0x24] sm:$0xf] %vm254_vm3, %v247_v17  ;;  %v160_v28 = vadd.f32 %v456_v18, %v159_v24  ;;  %v170_v29 = vadd.f32 %v456_v18, %v169_v25  ;;  %v141_v30 = vpop.f32.mrf.mxu0  ;;  %v151_v31 = vpop.f32.mrf.mxu1 }
  0xa3   :  { %268 = vst.msk [vmem:[%s560_s4 + $0x34] sm:$0xf] %vm254_vm3, %v251_v19  ;;  %v142_v32 = vadd.f32 %v456_v18, %v141_v30  ;;  %v152_v33 = vadd.f32 %v456_v18, %v151_v31 }
  0xa4   :  { %257 = vst.msk [vmem:[%s560_s4 + $0x8] sm:$0xf] %vm254_vm3, %v240_v22  ;;  %v216_v34 = vadd.f32 %v355_v20, %v160_v28  ;;  %v220_v35 = vadd.f32 %v363_v21, %v170_v29 }
  0xa5   :  { %261 = vst.msk [vmem:[%s560_s4 + $0x18] sm:$0xf] %vm254_vm3, %v244_v23  ;;  %v209_v36 = vadd.f32 %v340_v26, %v142_v32  ;;  %v213_v37 = vadd.f32 %v348_v27, %v152_v33 }
  0xa6   :  { %v232_v38 = vmax.f32 %v216_v34, 0.0  ;;  %v236_v39 = vmax.f32 %v220_v35, 0.0 }
  0xa7   :  { %v225_v40 = vmax.f32 %v209_v36, 0.0  ;;  %v229_v41 = vmax.f32 %v213_v37, 0.0 }
  0xa8   :  { %v248_v42 = vpack.c.bf16 %v232_v38, %v232_v38  ;;  %v252_v43 = vpack.c.bf16 %v236_v39, %v236_v39 }
  0xa9   :  { %v241_v46 = vpack.c.bf16 %v225_v40, %v225_v40  ;;  %v245_v47 = vpack.c.bf16 %v229_v41, %v229_v41  ;;  %v161_v48 = vpop.f32.mrf.mxu2  ;;  %v171_v49 = vpop.f32.mrf.mxu3 }
  0xaa   :  { %265 = vst.msk [vmem:[%s560_s4 + $0x28] sm:$0xf] %vm254_vm3, %v248_v42  ;;  %v162_v50 = vadd.f32 %v456_v18, %v161_v48  ;;  %v172_v51 = vadd.f32 %v456_v18, %v171_v49 }
  0xab   :  { %269 = vst.msk [vmem:[%s560_s4 + $0x38] sm:$0xf] %vm254_vm3, %v252_v43 }
  0xac   :  { %258 = vst.msk [vmem:[%s560_s4 + $0xc] sm:$0xf] %vm254_vm3, %v241_v46  ;;  %v217_v52 = vadd.f32 %v356_v44, %v162_v50  ;;  %v221_v53 = vadd.f32 %v364_v45, %v172_v51 }
  0xad   :  { %262 = vst.msk [vmem:[%s560_s4 + $0x1c] sm:$0xf] %vm254_vm3, %v245_v47 }
  0xae   :  { %v233_v54 = vmax.f32 %v217_v52, 0.0  ;;  %v237_v55 = vmax.f32 %v221_v53, 0.0 }
  0xb0   :  { %v249_v18 = vpack.c.bf16 %v233_v54, %v233_v54  ;;  %v253_v56 = vpack.c.bf16 %v237_v55, %v237_v55 }
  0xb2   :  { %266 = vst.msk [vmem:[%s560_s4 + $0x2c] sm:$0xf] %vm254_vm3, %v249_v18 }
  0xb3   :  { %270 = vst.msk [vmem:[%s560_s4 + $0x3c] sm:$0xf] %vm254_vm3, %v253_v56 }

// kernel: psa_relit_pcnet_forward.30
= control target key start
LH: loop header
LB: loop body
LE: loop exit
PB: predicated region body
PF: predicated region fallthrough
CT: control target
= control target key end

     0   :  { %s1027_s1 = inlined_call_operand.vmem [shape: bf16[640,128], index: 1, kind: input, shape index: {}]   ;;  %s1028_s2 = inlined_call_operand.vmem [shape: f32[1,128], index: 2, kind: input, shape index: {}]   ;;  %s1029_s0 = inlined_call_operand.vmem [shape: bf16[32,640], index: 0, kind: input, shape index: {}]   ;;  %s1030_s3 = inlined_call_operand.vmem [shape: bf16[32,128], index: 3, kind: input, shape index: {}]   ;;  %s1031_s4 = inlined_call_operand.vmem [shape: bf16[32,128], index: 4, kind: output, shape index: {}]  }
   0x1   :  { %v745_v0 = vld [vmem:[%s1027_s1 + $0x38] sm:$0xff]  ;;  %v744_v4 = vld [vmem:[%s1027_s1 + $0x30] sm:$0xff]  ;;  %v743_v8 = vld [vmem:[%s1027_s1 + $0x28] sm:$0xff] }
   0x2   :  { %v753_v1 = vld [vmem:[%s1027_s1 + $0x78] sm:$0xff]  ;;  %405 = vmatpush.bf16.msra.mxu0 %v745_v0  ;;  %v752_v5 = vld [vmem:[%s1027_s1 + $0x70] sm:$0xff]  ;;  %v751_v9 = vld [vmem:[%s1027_s1 + $0x68] sm:$0xff] }
   0x3   :  { %v761_v2 = vld [vmem:[%s1027_s1 + $0xb8] sm:$0xff]  ;;  %424 = vmatpush.bf16.msra.mxu1 %v753_v1  ;;  %v760_v6 = vld [vmem:[%s1027_s1 + $0xb0] sm:$0xff]  ;;  %v759_v10 = vld [vmem:[%s1027_s1 + $0xa8] sm:$0xff] }
   0x4   :  { %v769_v3 = vld [vmem:[%s1027_s1 + $0xf8] sm:$0xff]  ;;  %443 = vmatpush.bf16.msra.mxu2 %v761_v2  ;;  %v768_v7 = vld [vmem:[%s1027_s1 + $0xf0] sm:$0xff]  ;;  %v767_v11 = vld [vmem:[%s1027_s1 + $0xe8] sm:$0xff] }
   0x5   :  { %462 = vmatpush.bf16.msra.mxu3 %v769_v3  ;;  %v742_v12 = vld [vmem:[%s1027_s1 + $0x20] sm:$0xff]  ;;  %v741_v16 = vld [vmem:[%s1027_s1 + $0x18] sm:$0xff]  ;;  %v740_v20 = vld [vmem:[%s1027_s1 + $0x10] sm:$0xff] }
   0x6   :  { %406 = vmatpush.bf16.msra.mxu0 %v744_v4  ;;  %v750_v13 = vld [vmem:[%s1027_s1 + $0x60] sm:$0xff]  ;;  %v749_v17 = vld [vmem:[%s1027_s1 + $0x58] sm:$0xff]  ;;  %v748_v21 = vld [vmem:[%s1027_s1 + $0x50] sm:$0xff] }
   0x7   :  { %425 = vmatpush.bf16.msra.mxu1 %v752_v5  ;;  %v758_v14 = vld [vmem:[%s1027_s1 + $0xa0] sm:$0xff]  ;;  %v757_v18 = vld [vmem:[%s1027_s1 + $0x98] sm:$0xff]  ;;  %v756_v22 = vld [vmem:[%s1027_s1 + $0x90] sm:$0xff] }
   0x8   :  { %444 = vmatpush.bf16.msra.mxu2 %v760_v6  ;;  %v766_v15 = vld [vmem:[%s1027_s1 + $0xe0] sm:$0xff]  ;;  %v765_v19 = vld [vmem:[%s1027_s1 + $0xd8] sm:$0xff]  ;;  %v764_v23 = vld [vmem:[%s1027_s1 + $0xd0] sm:$0xff] }
   0x9   :  { %463 = vmatpush.bf16.msra.mxu3 %v768_v7  ;;  %v739_v24 = vld [vmem:[%s1027_s1 + $0x8] sm:$0xff]  ;;  %v738_v28 = vld [vmem:[%s1027_s1] sm:$0xff]  ;;  %v730_v33 = vld [vmem:[%s1029_s0 + $0x10] sm:$0xf0] }
   0xa   :  { %407 = vmatpush.bf16.msra.mxu0 %v743_v8  ;;  %v747_v25 = vld [vmem:[%s1027_s1 + $0x48] sm:$0xff]  ;;  %v746_v29 = vld [vmem:[%s1027_s1 + $0x40] sm:$0xff]  ;;  %v532_v35 = vld [vmem:[%s1029_s0 + $0x14] sm:$0xf0] }
   0xb   :  { %426 = vmatpush.bf16.msra.mxu1 %v751_v9  ;;  %v755_v26 = vld [vmem:[%s1027_s1 + $0x88] sm:$0xff]  ;;  %v754_v30 = vld [vmem:[%s1027_s1 + $0x80] sm:$0xff]  ;;  %v731_v37 = vld [vmem:[%s1029_s0 + $0x18] sm:$0xf0] }
   0xc   :  { %445 = vmatpush.bf16.msra.mxu2 %v759_v10  ;;  %v763_v27 = vld [vmem:[%s1027_s1 + $0xc8] sm:$0xff]  ;;  %v762_v31 = vld [vmem:[%s1027_s1 + $0xc0] sm:$0xff]  ;;  %v777_v40 = vld [vmem:[%s1027_s1 + $0x138] sm:$0xff] }
   0xd   :  { %464 = vmatpush.bf16.msra.mxu3 %v767_v11  ;;  %v530_v32 = vld [vmem:[%s1029_s0] sm:$0xf]  ;;  %v728_v34 = vld [vmem:[%s1029_s0 + $0x4] sm:$0xf]  ;;  %v538_v36 = vld [vmem:[%s1029_s0 + $0x8] sm:$0xf] }
   0xe   :  { %408 = vmatpush.bf16.msra.mxu0 %v742_v12  ;;  %v729_v38 = vld [vmem:[%s1029_s0 + $0xc] sm:$0xf]  ;;  %v540_v39 = vld [vmem:[%s1029_s0 + $0x1c] sm:$0xf0]  ;;  %v531_v41 = vor.u32 %v730_v33, %v530_v32  ;;  %v535_v42 = vor.u32 %v728_v34, %v532_v35  ;;  %v539_v43 = vor.u32 %v731_v37, %v538_v36  ;;  %v776_v45 = vld [vmem:[%s1027_s1 + $0x130] sm:$0xff] }
   0xf   :  { %427 = vmatpush.bf16.msra.mxu1 %v750_v13  ;;  %v543_v44 = vor.u32 %v729_v38, %v540_v39  ;;  %v775_v46 = vld [vmem:[%s1027_s1 + $0x128] sm:$0xff]  ;;  %v774_v47 = vld [vmem:[%s1027_s1 + $0x120] sm:$0xff]  ;;  %v735_v49 = vld [vmem:[%s1029_s0 + $0x38] sm:$0xf0] }
  0x10   :  { %446 = vmatpush.bf16.msra.mxu2 %v758_v14  ;;  %v550_v48 = vld [vmem:[%s1029_s0 + $0x28] sm:$0xf]  ;;  %v733_v50 = vld [vmem:[%s1029_s0 + $0x2c] sm:$0xf]  ;;  %v552_v51 = vld [vmem:[%s1029_s0 + $0x3c] sm:$0xf0] }
  0x11   :  { %465 = vmatpush.bf16.msra.mxu3 %v766_v15  ;;  %v558_v52 = vld [vmem:[%s1029_s0 + $0x30] sm:$0xf]  ;;  %v736_v53 = vld [vmem:[%s1029_s0 + $0x40] sm:$0xf0]  ;;  %v734_v54 = vld [vmem:[%s1029_s0 + $0x34] sm:$0xf]  ;;  %v551_v57 = vor.u32 %v735_v49, %v550_v48  ;;  %v555_v58 = vor.u32 %v733_v50, %v552_v51 }
  0x12   :  { %409 = vmatpush.bf16.msra.mxu0 %v741_v16  ;;  %v560_v55 = vld [vmem:[%s1029_s0 + $0x44] sm:$0xf0]  ;;  %v773_v56 = vld [vmem:[%s1027_s1 + $0x118] sm:$0xff]  ;;  %v559_v59 = vor.u32 %v736_v53, %v558_v52  ;;  %v772_v61 = vld [vmem:[%s1027_s1 + $0x110] sm:$0xff] }
  0x13   :  { %428 = vmatpush.bf16.msra.mxu1 %v749_v17  ;;  %v563_v60 = vor.u32 %v734_v54, %v560_v55  ;;  %v771_v62 = vld [vmem:[%s1027_s1 + $0x108] sm:$0xff]  ;;  %v770_v63 = vld [vmem:[%s1027_s1 + $0x100] sm:$0xff]  ;;  %v546_v0 = vld [vmem:[%s1029_s0 + $0x10] sm:$0xf] }
  0x14   :  { %447 = vmatpush.bf16.msra.mxu2 %v757_v18  ;;  %v732_v1 = vld [vmem:[%s1029_s0 + $0x20] sm:$0xf0]  ;;  %v566_v2 = vld [vmem:[%s1029_s0 + $0x38] sm:$0xf]  ;;  %v737_v3 = vld [vmem:[%s1029_s0 + $0x48] sm:$0xf0] }
  0x15   :  { %466 = vmatpush.bf16.msra.mxu3 %v765_v19  ;;  %v547_v4 = vor.u32 %v732_v1, %v546_v0  ;;  %v567_v5 = vor.u32 %v737_v3, %v566_v2  ;;  %v806_v16 = vld [vmem:[%s1028_s2] ss:$0 sm:$0xff]  ;;  %v796_v35 = vld [vmem:[%s1030_s3 + $0x8] sm:$0xff]  }
  0x16   :  { %410 = vmatpush.bf16.msra.mxu0 %v740_v20  ;;  %v779_v34 = vld [vmem:[%s1030_s3] sm:$0xff]   ;;  %v785_v48 = vunpack.c.h.bf16 %v796_v35 }
  0x17   :  { %429 = vmatpush.bf16.msra.mxu1 %v748_v21 }
  0x18   :  { %448 = vmatpush.bf16.msra.mxu2 %v756_v22 }
  0x19   :  { %467 = vmatpush.bf16.msra.mxu3 %v764_v23 }
  0x1a   :  { %411 = vmatpush.bf16.msra.mxu0 %v739_v24 }
  0x1b   :  { %430 = vmatpush.bf16.msra.mxu1 %v747_v25 }
  0x1c   :  { %449 = vmatpush.bf16.msra.mxu2 %v755_v26 }
  0x1d   :  { %468 = vmatpush.bf16.msra.mxu3 %v763_v27 }
  0x1e   :  { %412 = vmatpush.bf16.msra.mxu0 %v738_v28 }
  0x1f   :  { %431 = vmatpush.bf16.msra.mxu1 %v746_v29 }
  0x20   :  { %450 = vmatpush.bf16.msra.mxu2 %v754_v30 }
  0x21   :  { %469 = vmatpush.bf16.msra.mxu3 %v762_v31  ;;  %413 = vmatmul.bf16.vlgmr.msra.gmra.mxu0 %v531_v41  ;;  %v780_v41 = vunpack.c.l.bf16 %v779_v34 }
  0x22   :  { %481 = vmatpush.bf16.msrb.mxu0 %v777_v40  ;;  %432 = vmatmul.bf16.vlgmr.msra.gmra.mxu1 %v535_v42 }
  0x23   :  { %798 = vmatpush.bf16.msrb.mxu1 %v777_v40  ;;  %451 = vmatmul.bf16.vlgmr.msra.gmra.mxu2 %v539_v43  ;;  %v784_v43 = vunpack.c.l.bf16 %v796_v35 }
  0x24   :  { %470 = vmatmul.bf16.vlgmr.msra.gmra.mxu3 %v543_v44 }
  0x26   :  { %482 = vmatpush.bf16.msrb.mxu0 %v776_v45 }
  0x27   :  { %799 = vmatpush.bf16.msrb.mxu1 %v776_v45 }
  0x2a   :  { %483 = vmatpush.bf16.msrb.mxu0 %v775_v46 }
  0x2b   :  { %800 = vmatpush.bf16.msrb.mxu1 %v775_v46 }
  0x2e   :  { %484 = vmatpush.bf16.msrb.mxu0 %v774_v47 }
  0x2f   :  { %801 = vmatpush.bf16.msrb.mxu1 %v774_v47  ;;  %v781_v47 = vunpack.c.h.bf16 %v779_v34 }
  0x31   :  { %418 = vmatmul.bf16.gmra.mxu0 %v551_v57 }
  0x32   :  { %485 = vmatpush.bf16.msrb.mxu0 %v773_v56  ;;  %437 = vmatmul.bf16.gmra.mxu1 %v555_v58 }
  0x33   :  { %802 = vmatpush.bf16.msrb.mxu1 %v773_v56  ;;  %456 = vmatmul.bf16.gmra.mxu2 %v559_v59 }
  0x34   :  { %475 = vmatmul.bf16.gmra.mxu3 %v563_v60 }
  0x36   :  { %486 = vmatpush.bf16.msrb.mxu0 %v772_v61 }
  0x37   :  { %803 = vmatpush.bf16.msrb.mxu1 %v772_v61 }
  0x3a   :  { %487 = vmatpush.bf16.msrb.mxu0 %v771_v62 }
  0x3b   :  { %804 = vmatpush.bf16.msrb.mxu1 %v771_v62 }
  0x3e   :  { %488 = vmatpush.bf16.msrb.mxu0 %v770_v63 }
  0x3f   :  { %805 = vmatpush.bf16.msrb.mxu1 %v770_v63 }
  0x41   :  { %489 = vmatmul.bf16.vlgmr.msrb.gmra.mxu0 %v547_v4 }
  0x42   :  { %494 = vmatmul.bf16.vlgmr.msrb.gmra.mxu1 %v567_v5 }
  0x9e   :  { %v414_v6 = vpop.f32.mrf.mxu0 }
  0x9f   :  { %v433_v7 = vpop.f32.mrf.mxu1  ;;  %v415_v20 = vadd.f32 %v806_v16, %v414_v6 }
  0xa1   :  { %v434_v23 = vadd.f32 %v433_v7, %v415_v20 }
  0xa6   :  { %v452_v8 = vpop.f32.mrf.mxu2  ;;  %v416_v10 = vpop.f32.mrf.mxu0 }
  0xa7   :  { %v471_v9 = vpop.f32.mrf.mxu3  ;;  %v435_v11 = vpop.f32.mrf.mxu1  ;;  %v417_v24 = vadd.f32 %v806_v16, %v416_v10  ;;  %v453_v27 = vadd.f32 %v452_v8, %v434_v23 }
  0xa9   :  { %v436_v32 = vadd.f32 %v435_v11, %v417_v24  ;;  %v472_v36 = vadd.f32 %v471_v9, %v453_v27 }
  0xae   :  { %v454_v12 = vpop.f32.mrf.mxu2  ;;  %v419_v13 = vpop.f32.mrf.mxu0 }
  0xaf   :  { %v438_v14 = vpop.f32.mrf.mxu1  ;;  %v473_v15 = vpop.f32.mrf.mxu3  ;;  %v420_v21 = vadd.f32 %v806_v16, %v419_v13  ;;  %v455_v37 = vadd.f32 %v454_v12, %v436_v32 }
  0xb1   :  { %v439_v25 = vadd.f32 %v438_v14, %v420_v21  ;;  %v474_v45 = vadd.f32 %v473_v15, %v455_v37 }
  0xb6   :  { %v457_v17 = vpop.f32.mrf.mxu2  ;;  %v421_v18 = vpop.f32.mrf.mxu0 }
  0xb7   :  { %v440_v19 = vpop.f32.mrf.mxu1  ;;  %v476_v22 = vpop.f32.mrf.mxu3  ;;  %v422_v26 = vadd.f32 %v806_v16, %v421_v18  ;;  %v458_v28 = vadd.f32 %v457_v17, %v439_v25 }
  0xb9   :  { %v441_v33 = vadd.f32 %v440_v19, %v422_v26  ;;  %v477_v38 = vadd.f32 %v476_v22, %v458_v28 }
  0xbe   :  { %v459_v29 = vpop.f32.mrf.mxu2  ;;  %v490_v30 = vpop.f32.mrf.mxu0 }
  0xbf   :  { %v495_v31 = vpop.f32.mrf.mxu1  ;;  %v460_v39 = vadd.f32 %v459_v29, %v441_v33  ;;  %v491_v40 = vadd.f32 %v490_v30, %v472_v36  ;;  %v478_v44 = vpop.f32.mrf.mxu3 }
  0xc0   :  { %v496_v42 = vadd.f32 %v495_v31, %v477_v38 }
  0xc1   :  { %v479_v46 = vadd.f32 %v478_v44, %v460_v39  ;;  %v508_v51 = vadd.f32 %v780_v41, %v491_v40 }
  0xc2   :  { %v510_v52 = vadd.f32 %v784_v43, %v496_v42 }
  0xc3   :  { %v512_v57 = vmax.f32 %v508_v51, 0.0 }
  0xc4   :  { %v514_v58 = vmax.f32 %v510_v52, 0.0 }
  0xc6   :  { %v492_v49 = vpop.f32.mrf.mxu0 }
  0xc7   :  { %v497_v50 = vpop.f32.mrf.mxu1  ;;  %v493_v53 = vadd.f32 %v492_v49, %v474_v45 }
  0xc8   :  { %v498_v54 = vadd.f32 %v497_v50, %v479_v46 }
  0xc9   :  { %v509_v55 = vadd.f32 %v781_v47, %v493_v53 }
  0xca   :  { %v511_v56 = vadd.f32 %v785_v48, %v498_v54 }
  0xcb   :  { %v513_v59 = vmax.f32 %v509_v55, 0.0 }
  0xcc   :  { %v515_v60 = vmax.f32 %v511_v56, 0.0 }
  0xcd   :  { %v789_v61 = vpack.c.bf16 %v513_v59, %v512_v57 }
  0xce   :  { %v794_v62 = vpack.c.bf16 %v515_v60, %v514_v58 }
  0xcf   :  { %790 = vst [vmem:[%s1031_s4] sm:$0xff] %v789_v61  }
  0xd0   :  { %797 = vst [vmem:[%s1031_s4 + $0x8] sm:$0xff] %v794_v62  }

// kernel: psa_relit_pcnet_forward.31
= control target key start
LH: loop header
LB: loop body
LE: loop exit
PB: predicated region body
PF: predicated region fallthrough
CT: control target
= control target key end

     0   :  { %s3319_s1 = inlined_call_operand.vmem [shape: bf16[1152,256], index: 1, kind: input, shape index: {}]   ;;  %s3320_s0 = inlined_call_operand.vmem [shape: bf16[32,1152], index: 0, kind: input, shape index: {}]   ;;  %s3321_s2 = inlined_call_operand.vmem [shape: f32[1,256], index: 2, kind: input, shape index: {}]   ;;  %s3322_s3 = inlined_call_operand.vmem [shape: bf16[32,256], index: 3, kind: input, shape index: {}]   ;;  %s3323_s4 = inlined_call_operand.vmem [shape: bf16[32,256], index: 4, kind: output, shape index: {}]  }
   0x1   :  { %v1511_v0 = vld [vmem:[%s3319_s1 + $0x70] sm:$0xf]  ;;  %v2062_v1 = vld [vmem:[%s3319_s1 + $0x74] sm:$0xf0]  ;;  %v1503_v11 = vld [vmem:[%s3319_s1 + $0x60] sm:$0xf] }
   0x2   :  { %v1575_v2 = vld [vmem:[%s3319_s1 + $0xf0] sm:$0xf]  ;;  %v1512_v3 = vor.u32 %v2062_v1, %v1511_v0  ;;  %v2078_v4 = vld [vmem:[%s3319_s1 + $0xf4] sm:$0xf0]  ;;  %v2060_v13 = vld [vmem:[%s3319_s1 + $0x64] sm:$0xf0] }
   0x3   :  { %v1639_v5 = vld [vmem:[%s3319_s1 + $0x170] sm:$0xf]  ;;  %v2094_v6 = vld [vmem:[%s3319_s1 + $0x174] sm:$0xf0]  ;;  %v1576_v7 = vor.u32 %v2078_v4, %v1575_v2  ;;  %v1567_v14 = vld [vmem:[%s3319_s1 + $0xe0] sm:$0xf]  ;;  %v1504_v16 = vor.u32 %v2060_v13, %v1503_v11 }
   0x4   :  { %v1640_v8 = vor.u32 %v2094_v6, %v1639_v5  ;;  %v1703_v9 = vld [vmem:[%s3319_s1 + $0x1f0] sm:$0xf]  ;;  %v2110_v10 = vld [vmem:[%s3319_s1 + $0x1f4] sm:$0xf0]  ;;  %999 = vmatpush.bf16.msra.mxu0 %v1512_v3  ;;  %v2076_v15 = vld [vmem:[%s3319_s1 + $0xe4] sm:$0xf0] }
   0x5   :  { %v1704_v12 = vor.u32 %v2110_v10, %v1703_v9  ;;  %1018 = vmatpush.bf16.msra.mxu1 %v1576_v7  ;;  %v1568_v17 = vor.u32 %v2076_v15, %v1567_v14  ;;  %v1631_v18 = vld [vmem:[%s3319_s1 + $0x160] sm:$0xf]  ;;  %v2092_v19 = vld [vmem:[%s3319_s1 + $0x164] sm:$0xf0]  ;;  %v1495_v23 = vld [vmem:[%s3319_s1 + $0x50] sm:$0xf] }
   0x6   :  { %1037 = vmatpush.bf16.msra.mxu2 %v1640_v8  ;;  %v1695_v20 = vld [vmem:[%s3319_s1 + $0x1e0] sm:$0xf]  ;;  %v1632_v21 = vor.u32 %v2092_v19, %v1631_v18  ;;  %v2108_v22 = vld [vmem:[%s3319_s1 + $0x1e4] sm:$0xf0]  ;;  %v2058_v24 = vld [vmem:[%s3319_s1 + $0x54] sm:$0xf0] }
   0x7   :  { %1056 = vmatpush.bf16.msra.mxu3 %v1704_v12  ;;  %v1696_v25 = vor.u32 %v2108_v22, %v1695_v20  ;;  %v1559_v26 = vld [vmem:[%s3319_s1 + $0xd0] sm:$0xf]  ;;  %v2074_v27 = vld [vmem:[%s3319_s1 + $0xd4] sm:$0xf0]  ;;  %v1496_v29 = vor.u32 %v2058_v24, %v1495_v23  ;;  %v1487_v35 = vld [vmem:[%s3319_s1 + $0x40] sm:$0xf] }
   0x8   :  { %v1623_v28 = vld [vmem:[%s3319_s1 + $0x150] sm:$0xf]  ;;  %1000 = vmatpush.bf16.msra.mxu0 %v1504_v16  ;;  %v2090_v30 = vld [vmem:[%s3319_s1 + $0x154] sm:$0xf0]  ;;  %v1560_v33 = vor.u32 %v2074_v27, %v1559_v26  ;;  %v2056_v36 = vld [vmem:[%s3319_s1 + $0x44] sm:$0xf0] }
   0x9   :  { %v1687_v31 = vld [vmem:[%s3319_s1 + $0x1d0] sm:$0xf]  ;;  %v2106_v32 = vld [vmem:[%s3319_s1 + $0x1d4] sm:$0xf0]  ;;  %1019 = vmatpush.bf16.msra.mxu1 %v1568_v17  ;;  %v1624_v34 = vor.u32 %v2090_v30, %v1623_v28  ;;  %v1551_v37 = vld [vmem:[%s3319_s1 + $0xc0] sm:$0xf]  ;;  %v1488_v44 = vor.u32 %v2056_v36, %v1487_v35 }
   0xa   :  { %1038 = vmatpush.bf16.msra.mxu2 %v1632_v21  ;;  %v1688_v38 = vor.u32 %v2106_v32, %v1687_v31  ;;  %v2072_v39 = vld [vmem:[%s3319_s1 + $0xc4] sm:$0xf0]  ;;  %v1615_v40 = vld [vmem:[%s3319_s1 + $0x140] sm:$0xf]  ;;  %v1479_v47 = vld [vmem:[%s3319_s1 + $0x30] sm:$0xf] }
   0xb   :  { %1057 = vmatpush.bf16.msra.mxu3 %v1696_v25  ;;  %v2088_v41 = vld [vmem:[%s3319_s1 + $0x144] sm:$0xf0]  ;;  %v1679_v42 = vld [vmem:[%s3319_s1 + $0x1c0] sm:$0xf]  ;;  %v1552_v45 = vor.u32 %v2072_v39, %v1551_v37  ;;  %v2054_v48 = vld [vmem:[%s3319_s1 + $0x34] sm:$0xf0] }
   0xc   :  { %v2104_v43 = vld [vmem:[%s3319_s1 + $0x1c4] sm:$0xf0]  ;;  %1001 = vmatpush.bf16.msra.mxu0 %v1496_v29  ;;  %v1616_v46 = vor.u32 %v2088_v41, %v1615_v40  ;;  %v1543_v49 = vld [vmem:[%s3319_s1 + $0xb0] sm:$0xf]  ;;  %v2070_v51 = vld [vmem:[%s3319_s1 + $0xb4] sm:$0xf0]  ;;  %v1480_v56 = vor.u32 %v2054_v48, %v1479_v47 }
   0xd   :  { %1020 = vmatpush.bf16.msra.mxu1 %v1560_v33  ;;  %v1680_v50 = vor.u32 %v2104_v43, %v1679_v42  ;;  %v1607_v52 = vld [vmem:[%s3319_s1 + $0x130] sm:$0xf]  ;;  %v2086_v53 = vld [vmem:[%s3319_s1 + $0x134] sm:$0xf0]  ;;  %v1544_v57 = vor.u32 %v2070_v51, %v1543_v49  ;;  %v1471_v59 = vld [vmem:[%s3319_s1 + $0x20] sm:$0xf] }
   0xe   :  { %1039 = vmatpush.bf16.msra.mxu2 %v1624_v34  ;;  %v1671_v54 = vld [vmem:[%s3319_s1 + $0x1b0] sm:$0xf]  ;;  %v2102_v55 = vld [vmem:[%s3319_s1 + $0x1b4] sm:$0xf0]  ;;  %v1608_v58 = vor.u32 %v2086_v53, %v1607_v52  ;;  %v2052_v60 = vld [vmem:[%s3319_s1 + $0x24] sm:$0xf0] }
   0xf   :  { %1058 = vmatpush.bf16.msra.mxu3 %v1688_v38  ;;  %v1535_v61 = vld [vmem:[%s3319_s1 + $0xa0] sm:$0xf]  ;;  %v1672_v62 = vor.u32 %v2102_v55, %v1671_v54  ;;  %v2068_v63 = vld [vmem:[%s3319_s1 + $0xa4] sm:$0xf0]  ;;  %v1472_v4 = vor.u32 %v2052_v60, %v1471_v59  ;;  %v1463_v7 = vld [vmem:[%s3319_s1 + $0x10] sm:$0xf] }
  0x10   :  { %1002 = vmatpush.bf16.msra.mxu0 %v1488_v44  ;;  %v1599_v0 = vld [vmem:[%s3319_s1 + $0x120] sm:$0xf]  ;;  %v2084_v1 = vld [vmem:[%s3319_s1 + $0x124] sm:$0xf0]  ;;  %v1536_v5 = vor.u32 %v2068_v63, %v1535_v61  ;;  %v2050_v8 = vld [vmem:[%s3319_s1 + $0x14] sm:$0xf0] }
  0x11   :  { %1021 = vmatpush.bf16.msra.mxu1 %v1552_v45  ;;  %v1663_v2 = vld [vmem:[%s3319_s1 + $0x1a0] sm:$0xf]  ;;  %v2100_v3 = vld [vmem:[%s3319_s1 + $0x1a4] sm:$0xf0]  ;;  %v1600_v6 = vor.u32 %v2084_v1, %v1599_v0  ;;  %v1527_v9 = vld [vmem:[%s3319_s1 + $0x90] sm:$0xf]  ;;  %v1464_v17 = vor.u32 %v2050_v8, %v1463_v7 }
  0x12   :  { %1040 = vmatpush.bf16.msra.mxu2 %v1616_v46  ;;  %v1664_v10 = vor.u32 %v2100_v3, %v1663_v2  ;;  %v2066_v11 = vld [vmem:[%s3319_s1 + $0x94] sm:$0xf0]  ;;  %v1591_v12 = vld [vmem:[%s3319_s1 + $0x110] sm:$0xf]  ;;  %v1455_v16 = vld [vmem:[%s3319_s1] sm:$0xf] }
  0x13   :  { %1059 = vmatpush.bf16.msra.mxu3 %v1680_v50  ;;  %v2082_v13 = vld [vmem:[%s3319_s1 + $0x114] sm:$0xf0]  ;;  %v1655_v14 = vld [vmem:[%s3319_s1 + $0x190] sm:$0xf]  ;;  %v2048_v18 = vld [vmem:[%s3319_s1 + $0x4] sm:$0xf0]  ;;  %v1528_v21 = vor.u32 %v2066_v11, %v1527_v9 }
  0x14   :  { %1003 = vmatpush.bf16.msra.mxu0 %v1480_v56  ;;  %v2098_v15 = vld [vmem:[%s3319_s1 + $0x194] sm:$0xf0]  ;;  %v1519_v19 = vld [vmem:[%s3319_s1 + $0x80] sm:$0xf]  ;;  %v2064_v20 = vld [vmem:[%s3319_s1 + $0x84] sm:$0xf0]  ;;  %v1592_v22 = vor.u32 %v2082_v13, %v1591_v12  ;;  %v1456_v34 = vor.u32 %v2048_v18, %v1455_v16 }
  0x15   :  { %1022 = vmatpush.bf16.msra.mxu1 %v1544_v57  ;;  %v1583_v23 = vld [vmem:[%s3319_s1 + $0x100] sm:$0xf]  ;;  %v2080_v24 = vld [vmem:[%s3319_s1 + $0x104] sm:$0xf0]  ;;  %v1656_v26 = vor.u32 %v2098_v15, %v1655_v14  ;;  %v2033_v29 = vld [vmem:[%s3320_s0 + $0x20] sm:$0xf0]  ;;  %v1520_v38 = vor.u32 %v2064_v20, %v1519_v19 }
  0x16   :  { %1041 = vmatpush.bf16.msra.mxu2 %v1608_v58  ;;  %v1647_v25 = vld [vmem:[%s3319_s1 + $0x180] sm:$0xf]  ;;  %v2096_v27 = vld [vmem:[%s3319_s1 + $0x184] sm:$0xf0]  ;;  %v2029_v30 = vld [vmem:[%s3320_s0 + $0x4] sm:$0xf]  ;;  %v1584_v39 = vor.u32 %v2080_v24, %v1583_v23 }
  0x17   :  { %1060 = vmatpush.bf16.msra.mxu3 %v1672_v62  ;;  %v1383_v28 = vld [vmem:[%s3320_s0] sm:$0xf]  ;;  %v1385_v31 = vld [vmem:[%s3320_s0 + $0x24] sm:$0xf0]  ;;  %v1895_v32 = vld [vmem:[%s3319_s1 + $0x370] sm:$0xf]  ;;  %v1648_v43 = vor.u32 %v2096_v27, %v1647_v25 }
  0x18   :  { %1004 = vmatpush.bf16.msra.mxu0 %v1472_v4  ;;  %v2158_v33 = vld [vmem:[%s3319_s1 + $0x374] sm:$0xf0]  ;;  %v1391_v35 = vld [vmem:[%s3320_s0 + $0x8] sm:$0xf]  ;;  %v1831_v36 = vld [vmem:[%s3319_s1 + $0x2f0] sm:$0xf]  ;;  %v2469_v48 = vor.u32 %v2033_v29, %v1383_v28  ;;  %v2480_v53 = vor.u32 %v2029_v30, %v1385_v31 }
  0x19   :  { %1023 = vmatpush.bf16.msra.mxu1 %v1536_v5  ;;  %v2142_v37 = vld [vmem:[%s3319_s1 + $0x2f4] sm:$0xf0]  ;;  %v2034_v40 = vld [vmem:[%s3320_s0 + $0x28] sm:$0xf0]  ;;  %v1393_v42 = vld [vmem:[%s3320_s0 + $0x2c] sm:$0xf0]  ;;  %v1896_v44 = vor.u32 %v2158_v33, %v1895_v32 }
  0x1a   :  { %1042 = vmatpush.bf16.msra.mxu2 %v1600_v6  ;;  %v2030_v41 = vld [vmem:[%s3320_s0 + $0xc] sm:$0xf]  ;;  %v1767_v45 = vld [vmem:[%s3319_s1 + $0x270] sm:$0xf]  ;;  %v2126_v46 = vld [vmem:[%s3319_s1 + $0x274] sm:$0xf0]  ;;  %v1832_v49 = vor.u32 %v2142_v37, %v1831_v36  ;;  %v2482_v54 = vor.u32 %v2034_v40, %v1391_v35 }
  0x1b   :  { %1061 = vmatpush.bf16.msra.mxu3 %v1664_v10  ;;  %v1959_v47 = vld [vmem:[%s3319_s1 + $0x3f0] sm:$0xf]  ;;  %v2174_v50 = vld [vmem:[%s3319_s1 + $0x3f4] sm:$0xf0]  ;;  %v1887_v51 = vld [vmem:[%s3319_s1 + $0x360] sm:$0xf]  ;;  %v2490_v57 = vor.u32 %v2030_v41, %v1393_v42  ;;  %v1768_v58 = vor.u32 %v2126_v46, %v1767_v45 }
  0x1c   :  { %1005 = vmatpush.bf16.msra.mxu0 %v1464_v17  ;;  %v2156_v52 = vld [vmem:[%s3319_s1 + $0x364] sm:$0xf0]  ;;  %v1823_v55 = vld [vmem:[%s3319_s1 + $0x2e0] sm:$0xf]  ;;  %v1960_v59 = vor.u32 %v2174_v50, %v1959_v47  ;;  %v1879_v2 = vld [vmem:[%s3319_s1 + $0x350] sm:$0xf] }
  0x1d   :  { %1024 = vmatpush.bf16.msra.mxu1 %v1528_v21  ;;  %v2140_v56 = vld [vmem:[%s3319_s1 + $0x2e4] sm:$0xf0]  ;;  %v1888_v60 = vor.u32 %v2156_v52, %v1887_v51  ;;  %v1759_v61 = vld [vmem:[%s3319_s1 + $0x260] sm:$0xf]  ;;  %v2154_v3 = vld [vmem:[%s3319_s1 + $0x354] sm:$0xf0] }
  0x1e   :  { %1043 = vmatpush.bf16.msra.mxu2 %v1592_v22  ;;  %v2124_v62 = vld [vmem:[%s3319_s1 + $0x264] sm:$0xf0]  ;;  %v1951_v63 = vld [vmem:[%s3319_s1 + $0x3e0] sm:$0xf]  ;;  %v1824_v0 = vor.u32 %v2140_v56, %v1823_v55  ;;  %v1815_v4 = vld [vmem:[%s3319_s1 + $0x2d0] sm:$0xf]  ;;  %v1880_v8 = vor.u32 %v2154_v3, %v1879_v2 }
  0x1f   :  { %1062 = vmatpush.bf16.msra.mxu3 %v1656_v26  ;;  %v2172_v1 = vld [vmem:[%s3319_s1 + $0x3e4] sm:$0xf0]  ;;  %v2138_v5 = vld [vmem:[%s3319_s1 + $0x2d4] sm:$0xf0]  ;;  %v1760_v6 = vor.u32 %v2124_v62, %v1759_v61  ;;  %v1751_v9 = vld [vmem:[%s3319_s1 + $0x250] sm:$0xf] }
  0x20   :  { %1006 = vmatpush.bf16.msra.mxu0 %v1456_v34  ;;  %v1952_v7 = vor.u32 %v2172_v1, %v1951_v63  ;;  %v2122_v10 = vld [vmem:[%s3319_s1 + $0x254] sm:$0xf0]  ;;  %v1943_v11 = vld [vmem:[%s3319_s1 + $0x3d0] sm:$0xf]  ;;  %v1816_v12 = vor.u32 %v2138_v5, %v1815_v4  ;;  %v1871_v14 = vld [vmem:[%s3319_s1 + $0x340] sm:$0xf] }
  0x21   :  { %1025 = vmatpush.bf16.msra.mxu1 %v1520_v38  ;;  %v2170_v13 = vld [vmem:[%s3319_s1 + $0x3d4] sm:$0xf0]  ;;  %v2152_v15 = vld [vmem:[%s3319_s1 + $0x344] sm:$0xf0]  ;;  %v1807_v16 = vld [vmem:[%s3319_s1 + $0x2c0] sm:$0xf]  ;;  %v1752_v18 = vor.u32 %v2122_v10, %v1751_v9 }
  0x22   :  { %1044 = vmatpush.bf16.msra.mxu2 %v1584_v39  ;;  %v2136_v17 = vld [vmem:[%s3319_s1 + $0x2c4] sm:$0xf0]  ;;  %v1743_v19 = vld [vmem:[%s3319_s1 + $0x240] sm:$0xf]  ;;  %v1944_v22 = vor.u32 %v2170_v13, %v1943_v11  ;;  %v1872_v23 = vor.u32 %v2152_v15, %v1871_v14  ;;  %v2042_v26 = vld [vmem:[%s3320_s0 + $0x68] sm:$0xf0] }
  0x23   :  { %1063 = vmatpush.bf16.msra.mxu3 %v1648_v43  ;;  %1007 = vmatmul.bf16.vlgmr.msra.gmra.mxu0 %v2469_v48  ;;  %v2120_v20 = vld [vmem:[%s3319_s1 + $0x244] sm:$0xf0]  ;;  %v1935_v21 = vld [vmem:[%s3319_s1 + $0x3c0] sm:$0xf]  ;;  %v1808_v27 = vor.u32 %v2136_v17, %v1807_v16  ;;  %v2038_v28 = vld [vmem:[%s3320_s0 + $0x4c] sm:$0xf] }
  0x24   :  { %1026 = vmatmul.bf16.vlgmr.msra.gmra.mxu1 %v2480_v53  ;;  %1075 = vmatpush.bf16.msrb.mxu0 %v1768_v58  ;;  %v2168_v24 = vld [vmem:[%s3319_s1 + $0x3c4] sm:$0xf0]  ;;  %v1421_v29 = vld [vmem:[%s3320_s0 + $0x6c] sm:$0xf0]  ;;  %v2150_v31 = vld [vmem:[%s3319_s1 + $0x334] sm:$0xf0]  ;;  %v1744_v35 = vor.u32 %v2120_v20, %v1743_v19 }
  0x25   :  { %1094 = vmatpush.bf16.msrb.mxu1 %v1832_v49  ;;  %1045 = vmatmul.bf16.vlgmr.msra.gmra.mxu2 %v2482_v54  ;;  %v1419_v25 = vld [vmem:[%s3320_s0 + $0x48] sm:$0xf]  ;;  %v1863_v30 = vld [vmem:[%s3319_s1 + $0x330] sm:$0xf]  ;;  %v2134_v34 = vld [vmem:[%s3319_s1 + $0x2b4] sm:$0xf0]  ;;  %v1936_v39 = vor.u32 %v2168_v24, %v1935_v21  ;;  %v2612_v50 = vor.u32 %v2038_v28, %v1421_v29 }
  0x26   :  { %1113 = vmatpush.bf16.msrb.mxu2 %v1896_v44  ;;  %1064 = vmatmul.bf16.vlgmr.msra.gmra.mxu3 %v2490_v57  ;;  %v1427_v32 = vld [vmem:[%s3320_s0 + $0x50] sm:$0xf]  ;;  %v2043_v36 = vld [vmem:[%s3320_s0 + $0x70] sm:$0xf0]  ;;  %v1429_v38 = vld [vmem:[%s3320_s0 + $0x74] sm:$0xf0]  ;;  %v1864_v40 = vor.u32 %v2150_v31, %v1863_v30  ;;  %v2601_v44 = vor.u32 %v2042_v26, %v1419_v25 }
  0x27   :  { %1132 = vmatpush.bf16.msrb.mxu3 %v1960_v59  ;;  %v1799_v33 = vld [vmem:[%s3319_s1 + $0x2b0] sm:$0xf]  ;;  %v2039_v37 = vld [vmem:[%s3320_s0 + $0x54] sm:$0xf]  ;;  %v2118_v42 = vld [vmem:[%s3319_s1 + $0x234] sm:$0xf0]  ;;  %v2614_v51 = vor.u32 %v2043_v36, %v1427_v32 }
  0x28   :  { %1076 = vmatpush.bf16.msrb.mxu0 %v1760_v6  ;;  %v1735_v41 = vld [vmem:[%s3319_s1 + $0x230] sm:$0xf]  ;;  %v1800_v45 = vor.u32 %v2134_v34, %v1799_v33  ;;  %v2166_v46 = vld [vmem:[%s3319_s1 + $0x3b4] sm:$0xf0]  ;;  %v1855_v47 = vld [vmem:[%s3319_s1 + $0x320] sm:$0xf]  ;;  %v2622_v56 = vor.u32 %v2039_v37, %v1429_v38 }
  0x29   :  { %1095 = vmatpush.bf16.msrb.mxu1 %v1824_v0  ;;  %v1927_v43 = vld [vmem:[%s3319_s1 + $0x3b0] sm:$0xf]  ;;  %v2148_v49 = vld [vmem:[%s3319_s1 + $0x324] sm:$0xf0]  ;;  %v1791_v52 = vld [vmem:[%s3319_s1 + $0x2a0] sm:$0xf]  ;;  %v1736_v58 = vor.u32 %v2118_v42, %v1735_v41 }
  0x2a   :  { %1114 = vmatpush.bf16.msrb.mxu2 %v1888_v60  ;;  %v2132_v55 = vld [vmem:[%s3319_s1 + $0x2a4] sm:$0xf0]  ;;  %v1928_v59 = vor.u32 %v2166_v46, %v1927_v43  ;;  %v1856_v60 = vor.u32 %v2148_v49, %v1855_v47  ;;  %v1727_v61 = vld [vmem:[%s3319_s1 + $0x220] sm:$0xf]  ;;  %v1847_v2 = vld [vmem:[%s3319_s1 + $0x310] sm:$0xf] }
  0x2b   :  { %1133 = vmatpush.bf16.msrb.mxu3 %v1952_v7  ;;  %v2116_v62 = vld [vmem:[%s3319_s1 + $0x224] sm:$0xf0]  ;;  %v1919_v63 = vld [vmem:[%s3319_s1 + $0x3a0] sm:$0xf]  ;;  %v1792_v0 = vor.u32 %v2132_v55, %v1791_v52  ;;  %v2146_v3 = vld [vmem:[%s3319_s1 + $0x314] sm:$0xf0] }
  0x2c   :  { %1077 = vmatpush.bf16.msrb.mxu0 %v1752_v18  ;;  %v2164_v1 = vld [vmem:[%s3319_s1 + $0x3a4] sm:$0xf0]  ;;  %v1783_v4 = vld [vmem:[%s3319_s1 + $0x290] sm:$0xf]  ;;  %v2130_v5 = vld [vmem:[%s3319_s1 + $0x294] sm:$0xf0]  ;;  %v1728_v6 = vor.u32 %v2116_v62, %v1727_v61  ;;  %v1848_v9 = vor.u32 %v2146_v3, %v1847_v2 }
  0x2d   :  { %1096 = vmatpush.bf16.msrb.mxu1 %v1816_v12  ;;  %v1719_v7 = vld [vmem:[%s3319_s1 + $0x210] sm:$0xf]  ;;  %v2114_v10 = vld [vmem:[%s3319_s1 + $0x214] sm:$0xf0]  ;;  %v1784_v13 = vor.u32 %v2130_v5, %v1783_v4  ;;  %v1839_v14 = vld [vmem:[%s3319_s1 + $0x300] sm:$0xf] }
  0x2e   :  { %1115 = vmatpush.bf16.msrb.mxu2 %v1880_v8  ;;  %v1920_v8 = vor.u32 %v2164_v1, %v1919_v63  ;;  %v1911_v11 = vld [vmem:[%s3319_s1 + $0x390] sm:$0xf]  ;;  %v2162_v12 = vld [vmem:[%s3319_s1 + $0x394] sm:$0xf0]  ;;  %v2144_v15 = vld [vmem:[%s3319_s1 + $0x304] sm:$0xf0]  ;;  %v1720_v20 = vor.u32 %v2114_v10, %v1719_v7 }
  0x2f   :  { %1134 = vmatpush.bf16.msrb.mxu3 %v1944_v22  ;;  %v1775_v16 = vld [vmem:[%s3319_s1 + $0x280] sm:$0xf]  ;;  %v2128_v17 = vld [vmem:[%s3319_s1 + $0x284] sm:$0xf0]  ;;  %v2077_v18 = vld [vmem:[%s3319_s1 + $0xf4] sm:$0xf]  ;;  %v1912_v24 = vor.u32 %v2162_v12, %v1911_v11  ;;  %v1840_v25 = vor.u32 %v2144_v15, %v1839_v14 }
  0x30   :  { %1078 = vmatpush.bf16.msrb.mxu0 %v1744_v35  ;;  %v1577_v19 = vld [vmem:[%s3319_s1 + $0xf8] sm:$0xf0]  ;;  %v1711_v21 = vld [vmem:[%s3319_s1 + $0x200] sm:$0xf]  ;;  %v2061_v22 = vld [vmem:[%s3319_s1 + $0x74] sm:$0xf]  ;;  %v1776_v29 = vor.u32 %v2128_v17, %v1775_v16 }
  0x31   :  { %1097 = vmatpush.bf16.msrb.mxu1 %v1808_v27  ;;  %v2112_v26 = vld [vmem:[%s3319_s1 + $0x204] sm:$0xf0]  ;;  %v1903_v27 = vld [vmem:[%s3319_s1 + $0x380] sm:$0xf]  ;;  %v1399_v30 = vld [vmem:[%s3320_s0 + $0x10] sm:$0xf]  ;;  %v1580_v34 = vor.u32 %v2077_v18, %v1577_v19 }
  0x32   :  { %1116 = vmatpush.bf16.msrb.mxu2 %v1872_v23  ;;  %v1513_v23 = vld [vmem:[%s3319_s1 + $0x78] sm:$0xf0]  ;;  %v2160_v28 = vld [vmem:[%s3319_s1 + $0x384] sm:$0xf0]  ;;  %v2035_v31 = vld [vmem:[%s3320_s0 + $0x30] sm:$0xf0]  ;;  %v1712_v42 = vor.u32 %v2112_v26, %v1711_v21 }
  0x33   :  { %1135 = vmatpush.bf16.msrb.mxu3 %v1936_v39  ;;  %1012 = vmatmul.bf16.gmra.mxu0 %v2601_v44  ;;  %v2031_v32 = vld [vmem:[%s3320_s0 + $0x14] sm:$0xf]  ;;  %v1401_v33 = vld [vmem:[%s3320_s0 + $0x34] sm:$0xf0]  ;;  %v2023_v35 = vld [vmem:[%s3319_s1 + $0x470] sm:$0xf]  ;;  %v1516_v38 = vor.u32 %v2061_v22, %v1513_v23  ;;  %v1904_v47 = vor.u32 %v2160_v28, %v1903_v27 }
  0x34   :  { %1031 = vmatmul.bf16.gmra.mxu1 %v2612_v50  ;;  %1079 = vmatpush.bf16.msrb.mxu0 %v1736_v58  ;;  %v2190_v36 = vld [vmem:[%s3319_s1 + $0x474] sm:$0xf0]  ;;  %v2093_v37 = vld [vmem:[%s3319_s1 + $0x174] sm:$0xf]  ;;  %v1641_v39 = vld [vmem:[%s3319_s1 + $0x178] sm:$0xf0]  ;;  %v2759_v1 = vor.u32 %v2031_v32, %v1401_v33 }
  0x35   :  { %1098 = vmatpush.bf16.msrb.mxu1 %v1800_v45  ;;  %1050 = vmatmul.bf16.gmra.mxu2 %v2614_v51  ;;  %v1569_v41 = vld [vmem:[%s3319_s1 + $0xe8] sm:$0xf0]  ;;  %v1407_v43 = vld [vmem:[%s3320_s0 + $0x18] sm:$0xf]  ;;  %v2036_v45 = vld [vmem:[%s3320_s0 + $0x38] sm:$0xf0]  ;;  %v2024_v52 = vor.u32 %v2190_v36, %v2023_v35 }
  0x36   :  { %1117 = vmatpush.bf16.msrb.mxu2 %v1864_v40  ;;  %1069 = vmatmul.bf16.gmra.mxu3 %v2622_v56  ;;  %v2075_v40 = vld [vmem:[%s3319_s1 + $0xe4] sm:$0xf]  ;;  %v2032_v46 = vld [vmem:[%s3320_s0 + $0x1c] sm:$0xf]  ;;  %v1409_v49 = vld [vmem:[%s3320_s0 + $0x3c] sm:$0xf0]  ;;  %v2770_v5 = vor.u32 %v2036_v45, %v1407_v43 }
  0x37   :  { %1136 = vmatpush.bf16.msrb.mxu3 %v1928_v59  ;;  %v2015_v55 = vld [vmem:[%s3319_s1 + $0x460] sm:$0xf]  ;;  %v2188_v58 = vld [vmem:[%s3319_s1 + $0x464] sm:$0xf0]  ;;  %v1644_v59 = vor.u32 %v2093_v37, %v1641_v39  ;;  %v2059_v61 = vld [vmem:[%s3319_s1 + $0x64] sm:$0xf] }
  0x38   :  { %1080 = vmatpush.bf16.msrb.mxu0 %v1728_v6  ;;  %v1505_v62 = vld [vmem:[%s3319_s1 + $0x68] sm:$0xf0]  ;;  %v2091_v63 = vld [vmem:[%s3319_s1 + $0x164] sm:$0xf]  ;;  %v2073_v3 = vld [vmem:[%s3319_s1 + $0xd4] sm:$0xf]  ;;  %v2772_v6 = vor.u32 %v2032_v46, %v1409_v49  ;;  %v2016_v7 = vor.u32 %v2188_v58, %v2015_v55 }
  0x39   :  { %1099 = vmatpush.bf16.msrb.mxu1 %v1792_v0  ;;  %v2757_v0 = vor.u32 %v2035_v31, %v1399_v30  ;;  %v1633_v2 = vld [vmem:[%s3319_s1 + $0x168] sm:$0xf0]  ;;  %v1561_v4 = vld [vmem:[%s3319_s1 + $0xd8] sm:$0xf0]  ;;  %v2186_v10 = vld [vmem:[%s3319_s1 + $0x454] sm:$0xf0] }
  0x3a   :  { %1118 = vmatpush.bf16.msrb.mxu2 %v1856_v60  ;;  %v1572_v60 = vor.u32 %v2075_v40, %v1569_v41  ;;  %v1636_v11 = vor.u32 %v2091_v63, %v1633_v2  ;;  %v1564_v12 = vor.u32 %v2073_v3, %v1561_v4  ;;  %v1497_v14 = vld [vmem:[%s3319_s1 + $0x58] sm:$0xf0]  ;;  %v2089_v15 = vld [vmem:[%s3319_s1 + $0x154] sm:$0xf]  ;;  %v2071_v17 = vld [vmem:[%s3319_s1 + $0xc4] sm:$0xf] }
  0x3b   :  { %1137 = vmatpush.bf16.msrb.mxu3 %v1920_v8  ;;  %v1508_v8 = vor.u32 %v2059_v61, %v1505_v62  ;;  %v1625_v16 = vld [vmem:[%s3319_s1 + $0x158] sm:$0xf0]  ;;  %v1553_v18 = vld [vmem:[%s3319_s1 + $0xc8] sm:$0xf0]  ;;  %v1999_v21 = vld [vmem:[%s3319_s1 + $0x440] sm:$0xf] }
  0x3c   :  { %1081 = vmatpush.bf16.msrb.mxu0 %v1720_v20  ;;  %v2184_v22 = vld [vmem:[%s3319_s1 + $0x444] sm:$0xf0]  ;;  %v1628_v23 = vor.u32 %v2089_v15, %v1625_v16  ;;  %v1489_v26 = vld [vmem:[%s3319_s1 + $0x48] sm:$0xf0]  ;;  %v2087_v27 = vld [vmem:[%s3319_s1 + $0x144] sm:$0xf] }
  0x3d   :  { %1100 = vmatpush.bf16.msrb.mxu1 %v1784_v13  ;;  %v2057_v13 = vld [vmem:[%s3319_s1 + $0x54] sm:$0xf]  ;;  %v1617_v28 = vld [vmem:[%s3319_s1 + $0x148] sm:$0xf0]  ;;  %v1545_v30 = vld [vmem:[%s3319_s1 + $0xb8] sm:$0xf0]  ;;  %v2000_v31 = vor.u32 %v2184_v22, %v1999_v21 }
  0x3e   :  { %1119 = vmatpush.bf16.msrb.mxu2 %v1848_v9  ;;  %v2007_v9 = vld [vmem:[%s3319_s1 + $0x450] sm:$0xf]  ;;  %v1500_v20 = vor.u32 %v2057_v13, %v1497_v14  ;;  %v1620_v35 = vor.u32 %v2087_v27, %v1617_v28  ;;  %v1435_v36 = vld [vmem:[%s3320_s0 + $0x58] sm:$0xf]  ;;  %v2044_v37 = vld [vmem:[%s3320_s0 + $0x78] sm:$0xf0] }
  0x3f   :  { %1138 = vmatpush.bf16.msrb.mxu3 %v1912_v24  ;;  %v2008_v19 = vor.u32 %v2186_v10, %v2007_v9  ;;  %v1556_v24 = vor.u32 %v2071_v17, %v1553_v18  ;;  %v1991_v33 = vld [vmem:[%s3319_s1 + $0x430] sm:$0xf]  ;;  %v1437_v39 = vld [vmem:[%s3320_s0 + $0x7c] sm:$0xf0]  ;;  %v2053_v41 = vld [vmem:[%s3319_s1 + $0x34] sm:$0xf] }
  0x40   :  { %1082 = vmatpush.bf16.msrb.mxu0 %v1712_v42  ;;  %v1481_v42 = vld [vmem:[%s3319_s1 + $0x38] sm:$0xf0]  ;;  %v2085_v43 = vld [vmem:[%s3319_s1 + $0x134] sm:$0xf]  ;;  %v2067_v46 = vld [vmem:[%s3319_s1 + $0xa4] sm:$0xf] }
  0x41   :  { %1101 = vmatpush.bf16.msrb.mxu1 %v1776_v29  ;;  %v2069_v29 = vld [vmem:[%s3319_s1 + $0xb4] sm:$0xf]  ;;  %v1609_v45 = vld [vmem:[%s3319_s1 + $0x138] sm:$0xf0]  ;;  %v1443_v49 = vld [vmem:[%s3320_s0 + $0x60] sm:$0xf] }
  0x42   :  { %1120 = vmatpush.bf16.msrb.mxu2 %v1840_v25  ;;  %v2055_v25 = vld [vmem:[%s3319_s1 + $0x44] sm:$0xf]  ;;  %v1548_v40 = vor.u32 %v2069_v29, %v1545_v30  ;;  %v1445_v58 = vld [vmem:[%s3320_s0 + $0x84] sm:$0xf0]  ;;  %v1983_v61 = vld [vmem:[%s3319_s1 + $0x420] sm:$0xf]  ;;  %v1612_v63 = vor.u32 %v2085_v43, %v1609_v45 }
  0x43   :  { %1139 = vmatpush.bf16.msrb.mxu3 %v1904_v47  ;;  %1083 = vmatmul.bf16.vlgmr.msrb.gmra.mxu0 %v2757_v0  ;;  %v1492_v32 = vor.u32 %v2055_v25, %v1489_v26  ;;  %v1537_v47 = vld [vmem:[%s3319_s1 + $0xa8] sm:$0xf0]  ;;  %v2041_v55 = vld [vmem:[%s3320_s0 + $0x64] sm:$0xf]  ;;  %v2180_v62 = vld [vmem:[%s3319_s1 + $0x424] sm:$0xf0] }
  0x44   :  { %1151 = vmatpush.bf16.msra.mxu0 %v2024_v52  ;;  %1102 = vmatmul.bf16.vlgmr.msrb.gmra.mxu1 %v2759_v1  ;;  %v2045_v52 = vld [vmem:[%s3320_s0 + $0x80] sm:$0xf0]  ;;  %v1540_v2 = vor.u32 %v2067_v46, %v1537_v47  ;;  %v1473_v4 = vld [vmem:[%s3319_s1 + $0x28] sm:$0xf0]  ;;  %v2904_v14 = vor.u32 %v2041_v55, %v1445_v58  ;;  %v1984_v15 = vor.u32 %v2180_v62, %v1983_v61  ;;  %v1975_v17 = vld [vmem:[%s3319_s1 + $0x410] sm:$0xf] }
  0x45   :  { %1170 = vmatpush.bf16.msra.mxu1 %v1516_v38  ;;  %1121 = vmatmul.bf16.vlgmr.msrb.gmra.mxu2 %v2770_v5  ;;  %v2040_v38 = vld [vmem:[%s3320_s0 + $0x5c] sm:$0xf]  ;;  %v2051_v3 = vld [vmem:[%s3319_s1 + $0x24] sm:$0xf]  ;;  %v1601_v10 = vld [vmem:[%s3319_s1 + $0x128] sm:$0xf0]  ;;  %v2902_v13 = vor.u32 %v2045_v52, %v1443_v49 }
  0x46   :  { %1189 = vmatpush.bf16.msra.mxu2 %v1580_v34  ;;  %1140 = vmatmul.bf16.vlgmr.msrb.gmra.mxu3 %v2772_v6  ;;  %v2182_v34 = vld [vmem:[%s3319_s1 + $0x434] sm:$0xf0]  ;;  %v2891_v9 = vor.u32 %v2040_v38, %v1437_v39  ;;  %v1476_v16 = vor.u32 %v2051_v3, %v1473_v4  ;;  %v2049_v21 = vld [vmem:[%s3319_s1 + $0x14] sm:$0xf]  ;;  %v1465_v22 = vld [vmem:[%s3319_s1 + $0x18] sm:$0xf0] }
  0x47   :  { %1208 = vmatpush.bf16.msra.mxu3 %v1644_v59  ;;  %v1992_v59 = vor.u32 %v2182_v34, %v1991_v33  ;;  %v2178_v18 = vld [vmem:[%s3319_s1 + $0x414] sm:$0xf0]  ;;  %v2063_v25 = vld [vmem:[%s3319_s1 + $0x84] sm:$0xf]  ;;  %v1521_v26 = vld [vmem:[%s3319_s1 + $0x88] sm:$0xf0]  ;;  %v1468_v30 = vor.u32 %v2049_v21, %v1465_v22 }
  0x48   :  { %1152 = vmatpush.bf16.msra.mxu0 %v2016_v7  ;;  %v2083_v7 = vld [vmem:[%s3319_s1 + $0x124] sm:$0xf]  ;;  %v2141_v27 = vld [vmem:[%s3319_s1 + $0x2f4] sm:$0xf]  ;;  %v1833_v28 = vld [vmem:[%s3319_s1 + $0x2f8] sm:$0xf0]  ;;  %v1976_v29 = vor.u32 %v2178_v18, %v1975_v17 }
  0x49   :  { %1171 = vmatpush.bf16.msra.mxu1 %v1508_v8  ;;  %v2889_v8 = vor.u32 %v2044_v37, %v1435_v36  ;;  %v2047_v33 = vld [vmem:[%s3319_s1 + $0x4] sm:$0xf]  ;;  %v1457_v36 = vld [vmem:[%s3319_s1 + $0x8] sm:$0xf0]  ;;  %v1836_v39 = vor.u32 %v2141_v27, %v1833_v28  ;;  %v1769_v43 = vld [vmem:[%s3319_s1 + $0x278] sm:$0xf0] }
  0x4a   :  { %1190 = vmatpush.bf16.msra.mxu2 %v1572_v60  ;;  %v1484_v60 = vor.u32 %v2053_v41, %v1481_v42  ;;  %v2079_v37 = vld [vmem:[%s3319_s1 + $0x104] sm:$0xf]  ;;  %v1585_v38 = vld [vmem:[%s3319_s1 + $0x108] sm:$0xf0]  ;;  %v1705_v41 = vld [vmem:[%s3319_s1 + $0x1f8] sm:$0xf0]  ;;  %v1460_v49 = vor.u32 %v2047_v33, %v1457_v36 }
  0x4b   :  { %1209 = vmatpush.bf16.msra.mxu3 %v1636_v11  ;;  %v2065_v11 = vld [vmem:[%s3319_s1 + $0x94] sm:$0xf]  ;;  %v1897_v46 = vld [vmem:[%s3319_s1 + $0x378] sm:$0xf0]  ;;  %v2139_v52 = vld [vmem:[%s3319_s1 + $0x2e4] sm:$0xf]  ;;  %v1588_v58 = vor.u32 %v2079_v37, %v1585_v38 }
  0x4c   :  { %1153 = vmatpush.bf16.msra.mxu0 %v2008_v19  ;;  %v1604_v19 = vor.u32 %v2083_v7, %v1601_v10  ;;  %v2125_v42 = vld [vmem:[%s3319_s1 + $0x274] sm:$0xf]  ;;  %v1825_v55 = vld [vmem:[%s3319_s1 + $0x2e8] sm:$0xf0]  ;;  %v2107_v62 = vld [vmem:[%s3319_s1 + $0x1e4] sm:$0xf] }
  0x4d   :  { %1172 = vmatpush.bf16.msra.mxu1 %v1500_v20  ;;  %v2157_v45 = vld [vmem:[%s3319_s1 + $0x374] sm:$0xf]  ;;  %v2037_v3 = vld [vmem:[%s3320_s0 + $0x40] sm:$0xf0]  ;;  %v1828_v4 = vor.u32 %v2139_v52, %v1825_v55  ;;  %v1761_v10 = vld [vmem:[%s3319_s1 + $0x268] sm:$0xf0] }
  0x4e   :  { %1191 = vmatpush.bf16.msra.mxu2 %v1564_v12  ;;  %v1529_v12 = vld [vmem:[%s3319_s1 + $0x98] sm:$0xf0]  ;;  %v1900_v61 = vor.u32 %v2157_v45, %v1897_v46  ;;  %v2123_v7 = vld [vmem:[%s3319_s1 + $0x264] sm:$0xf]  ;;  %v2153_v27 = vld [vmem:[%s3319_s1 + $0x354] sm:$0xf] }
  0x4f   :  { %1210 = vmatpush.bf16.msra.mxu3 %v1628_v23  ;;  %v1532_v20 = vor.u32 %v2065_v11, %v1529_v12  ;;  %v2081_v23 = vld [vmem:[%s3319_s1 + $0x114] sm:$0xf]  ;;  %v2155_v12 = vld [vmem:[%s3319_s1 + $0x364] sm:$0xf]  ;;  %v1817_v18 = vld [vmem:[%s3319_s1 + $0x2d8] sm:$0xf0]  ;;  %v1764_v21 = vor.u32 %v2123_v7, %v1761_v10 }
  0x50   :  { %1154 = vmatpush.bf16.msra.mxu0 %v2000_v31  ;;  %v1967_v31 = vld [vmem:[%s3319_s1 + $0x400] sm:$0xf]  ;;  %v1881_v28 = vld [vmem:[%s3319_s1 + $0x358] sm:$0xf0]  ;;  %v2133_v38 = vld [vmem:[%s3319_s1 + $0x2b4] sm:$0xf] }
  0x51   :  { %1173 = vmatpush.bf16.msra.mxu1 %v1492_v32  ;;  %v2176_v32 = vld [vmem:[%s3319_s1 + $0x404] sm:$0xf0]  ;;  %v2117_v45 = vld [vmem:[%s3319_s1 + $0x234] sm:$0xf]  ;;  %v1737_v46 = vld [vmem:[%s3319_s1 + $0x238] sm:$0xf0] }
  0x52   :  { %1192 = vmatpush.bf16.msra.mxu2 %v1556_v24  ;;  %v1593_v24 = vld [vmem:[%s3319_s1 + $0x118] sm:$0xf0]  ;;  %v1968_v47 = vor.u32 %v2176_v32, %v1967_v31  ;;  %v2103_v31 = vld [vmem:[%s3319_s1 + $0x1c4] sm:$0xf]  ;;  %v1681_v32 = vld [vmem:[%s3319_s1 + $0x1c8] sm:$0xf0] }
  0x53   :  { %1211 = vmatpush.bf16.msra.mxu3 %v1620_v35  ;;  %1088 = vmatmul.bf16.gmra.mxu0 %v2889_v8  ;;  %v1596_v34 = vor.u32 %v2081_v23, %v1593_v24  ;;  %v1524_v35 = vor.u32 %v2063_v25, %v1521_v26  ;;  %v2121_v23 = vld [vmem:[%s3319_s1 + $0x254] sm:$0xf]  ;;  %v1753_v24 = vld [vmem:[%s3319_s1 + $0x258] sm:$0xf0]  ;;  %v1684_v37 = vor.u32 %v2103_v31, %v1681_v32  ;;  %v1729_v7 = vld [vmem:[%s3319_s1 + $0x228] sm:$0xf0] }
  0x54   :  { %1155 = vmatpush.bf16.msra.mxu0 %v1992_v59  ;;  %1107 = vmatmul.bf16.gmra.mxu1 %v2891_v9  ;;  %v1756_v33 = vor.u32 %v2121_v23, %v1753_v24  ;;  %v2149_v52 = vld [vmem:[%s3319_s1 + $0x334] sm:$0xf]  ;;  %v1865_v55 = vld [vmem:[%s3319_s1 + $0x338] sm:$0xf0]  ;;  %v1777_v31 = vld [vmem:[%s3319_s1 + $0x288] sm:$0xf0] }
  0x55   :  { %1174 = vmatpush.bf16.msra.mxu1 %v1484_v60  ;;  %1126 = vmatmul.bf16.gmra.mxu2 %v2902_v13  ;;  %v1772_v60 = vor.u32 %v2125_v42, %v1769_v43  ;;  %v2113_v24 = vld [vmem:[%s3319_s1 + $0x214] sm:$0xf]  ;;  %v2095_v32 = vld [vmem:[%s3319_s1 + $0x184] sm:$0xf] }
  0x56   :  { %1193 = vmatpush.bf16.msra.mxu2 %v1548_v40  ;;  %1145 = vmatmul.bf16.gmra.mxu3 %v2904_v14  ;;  %v2109_v40 = vld [vmem:[%s3319_s1 + $0x1f4] sm:$0xf] }
  0x57   :  { %1212 = vmatpush.bf16.msra.mxu3 %v1612_v63  ;;  %v1708_v59 = vor.u32 %v2109_v40, %v1705_v41  ;;  %v1697_v63 = vld [vmem:[%s3319_s1 + $0x1e8] sm:$0xf0]  ;;  %v2101_v40 = vld [vmem:[%s3319_s1 + $0x1b4] sm:$0xf]  ;;  %v1673_v41 = vld [vmem:[%s3319_s1 + $0x1b8] sm:$0xf0] }
  0x58   :  { %1156 = vmatpush.bf16.msra.mxu0 %v1984_v15  ;;  %v1700_v11 = vor.u32 %v2107_v62, %v1697_v63  ;;  %v1889_v15 = vld [vmem:[%s3319_s1 + $0x368] sm:$0xf0]  ;;  %v1451_v62 = vld [vmem:[%s3320_s0 + $0x68] sm:$0xf] }
  0x59   :  { %1175 = vmatpush.bf16.msra.mxu1 %v1476_v16  ;;  %v2137_v16 = vld [vmem:[%s3319_s1 + $0x2d4] sm:$0xf]  ;;  %v1892_v22 = vor.u32 %v2155_v12, %v1889_v15  ;;  %v2046_v63 = vld [vmem:[%s3320_s0 + $0x88] sm:$0xf0]  ;;  %v2147_v12 = vld [vmem:[%s3319_s1 + $0x324] sm:$0xf] }
  0x5a   :  { %1194 = vmatpush.bf16.msra.mxu2 %v1540_v2  ;;  %v1415_v2 = vld [vmem:[%s3320_s0 + $0x20] sm:$0xf]  ;;  %v1820_v25 = vor.u32 %v2137_v16, %v1817_v18  ;;  %v1857_v15 = vld [vmem:[%s3319_s1 + $0x328] sm:$0xf0]  ;;  %v2129_v16 = vld [vmem:[%s3319_s1 + $0x294] sm:$0xf]  ;;  %v3117_v18 = vor.u32 %v2046_v63, %v1451_v62 }
  0x5b   :  { %1213 = vmatpush.bf16.msra.mxu3 %v1604_v19  ;;  %v3009_v17 = vor.u32 %v2037_v3, %v1415_v2  ;;  %v2105_v19 = vld [vmem:[%s3319_s1 + $0x1d4] sm:$0xf]  ;;  %v1740_v2 = vor.u32 %v2117_v45, %v1737_v46  ;;  %v1868_v3 = vor.u32 %v2149_v52, %v1865_v55  ;;  %v1860_v23 = vor.u32 %v2147_v12, %v1857_v15  ;;  %v2017_v52 = vld [vmem:[%s3319_s1 + $0x468] sm:$0xf0] }
  0x5c   :  { %1157 = vmatpush.bf16.msra.mxu0 %v1976_v29  ;;  %v2135_v29 = vld [vmem:[%s3319_s1 + $0x2c4] sm:$0xf] }
  0x5d   :  { %1176 = vmatpush.bf16.msra.mxu1 %v1468_v30  ;;  %v1809_v30 = vld [vmem:[%s3319_s1 + $0x2c8] sm:$0xf0] }
  0x5e   :  { %1195 = vmatpush.bf16.msra.mxu2 %v1532_v20  ;;  %v1689_v20 = vld [vmem:[%s3319_s1 + $0x1d8] sm:$0xf0]  ;;  %v1812_v36 = vor.u32 %v2135_v29, %v1809_v30  ;;  %v2127_v30 = vld [vmem:[%s3319_s1 + $0x284] sm:$0xf] }
  0x5f   :  { %1214 = vmatpush.bf16.msra.mxu3 %v1596_v34  ;;  %v1692_v26 = vor.u32 %v2105_v19, %v1689_v20  ;;  %v2119_v34 = vld [vmem:[%s3319_s1 + $0x244] sm:$0xf]  ;;  %v1785_v19 = vld [vmem:[%s3319_s1 + $0x298] sm:$0xf0]  ;;  %v2097_v20 = vld [vmem:[%s3319_s1 + $0x194] sm:$0xf] }
  0x60   :  { %1158 = vmatpush.bf16.msra.mxu0 %v1968_v47  ;;  %v1849_v29 = vld [vmem:[%s3319_s1 + $0x318] sm:$0xf0] }
  0x61   :  { %1177 = vmatpush.bf16.msra.mxu1 %v1460_v49  ;;  %v1676_v49 = vor.u32 %v2101_v40, %v1673_v41  ;;  %v2025_v40 = vld [vmem:[%s3319_s1 + $0x478] sm:$0xf0]  ;;  %v2171_v41 = vld [vmem:[%s3319_s1 + $0x3e4] sm:$0xf] }
  0x62   :  { %1196 = vmatpush.bf16.msra.mxu2 %v1524_v35  ;;  %v1745_v35 = vld [vmem:[%s3319_s1 + $0x248] sm:$0xf0] }
  0x63   :  { %1215 = vmatpush.bf16.msra.mxu3 %v1588_v58  ;;  %1159 = vmatmul.bf16.vlgmr.msra.gmra.mxu0 %v3009_v17  ;;  %v1748_v42 = vor.u32 %v2119_v34, %v1745_v35  ;;  %v2131_v58 = vld [vmem:[%s3319_s1 + $0x2a4] sm:$0xf] }
  0x64   :  { %1227 = vmatpush.bf16.msrb.mxu0 %v1708_v59  ;;  %1178 = vmatmul.bf16.vlgmr.msra.gmra.mxu1 %v2469_v48  ;;  %v1884_v48 = vor.u32 %v2153_v27, %v1881_v28  ;;  %v1793_v59 = vld [vmem:[%s3319_s1 + $0x2a8] sm:$0xf0]  ;;  %v2145_v28 = vld [vmem:[%s3319_s1 + $0x314] sm:$0xf] }
  0x65   :  { %1246 = vmatpush.bf16.msrb.mxu1 %v1772_v60  ;;  %1197 = vmatmul.bf16.vlgmr.msra.gmra.mxu2 %v2480_v53  ;;  %v2151_v53 = vld [vmem:[%s3319_s1 + $0x344] sm:$0xf]  ;;  %v1796_v10 = vor.u32 %v2131_v58, %v1793_v59  ;;  %v1852_v35 = vor.u32 %v2145_v28, %v1849_v29  ;;  %v2169_v58 = vld [vmem:[%s3319_s1 + $0x3d4] sm:$0xf]  ;;  %v1945_v59 = vld [vmem:[%s3319_s1 + $0x3d8] sm:$0xf0] }
  0x66   :  { %1265 = vmatpush.bf16.msrb.mxu2 %v1836_v39  ;;  %1216 = vmatmul.bf16.vlgmr.msra.gmra.mxu3 %v2482_v54  ;;  %v1873_v54 = vld [vmem:[%s3319_s1 + $0x348] sm:$0xf0]  ;;  %v1801_v39 = vld [vmem:[%s3319_s1 + $0x2b8] sm:$0xf0]  ;;  %v2099_v60 = vld [vmem:[%s3319_s1 + $0x1a4] sm:$0xf]  ;;  %v1948_v62 = vor.u32 %v2169_v58, %v1945_v59 }
  0x67   :  { %1284 = vmatpush.bf16.msrb.mxu3 %v1900_v61  ;;  %v1876_v43 = vor.u32 %v2151_v53, %v1873_v54  ;;  %v1804_v47 = vor.u32 %v2133_v38, %v1801_v39  ;;  %v1665_v61 = vld [vmem:[%s3319_s1 + $0x1a8] sm:$0xf0]  ;;  %v2143_v53 = vld [vmem:[%s3319_s1 + $0x304] sm:$0xf]  ;;  %v2189_v39 = vld [vmem:[%s3319_s1 + $0x474] sm:$0xf] }
  0x68   :  { %1228 = vmatpush.bf16.msrb.mxu0 %v1700_v11  ;;  %v1668_v11 = vor.u32 %v2099_v60, %v1665_v61  ;;  %v1841_v54 = vld [vmem:[%s3319_s1 + $0x308] sm:$0xf0]  ;;  %v2028_v46 = vor.u32 %v2189_v39, %v2025_v40  ;;  %v2185_v60 = vld [vmem:[%s3319_s1 + $0x454] sm:$0xf]  ;;  %v2009_v61 = vld [vmem:[%s3319_s1 + $0x458] sm:$0xf0] }
  0x69   :  { %1247 = vmatpush.bf16.msrb.mxu1 %v1764_v21  ;;  %v1657_v21 = vld [vmem:[%s3319_s1 + $0x198] sm:$0xf0]  ;;  %v1844_v45 = vor.u32 %v2143_v53, %v1841_v54  ;;  %v2012_v63 = vor.u32 %v2185_v60, %v2009_v61 }
  0x6a   :  { %1266 = vmatpush.bf16.msrb.mxu2 %v1828_v4  ;;  %v2115_v4 = vld [vmem:[%s3319_s1 + $0x224] sm:$0xf]  ;;  %v1660_v27 = vor.u32 %v2097_v20, %v1657_v21  ;;  %v1985_v21 = vld [vmem:[%s3319_s1 + $0x428] sm:$0xf0] }
  0x6b   :  { %1285 = vmatpush.bf16.msrb.mxu3 %v1892_v22  ;;  %v1732_v22 = vor.u32 %v2115_v4, %v1729_v7  ;;  %v2183_v4 = vld [vmem:[%s3319_s1 + $0x444] sm:$0xf]  ;;  %v2001_v7 = vld [vmem:[%s3319_s1 + $0x448] sm:$0xf0] }
  0x6c   :  { %1229 = vmatpush.bf16.msrb.mxu0 %v1692_v26  ;;  %v1788_v26 = vor.u32 %v2129_v16, %v1785_v19  ;;  %v2163_v16 = vld [vmem:[%s3319_s1 + $0x3a4] sm:$0xf]  ;;  %v1921_v19 = vld [vmem:[%s3319_s1 + $0x3a8] sm:$0xf0] }
  0x6d   :  { %1248 = vmatpush.bf16.msrb.mxu1 %v1756_v33  ;;  %v1649_v33 = vld [vmem:[%s3319_s1 + $0x188] sm:$0xf0]  ;;  %v2179_v20 = vld [vmem:[%s3319_s1 + $0x424] sm:$0xf] }
  0x6e   :  { %1267 = vmatpush.bf16.msrb.mxu2 %v1820_v25  ;;  %v1721_v25 = vld [vmem:[%s3319_s1 + $0x218] sm:$0xf0] }
  0x6f   :  { %1286 = vmatpush.bf16.msrb.mxu3 %v1884_v48  ;;  %v1961_v48 = vld [vmem:[%s3319_s1 + $0x3f8] sm:$0xf0]  ;;  %v1724_v34 = vor.u32 %v2113_v24, %v1721_v25  ;;  %v2161_v24 = vld [vmem:[%s3319_s1 + $0x394] sm:$0xf] }
  0x70   :  { %1230 = vmatpush.bf16.msrb.mxu0 %v1684_v37  ;;  %v1713_v37 = vld [vmem:[%s3319_s1 + $0x208] sm:$0xf0]  ;;  %v1913_v25 = vld [vmem:[%s3319_s1 + $0x398] sm:$0xf0] }
  0x71   :  { %1249 = vmatpush.bf16.msrb.mxu1 %v1748_v42  ;;  %v1953_v42 = vld [vmem:[%s3319_s1 + $0x3e8] sm:$0xf0]  ;;  %v1916_v28 = vor.u32 %v2161_v24, %v1913_v25 }
  0x72   :  { %1268 = vmatpush.bf16.msrb.mxu2 %v1812_v36  ;;  %v2111_v36 = vld [vmem:[%s3319_s1 + $0x204] sm:$0xf] }
  0x73   :  { %1287 = vmatpush.bf16.msrb.mxu3 %v1876_v43  ;;  %1164 = vmatmul.bf16.gmra.mxu0 %v3117_v18  ;;  %v1716_v43 = vor.u32 %v2111_v36, %v1713_v37 }
  0x74   :  { %1231 = vmatpush.bf16.msrb.mxu0 %v1676_v49  ;;  %1183 = vmatmul.bf16.gmra.mxu1 %v2601_v44  ;;  %v2173_v44 = vld [vmem:[%s3319_s1 + $0x3f4] sm:$0xf]  ;;  %v2187_v49 = vld [vmem:[%s3319_s1 + $0x464] sm:$0xf] }
  0x75   :  { %1250 = vmatpush.bf16.msrb.mxu1 %v1740_v2  ;;  %1202 = vmatmul.bf16.gmra.mxu2 %v2612_v50  ;;  %v1780_v50 = vor.u32 %v2127_v30, %v1777_v31  ;;  %v1964_v38 = vor.u32 %v2173_v44, %v1961_v48  ;;  %v2020_v55 = vor.u32 %v2187_v49, %v2017_v52  ;;  %v2167_v2 = vld [vmem:[%s3319_s1 + $0x3c4] sm:$0xf]  ;;  %v1905_v31 = vld [vmem:[%s3319_s1 + $0x388] sm:$0xf0] }
  0x76   :  { %1269 = vmatpush.bf16.msrb.mxu2 %v1804_v47  ;;  %1221 = vmatmul.bf16.gmra.mxu3 %v2614_v51  ;;  %v1652_v51 = vor.u32 %v2095_v32, %v1649_v33  ;;  %v1956_v47 = vor.u32 %v2171_v41, %v1953_v42  ;;  %v2159_v30 = vld [vmem:[%s3319_s1 + $0x384] sm:$0xf]  ;;  %v1969_v33 = vld [vmem:[%s3319_s1 + $0x408] sm:$0xf0] }
  0x77   :  { %1288 = vmatpush.bf16.msrb.mxu3 %v1868_v3  ;;  %v1937_v3 = vld [vmem:[%s3319_s1 + $0x3c8] sm:$0xf0]  ;;  %v2175_v32 = vld [vmem:[%s3319_s1 + $0x404] sm:$0xf]  ;;  %v1908_v44 = vor.u32 %v2159_v30, %v1905_v31 }
  0x78   :  { %1232 = vmatpush.bf16.msrb.mxu0 %v1668_v11  ;;  %v1929_v11 = vld [vmem:[%s3319_s1 + $0x3b8] sm:$0xf0] }
  0x79   :  { %1251 = vmatpush.bf16.msrb.mxu1 %v1732_v22  ;;  %v1924_v22 = vor.u32 %v2163_v16, %v1921_v19 }
  0x7a   :  { %1270 = vmatpush.bf16.msrb.mxu2 %v1796_v10  ;;  %v1940_v10 = vor.u32 %v2167_v2, %v1937_v3 }
  0x7b   :  { %1289 = vmatpush.bf16.msrb.mxu3 %v1860_v23  ;;  %v1988_v23 = vor.u32 %v2179_v20, %v1985_v21 }
  0x7c   :  { %1233 = vmatpush.bf16.msrb.mxu0 %v1660_v27  ;;  %v1977_v27 = vld [vmem:[%s3319_s1 + $0x418] sm:$0xf0] }
  0x7d   :  { %1252 = vmatpush.bf16.msrb.mxu1 %v1724_v34 }
  0x7e   :  { %1271 = vmatpush.bf16.msrb.mxu2 %v1788_v26  ;;  %v2177_v26 = vld [vmem:[%s3319_s1 + $0x414] sm:$0xf] }
  0x7f   :  { %1290 = vmatpush.bf16.msrb.mxu3 %v1852_v35  ;;  %v1980_v29 = vor.u32 %v2177_v26, %v1977_v27 }
  0x80   :  { %1234 = vmatpush.bf16.msrb.mxu0 %v1652_v51 }
  0x81   :  { %1253 = vmatpush.bf16.msrb.mxu1 %v1716_v43 }
  0x82   :  { %1272 = vmatpush.bf16.msrb.mxu2 %v1780_v50 }
  0x83   :  { %1291 = vmatpush.bf16.msrb.mxu3 %v1844_v45  ;;  %1235 = vmatmul.bf16.vlgmr.msrb.gmra.mxu0 %v2490_v57  ;;  %v2004_v57 = vor.u32 %v2183_v4, %v2001_v7 }
  0x84   :  { %1303 = vmatpush.bf16.msra.mxu0 %v1964_v38  ;;  %1254 = vmatmul.bf16.vlgmr.msrb.gmra.mxu1 %v2757_v0  ;;  %v2165_v0 = vld [vmem:[%s3319_s1 + $0x3b4] sm:$0xf] }
  0x85   :  { %1322 = vmatpush.bf16.msra.mxu1 %v2028_v46  ;;  %1273 = vmatmul.bf16.vlgmr.msrb.gmra.mxu2 %v2759_v1  ;;  %v2181_v1 = vld [vmem:[%s3319_s1 + $0x434] sm:$0xf]  ;;  %v1932_v12 = vor.u32 %v2165_v0, %v1929_v11 }
  0x86   :  { %2191 = vmatpush.bf16.msra.mxu2 %v1964_v38  ;;  %1292 = vmatmul.bf16.vlgmr.msrb.gmra.mxu3 %v2770_v5  ;;  %v1993_v5 = vld [vmem:[%s3319_s1 + $0x438] sm:$0xf0] }
  0x87   :  { %2199 = vmatpush.bf16.msra.mxu3 %v2028_v46  ;;  %v1996_v15 = vor.u32 %v2181_v1, %v1993_v5 }
  0x88   :  { %1304 = vmatpush.bf16.msra.mxu0 %v1956_v47 }
  0x89   :  { %1323 = vmatpush.bf16.msra.mxu1 %v2020_v55 }
  0x8a   :  { %2192 = vmatpush.bf16.msra.mxu2 %v1956_v47 }
  0x8b   :  { %2200 = vmatpush.bf16.msra.mxu3 %v2020_v55 }
  0x8c   :  { %1305 = vmatpush.bf16.msra.mxu0 %v1948_v62 }
  0x8d   :  { %1324 = vmatpush.bf16.msra.mxu1 %v2012_v63 }
  0x8e   :  { %2193 = vmatpush.bf16.msra.mxu2 %v1948_v62 }
  0x8f   :  { %2201 = vmatpush.bf16.msra.mxu3 %v2012_v63 }
  0x90   :  { %1306 = vmatpush.bf16.msra.mxu0 %v1940_v10 }
  0x91   :  { %1325 = vmatpush.bf16.msra.mxu1 %v2004_v57 }
  0x92   :  { %2194 = vmatpush.bf16.msra.mxu2 %v1940_v10 }
  0x93   :  { %2202 = vmatpush.bf16.msra.mxu3 %v2004_v57  ;;  %1240 = vmatmul.bf16.gmra.mxu0 %v2622_v56  ;;  %v1972_v56 = vor.u32 %v2175_v32, %v1969_v33 }
  0x94   :  { %1307 = vmatpush.bf16.msra.mxu0 %v1932_v12  ;;  %1259 = vmatmul.bf16.gmra.mxu1 %v2889_v8  ;;  %v3275_v8 = vld [vmem:[%s3321_s2] sm:$0x3] }
  0x95   :  { %1326 = vmatpush.bf16.msra.mxu1 %v1996_v15  ;;  %1278 = vmatmul.bf16.gmra.mxu2 %v2891_v9  ;;  %v183_v48 = vperm.slane %v3275_v8, 0 }
  0x96   :  { %2195 = vmatpush.bf16.msra.mxu2 %v1932_v12  ;;  %1297 = vmatmul.bf16.gmra.mxu3 %v2902_v13 }
  0x97   :  { %2203 = vmatpush.bf16.msra.mxu3 %v1996_v15 }
  0x98   :  { %1308 = vmatpush.bf16.msra.mxu0 %v1924_v22 }
  0x99   :  { %1327 = vmatpush.bf16.msra.mxu1 %v1988_v23 }
  0x9a   :  { %2196 = vmatpush.bf16.msra.mxu2 %v1924_v22 }
  0x9b   :  { %2204 = vmatpush.bf16.msra.mxu3 %v1988_v23 }
  0x9c   :  { %1309 = vmatpush.bf16.msra.mxu0 %v1916_v28 }
  0x9d   :  { %1328 = vmatpush.bf16.msra.mxu1 %v1980_v29 }
  0x9e   :  { %2197 = vmatpush.bf16.msra.mxu2 %v1916_v28 }
  0x9f   :  { %2205 = vmatpush.bf16.msra.mxu3 %v1980_v29 }
  0xa0   :  { %1310 = vmatpush.bf16.msra.mxu0 %v1908_v44  ;;  %v1008_v9 = vpop.f32.mrf.mxu0 }
  0xa1   :  { %1329 = vmatpush.bf16.msra.mxu1 %v1972_v56  ;;  %v1009_v34 = vadd.f32 %v1008_v9, %v183_v48  ;;  %v1027_v13 = vpop.f32.mrf.mxu1 }
  0xa2   :  { %2198 = vmatpush.bf16.msra.mxu2 %v1908_v44 }
  0xa3   :  { %2206 = vmatpush.bf16.msra.mxu3 %v1972_v56  ;;  %v1028_v35 = vadd.f32 %v1027_v13, %v1009_v34  ;;  %1311 = vmatmul.bf16.vlgmr.msra.gmra.mxu0 %v2772_v6 }
  0xa4   :  { %1330 = vmatmul.bf16.vlgmr.msra.gmra.mxu1 %v3009_v17 }
  0xa5   :  { %1316 = vmatmul.bf16.vlgmr.msra.gmra.mxu2 %v2904_v14 }
  0xa6   :  { %1335 = vmatmul.bf16.vlgmr.msra.gmra.mxu3 %v3117_v18 }
  0xa8   :  { %v1046_v36 = vpop.f32.mrf.mxu2  ;;  %v1010_v37 = vpop.f32.mrf.mxu0 }
  0xa9   :  { %v1047_v50 = vadd.f32 %v1046_v36, %v1028_v35  ;;  %v1065_v51 = vpop.f32.mrf.mxu3  ;;  %v1011_v53 = vadd.f32 %v1010_v37, %v183_v48  ;;  %v1029_v54 = vpop.f32.mrf.mxu1 }
  0xab   :  { %v1066_v38 = vadd.f32 %v1065_v51, %v1047_v50  ;;  %v1030_v39 = vadd.f32 %v1029_v54, %v1011_v53 }
  0xb0   :  { %v1048_v40 = vpop.f32.mrf.mxu2  ;;  %v1013_v43 = vpop.f32.mrf.mxu0 }
  0xb1   :  { %v1049_v41 = vadd.f32 %v1048_v40, %v1030_v39  ;;  %v1067_v42 = vpop.f32.mrf.mxu3  ;;  %v1014_v45 = vadd.f32 %v1013_v43, %v183_v48  ;;  %v1032_v6 = vpop.f32.mrf.mxu1 }
  0xb3   :  { %v1068_v46 = vadd.f32 %v1067_v42, %v1049_v41  ;;  %v1033_v17 = vadd.f32 %v1032_v6, %v1014_v45 }
  0xb8   :  { %v1051_v47 = vpop.f32.mrf.mxu2  ;;  %v1015_v18 = vpop.f32.mrf.mxu0 }
  0xb9   :  { %v1052_v14 = vadd.f32 %v1051_v47, %v1033_v17  ;;  %v1070_v49 = vpop.f32.mrf.mxu3  ;;  %v1016_v52 = vadd.f32 %v1015_v18, %v183_v48  ;;  %v1034_v55 = vpop.f32.mrf.mxu1 }
  0xbb   :  { %v1071_v58 = vadd.f32 %v1070_v49, %v1052_v14  ;;  %v1035_v59 = vadd.f32 %v1034_v55, %v1016_v52  ;;  %v184_v14 = vperm.slane %v3275_v8, 1 }
  0xc0   :  { %v1053_v60 = vpop.f32.mrf.mxu2  ;;  %v1084_v63 = vpop.f32.mrf.mxu0 }
  0xc1   :  { %v1054_v61 = vadd.f32 %v1053_v60, %v1035_v59  ;;  %v1072_v62 = vpop.f32.mrf.mxu3  ;;  %v1103_v2 = vpop.f32.mrf.mxu1  ;;  %v1085_v4 = vadd.f32 %v1084_v63, %v1066_v38 }
  0xc3   :  { %v1073_v3 = vadd.f32 %v1072_v62, %v1054_v61  ;;  %v1104_v7 = vadd.f32 %v1103_v2, %v1085_v4 }
  0xc8   :  { %v1122_v10 = vpop.f32.mrf.mxu2  ;;  %v1086_v11 = vpop.f32.mrf.mxu0 }
  0xc9   :  { %v1141_v57 = vpop.f32.mrf.mxu3  ;;  %v1123_v0 = vadd.f32 %v1122_v10, %v1104_v7  ;;  %v1105_v1 = vpop.f32.mrf.mxu1  ;;  %v1087_v5 = vadd.f32 %v1086_v11, %v1068_v46 }
  0xcb   :  { %v1142_v12 = vadd.f32 %v1141_v57, %v1123_v0  ;;  %v1106_v15 = vadd.f32 %v1105_v1, %v1087_v5 }
  0xd0   :  { %v1124_v16 = vpop.f32.mrf.mxu2  ;;  %v1089_v21 = vpop.f32.mrf.mxu0 }
  0xd1   :  { %v1143_v19 = vpop.f32.mrf.mxu3  ;;  %v1125_v20 = vadd.f32 %v1124_v16, %v1106_v15  ;;  %v1108_v22 = vpop.f32.mrf.mxu1  ;;  %v1090_v23 = vadd.f32 %v1089_v21, %v1071_v58 }
  0xd3   :  { %v1144_v24 = vadd.f32 %v1143_v19, %v1125_v20  ;;  %v1109_v25 = vadd.f32 %v1108_v22, %v1090_v23  ;;  %v1341_v19 = vld [vmem:[%s3322_s3] sm:$0xff] }
  0xd8   :  { %v1127_v26 = vpop.f32.mrf.mxu2  ;;  %v1091_v29 = vpop.f32.mrf.mxu0 }
  0xd9   :  { %v1146_v27 = vpop.f32.mrf.mxu3  ;;  %v1128_v28 = vadd.f32 %v1127_v26, %v1109_v25  ;;  %v1110_v30 = vpop.f32.mrf.mxu1  ;;  %v1092_v31 = vadd.f32 %v1091_v29, %v1073_v3 }
  0xdb   :  { %v3282_v32 = vadd.f32 %v1146_v27, %v1128_v28  ;;  %v1111_v33 = vadd.f32 %v1110_v30, %v1092_v31 }
  0xe0   :  { %v1129_v44 = vpop.f32.mrf.mxu2  ;;  %v1160_v9 = vpop.f32.mrf.mxu0 }
  0xe1   :  { %v1148_v56 = vpop.f32.mrf.mxu3  ;;  %v1130_v48 = vadd.f32 %v1129_v44, %v1111_v33  ;;  %v1179_v34 = vpop.f32.mrf.mxu1  ;;  %v1161_v13 = vadd.f32 %v1160_v9, %v1142_v12  ;;  %v1346_v44 = vunpack.c.h.bf16 %v1341_v19 }
  0xe2   :  { %v1180_v58 = vadd.f32 %v1179_v34, %v184_v14  ;;  %v1343_v34 = vld [vmem:[%s3322_s3 + $0x10] sm:$0xff] }
  0xe3   :  { %v3284_v35 = vadd.f32 %v1148_v56, %v1130_v48 }
  0xe8   :  { %v1198_v36 = vpop.f32.mrf.mxu2  ;;  %v1162_v51 = vpop.f32.mrf.mxu0 }
  0xe9   :  { %v1217_v50 = vpop.f32.mrf.mxu3  ;;  %v1181_v37 = vpop.f32.mrf.mxu1  ;;  %v3286_v53 = vadd.f32 %v1162_v51, %v1144_v24  ;;  %v1199_v59 = vadd.f32 %v1198_v36, %v1180_v58  ;;  %v1345_v24 = vunpack.c.l.bf16 %v1341_v19  ;;  %v1342_v51 = vld [vmem:[%s3322_s3 + $0x8] sm:$0xff] }
  0xea   :  { %v1182_v4 = vadd.f32 %v1181_v37, %v184_v14  ;;  %v1348_v58 = vunpack.c.h.bf16 %v1342_v51 }
  0xeb   :  { %v1218_v3 = vadd.f32 %v1217_v50, %v1199_v59  ;;  %v1353_v9 = vadd.f32 %v1345_v24, %v1161_v13 }
  0xf0   :  { %v1200_v54 = vpop.f32.mrf.mxu2  ;;  %v1165_v39 = vpop.f32.mrf.mxu0 }
  0xf1   :  { %v1219_v38 = vpop.f32.mrf.mxu3  ;;  %v1184_v40 = vpop.f32.mrf.mxu1  ;;  %v1201_v57 = vadd.f32 %v1200_v54, %v1182_v4 }
  0xf2   :  { %v1185_v2 = vadd.f32 %v1184_v40, %v184_v14  ;;  %v1349_v40 = vunpack.c.l.bf16 %v1343_v34 }
  0xf3   :  { %v1220_v15 = vadd.f32 %v1219_v38, %v1201_v57  ;;  %v1166_v38 = vadd.f32 %v1165_v39, %v3282_v32  ;;  %v1344_v32 = vld [vmem:[%s3322_s3 + $0x18] sm:$0xff] }
  0xf5   :  { %v1357_v59 = vadd.f32 %v1349_v40, %v1166_v38 }
  0xf8   :  { %v1203_v41 = vpop.f32.mrf.mxu2  ;;  %v3288_v43 = vpop.f32.mrf.mxu0 }
  0xf9   :  { %v1222_v42 = vpop.f32.mrf.mxu3  ;;  %v1186_v45 = vpop.f32.mrf.mxu1  ;;  %v1204_v10 = vadd.f32 %v1203_v41, %v1185_v2 }
  0xfa   :  { %v1187_v20 = vadd.f32 %v1186_v45, %v184_v14  ;;  %v1347_v45 = vunpack.c.l.bf16 %v1342_v51 }
  0xfb   :  { %v1223_v12 = vadd.f32 %v1222_v42, %v1204_v10  ;;  %v1361_v42 = vmax.f32 %v1353_v9, 0.0  ;;  %v1168_v10 = vadd.f32 %v3288_v43, %v3284_v35 }
 0x100   :  { %v1205_v6 = vpop.f32.mrf.mxu2  ;;  %v1236_v17 = vpop.f32.mrf.mxu0 }
 0x101   :  { %v1224_v46 = vpop.f32.mrf.mxu3  ;;  %v1255_v47 = vpop.f32.mrf.mxu1  ;;  %v1237_v7 = vadd.f32 %v1236_v17, %v1218_v3  ;;  %v1206_v23 = vadd.f32 %v1205_v6, %v1187_v20  ;;  %v1351_v3 = vunpack.c.l.bf16 %v1344_v32 }
 0x103   :  { %v1256_v5 = vadd.f32 %v1255_v47, %v1237_v7  ;;  %v1225_v56 = vadd.f32 %v1224_v46, %v1206_v23  ;;  %v1365_v7 = vmax.f32 %v1357_v59, 0.0  ;;  %v1359_v19 = vadd.f32 %v1351_v3, %v1168_v10 }
 0x105   :  { %v1367_v43 = vmax.f32 %v1359_v19, 0.0 }
 0x108   :  { %v1274_v49 = vpop.f32.mrf.mxu2  ;;  %v1238_v52 = vpop.f32.mrf.mxu0 }
 0x109   :  { %v1293_v18 = vpop.f32.mrf.mxu3  ;;  %v1257_v55 = vpop.f32.mrf.mxu1  ;;  %v1275_v16 = vadd.f32 %v1274_v49, %v1256_v5  ;;  %v1239_v22 = vadd.f32 %v1238_v52, %v1220_v15  ;;  %v1350_v49 = vunpack.c.h.bf16 %v1343_v34 }
 0x10b   :  { %v1294_v25 = vadd.f32 %v1293_v18, %v1275_v16  ;;  %v1258_v31 = vadd.f32 %v1257_v55, %v1239_v22 }
 0x110   :  { %v1276_v60 = vpop.f32.mrf.mxu2  ;;  %v1241_v62 = vpop.f32.mrf.mxu0 }
 0x111   :  { %v1295_v61 = vpop.f32.mrf.mxu3  ;;  %v1260_v63 = vpop.f32.mrf.mxu1  ;;  %v1242_v21 = vadd.f32 %v1241_v62, %v1223_v12  ;;  %v1277_v36 = vadd.f32 %v1276_v60, %v1258_v31 }
 0x113   :  { %v1261_v28 = vadd.f32 %v1260_v63, %v1242_v21  ;;  %v1296_v6 = vadd.f32 %v1295_v61, %v1277_v36  ;;  %v1355_v61 = vadd.f32 %v1347_v45, %v3286_v53  ;;  %v1352_v53 = vunpack.c.h.bf16 %v1344_v32 }
 0x118   :  { %v1279_v0 = vpop.f32.mrf.mxu2  ;;  %v1243_v1 = vpop.f32.mrf.mxu0 }
 0x119   :  { %v1298_v11 = vpop.f32.mrf.mxu3  ;;  %v1262_v8 = vpop.f32.mrf.mxu1  ;;  %v1280_v48 = vadd.f32 %v1279_v0, %v1261_v28  ;;  %v1244_v37 = vadd.f32 %v1243_v1, %v1225_v56 }
 0x11b   :  { %v1299_v41 = vadd.f32 %v1298_v11, %v1280_v48  ;;  %v1263_v47 = vadd.f32 %v1262_v8, %v1244_v37  ;;  %v1363_v11 = vmax.f32 %v1355_v61, 0.0 }
 0x120   :  { %v1281_v26 = vpop.f32.mrf.mxu2  ;;  %v1312_v29 = vpop.f32.mrf.mxu0 }
 0x121   :  { %v1300_v27 = vpop.f32.mrf.mxu3  ;;  %v1331_v30 = vpop.f32.mrf.mxu1  ;;  %v1313_v33 = vadd.f32 %v1312_v29, %v1294_v25  ;;  %v1282_v39 = vadd.f32 %v1281_v26, %v1263_v47 }
 0x123   :  { %v1332_v50 = vadd.f32 %v1331_v30, %v1313_v33  ;;  %v1301_v57 = vadd.f32 %v1300_v27, %v1282_v39 }
 0x125   :  { %v1354_v54 = vadd.f32 %v1346_v44, %v1332_v50 }
 0x127   :  { %v1362_v13 = vmax.f32 %v1354_v54, 0.0 }
 0x128   :  { %v1317_v46 = vpop.f32.mrf.mxu2  ;;  %v1314_v18 = vpop.f32.mrf.mxu0 }
 0x129   :  { %v1336_v17 = vpop.f32.mrf.mxu3  ;;  %v1318_v14 = vadd.f32 %v1317_v46, %v1299_v41  ;;  %v1369_v52 = vpack.c.bf16 %v1362_v13, %v1361_v42  ;;  %v1315_v55 = vadd.f32 %v1314_v18, %v1296_v6  ;;  %v1333_v62 = vpop.f32.mrf.mxu1 }
 0x12b   :  { %v1337_v60 = vadd.f32 %v1336_v17, %v1318_v14  ;;  %1373 = vst [vmem:[%s3323_s4] sm:$0xff] %v1369_v52  ;;  %v1334_v63 = vadd.f32 %v1333_v62, %v1315_v55 }
 0x12d   :  { %v1358_v2 = vadd.f32 %v1350_v49, %v1337_v60  ;;  %v1356_v4 = vadd.f32 %v1348_v58, %v1334_v63 }
 0x12f   :  { %v1366_v0 = vmax.f32 %v1358_v2, 0.0  ;;  %v1364_v1 = vmax.f32 %v1356_v4, 0.0 }
 0x130   :  { %v1319_v8 = vpop.f32.mrf.mxu2 }
 0x131   :  { %v1371_v5 = vpack.c.bf16 %v1366_v0, %v1365_v7  ;;  %v1320_v12 = vadd.f32 %v1319_v8, %v1301_v57  ;;  %v1370_v15 = vpack.c.bf16 %v1364_v1, %v1363_v11  ;;  %v1338_v16 = vpop.f32.mrf.mxu3 }
 0x133   :  { %1375 = vst [vmem:[%s3323_s4 + $0x10] sm:$0xff] %v1371_v5  ;;  %v1339_v20 = vadd.f32 %v1338_v16, %v1320_v12 }
 0x134   :  { %1374 = vst [vmem:[%s3323_s4 + $0x8] sm:$0xff] %v1370_v15 }
 0x135   :  { %v1360_v35 = vadd.f32 %v1352_v53, %v1339_v20 }
 0x137   :  { %v1368_v21 = vmax.f32 %v1360_v35, 0.0 }
 0x139   :  { %v1372_v22 = vpack.c.bf16 %v1368_v21, %v1367_v43 }
 0x13b   :  { %1376 = vst [vmem:[%s3323_s4 + $0x18] sm:$0xff] %v1372_v22 }

// kernel: psa_relit_pcnet_forward.29
= control target key start
LH: loop header
LB: loop body
LE: loop exit
PB: predicated region body
PF: predicated region fallthrough
CT: control target
= control target key end

     0   :  { %s988_s1 = inlined_call_operand.vmem [shape: bf16[640,128], index: 1, kind: input, shape index: {}]   ;;  %s989_s2 = inlined_call_operand.vmem [shape: f32[1,128], index: 2, kind: input, shape index: {}]   ;;  %s990_s0 = inlined_call_operand.vmem [shape: bf16[32,640], index: 0, kind: input, shape index: {}]   ;;  %s991_s3 = inlined_call_operand.vmem [shape: bf16[32,128], index: 3, kind: output, shape index: {}]  }
   0x1   :  { %v726_v0 = vld [vmem:[%s988_s1 + $0x38] sm:$0xff]  ;;  %v725_v4 = vld [vmem:[%s988_s1 + $0x30] sm:$0xff]  ;;  %v724_v8 = vld [vmem:[%s988_s1 + $0x28] sm:$0xff] }
   0x2   :  { %v734_v1 = vld [vmem:[%s988_s1 + $0x78] sm:$0xff]  ;;  %402 = vmatpush.bf16.msra.mxu0 %v726_v0  ;;  %v733_v5 = vld [vmem:[%s988_s1 + $0x70] sm:$0xff]  ;;  %v732_v9 = vld [vmem:[%s988_s1 + $0x68] sm:$0xff] }
   0x3   :  { %v742_v2 = vld [vmem:[%s988_s1 + $0xb8] sm:$0xff]  ;;  %421 = vmatpush.bf16.msra.mxu1 %v734_v1  ;;  %v741_v6 = vld [vmem:[%s988_s1 + $0xb0] sm:$0xff]  ;;  %v740_v10 = vld [vmem:[%s988_s1 + $0xa8] sm:$0xff] }
   0x4   :  { %v750_v3 = vld [vmem:[%s988_s1 + $0xf8] sm:$0xff]  ;;  %440 = vmatpush.bf16.msra.mxu2 %v742_v2  ;;  %v749_v7 = vld [vmem:[%s988_s1 + $0xf0] sm:$0xff]  ;;  %v748_v11 = vld [vmem:[%s988_s1 + $0xe8] sm:$0xff] }
   0x5   :  { %459 = vmatpush.bf16.msra.mxu3 %v750_v3  ;;  %v723_v12 = vld [vmem:[%s988_s1 + $0x20] sm:$0xff]  ;;  %v722_v16 = vld [vmem:[%s988_s1 + $0x18] sm:$0xff]  ;;  %v721_v20 = vld [vmem:[%s988_s1 + $0x10] sm:$0xff] }
   0x6   :  { %403 = vmatpush.bf16.msra.mxu0 %v725_v4  ;;  %v731_v13 = vld [vmem:[%s988_s1 + $0x60] sm:$0xff]  ;;  %v730_v17 = vld [vmem:[%s988_s1 + $0x58] sm:$0xff]  ;;  %v729_v21 = vld [vmem:[%s988_s1 + $0x50] sm:$0xff] }
   0x7   :  { %422 = vmatpush.bf16.msra.mxu1 %v733_v5  ;;  %v739_v14 = vld [vmem:[%s988_s1 + $0xa0] sm:$0xff]  ;;  %v738_v18 = vld [vmem:[%s988_s1 + $0x98] sm:$0xff]  ;;  %v737_v22 = vld [vmem:[%s988_s1 + $0x90] sm:$0xff] }
   0x8   :  { %441 = vmatpush.bf16.msra.mxu2 %v741_v6  ;;  %v747_v15 = vld [vmem:[%s988_s1 + $0xe0] sm:$0xff]  ;;  %v746_v19 = vld [vmem:[%s988_s1 + $0xd8] sm:$0xff]  ;;  %v745_v23 = vld [vmem:[%s988_s1 + $0xd0] sm:$0xff] }
   0x9   :  { %460 = vmatpush.bf16.msra.mxu3 %v749_v7  ;;  %v720_v24 = vld [vmem:[%s988_s1 + $0x8] sm:$0xff]  ;;  %v719_v28 = vld [vmem:[%s988_s1] sm:$0xff]  ;;  %v711_v33 = vld [vmem:[%s990_s0 + $0x10] sm:$0xf0] }
   0xa   :  { %404 = vmatpush.bf16.msra.mxu0 %v724_v8  ;;  %v728_v25 = vld [vmem:[%s988_s1 + $0x48] sm:$0xff]  ;;  %v727_v29 = vld [vmem:[%s988_s1 + $0x40] sm:$0xff]  ;;  %v513_v35 = vld [vmem:[%s990_s0 + $0x14] sm:$0xf0] }
   0xb   :  { %423 = vmatpush.bf16.msra.mxu1 %v732_v9  ;;  %v736_v26 = vld [vmem:[%s988_s1 + $0x88] sm:$0xff]  ;;  %v735_v30 = vld [vmem:[%s988_s1 + $0x80] sm:$0xff]  ;;  %v712_v37 = vld [vmem:[%s990_s0 + $0x18] sm:$0xf0] }
   0xc   :  { %442 = vmatpush.bf16.msra.mxu2 %v740_v10  ;;  %v744_v27 = vld [vmem:[%s988_s1 + $0xc8] sm:$0xff]  ;;  %v743_v31 = vld [vmem:[%s988_s1 + $0xc0] sm:$0xff]  ;;  %v758_v40 = vld [vmem:[%s988_s1 + $0x138] sm:$0xff] }
   0xd   :  { %461 = vmatpush.bf16.msra.mxu3 %v748_v11  ;;  %v511_v32 = vld [vmem:[%s990_s0] sm:$0xf]  ;;  %v709_v34 = vld [vmem:[%s990_s0 + $0x4] sm:$0xf]  ;;  %v519_v36 = vld [vmem:[%s990_s0 + $0x8] sm:$0xf] }
   0xe   :  { %405 = vmatpush.bf16.msra.mxu0 %v723_v12  ;;  %v710_v38 = vld [vmem:[%s990_s0 + $0xc] sm:$0xf]  ;;  %v521_v39 = vld [vmem:[%s990_s0 + $0x1c] sm:$0xf0]  ;;  %v512_v41 = vor.u32 %v711_v33, %v511_v32  ;;  %v516_v42 = vor.u32 %v709_v34, %v513_v35  ;;  %v520_v43 = vor.u32 %v712_v37, %v519_v36  ;;  %v757_v45 = vld [vmem:[%s988_s1 + $0x130] sm:$0xff] }
   0xf   :  { %424 = vmatpush.bf16.msra.mxu1 %v731_v13  ;;  %v524_v44 = vor.u32 %v710_v38, %v521_v39  ;;  %v756_v46 = vld [vmem:[%s988_s1 + $0x128] sm:$0xff]  ;;  %v755_v47 = vld [vmem:[%s988_s1 + $0x120] sm:$0xff]  ;;  %v716_v49 = vld [vmem:[%s990_s0 + $0x38] sm:$0xf0] }
  0x10   :  { %443 = vmatpush.bf16.msra.mxu2 %v739_v14  ;;  %v531_v48 = vld [vmem:[%s990_s0 + $0x28] sm:$0xf]  ;;  %v714_v50 = vld [vmem:[%s990_s0 + $0x2c] sm:$0xf]  ;;  %v533_v51 = vld [vmem:[%s990_s0 + $0x3c] sm:$0xf0] }
  0x11   :  { %462 = vmatpush.bf16.msra.mxu3 %v747_v15  ;;  %v539_v52 = vld [vmem:[%s990_s0 + $0x30] sm:$0xf]  ;;  %v717_v53 = vld [vmem:[%s990_s0 + $0x40] sm:$0xf0]  ;;  %v715_v54 = vld [vmem:[%s990_s0 + $0x34] sm:$0xf]  ;;  %v532_v57 = vor.u32 %v716_v49, %v531_v48  ;;  %v536_v58 = vor.u32 %v714_v50, %v533_v51 }
  0x12   :  { %406 = vmatpush.bf16.msra.mxu0 %v722_v16  ;;  %v541_v55 = vld [vmem:[%s990_s0 + $0x44] sm:$0xf0]  ;;  %v754_v56 = vld [vmem:[%s988_s1 + $0x118] sm:$0xff]  ;;  %v540_v59 = vor.u32 %v717_v53, %v539_v52  ;;  %v753_v61 = vld [vmem:[%s988_s1 + $0x110] sm:$0xff] }
  0x13   :  { %425 = vmatpush.bf16.msra.mxu1 %v730_v17  ;;  %v544_v60 = vor.u32 %v715_v54, %v541_v55  ;;  %v752_v62 = vld [vmem:[%s988_s1 + $0x108] sm:$0xff]  ;;  %v751_v63 = vld [vmem:[%s988_s1 + $0x100] sm:$0xff]  ;;  %v527_v0 = vld [vmem:[%s990_s0 + $0x10] sm:$0xf] }
  0x14   :  { %444 = vmatpush.bf16.msra.mxu2 %v738_v18  ;;  %v713_v1 = vld [vmem:[%s990_s0 + $0x20] sm:$0xf0]  ;;  %v547_v2 = vld [vmem:[%s990_s0 + $0x38] sm:$0xf]  ;;  %v718_v3 = vld [vmem:[%s990_s0 + $0x48] sm:$0xf0] }
  0x15   :  { %463 = vmatpush.bf16.msra.mxu3 %v746_v19  ;;  %v528_v4 = vor.u32 %v713_v1, %v527_v0  ;;  %v548_v5 = vor.u32 %v718_v3, %v547_v2  ;;  %v778_v19 = vld [vmem:[%s989_s2] ss:$0 sm:$0xff] }
  0x16   :  { %407 = vmatpush.bf16.msra.mxu0 %v721_v20 }
  0x17   :  { %426 = vmatpush.bf16.msra.mxu1 %v729_v21 }
  0x18   :  { %445 = vmatpush.bf16.msra.mxu2 %v737_v22 }
  0x19   :  { %464 = vmatpush.bf16.msra.mxu3 %v745_v23 }
  0x1a   :  { %408 = vmatpush.bf16.msra.mxu0 %v720_v24 }
  0x1b   :  { %427 = vmatpush.bf16.msra.mxu1 %v728_v25 }
  0x1c   :  { %446 = vmatpush.bf16.msra.mxu2 %v736_v26 }
  0x1d   :  { %465 = vmatpush.bf16.msra.mxu3 %v744_v27 }
  0x1e   :  { %409 = vmatpush.bf16.msra.mxu0 %v719_v28 }
  0x1f   :  { %428 = vmatpush.bf16.msra.mxu1 %v727_v29 }
  0x20   :  { %447 = vmatpush.bf16.msra.mxu2 %v735_v30 }
  0x21   :  { %466 = vmatpush.bf16.msra.mxu3 %v743_v31  ;;  %410 = vmatmul.bf16.vlgmr.msra.gmra.mxu0 %v512_v41 }
  0x22   :  { %478 = vmatpush.bf16.msrb.mxu0 %v758_v40  ;;  %429 = vmatmul.bf16.vlgmr.msra.gmra.mxu1 %v516_v42 }
  0x23   :  { %770 = vmatpush.bf16.msrb.mxu1 %v758_v40  ;;  %448 = vmatmul.bf16.vlgmr.msra.gmra.mxu2 %v520_v43 }
  0x24   :  { %467 = vmatmul.bf16.vlgmr.msra.gmra.mxu3 %v524_v44 }
  0x26   :  { %479 = vmatpush.bf16.msrb.mxu0 %v757_v45 }
  0x27   :  { %771 = vmatpush.bf16.msrb.mxu1 %v757_v45 }
  0x2a   :  { %480 = vmatpush.bf16.msrb.mxu0 %v756_v46 }
  0x2b   :  { %772 = vmatpush.bf16.msrb.mxu1 %v756_v46 }
  0x2e   :  { %481 = vmatpush.bf16.msrb.mxu0 %v755_v47 }
  0x2f   :  { %773 = vmatpush.bf16.msrb.mxu1 %v755_v47 }
  0x31   :  { %415 = vmatmul.bf16.gmra.mxu0 %v532_v57 }
  0x32   :  { %482 = vmatpush.bf16.msrb.mxu0 %v754_v56  ;;  %434 = vmatmul.bf16.gmra.mxu1 %v536_v58 }
  0x33   :  { %774 = vmatpush.bf16.msrb.mxu1 %v754_v56  ;;  %453 = vmatmul.bf16.gmra.mxu2 %v540_v59 }
  0x34   :  { %472 = vmatmul.bf16.gmra.mxu3 %v544_v60 }
  0x36   :  { %483 = vmatpush.bf16.msrb.mxu0 %v753_v61 }
  0x37   :  { %775 = vmatpush.bf16.msrb.mxu1 %v753_v61 }
  0x3a   :  { %484 = vmatpush.bf16.msrb.mxu0 %v752_v62 }
  0x3b   :  { %776 = vmatpush.bf16.msrb.mxu1 %v752_v62 }
  0x3e   :  { %485 = vmatpush.bf16.msrb.mxu0 %v751_v63 }
  0x3f   :  { %777 = vmatpush.bf16.msrb.mxu1 %v751_v63 }
  0x41   :  { %486 = vmatmul.bf16.vlgmr.msrb.gmra.mxu0 %v528_v4 }
  0x42   :  { %491 = vmatmul.bf16.vlgmr.msrb.gmra.mxu1 %v548_v5 }
  0x9e   :  { %v411_v6 = vpop.f32.mrf.mxu0 }
  0x9f   :  { %v430_v7 = vpop.f32.mrf.mxu1  ;;  %v412_v21 = vadd.f32 %v778_v19, %v411_v6 }
  0xa1   :  { %v431_v28 = vadd.f32 %v430_v7, %v412_v21 }
  0xa6   :  { %v449_v8 = vpop.f32.mrf.mxu2  ;;  %v413_v10 = vpop.f32.mrf.mxu0 }
  0xa7   :  { %v468_v9 = vpop.f32.mrf.mxu3  ;;  %v432_v11 = vpop.f32.mrf.mxu1  ;;  %v414_v22 = vadd.f32 %v778_v19, %v413_v10  ;;  %v450_v32 = vadd.f32 %v449_v8, %v431_v28 }
  0xa9   :  { %v433_v29 = vadd.f32 %v432_v11, %v414_v22  ;;  %v469_v37 = vadd.f32 %v468_v9, %v450_v32 }
  0xae   :  { %v451_v12 = vpop.f32.mrf.mxu2  ;;  %v416_v13 = vpop.f32.mrf.mxu0 }
  0xaf   :  { %v435_v14 = vpop.f32.mrf.mxu1  ;;  %v470_v15 = vpop.f32.mrf.mxu3  ;;  %v417_v23 = vadd.f32 %v778_v19, %v416_v13  ;;  %v452_v33 = vadd.f32 %v451_v12, %v433_v29 }
  0xb1   :  { %v436_v30 = vadd.f32 %v435_v14, %v417_v23  ;;  %v471_v38 = vadd.f32 %v470_v15, %v452_v33 }
  0xb6   :  { %v454_v16 = vpop.f32.mrf.mxu2  ;;  %v418_v17 = vpop.f32.mrf.mxu0 }
  0xb7   :  { %v437_v18 = vpop.f32.mrf.mxu1  ;;  %v473_v20 = vpop.f32.mrf.mxu3  ;;  %v419_v24 = vadd.f32 %v778_v19, %v418_v17  ;;  %v455_v34 = vadd.f32 %v454_v16, %v436_v30 }
  0xb9   :  { %v438_v31 = vadd.f32 %v437_v18, %v419_v24  ;;  %v474_v39 = vadd.f32 %v473_v20, %v455_v34 }
  0xbe   :  { %v456_v25 = vpop.f32.mrf.mxu2  ;;  %v487_v26 = vpop.f32.mrf.mxu0 }
  0xbf   :  { %v492_v27 = vpop.f32.mrf.mxu1  ;;  %v457_v35 = vadd.f32 %v456_v25, %v438_v31  ;;  %v475_v36 = vpop.f32.mrf.mxu3  ;;  %v488_v43 = vadd.f32 %v487_v26, %v469_v37 }
  0xc0   :  { %v493_v44 = vadd.f32 %v492_v27, %v474_v39 }
  0xc1   :  { %v476_v40 = vadd.f32 %v475_v36, %v457_v35 }
  0xc6   :  { %v489_v41 = vpop.f32.mrf.mxu0 }
  0xc7   :  { %v494_v42 = vpop.f32.mrf.mxu1  ;;  %v490_v45 = vadd.f32 %v489_v41, %v471_v38 }
  0xc8   :  { %v495_v46 = vadd.f32 %v494_v42, %v476_v40 }
  0xc9   :  { %v762_v47 = vpack.c.bf16 %v490_v45, %v488_v43 }
  0xca   :  { %v767_v48 = vpack.c.bf16 %v495_v46, %v493_v44 }
  0xcb   :  { %763 = vst [vmem:[%s991_s3] sm:$0xff] %v762_v47  }
  0xcc   :  { %769 = vst [vmem:[%s991_s3 + $0x8] sm:$0xff] %v767_v48  }

// kernel: psa_relit_pcnet_forward.27
= control target key start
LH: loop header
LB: loop body
LE: loop exit
PB: predicated region body
PF: predicated region fallthrough
CT: control target
= control target key end

     0   :  { %vm91_vm0 = vcmask 261120   ;;  %vm181_vm1 = vcmask 519168   ;;  %s392_s1 = inlined_call_operand.vmem [shape: bf16[32,64], index: 1, kind: input, shape index: {}]   ;;  %s393_s0 = inlined_call_operand.vmem [shape: bf16[128,32], index: 0, kind: input, shape index: {}]   ;;  %s394_s2 = inlined_call_operand.vmem [shape: f32[1,64], index: 2, kind: input, shape index: {}]   ;;  %s395_s3 = inlined_call_operand.vmem [shape: bf16[128,64], index: 3, kind: output, shape index: {}]  }
   0x1   :  { %v259_v0 = vld [vmem:[%s392_s1 + $0x8] sm:$0xff]  ;;  %v258_v1 = vld [vmem:[%s392_s1] sm:$0xff]  ;;  %v252_v3 = vld [vmem:[%s393_s0 + $0x10] sm:$0xff] }
   0x2   :  { %122 = vmatpush.bf16.msra.mxu0 %v259_v0  ;;  %260 = vmatpush.bf16.msra.mxu1 %v259_v0  ;;  %v250_v2 = vld [vmem:[%s393_s0] sm:$0xff]  ;;  %v256_v5 = vld [vmem:[%s393_s0 + $0x30] sm:$0xff]  ;;  %v251_v6 = vld [vmem:[%s393_s0 + $0x8] sm:$0xff] }
   0x3   :  { %261 = vmatpush.bf16.msra.mxu2 %v259_v0  ;;  %262 = vmatpush.bf16.msra.mxu3 %v259_v0  ;;  %v254_v4 = vld [vmem:[%s393_s0 + $0x20] sm:$0xff]  ;;  %v253_v7 = vld [vmem:[%s393_s0 + $0x18] sm:$0xff]  ;;  %v255_v8 = vld [vmem:[%s393_s0 + $0x28] sm:$0xff] }
   0x4   :  { %v257_v9 = vld [vmem:[%s393_s0 + $0x38] sm:$0xff]  ;;  %v266_v10 = vld [vmem:[%s394_s2] ss:$0 sm:$0xff] }
   0x6   :  { %123 = vmatpush.bf16.msra.mxu0 %v258_v1  ;;  %263 = vmatpush.bf16.msra.mxu1 %v258_v1 }
   0x7   :  { %264 = vmatpush.bf16.msra.mxu2 %v258_v1  ;;  %265 = vmatpush.bf16.msra.mxu3 %v258_v1 }
   0x9   :  { %242 = vmatmul.msk.bf16.vlgmr.msra.gmra.mxu0 %vm91_vm0, %v250_v2  ;;  %244 = vmatmul.msk.bf16.vlgmr.msra.gmra.mxu1 %vm91_vm0, %v252_v3 }
   0xa   :  { %246 = vmatmul.msk.bf16.vlgmr.msra.gmra.mxu2 %vm91_vm0, %v254_v4  ;;  %248 = vmatmul.msk.bf16.vlgmr.msra.gmra.mxu3 %vm91_vm0, %v256_v5 }
  0x19   :  { %243 = vmatmul.msk.bf16.gmra.mxu0 %vm91_vm0, %v251_v6  ;;  %245 = vmatmul.msk.bf16.gmra.mxu1 %vm91_vm0, %v253_v7 }
  0x1a   :  { %247 = vmatmul.msk.bf16.gmra.mxu2 %vm91_vm0, %v255_v8  ;;  %249 = vmatmul.msk.bf16.gmra.mxu3 %vm91_vm0, %v257_v9 }
  0x86   :  { %v125_v11 = vpop.f32.mrf.mxu0  ;;  %v135_v12 = vpop.f32.mrf.mxu1 }
  0x87   :  { %v126_v13 = vadd.f32 %v266_v10, %v125_v11  ;;  %v136_v14 = vadd.f32 %v266_v10, %v135_v12 }
  0x89   :  { %v165_v15 = vpack.c.bf16 %v126_v13, %v126_v13  ;;  %v169_v16 = vpack.c.bf16 %v136_v14, %v136_v14 }
  0x8b   :  { %182 = vst.msk [vmem:[%s395_s3] sm:$0xf] %vm181_vm1, %v165_v15 }
  0x8c   :  { %186 = vst.msk [vmem:[%s395_s3 + $0x10] sm:$0xf] %vm181_vm1, %v169_v16 }
  0x8d   :  { %v145_v17 = vpop.f32.mrf.mxu2  ;;  %v155_v18 = vpop.f32.mrf.mxu3 }
  0x8e   :  { %v146_v19 = vadd.f32 %v266_v10, %v145_v17  ;;  %v156_v20 = vadd.f32 %v266_v10, %v155_v18  ;;  %v127_v21 = vpop.f32.mrf.mxu0  ;;  %v137_v22 = vpop.f32.mrf.mxu1 }
  0x8f   :  { %v128_v23 = vadd.f32 %v266_v10, %v127_v21  ;;  %v138_v24 = vadd.f32 %v266_v10, %v137_v22 }
  0x90   :  { %v173_v25 = vpack.c.bf16 %v146_v19, %v146_v19  ;;  %v177_v26 = vpack.c.bf16 %v156_v20, %v156_v20 }
  0x91   :  { %v166_v27 = vpack.c.bf16 %v128_v23, %v128_v23  ;;  %v170_v28 = vpack.c.bf16 %v138_v24, %v138_v24 }
  0x92   :  { %190 = vst.msk [vmem:[%s395_s3 + $0x20] sm:$0xf] %vm181_vm1, %v173_v25 }
  0x93   :  { %194 = vst.msk [vmem:[%s395_s3 + $0x30] sm:$0xf] %vm181_vm1, %v177_v26 }
  0x94   :  { %183 = vst.msk [vmem:[%s395_s3 + $0x4] sm:$0xf] %vm181_vm1, %v166_v27 }
  0x95   :  { %187 = vst.msk [vmem:[%s395_s3 + $0x14] sm:$0xf] %vm181_vm1, %v170_v28  ;;  %v147_v29 = vpop.f32.mrf.mxu2  ;;  %v157_v30 = vpop.f32.mrf.mxu3 }
  0x96   :  { %v148_v31 = vadd.f32 %v266_v10, %v147_v29  ;;  %v158_v32 = vadd.f32 %v266_v10, %v157_v30  ;;  %v130_v33 = vpop.f32.mrf.mxu0  ;;  %v140_v34 = vpop.f32.mrf.mxu1 }
  0x97   :  { %v131_v35 = vadd.f32 %v266_v10, %v130_v33  ;;  %v141_v36 = vadd.f32 %v266_v10, %v140_v34 }
  0x98   :  { %v174_v37 = vpack.c.bf16 %v148_v31, %v148_v31  ;;  %v178_v38 = vpack.c.bf16 %v158_v32, %v158_v32 }
  0x99   :  { %v167_v39 = vpack.c.bf16 %v131_v35, %v131_v35  ;;  %v171_v40 = vpack.c.bf16 %v141_v36, %v141_v36 }
  0x9a   :  { %191 = vst.msk [vmem:[%s395_s3 + $0x24] sm:$0xf] %vm181_vm1, %v174_v37 }
  0x9b   :  { %195 = vst.msk [vmem:[%s395_s3 + $0x34] sm:$0xf] %vm181_vm1, %v178_v38 }
  0x9c   :  { %184 = vst.msk [vmem:[%s395_s3 + $0x8] sm:$0xf] %vm181_vm1, %v167_v39 }
  0x9d   :  { %188 = vst.msk [vmem:[%s395_s3 + $0x18] sm:$0xf] %vm181_vm1, %v171_v40  ;;  %v150_v41 = vpop.f32.mrf.mxu2  ;;  %v160_v42 = vpop.f32.mrf.mxu3 }
  0x9e   :  { %v151_v43 = vadd.f32 %v266_v10, %v150_v41  ;;  %v161_v44 = vadd.f32 %v266_v10, %v160_v42  ;;  %v132_v45 = vpop.f32.mrf.mxu0  ;;  %v142_v46 = vpop.f32.mrf.mxu1 }
  0x9f   :  { %v133_v47 = vadd.f32 %v266_v10, %v132_v45  ;;  %v143_v48 = vadd.f32 %v266_v10, %v142_v46 }
  0xa0   :  { %v175_v49 = vpack.c.bf16 %v151_v43, %v151_v43  ;;  %v179_v50 = vpack.c.bf16 %v161_v44, %v161_v44 }
  0xa1   :  { %v168_v51 = vpack.c.bf16 %v133_v47, %v133_v47  ;;  %v172_v52 = vpack.c.bf16 %v143_v48, %v143_v48 }
  0xa2   :  { %192 = vst.msk [vmem:[%s395_s3 + $0x28] sm:$0xf] %vm181_vm1, %v175_v49 }
  0xa3   :  { %196 = vst.msk [vmem:[%s395_s3 + $0x38] sm:$0xf] %vm181_vm1, %v179_v50 }
  0xa4   :  { %185 = vst.msk [vmem:[%s395_s3 + $0xc] sm:$0xf] %vm181_vm1, %v168_v51 }
  0xa5   :  { %189 = vst.msk [vmem:[%s395_s3 + $0x1c] sm:$0xf] %vm181_vm1, %v172_v52  ;;  %v152_v53 = vpop.f32.mrf.mxu2  ;;  %v162_v54 = vpop.f32.mrf.mxu3 }
  0xa6   :  { %v153_v55 = vadd.f32 %v266_v10, %v152_v53  ;;  %v163_v56 = vadd.f32 %v266_v10, %v162_v54 }
  0xa8   :  { %v176_v57 = vpack.c.bf16 %v153_v55, %v153_v55  ;;  %v180_v58 = vpack.c.bf16 %v163_v56, %v163_v56 }
  0xaa   :  { %193 = vst.msk [vmem:[%s395_s3 + $0x2c] sm:$0xf] %vm181_vm1, %v176_v57 }
  0xab   :  { %197 = vst.msk [vmem:[%s395_s3 + $0x3c] sm:$0xf] %vm181_vm1, %v180_v58 }

// kernel: psa_relit_pcnet_forward.34
= control target key start
LH: loop header
LB: loop body
LE: loop exit
PB: predicated region body
PF: predicated region fallthrough
CT: control target
= control target key end

     0   :  { %s802_s12 = smov 0   ;;  %s804_s13 = smov 0   ;;  %s975_s0 = inlined_call_operand.vmem [shape: bf16[128,64], index: 0, kind: input, shape index: {}]   ;;  %s976_s1 = inlined_call_operand.vmem [shape: bf16[2,64,64], index: 1, kind: input, shape index: {}]   ;;  %s977_s2 = inlined_call_operand.vmem [shape: f32[1,64], index: 2, kind: input, shape index: {}]   ;;  %s978_s3 = inlined_call_operand.vmem [shape: bf16[16,2,8,64], index: 3, kind: output, shape index: {}]  }
   0x1   :  { %s806_s14 = smov 0   ;;  %s808_s15 = smov 0  }
   0x2   :  { %s810_s16 = smov 0  }
   0x3 LB: > { %s607_s17 = sadd.s32 4294967295, %s780_s16   ;;  %s22_s18 = sadd.s32 1, %s776_s15  ;;  %s780_s16 = sphi %s810_s16, %s13_s16   ;;  %s776_s15 = sphi %s808_s15, %s983_s15   ;;  %s772_s14 = sphi %s806_s14, %s982_s14   ;;  %s768_s13 = sphi %s804_s13, %s981_s13   ;;  %s764_s12 = sphi %s802_s12, %s980_s12  }
   0x4   : > { %p23_p0 = scmp.ge.s32.totalorder %s22_s18, 2  ;;  %s107_s19 = sadd.s32 1, %s768_s13 }
   0x5   : > { %p117_p1 = scmp.ne.s32.totalorder %s768_s13, %s764_s12  ;;  %p118_p2 = scmp.eq.s32.totalorder %s607_s17, 1 }
   0x6   : > { %s985_s18 = smov (%p23_p0, %s22_s18), 0  ;;  %p612_p4 = scmp.ge.s32.totalorder %s780_s16, 1 }
   0x7   : > { %p834_p3 = por %p118_p2, %p117_p1  ;;  %s103_s21 = ssub.s32 %s776_s15, %s985_s18 }
   0x8   : > { %p162_p5 = scmp.lt.s32.totalorder %s780_s16, 3  ;;  %p105_p6 = scmp.eq.s32.totalorder %s103_s21, 0 }
   0xa   : > { %p163_p7 = pnand %p612_p4, %p162_p5 }
   0xb   : > { %s843_s22 = scalar_select %p105_p6, %s768_s13, %s107_s19  }
   0xc   : > { %166 = sbr.rel (%p163_p7) target bundleno = 210 (0xd2), region = 32  ;;  %p196_p8 = scmp.lt.s32.totalorder (!%p163_p7), %s772_s14, 1 }
  0x11   : > { %s197_s23 = scalar_select %p196_p8, %s772_s14, 1  ;;  %v677_v4 = vld [vmem:[%s975_s0] sm:$0xff]  ;;  %v679_v5 = vld [vmem:[%s975_s0 + $0x10] sm:$0xff]  ;;  %vm295_vm0 = vcmask 523264   ;;  %v678_v8 = vld [vmem:[%s975_s0 + $0x8] sm:$0xff]  ;;  %vm401_vm1 = vcmask 519168  }
  0x12   : > { %v681_v6 = vld [vmem:[%s975_s0 + $0x20] sm:$0xff]  ;;  %v683_v7 = vld [vmem:[%s975_s0 + $0x30] sm:$0xff]  ;;  %v680_v9 = vld [vmem:[%s975_s0 + $0x18] sm:$0xff] }
  0x13   : > { %s676_s24 = sshll.u32 %s197_s23, 5  ;;  %v682_v10 = vld [vmem:[%s975_s0 + $0x28] sm:$0xff]  ;;  %v684_v11 = vld [vmem:[%s975_s0 + $0x38] sm:$0xff]  ;;  %v885_v12 = vld [vmem:[%s977_s2] ss:$0 sm:$0xff] }
  0x14   : > { %s200_s27 = scalar_lea.vmem %s976_s1, %s676_s24 }
  0x15   : > { %v688_v0 = vld [vmem:[%s200_s27 + $0x18] sm:$0xff]  ;;  %v687_v1 = vld [vmem:[%s200_s27 + $0x10] sm:$0xff]  ;;  %v686_v2 = vld [vmem:[%s200_s27 + $0x8] sm:$0xff] }
  0x16   : > { %324 = vmatpush.bf16.msra.mxu0 %v688_v0  ;;  %689 = vmatpush.bf16.msra.mxu1 %v688_v0  ;;  %v685_v3 = vld [vmem:[%s200_s27] sm:$0xff]  ;;  %s187_s27 = sand.u32 1, %s764_s12   ;;  %s673_s12 = sshll.u32 (%p834_p3), %s772_s14, 2 }
  0x17   : > { %690 = vmatpush.bf16.msra.mxu2 %v688_v0  ;;  %691 = vmatpush.bf16.msra.mxu3 %v688_v0  ;;  %s613_s28 = sshll.u32 %s187_s27, 6  ;;  %s429_s5 = scalar_lea.vmem (%p834_p3), %s978_s3, %s673_s12 }
  0x18   : > { %s890_s29 = scalar_lea.vmem [#allocation2], %s613_s28 }
  0x1a   : > { %325 = vmatpush.bf16.msra.mxu0 %v687_v1  ;;  %692 = vmatpush.bf16.msra.mxu1 %v687_v1 }
  0x1b   : > { %693 = vmatpush.bf16.msra.mxu2 %v687_v1  ;;  %694 = vmatpush.bf16.msra.mxu3 %v687_v1 }
  0x1e   : > { %326 = vmatpush.bf16.msra.mxu0 %v686_v2  ;;  %695 = vmatpush.bf16.msra.mxu1 %v686_v2 }
  0x1f   : > { %696 = vmatpush.bf16.msra.mxu2 %v686_v2  ;;  %697 = vmatpush.bf16.msra.mxu3 %v686_v2 }
  0x22   : > { %327 = vmatpush.bf16.msra.mxu0 %v685_v3  ;;  %698 = vmatpush.bf16.msra.mxu1 %v685_v3 }
  0x23   : > { %699 = vmatpush.bf16.msra.mxu2 %v685_v3  ;;  %700 = vmatpush.bf16.msra.mxu3 %v685_v3 }
  0x25   : > { %664 = vmatmul.msk.bf16.vlgmr.msra.gmra.mxu0 %vm295_vm0, %v677_v4  ;;  %666 = vmatmul.msk.bf16.vlgmr.msra.gmra.mxu1 %vm295_vm0, %v679_v5 }
  0x26   : > { %668 = vmatmul.msk.bf16.vlgmr.msra.gmra.mxu2 %vm295_vm0, %v681_v6  ;;  %670 = vmatmul.msk.bf16.vlgmr.msra.gmra.mxu3 %vm295_vm0, %v683_v7 }
  0x35   : > { %665 = vmatmul.msk.bf16.gmra.mxu0 %vm295_vm0, %v678_v8  ;;  %667 = vmatmul.msk.bf16.gmra.mxu1 %vm295_vm0, %v680_v9 }
  0x36   : > { %669 = vmatmul.msk.bf16.gmra.mxu2 %vm295_vm0, %v682_v10  ;;  %671 = vmatmul.msk.bf16.gmra.mxu3 %vm295_vm0, %v684_v11 }
  0xa2   : > { %v329_v13 = vpop.f32.mrf.mxu0  ;;  %v339_v14 = vpop.f32.mrf.mxu1 }
  0xa3   : > { %v330_v15 = vadd.f32 %v885_v12, %v329_v13  ;;  %v340_v16 = vadd.f32 %v885_v12, %v339_v14 }
  0xa5   : > { %v369_v17 = vmax.f32 %v330_v15, 0.0  ;;  %v373_v18 = vmax.f32 %v340_v16, 0.0 }
  0xa7   : > { %v385_v19 = vpack.c.bf16 %v369_v17, %v369_v17  ;;  %v389_v20 = vpack.c.bf16 %v373_v18, %v373_v18 }
  0xa9   : > { %402 = vst.msk [vmem:[%s890_s29] sm:$0xf] %vm401_vm1, %v385_v19  ;;  %v349_v21 = vpop.f32.mrf.mxu2  ;;  %v359_v22 = vpop.f32.mrf.mxu3 }
  0xaa   : > { %406 = vst.msk [vmem:[%s890_s29 + $0x10] sm:$0xf] %vm401_vm1, %v389_v20  ;;  %v350_v23 = vadd.f32 %v885_v12, %v349_v21  ;;  %v360_v24 = vadd.f32 %v885_v12, %v359_v22  ;;  %v331_v25 = vpop.f32.mrf.mxu0  ;;  %v341_v26 = vpop.f32.mrf.mxu1 }
  0xab   : > { %v332_v27 = vadd.f32 %v885_v12, %v331_v25  ;;  %v342_v28 = vadd.f32 %v885_v12, %v341_v26 }
  0xac   : > { %v377_v29 = vmax.f32 %v350_v23, 0.0  ;;  %v381_v30 = vmax.f32 %v360_v24, 0.0 }
  0xad   : > { %v370_v31 = vmax.f32 %v332_v27, 0.0  ;;  %v374_v32 = vmax.f32 %v342_v28, 0.0 }
  0xae   : > { %v393_v33 = vpack.c.bf16 %v377_v29, %v377_v29  ;;  %v397_v34 = vpack.c.bf16 %v381_v30, %v381_v30 }
  0xaf   : > { %v386_v35 = vpack.c.bf16 %v370_v31, %v370_v31  ;;  %v390_v36 = vpack.c.bf16 %v374_v32, %v374_v32 }
  0xb0   : > { %410 = vst.msk [vmem:[%s890_s29 + $0x20] sm:$0xf] %vm401_vm1, %v393_v33 }
  0xb1   : > { %414 = vst.msk [vmem:[%s890_s29 + $0x30] sm:$0xf] %vm401_vm1, %v397_v34  ;;  %v351_v37 = vpop.f32.mrf.mxu2  ;;  %v361_v38 = vpop.f32.mrf.mxu3  ;;  %v454_v17 = vld [vmem:[%s890_s29 + $0x10] sm:$0xf] (%p834_p3) }
  0xb2   : > { %403 = vst.msk [vmem:[%s890_s29 + $0x4] sm:$0xf] %vm401_vm1, %v386_v35  ;;  %v352_v39 = vadd.f32 %v885_v12, %v351_v37  ;;  %v362_v40 = vadd.f32 %v885_v12, %v361_v38  ;;  %v334_v41 = vpop.f32.mrf.mxu0  ;;  %v344_v42 = vpop.f32.mrf.mxu1 }
  0xb3   : > { %407 = vst.msk [vmem:[%s890_s29 + $0x14] sm:$0xf] %vm401_vm1, %v390_v36  ;;  %v335_v43 = vadd.f32 %v885_v12, %v334_v41  ;;  %v345_v44 = vadd.f32 %v885_v12, %v344_v42 }
  0xb4   : > { %v378_v45 = vmax.f32 %v352_v39, 0.0  ;;  %v382_v46 = vmax.f32 %v362_v40, 0.0  ;;  %455 = vst [vmem:[%s429_s5 + $0x20] sm:$0xf] (%p834_p3), %v454_v17 }
  0xb5   : > { %v371_v47 = vmax.f32 %v335_v43, 0.0  ;;  %v375_v48 = vmax.f32 %v345_v44, 0.0 }
  0xb6   : > { %v394_v49 = vpack.c.bf16 %v378_v45, %v378_v45  ;;  %v398_v50 = vpack.c.bf16 %v382_v46, %v382_v46 }
  0xb7   : > { %v387_v51 = vpack.c.bf16 %v371_v47, %v371_v47  ;;  %v391_v52 = vpack.c.bf16 %v375_v48, %v375_v48  ;;  %v462_v21 = vld [vmem:[%s890_s29 + $0x20] sm:$0xf] (%p834_p3) }
  0xb8   : > { %411 = vst.msk [vmem:[%s890_s29 + $0x24] sm:$0xf] %vm401_vm1, %v394_v49  ;;  %v470_v25 = vld [vmem:[%s890_s29 + $0x30] sm:$0xf] (%p834_p3) }
  0xb9   : > { %415 = vst.msk [vmem:[%s890_s29 + $0x34] sm:$0xf] %vm401_vm1, %v398_v50  ;;  %v354_v53 = vpop.f32.mrf.mxu2  ;;  %v364_v54 = vpop.f32.mrf.mxu3  ;;  %v448_v14 = vld [vmem:[%s890_s29 + $0x4] sm:$0xf] (%p834_p3) }
  0xba   : > { %404 = vst.msk [vmem:[%s890_s29 + $0x8] sm:$0xf] %vm401_vm1, %v387_v51  ;;  %v355_v55 = vadd.f32 %v885_v12, %v354_v53  ;;  %v365_v56 = vadd.f32 %v885_v12, %v364_v54  ;;  %v336_v57 = vpop.f32.mrf.mxu0  ;;  %v346_v58 = vpop.f32.mrf.mxu1  ;;  %v456_v18 = vld [vmem:[%s890_s29 + $0x14] sm:$0xf] (%p834_p3) }
  0xbb   : > { %408 = vst.msk [vmem:[%s890_s29 + $0x18] sm:$0xf] %vm401_vm1, %v391_v52  ;;  %v337_v59 = vadd.f32 %v885_v12, %v336_v57  ;;  %v347_v60 = vadd.f32 %v885_v12, %v346_v58 }
  0xbc   : > { %v379_v61 = vmax.f32 %v355_v55, 0.0  ;;  %v383_v62 = vmax.f32 %v365_v56, 0.0  ;;  %449 = vst [vmem:[%s429_s5 + $0x8] sm:$0xf] (%p834_p3), %v448_v14 }
  0xbd   : > { %v372_v63 = vmax.f32 %v337_v59, 0.0  ;;  %v376_v0 = vmax.f32 %v347_v60, 0.0  ;;  %457 = vst [vmem:[%s429_s5 + $0x28] sm:$0xf] (%p834_p3), %v456_v18 }
  0xbe   : > { %v395_v1 = vpack.c.bf16 %v379_v61, %v379_v61  ;;  %v399_v2 = vpack.c.bf16 %v383_v62, %v383_v62  ;;  %463 = vst [vmem:[%s429_s5 + $0x40] sm:$0xf] (%p834_p3), %v462_v21 }
  0xbf   : > { %v388_v3 = vpack.c.bf16 %v372_v63, %v372_v63  ;;  %v392_v4 = vpack.c.bf16 %v376_v0, %v376_v0  ;;  %v464_v22 = vld [vmem:[%s890_s29 + $0x24] sm:$0xf] (%p834_p3)  ;;  %471 = vst [vmem:[%s429_s5 + $0x60] sm:$0xf] (%p834_p3), %v470_v25 }
  0xc0   : > { %412 = vst.msk [vmem:[%s890_s29 + $0x28] sm:$0xf] %vm401_vm1, %v395_v1  ;;  %v472_v26 = vld [vmem:[%s890_s29 + $0x34] sm:$0xf] (%p834_p3) }
  0xc1   : > { %416 = vst.msk [vmem:[%s890_s29 + $0x38] sm:$0xf] %vm401_vm1, %v399_v2  ;;  %v356_v5 = vpop.f32.mrf.mxu2  ;;  %v366_v6 = vpop.f32.mrf.mxu3  ;;  %v450_v15 = vld [vmem:[%s890_s29 + $0x8] sm:$0xf] (%p834_p3) }
  0xc2   : > { %405 = vst.msk [vmem:[%s890_s29 + $0xc] sm:$0xf] %vm401_vm1, %v388_v3  ;;  %v357_v7 = vadd.f32 %v885_v12, %v356_v5  ;;  %v367_v8 = vadd.f32 %v885_v12, %v366_v6  ;;  %v446_v12 = vld [vmem:[%s890_s29] sm:$0xf] (%p834_p3)  ;;  %v458_v19 = vld [vmem:[%s890_s29 + $0x18] sm:$0xf] (%p834_p3) }
  0xc3   : > { %409 = vst.msk [vmem:[%s890_s29 + $0x1c] sm:$0xf] %vm401_vm1, %v392_v4 }
  0xc4   : > { %v380_v9 = vmax.f32 %v357_v7, 0.0  ;;  %v384_v10 = vmax.f32 %v367_v8, 0.0  ;;  %447 = vst [vmem:[%s429_s5] sm:$0xf] (%p834_p3), %v446_v12 }
  0xc5   : > { %424 = sbr.rel (!%p834_p3) target bundleno = 210 (0xd2), region = 36  ;;  %451 = vst [vmem:[%s429_s5 + $0x10] sm:$0xf] (%p834_p3), %v450_v15 }
  0xc6   : > { %v396_v11 = vpack.c.bf16 %v380_v9, %v380_v9  ;;  %v400_v13 = vpack.c.bf16 %v384_v10, %v384_v10  ;;  %459 = vst [vmem:[%s429_s5 + $0x30] sm:$0xf] (%p834_p3), %v458_v19 }
  0xc7   : > { %v466_v23 = vld [vmem:[%s890_s29 + $0x28] sm:$0xf] (%p834_p3)  ;;  %465 = vst [vmem:[%s429_s5 + $0x48] sm:$0xf] (%p834_p3), %v464_v22 }
  0xc8   : > { %413 = vst.msk [vmem:[%s890_s29 + $0x2c] sm:$0xf] %vm401_vm1, %v396_v11  ;;  %v474_v27 = vld [vmem:[%s890_s29 + $0x38] sm:$0xf] (%p834_p3) }
  0xc9   : > { %417 = vst.msk [vmem:[%s890_s29 + $0x3c] sm:$0xf] %vm401_vm1, %v400_v13  ;;  %v452_v16 = vld [vmem:[%s890_s29 + $0xc] sm:$0xf] (%p834_p3) }
  0xca   : > { %453 = vst [vmem:[%s429_s5 + $0x18] sm:$0xf] %v452_v16  ;;  %v460_v20 = vld [vmem:[%s890_s29 + $0x1c] sm:$0xf] }
  0xcb   : > { %461 = vst [vmem:[%s429_s5 + $0x38] sm:$0xf] %v460_v20 }
  0xcc   : > { %467 = vst [vmem:[%s429_s5 + $0x50] sm:$0xf] %v466_v23 }
  0xcd   : > { %473 = vst [vmem:[%s429_s5 + $0x68] sm:$0xf] %v472_v26 }
  0xce   : > { %475 = vst [vmem:[%s429_s5 + $0x70] sm:$0xf] %v474_v27 }
  0xcf   : > { %v468_v24 = vld [vmem:[%s890_s29 + $0x2c] sm:$0xf] }
  0xd0   : > { %469 = vst [vmem:[%s429_s5 + $0x58] sm:$0xf] %v468_v24  ;;  %v476_v28 = vld [vmem:[%s890_s29 + $0x3c] sm:$0xf] }
  0xd1   : > { %477 = vst [vmem:[%s429_s5 + $0x78] sm:$0xf] %v476_v28 }
  0xd2 PF: > { %s13_s16 = sadd.s32 1, %s780_s16   ;;  %s980_s12 = smov %s768_s13 }
  0xd3   : > { %p10_p9 = scmp.ge.s32.totalorder %s13_s16, 4   ;;  %s981_s13 = smov %s843_s22 }
  0xd4   : > { %s982_s14 = smov %s776_s15  ;;  %s983_s15 = smov %s985_s18 }
  0xd5   :  { %12 = sbr.rel (!%p10_p9) target bundleno = 3 (0x3), region = 106 }

// kernel: psa_relit_pcnet_forward.33
= control target key start
LH: loop header
LB: loop body
LE: loop exit
PB: predicated region body
PF: predicated region fallthrough
CT: control target
= control target key end

     0   :  { %s1273_s15 = smov 0   ;;  %s1275_s16 = smov 0   ;;  %s1467_s0 = inlined_call_operand.vmem [shape: bf16[32,512], index: 0, kind: input, shape index: {}]   ;;  %s1468_s1 = inlined_call_operand.vmem [shape: bf16[2,512,128], index: 1, kind: input, shape index: {}]   ;;  %s1469_s2 = inlined_call_operand.vmem [shape: f32[1,128], index: 2, kind: input, shape index: {}]   ;;  %s1470_s3 = inlined_call_operand.vmem [shape: bf16[8,2,4,128], index: 3, kind: input, shape index: {}]   ;;  %s1471_s4 = inlined_call_operand.vmem [shape: bf16[8,2,4,128], index: 4, kind: output, shape index: {}]  }
   0x1   :  { %s1277_s17 = smov 0   ;;  %s1279_s18 = smov 0  }
   0x2   :  { %s1281_s19 = smov 0  }
   0x3 LB: > { %s23_s20 = sadd.s32 1, %s1242_s18  ;;  %s950_s21 = sadd.s32 4294967295, %s1246_s19   ;;  %s1246_s19 = sphi %s1281_s19, %s14_s19   ;;  %s1242_s18 = sphi %s1279_s18, %s1476_s18   ;;  %s1238_s17 = sphi %s1277_s17, %s1475_s17   ;;  %s1234_s16 = sphi %s1275_s16, %s1474_s16   ;;  %s1230_s15 = sphi %s1273_s15, %s1473_s15  }
   0x4   : > { %p24_p0 = scmp.ge.s32.totalorder %s23_s20, 2  ;;  %p115_p1 = scmp.ne.s32.totalorder %s1234_s16, %s1230_s15 }
   0x5   : > { %p116_p2 = scmp.eq.s32.totalorder %s1246_s19, 0  ;;  %p147_p4 = scmp.eq.s32.totalorder %s950_s21, 1 }
   0x6   : > { %s1478_s20 = smov (%p24_p0, %s23_s20), 0  ;;  %s108_s23 = sadd.s32 1, %s1234_s16 }
   0x7   : > { %p117_p3 = por %p116_p2, %p115_p1  ;;  %s104_s22 = ssub.s32 %s1242_s18, %s1478_s20 }
   0x8   : > { %p106_p5 = scmp.eq.s32.totalorder %s104_s22, 0  ;;  %p1308_p6 = por %p147_p4, %p115_p1 }
   0x9   : > { %p954_p7 = scmp.ge.s32.totalorder %s1246_s19, 2 }
   0xa   : > { %s1313_s25 = scalar_select %p106_p5, %s1234_s16, %s108_s23  }
   0xb   : > { %182 = sbr.rel (%p954_p7) target bundleno = 28 (0x1c), region = 24 }
  0x10   : > { %193 = sbr.rel (!%p117_p3) target bundleno = 28 (0x1c), region = 32  ;;  %s195_s26 = sand.u32 (%p117_p3), 1, %s1234_s16  }
  0x11   : > { %s956_s27 = sshll.u32 (%p117_p3), %s1242_s18, 1  ;;  %s955_s28 = sshll.u32 (%p117_p3), %s195_s26, 4 }
  0x12   : > { %s202_s5 = scalar_lea.vmem (%p117_p3), %s1470_s3, %s956_s27  ;;  %s197_s6 = scalar_lea.vmem (%p117_p3), [#allocation2], %s955_s28 }
  0x13   : > { %v219_v0 = vld [vmem:[%s202_s5] sm:$0x3] (%p117_p3)  ;;  %v221_v1 = vld [vmem:[%s202_s5 + $0x4] sm:$0x3] (%p117_p3)  ;;  %v223_v2 = vld [vmem:[%s202_s5 + $0x8] sm:$0x3] (%p117_p3) }
  0x14   : > { %220 = vst [vmem:[%s197_s6] sm:$0x3] (%p117_p3), %v219_v0  ;;  %v225_v3 = vld [vmem:[%s202_s5 + $0xc] sm:$0x3] (%p117_p3)  ;;  %v227_v4 = vld [vmem:[%s202_s5 + $0x10] sm:$0x3] (%p117_p3) }
  0x15   : > { %222 = vst [vmem:[%s197_s6 + $0x2] sm:$0x3] %v221_v1  ;;  %v229_v5 = vld [vmem:[%s202_s5 + $0x14] sm:$0x3]  ;;  %v231_v6 = vld [vmem:[%s202_s5 + $0x18] sm:$0x3] }
  0x16   : > { %224 = vst [vmem:[%s197_s6 + $0x4] sm:$0x3] %v223_v2  ;;  %v233_v7 = vld [vmem:[%s202_s5 + $0x1c] sm:$0x3] }
  0x17   : > { %226 = vst [vmem:[%s197_s6 + $0x6] sm:$0x3] %v225_v3 }
  0x18   : > { %228 = vst [vmem:[%s197_s6 + $0x8] sm:$0x3] %v227_v4 }
  0x19   : > { %230 = vst [vmem:[%s197_s6 + $0xa] sm:$0x3] %v229_v5 }
  0x1a   : > { %232 = vst [vmem:[%s197_s6 + $0xc] sm:$0x3] %v231_v6 }
  0x1b   : > { %234 = vst [vmem:[%s197_s6 + $0xe] sm:$0x3] %v233_v7 }
  0x1c PF: > { %p957_p8 = scmp.ge.s32.totalorder %s1246_s19, 1  ;;  %p273_p9 = scmp.lt.s32.totalorder %s1246_s19, 3 }
  0x1e   : > { %p274_p10 = pnand %p957_p8, %p273_p9 }
  0x1f   : > { %p322_p11 = scmp.lt.s32.totalorder (!%p274_p10), %s1238_s17, 1 }
  0x20   : > { %277 = sbr.rel (%p274_p10) target bundleno = 252 (0xfc), region = 73 }
  0x25   : > { %s323_s7 = scalar_select %p322_p11, %s1238_s17, 1  ;;  %v964_v36 = vld [vmem:[%s1467_s0] sm:$0xf]  ;;  %v1129_v37 = vld [vmem:[%s1467_s0 + $0xc] sm:$0xf0] }
  0x26   : > { %v1127_v38 = vld [vmem:[%s1467_s0 + $0x4] sm:$0xf]  ;;  %v966_v43 = vld [vmem:[%s1467_s0 + $0x10] sm:$0xf0]  ;;  %v972_v44 = vld [vmem:[%s1467_s0 + $0x8] sm:$0xf]  ;;  %v965_v48 = vor.u32 %v1129_v37, %v964_v36 }
  0x27   : > { %s1126_s8 = sshll.u32 %s323_s7, 8  ;;  %v1130_v45 = vld [vmem:[%s1467_s0 + $0x14] sm:$0xf0]  ;;  %v1128_v46 = vld [vmem:[%s1467_s0 + $0xc] sm:$0xf]  ;;  %v969_v49 = vor.u32 %v1127_v38, %v966_v43  ;;  %s1123_s13 = sshll.u32 (%p1308_p6), %s1238_s17, 1 }
  0x28   : > { %s1328_s11 = scalar_lea.vmem %s1468_s1, %s1126_s8  ;;  %v974_v47 = vld [vmem:[%s1467_s0 + $0x18] sm:$0xf0]  ;;  %v973_v50 = vor.u32 %v1130_v45, %v972_v44  ;;  %v980_v52 = vld [vmem:[%s1467_s0 + $0x20] sm:$0xf]  ;;  %v1133_v53 = vld [vmem:[%s1467_s0 + $0x2c] sm:$0xf0]  ;;  %s784_s22 = scalar_lea.vmem (%p1308_p6), %s1471_s4, %s1123_s13 }
  0x29   : > { %v1142_v8 = vld [vmem:[%s1328_s11 + $0x38] sm:$0xff]  ;;  %v1141_v12 = vld [vmem:[%s1328_s11 + $0x30] sm:$0xff]  ;;  %v1140_v16 = vld [vmem:[%s1328_s11 + $0x28] sm:$0xff]  ;;  %v977_v51 = vor.u32 %v1128_v46, %v974_v47  ;;  %v981_v60 = vor.u32 %v1133_v53, %v980_v52  ;;  %s280_s8 = sand.u32 1, %s1230_s15  }
  0x2a   : > { %v1150_v9 = vld [vmem:[%s1328_s11 + $0x78] sm:$0xff]  ;;  %637 = vmatpush.bf16.msra.mxu0 %v1142_v8  ;;  %v1149_v13 = vld [vmem:[%s1328_s11 + $0x70] sm:$0xff]  ;;  %v1148_v17 = vld [vmem:[%s1328_s11 + $0x68] sm:$0xff] }
  0x2b   : > { %v1158_v10 = vld [vmem:[%s1328_s11 + $0xb8] sm:$0xff]  ;;  %656 = vmatpush.bf16.msra.mxu1 %v1150_v9  ;;  %v1157_v14 = vld [vmem:[%s1328_s11 + $0xb0] sm:$0xff]  ;;  %v1156_v18 = vld [vmem:[%s1328_s11 + $0xa8] sm:$0xff] }
  0x2c   : > { %v1166_v11 = vld [vmem:[%s1328_s11 + $0xf8] sm:$0xff]  ;;  %675 = vmatpush.bf16.msra.mxu2 %v1158_v10  ;;  %v1165_v15 = vld [vmem:[%s1328_s11 + $0xf0] sm:$0xff]  ;;  %v1164_v19 = vld [vmem:[%s1328_s11 + $0xe8] sm:$0xff] }
  0x2d   : > { %694 = vmatpush.bf16.msra.mxu3 %v1166_v11  ;;  %v1139_v20 = vld [vmem:[%s1328_s11 + $0x20] sm:$0xff]  ;;  %v1138_v24 = vld [vmem:[%s1328_s11 + $0x18] sm:$0xff]  ;;  %v1137_v28 = vld [vmem:[%s1328_s11 + $0x10] sm:$0xff] }
  0x2e   : > { %638 = vmatpush.bf16.msra.mxu0 %v1141_v12  ;;  %v1147_v21 = vld [vmem:[%s1328_s11 + $0x60] sm:$0xff]  ;;  %v1146_v25 = vld [vmem:[%s1328_s11 + $0x58] sm:$0xff]  ;;  %v1145_v29 = vld [vmem:[%s1328_s11 + $0x50] sm:$0xff] }
  0x2f   : > { %657 = vmatpush.bf16.msra.mxu1 %v1149_v13  ;;  %v1155_v22 = vld [vmem:[%s1328_s11 + $0xa0] sm:$0xff]  ;;  %v1154_v26 = vld [vmem:[%s1328_s11 + $0x98] sm:$0xff]  ;;  %v1153_v30 = vld [vmem:[%s1328_s11 + $0x90] sm:$0xff] }
  0x30   : > { %676 = vmatpush.bf16.msra.mxu2 %v1157_v14  ;;  %v1163_v23 = vld [vmem:[%s1328_s11 + $0xe0] sm:$0xff]  ;;  %v1162_v27 = vld [vmem:[%s1328_s11 + $0xd8] sm:$0xff]  ;;  %v1161_v31 = vld [vmem:[%s1328_s11 + $0xd0] sm:$0xff] }
  0x31   : > { %695 = vmatpush.bf16.msra.mxu3 %v1165_v15  ;;  %v1136_v32 = vld [vmem:[%s1328_s11 + $0x8] sm:$0xff]  ;;  %v1135_v39 = vld [vmem:[%s1328_s11] sm:$0xff]  ;;  %v982_v55 = vld [vmem:[%s1467_s0 + $0x30] sm:$0xf0] }
  0x32   : > { %639 = vmatpush.bf16.msra.mxu0 %v1140_v16  ;;  %v1144_v33 = vld [vmem:[%s1328_s11 + $0x48] sm:$0xff]  ;;  %v1143_v40 = vld [vmem:[%s1328_s11 + $0x40] sm:$0xff]  ;;  %v1134_v57 = vld [vmem:[%s1467_s0 + $0x34] sm:$0xf0] }
  0x33   : > { %658 = vmatpush.bf16.msra.mxu1 %v1148_v17  ;;  %v1152_v34 = vld [vmem:[%s1328_s11 + $0x88] sm:$0xff]  ;;  %v1151_v41 = vld [vmem:[%s1328_s11 + $0x80] sm:$0xff]  ;;  %v990_v59 = vld [vmem:[%s1467_s0 + $0x38] sm:$0xf0] }
  0x34   : > { %677 = vmatpush.bf16.msra.mxu2 %v1156_v18  ;;  %v1160_v35 = vld [vmem:[%s1328_s11 + $0xc8] sm:$0xff]  ;;  %v1159_v42 = vld [vmem:[%s1328_s11 + $0xc0] sm:$0xff]  ;;  %s1414_s11 = sshll.u32 %s280_s8, 4 }
  0x35   : > { %696 = vmatpush.bf16.msra.mxu3 %v1164_v19  ;;  %v1131_v54 = vld [vmem:[%s1467_s0 + $0x24] sm:$0xf]  ;;  %v988_v56 = vld [vmem:[%s1467_s0 + $0x28] sm:$0xf]  ;;  %v1132_v58 = vld [vmem:[%s1467_s0 + $0x2c] sm:$0xf] }
  0x36   : > { %640 = vmatpush.bf16.msra.mxu0 %v1139_v20  ;;  %v985_v61 = vor.u32 %v1131_v54, %v982_v55  ;;  %v989_v62 = vor.u32 %v1134_v57, %v988_v56  ;;  %v993_v63 = vor.u32 %v1132_v58, %v990_v59  ;;  %v1207_v0 = vld [vmem:[%s1469_s2] ss:$0 sm:$0xff]  ;;  %s1417_s12 = scalar_lea.vmem [#allocation2], %s1414_s11  ;;  %s1424_s15 = scalar_lea.vmem [#allocation3], %s1414_s11 }
  0x37   : > { %659 = vmatpush.bf16.msra.mxu1 %v1147_v21  ;;  %v725_v5 = vld [vmem:[%s1417_s12] sm:$0x3]  ;;  %v726_v8 = vld [vmem:[%s1417_s12 + $0x2] sm:$0x3]  ;;  %v727_v18 = vld [vmem:[%s1417_s12 + $0x4] sm:$0x3] }
  0x38   : > { %678 = vmatpush.bf16.msra.mxu2 %v1155_v22  ;;  %v733_v10 = vunpack.c.l.bf16 %v725_v5  ;;  %v734_v14 = vunpack.c.l.bf16 %v726_v8  ;;  %v729_v38 = vld [vmem:[%s1417_s12 + $0x8] sm:$0x3]  ;;  %v730_v43 = vld [vmem:[%s1417_s12 + $0xa] sm:$0x3]  ;;  %v731_v56 = vld [vmem:[%s1417_s12 + $0xc] sm:$0x3] }
  0x39   : > { %697 = vmatpush.bf16.msra.mxu3 %v1163_v23  ;;  %v737_v47 = vunpack.c.l.bf16 %v729_v38 }
  0x3a   : > { %641 = vmatpush.bf16.msra.mxu0 %v1138_v24  ;;  %v728_v24 = vld [vmem:[%s1417_s12 + $0x6] sm:$0x3] }
  0x3b   : > { %660 = vmatpush.bf16.msra.mxu1 %v1146_v25 }
  0x3c   : > { %679 = vmatpush.bf16.msra.mxu2 %v1154_v26 }
  0x3d   : > { %698 = vmatpush.bf16.msra.mxu3 %v1162_v27 }
  0x3e   : > { %642 = vmatpush.bf16.msra.mxu0 %v1137_v28  ;;  %v735_v28 = vunpack.c.l.bf16 %v727_v18 }
  0x3f   : > { %661 = vmatpush.bf16.msra.mxu1 %v1145_v29 }
  0x40   : > { %680 = vmatpush.bf16.msra.mxu2 %v1153_v30 }
  0x41   : > { %699 = vmatpush.bf16.msra.mxu3 %v1161_v31 }
  0x42   : > { %643 = vmatpush.bf16.msra.mxu0 %v1136_v32 }
  0x43   : > { %662 = vmatpush.bf16.msra.mxu1 %v1144_v33  ;;  %v736_v33 = vunpack.c.l.bf16 %v728_v24 }
  0x44   : > { %681 = vmatpush.bf16.msra.mxu2 %v1152_v34 }
  0x45   : > { %700 = vmatpush.bf16.msra.mxu3 %v1160_v35 }
  0x46   : > { %644 = vmatpush.bf16.msra.mxu0 %v1135_v39 }
  0x47   : > { %663 = vmatpush.bf16.msra.mxu1 %v1143_v40 }
  0x48   : > { %682 = vmatpush.bf16.msra.mxu2 %v1151_v41 }
  0x49   : > { %701 = vmatpush.bf16.msra.mxu3 %v1159_v42  ;;  %645 = vmatmul.bf16.vlgmr.msra.gmra.mxu0 %v965_v48 }
  0x4a   : > { %664 = vmatmul.bf16.vlgmr.msra.gmra.mxu1 %v969_v49 }
  0x4b   : > { %683 = vmatmul.bf16.vlgmr.msra.gmra.mxu2 %v973_v50 }
  0x4c   : > { %702 = vmatmul.bf16.vlgmr.msra.gmra.mxu3 %v977_v51  ;;  %v738_v51 = vunpack.c.l.bf16 %v730_v43 }
  0x59   : > { %650 = vmatmul.bf16.gmra.mxu0 %v981_v60 }
  0x5a   : > { %669 = vmatmul.bf16.gmra.mxu1 %v985_v61  ;;  %v732_v61 = vld [vmem:[%s1417_s12 + $0xe] sm:$0x3] }
  0x5b   : > { %688 = vmatmul.bf16.gmra.mxu2 %v989_v62  ;;  %v740_v5 = vunpack.c.l.bf16 %v732_v61 }
  0x5c   : > { %707 = vmatmul.bf16.gmra.mxu3 %v993_v63 }
  0xc6   : > { %v646_v1 = vpop.f32.mrf.mxu0 }
  0xc7   : > { %v665_v2 = vpop.f32.mrf.mxu1  ;;  %v647_v3 = vadd.f32 %v1207_v0, %v646_v1 }
  0xc9   : > { %v666_v4 = vadd.f32 %v665_v2, %v647_v3  ;;  %v739_v2 = vunpack.c.l.bf16 %v731_v56 }
  0xce   : > { %v684_v6 = vpop.f32.mrf.mxu2  ;;  %v648_v11 = vpop.f32.mrf.mxu0 }
  0xcf   : > { %v703_v7 = vpop.f32.mrf.mxu3  ;;  %v685_v9 = vadd.f32 %v684_v6, %v666_v4  ;;  %v667_v12 = vpop.f32.mrf.mxu1  ;;  %v649_v15 = vadd.f32 %v1207_v0, %v648_v11 }
  0xd1   : > { %v704_v13 = vadd.f32 %v703_v7, %v685_v9  ;;  %v668_v21 = vadd.f32 %v667_v12, %v649_v15 }
  0xd3   : > { %v717_v16 = vrot.slane %v704_v13, 4  ;;  %v741_v17 = vadd.f32 %v733_v10, %v704_v13 }
  0xd5   : > { %v742_v19 = vadd.f32 %v734_v14, %v717_v16  ;;  %v749_v20 = vmax.f32 %v741_v17, 0.0 }
  0xd6   : > { %v686_v22 = vpop.f32.mrf.mxu2  ;;  %v651_v29 = vpop.f32.mrf.mxu0 }
  0xd7   : > { %v705_v23 = vpop.f32.mrf.mxu3  ;;  %v750_v25 = vmax.f32 %v742_v19, 0.0  ;;  %v757_v26 = vpack.c.bf16 %v749_v20, %v749_v20  ;;  %v687_v27 = vadd.f32 %v686_v22, %v668_v21  ;;  %v652_v30 = vadd.f32 %v1207_v0, %v651_v29  ;;  %v670_v34 = vpop.f32.mrf.mxu1 }
  0xd9   : > { %v758_v31 = vpack.c.bf16 %v750_v25, %v750_v25  ;;  %765 = vst [vmem:[%s1424_s15] sm:$0x3] %v757_v26  ;;  %v706_v32 = vadd.f32 %v705_v23, %v687_v27  ;;  %v671_v37 = vadd.f32 %v670_v34, %v652_v30 }
  0xdb   : > { %766 = vst [vmem:[%s1424_s15 + $0x2] sm:$0x3] %v758_v31  ;;  %v718_v35 = vrot.slane %v706_v32, 4  ;;  %v743_v36 = vadd.f32 %v735_v28, %v706_v32 }
  0xdd   : > { %v744_v39 = vadd.f32 %v736_v33, %v718_v35  ;;  %v751_v40 = vmax.f32 %v743_v36, 0.0 }
  0xde   : > { %v689_v41 = vpop.f32.mrf.mxu2  ;;  %v653_v48 = vpop.f32.mrf.mxu0 }
  0xdf   : > { %v708_v42 = vpop.f32.mrf.mxu3  ;;  %v752_v44 = vmax.f32 %v744_v39, 0.0  ;;  %v759_v45 = vpack.c.bf16 %v751_v40, %v751_v40  ;;  %v690_v46 = vadd.f32 %v689_v41, %v671_v37  ;;  %v654_v52 = vadd.f32 %v1207_v0, %v653_v48  ;;  %v672_v55 = vpop.f32.mrf.mxu1 }
  0xe0   : > { %v801_v13 = vld [vmem:[%s1424_s15] sm:$0x3] (%p1308_p6) }
  0xe1   : > { %v760_v49 = vpack.c.bf16 %v752_v44, %v752_v44  ;;  %767 = vst [vmem:[%s1424_s15 + $0x4] sm:$0x3] %v759_v45  ;;  %v709_v50 = vadd.f32 %v708_v42, %v690_v46  ;;  %v673_v59 = vadd.f32 %v672_v55, %v654_v52 }
  0xe2   : > { %v803_v14 = vld [vmem:[%s1424_s15 + $0x2] sm:$0x3] (%p1308_p6)  ;;  %802 = vst [vmem:[%s784_s22] sm:$0x3] (%p1308_p6), %v801_v13 }
  0xe3   : > { %768 = vst [vmem:[%s1424_s15 + $0x6] sm:$0x3] %v760_v49  ;;  %v719_v53 = vrot.slane %v709_v50, 4  ;;  %v745_v54 = vadd.f32 %v737_v47, %v709_v50 }
  0xe4   : > { %804 = vst [vmem:[%s784_s22 + $0x4] sm:$0x3] (%p1308_p6), %v803_v14 }
  0xe5   : > { %v746_v57 = vadd.f32 %v738_v51, %v719_v53  ;;  %v753_v58 = vmax.f32 %v745_v54, 0.0 }
  0xe6   : > { %v691_v60 = vpop.f32.mrf.mxu2 }
  0xe7   : > { %v754_v62 = vmax.f32 %v746_v57, 0.0  ;;  %v761_v63 = vpack.c.bf16 %v753_v58, %v753_v58  ;;  %v692_v1 = vadd.f32 %v691_v60, %v673_v59  ;;  %v710_v3 = vpop.f32.mrf.mxu3 }
  0xe8   : > { %v805_v15 = vld [vmem:[%s1424_s15 + $0x4] sm:$0x3] (%p1308_p6) }
  0xe9   : > { %v762_v0 = vpack.c.bf16 %v754_v62, %v754_v62  ;;  %769 = vst [vmem:[%s1424_s15 + $0x8] sm:$0x3] %v761_v63  ;;  %v711_v4 = vadd.f32 %v710_v3, %v692_v1 }
  0xea   : > { %v807_v16 = vld [vmem:[%s1424_s15 + $0x6] sm:$0x3] (%p1308_p6)  ;;  %806 = vst [vmem:[%s784_s22 + $0x8] sm:$0x3] (%p1308_p6), %v805_v15 }
  0xeb   : > { %770 = vst [vmem:[%s1424_s15 + $0xa] sm:$0x3] %v762_v0  ;;  %v720_v6 = vrot.slane %v711_v4, 4  ;;  %v747_v7 = vadd.f32 %v739_v2, %v711_v4 }
  0xec   : > { %808 = vst [vmem:[%s784_s22 + $0xc] sm:$0x3] (%p1308_p6), %v807_v16 }
  0xed   : > { %v748_v8 = vadd.f32 %v740_v5, %v720_v6  ;;  %v755_v9 = vmax.f32 %v747_v7, 0.0 }
  0xef   : > { %v756_v10 = vmax.f32 %v748_v8, 0.0  ;;  %v763_v11 = vpack.c.bf16 %v755_v9, %v755_v9  ;;  %779 = sbr.rel (!%p1308_p6) target bundleno = 252 (0xfc), region = 81 }
  0xf0   : > { %v809_v17 = vld [vmem:[%s1424_s15 + $0x8] sm:$0x3] (%p1308_p6) }
  0xf1   : > { %v764_v12 = vpack.c.bf16 %v756_v10, %v756_v10  ;;  %771 = vst [vmem:[%s1424_s15 + $0xc] sm:$0x3] %v763_v11 }
  0xf2   : > { %v811_v18 = vld [vmem:[%s1424_s15 + $0xa] sm:$0x3] (%p1308_p6)  ;;  %810 = vst [vmem:[%s784_s22 + $0x10] sm:$0x3] (%p1308_p6), %v809_v17 }
  0xf3   : > { %772 = vst [vmem:[%s1424_s15 + $0xe] sm:$0x3] %v764_v12 }
  0xf4   : > { %812 = vst [vmem:[%s784_s22 + $0x14] sm:$0x3] %v811_v18 }
  0xf8   : > { %v813_v19 = vld [vmem:[%s1424_s15 + $0xc] sm:$0x3] }
  0xf9   : > { %814 = vst [vmem:[%s784_s22 + $0x18] sm:$0x3] %v813_v19 }
  0xfa   : > { %v815_v20 = vld [vmem:[%s1424_s15 + $0xe] sm:$0x3] }
  0xfb   : > { %816 = vst [vmem:[%s784_s22 + $0x1c] sm:$0x3] %v815_v20 }
  0xfc PF: > { %s14_s19 = sadd.s32 1, %s1246_s19   ;;  %s1473_s15 = smov %s1234_s16 }
  0xfd   : > { %p11_p12 = scmp.ge.s32.totalorder %s14_s19, 4   ;;  %s1474_s16 = smov %s1313_s25 }
  0xfe   : > { %s1475_s17 = smov %s1242_s18  ;;  %s1476_s18 = smov %s1478_s20 }
  0xff   :  { %13 = sbr.rel (!%p11_p12) target bundleno = 3 (0x3), region = 159 }

// kernel: psa_relit_pcnet_forward.32
= control target key start
LH: loop header
LB: loop body
LE: loop exit
PB: predicated region body
PF: predicated region fallthrough
CT: control target
= control target key end

     0   :  { %s3384_s1 = inlined_call_operand.vmem [shape: bf16[2304,128], index: 1, kind: input, shape index: {}]   ;;  %s3385_s0 = inlined_call_operand.vmem [shape: bf16[32,2304], index: 0, kind: input, shape index: {}]   ;;  %s3386_s2 = inlined_call_operand.vmem [shape: f32[1,128], index: 2, kind: input, shape index: {}]   ;;  %s3387_s3 = inlined_call_operand.vmem [shape: bf16[32,128], index: 3, kind: input, shape index: {}]   ;;  %s3388_s4 = inlined_call_operand.vmem [shape: bf16[32,128], index: 4, kind: output, shape index: {}]  }
   0x1   :  { %v2522_v0 = vld [vmem:[%s3384_s1 + $0x38] sm:$0xff]  ;;  %v2521_v4 = vld [vmem:[%s3384_s1 + $0x30] sm:$0xff]  ;;  %v2520_v8 = vld [vmem:[%s3384_s1 + $0x28] sm:$0xff] }
   0x2   :  { %v2530_v1 = vld [vmem:[%s3384_s1 + $0x78] sm:$0xff]  ;;  %1389 = vmatpush.bf16.msra.mxu0 %v2522_v0  ;;  %v2529_v5 = vld [vmem:[%s3384_s1 + $0x70] sm:$0xff]  ;;  %v2528_v9 = vld [vmem:[%s3384_s1 + $0x68] sm:$0xff] }
   0x3   :  { %v2538_v2 = vld [vmem:[%s3384_s1 + $0xb8] sm:$0xff]  ;;  %1408 = vmatpush.bf16.msra.mxu1 %v2530_v1  ;;  %v2537_v6 = vld [vmem:[%s3384_s1 + $0xb0] sm:$0xff]  ;;  %v2536_v10 = vld [vmem:[%s3384_s1 + $0xa8] sm:$0xff] }
   0x4   :  { %v2546_v3 = vld [vmem:[%s3384_s1 + $0xf8] sm:$0xff]  ;;  %1427 = vmatpush.bf16.msra.mxu2 %v2538_v2  ;;  %v2545_v7 = vld [vmem:[%s3384_s1 + $0xf0] sm:$0xff]  ;;  %v2544_v11 = vld [vmem:[%s3384_s1 + $0xe8] sm:$0xff] }
   0x5   :  { %1446 = vmatpush.bf16.msra.mxu3 %v2546_v3  ;;  %v2519_v12 = vld [vmem:[%s3384_s1 + $0x20] sm:$0xff]  ;;  %v2518_v16 = vld [vmem:[%s3384_s1 + $0x18] sm:$0xff]  ;;  %v2517_v20 = vld [vmem:[%s3384_s1 + $0x10] sm:$0xff] }
   0x6   :  { %1390 = vmatpush.bf16.msra.mxu0 %v2521_v4  ;;  %v2527_v13 = vld [vmem:[%s3384_s1 + $0x60] sm:$0xff]  ;;  %v2526_v17 = vld [vmem:[%s3384_s1 + $0x58] sm:$0xff]  ;;  %v2525_v21 = vld [vmem:[%s3384_s1 + $0x50] sm:$0xff] }
   0x7   :  { %1409 = vmatpush.bf16.msra.mxu1 %v2529_v5  ;;  %v2535_v14 = vld [vmem:[%s3384_s1 + $0xa0] sm:$0xff]  ;;  %v2534_v18 = vld [vmem:[%s3384_s1 + $0x98] sm:$0xff]  ;;  %v2533_v22 = vld [vmem:[%s3384_s1 + $0x90] sm:$0xff] }
   0x8   :  { %1428 = vmatpush.bf16.msra.mxu2 %v2537_v6  ;;  %v2543_v15 = vld [vmem:[%s3384_s1 + $0xe0] sm:$0xff]  ;;  %v2542_v19 = vld [vmem:[%s3384_s1 + $0xd8] sm:$0xff]  ;;  %v2541_v23 = vld [vmem:[%s3384_s1 + $0xd0] sm:$0xff] }
   0x9   :  { %1447 = vmatpush.bf16.msra.mxu3 %v2545_v7  ;;  %v2516_v24 = vld [vmem:[%s3384_s1 + $0x8] sm:$0xff]  ;;  %v2515_v28 = vld [vmem:[%s3384_s1] sm:$0xff]  ;;  %v2489_v37 = vld [vmem:[%s3385_s0 + $0x4c] sm:$0xf0] }
   0xa   :  { %1391 = vmatpush.bf16.msra.mxu0 %v2520_v8  ;;  %v2524_v25 = vld [vmem:[%s3384_s1 + $0x48] sm:$0xff]  ;;  %v2523_v29 = vld [vmem:[%s3384_s1 + $0x40] sm:$0xff]  ;;  %v1771_v39 = vld [vmem:[%s3385_s0 + $0x50] sm:$0xf0] }
   0xb   :  { %1410 = vmatpush.bf16.msra.mxu1 %v2528_v9  ;;  %v2532_v26 = vld [vmem:[%s3384_s1 + $0x88] sm:$0xff]  ;;  %v2531_v30 = vld [vmem:[%s3384_s1 + $0x80] sm:$0xff]  ;;  %v2570_v40 = vld [vmem:[%s3384_s1 + $0x1b8] sm:$0xff] }
   0xc   :  { %1429 = vmatpush.bf16.msra.mxu2 %v2536_v10  ;;  %v2540_v27 = vld [vmem:[%s3384_s1 + $0xc8] sm:$0xff]  ;;  %v2539_v31 = vld [vmem:[%s3384_s1 + $0xc0] sm:$0xff]  ;;  %v2554_v41 = vld [vmem:[%s3384_s1 + $0x138] sm:$0xff] }
   0xd   :  { %1448 = vmatpush.bf16.msra.mxu3 %v2544_v11  ;;  %v1761_v32 = vld [vmem:[%s3385_s0] sm:$0xf]  ;;  %v2488_v33 = vld [vmem:[%s3385_s0 + $0x44] sm:$0xf0]  ;;  %v2479_v34 = vld [vmem:[%s3385_s0 + $0x4] sm:$0xf] }
   0xe   :  { %1392 = vmatpush.bf16.msra.mxu0 %v2519_v12  ;;  %v1763_v35 = vld [vmem:[%s3385_s0 + $0x48] sm:$0xf0]  ;;  %v1769_v36 = vld [vmem:[%s3385_s0 + $0x8] sm:$0xf]  ;;  %v1762_v42 = vor.u32 %v2488_v33, %v1761_v32  ;;  %v2562_v46 = vld [vmem:[%s3384_s1 + $0x178] sm:$0xff] }
   0xf   :  { %1411 = vmatpush.bf16.msra.mxu1 %v2527_v13  ;;  %v2480_v38 = vld [vmem:[%s3385_s0 + $0xc] sm:$0xf]  ;;  %v1766_v43 = vor.u32 %v2479_v34, %v1763_v35  ;;  %v1770_v44 = vor.u32 %v2489_v37, %v1769_v36  ;;  %v2578_v47 = vld [vmem:[%s3384_s1 + $0x1f8] sm:$0xff]  ;;  %v2569_v48 = vld [vmem:[%s3384_s1 + $0x1b0] sm:$0xff] }
  0x10   :  { %1430 = vmatpush.bf16.msra.mxu2 %v2535_v14  ;;  %v1774_v45 = vor.u32 %v2480_v38, %v1771_v39  ;;  %v2553_v49 = vld [vmem:[%s3384_s1 + $0x130] sm:$0xff]  ;;  %v2568_v52 = vld [vmem:[%s3384_s1 + $0x1a8] sm:$0xff]  ;;  %v2567_v56 = vld [vmem:[%s3384_s1 + $0x1a0] sm:$0xff] }
  0x11   :  { %1449 = vmatpush.bf16.msra.mxu3 %v2543_v15  ;;  %v2561_v50 = vld [vmem:[%s3384_s1 + $0x170] sm:$0xff]  ;;  %v2552_v53 = vld [vmem:[%s3384_s1 + $0x128] sm:$0xff]  ;;  %v2551_v57 = vld [vmem:[%s3384_s1 + $0x120] sm:$0xff] }
  0x12   :  { %1393 = vmatpush.bf16.msra.mxu0 %v2518_v16  ;;  %v2577_v51 = vld [vmem:[%s3384_s1 + $0x1f0] sm:$0xff]  ;;  %v2560_v54 = vld [vmem:[%s3384_s1 + $0x168] sm:$0xff]  ;;  %v2559_v58 = vld [vmem:[%s3384_s1 + $0x160] sm:$0xff] }
  0x13   :  { %1412 = vmatpush.bf16.msra.mxu1 %v2526_v17  ;;  %v2576_v55 = vld [vmem:[%s3384_s1 + $0x1e8] sm:$0xff]  ;;  %v2575_v59 = vld [vmem:[%s3384_s1 + $0x1e0] sm:$0xff]  ;;  %v1833_v60 = vld [vmem:[%s3385_s0 + $0x90] sm:$0xf] }
  0x14   :  { %1431 = vmatpush.bf16.msra.mxu2 %v2534_v18  ;;  %v2506_v61 = vld [vmem:[%s3385_s0 + $0xd4] sm:$0xf0]  ;;  %v2497_v62 = vld [vmem:[%s3385_s0 + $0x94] sm:$0xf]  ;;  %v1835_v63 = vld [vmem:[%s3385_s0 + $0xd8] sm:$0xf0] }
  0x15   :  { %1450 = vmatpush.bf16.msra.mxu3 %v2542_v19  ;;  %v1841_v0 = vld [vmem:[%s3385_s0 + $0x98] sm:$0xf]  ;;  %v2507_v1 = vld [vmem:[%s3385_s0 + $0xdc] sm:$0xf0]  ;;  %v2498_v2 = vld [vmem:[%s3385_s0 + $0x9c] sm:$0xf]  ;;  %v1834_v6 = vor.u32 %v2506_v61, %v1833_v60  ;;  %v1838_v7 = vor.u32 %v2497_v62, %v1835_v63 }
  0x16   :  { %1394 = vmatpush.bf16.msra.mxu0 %v2517_v20  ;;  %v1843_v3 = vld [vmem:[%s3385_s0 + $0xe0] sm:$0xf0]  ;;  %v2566_v4 = vld [vmem:[%s3384_s1 + $0x198] sm:$0xff]  ;;  %v1842_v8 = vor.u32 %v2507_v1, %v1841_v0  ;;  %v2565_v12 = vld [vmem:[%s3384_s1 + $0x190] sm:$0xff] }
  0x17   :  { %1413 = vmatpush.bf16.msra.mxu1 %v2525_v21  ;;  %v2550_v5 = vld [vmem:[%s3384_s1 + $0x118] sm:$0xff]  ;;  %v1846_v9 = vor.u32 %v2498_v2, %v1843_v3  ;;  %v2549_v13 = vld [vmem:[%s3384_s1 + $0x110] sm:$0xff]  ;;  %v2564_v16 = vld [vmem:[%s3384_s1 + $0x188] sm:$0xff] }
  0x18   :  { %1432 = vmatpush.bf16.msra.mxu2 %v2533_v22  ;;  %v2558_v10 = vld [vmem:[%s3384_s1 + $0x158] sm:$0xff]  ;;  %v2557_v14 = vld [vmem:[%s3384_s1 + $0x150] sm:$0xff]  ;;  %v2548_v17 = vld [vmem:[%s3384_s1 + $0x108] sm:$0xff] }
  0x19   :  { %1451 = vmatpush.bf16.msra.mxu3 %v2541_v23  ;;  %v2574_v11 = vld [vmem:[%s3384_s1 + $0x1d8] sm:$0xff]  ;;  %v2573_v15 = vld [vmem:[%s3384_s1 + $0x1d0] sm:$0xff]  ;;  %v2556_v18 = vld [vmem:[%s3384_s1 + $0x148] sm:$0xff] }
  0x1a   :  { %1395 = vmatpush.bf16.msra.mxu0 %v2516_v24  ;;  %v2572_v19 = vld [vmem:[%s3384_s1 + $0x1c8] sm:$0xff]  ;;  %v2563_v20 = vld [vmem:[%s3384_s1 + $0x180] sm:$0xff]  ;;  %v1777_v24 = vld [vmem:[%s3385_s0 + $0x10] sm:$0xf] }
  0x1b   :  { %1414 = vmatpush.bf16.msra.mxu1 %v2524_v25  ;;  %v2547_v21 = vld [vmem:[%s3384_s1 + $0x100] sm:$0xff]  ;;  %v2602_v25 = vld [vmem:[%s3384_s1 + $0x2b8] sm:$0xff]  ;;  %v2601_v37 = vld [vmem:[%s3384_s1 + $0x2b0] sm:$0xff] }
  0x1c   :  { %1433 = vmatpush.bf16.msra.mxu2 %v2532_v26  ;;  %v2555_v22 = vld [vmem:[%s3384_s1 + $0x140] sm:$0xff]  ;;  %v2586_v26 = vld [vmem:[%s3384_s1 + $0x238] sm:$0xff]  ;;  %v1859_v61 = vld [vmem:[%s3385_s0 + $0xf0] sm:$0xf0] }
  0x1d   :  { %1452 = vmatpush.bf16.msra.mxu3 %v2540_v27  ;;  %v2571_v23 = vld [vmem:[%s3384_s1 + $0x1c0] sm:$0xff]  ;;  %v2490_v27 = vld [vmem:[%s3385_s0 + $0x54] sm:$0xf0]  ;;  %v2482_v32 = vld [vmem:[%s3385_s0 + $0x1c] sm:$0xf] }
  0x1e   :  { %1396 = vmatpush.bf16.msra.mxu0 %v2515_v28  ;;  %v2481_v28 = vld [vmem:[%s3385_s0 + $0x14] sm:$0xf]  ;;  %v1787_v33 = vld [vmem:[%s3385_s0 + $0x60] sm:$0xf0]  ;;  %v2594_v34 = vld [vmem:[%s3384_s1 + $0x278] sm:$0xff]  ;;  %v1778_v36 = vor.u32 %v2490_v27, %v1777_v24 }
  0x1f   :  { %1415 = vmatpush.bf16.msra.mxu1 %v2523_v29  ;;  %v1779_v29 = vld [vmem:[%s3385_s0 + $0x58] sm:$0xf0]  ;;  %v2597_v1 = vld [vmem:[%s3384_s1 + $0x290] sm:$0xff]  ;;  %v1795_v24 = vld [vmem:[%s3385_s0 + $0x68] sm:$0xf0] }
  0x20   :  { %1434 = vmatpush.bf16.msra.mxu2 %v2531_v30  ;;  %v1785_v30 = vld [vmem:[%s3385_s0 + $0x18] sm:$0xf]  ;;  %v1782_v38 = vor.u32 %v2481_v28, %v1779_v29  ;;  %v2484_v27 = vld [vmem:[%s3385_s0 + $0x2c] sm:$0xf]  ;;  %v1803_v28 = vld [vmem:[%s3385_s0 + $0x70] sm:$0xf0] }
  0x21   :  { %1453 = vmatpush.bf16.msra.mxu3 %v2539_v31  ;;  %1397 = vmatmul.bf16.vlgmr.msra.gmra.mxu0 %v1762_v42  ;;  %v2491_v31 = vld [vmem:[%s3385_s0 + $0x5c] sm:$0xf0]  ;;  %v2610_v35 = vld [vmem:[%s3384_s1 + $0x2f8] sm:$0xff]  ;;  %v2593_v42 = vld [vmem:[%s3384_s1 + $0x270] sm:$0xff] }
  0x22   :  { %1465 = vmatpush.bf16.msrb.mxu0 %v2554_v41  ;;  %1416 = vmatmul.bf16.vlgmr.msra.gmra.mxu1 %v1766_v43  ;;  %v1786_v39 = vor.u32 %v2491_v31, %v1785_v30  ;;  %v2585_v41 = vld [vmem:[%s3384_s1 + $0x230] sm:$0xff]  ;;  %v2582_v60 = vld [vmem:[%s3384_s1 + $0x218] sm:$0xff] }
  0x23   :  { %1435 = vmatmul.bf16.vlgmr.msra.gmra.mxu2 %v1770_v44  ;;  %1484 = vmatpush.bf16.msrb.mxu1 %v2562_v46  ;;  %v2609_v43 = vld [vmem:[%s3384_s1 + $0x2f0] sm:$0xff]  ;;  %v2600_v44 = vld [vmem:[%s3384_s1 + $0x2a8] sm:$0xff]  ;;  %v2590_v62 = vld [vmem:[%s3384_s1 + $0x258] sm:$0xff] }
  0x24   :  { %1503 = vmatpush.bf16.msrb.mxu2 %v2570_v40  ;;  %1454 = vmatmul.bf16.vlgmr.msra.gmra.mxu3 %v1774_v45  ;;  %v1790_v40 = vor.u32 %v2482_v32, %v1787_v33  ;;  %v2584_v45 = vld [vmem:[%s3384_s1 + $0x228] sm:$0xff]  ;;  %v2606_v63 = vld [vmem:[%s3384_s1 + $0x2d8] sm:$0xff]  ;;  %v2625_v30 = vld [vmem:[%s3384_s1 + $0x370] sm:$0xff]  ;;  %v1806_v33 = vor.u32 %v2484_v27, %v1803_v28 }
  0x25   :  { %1522 = vmatpush.bf16.msrb.mxu3 %v2578_v47  ;;  %v2592_v46 = vld [vmem:[%s3384_s1 + $0x268] sm:$0xff]  ;;  %v2655_v27 = vld [vmem:[%s3384_s1 + $0x460] sm:$0xff]  ;;  %v2646_v28 = vld [vmem:[%s3384_s1 + $0x418] sm:$0xff] }
  0x26   :  { %1466 = vmatpush.bf16.msrb.mxu0 %v2553_v49  ;;  %v2608_v47 = vld [vmem:[%s3384_s1 + $0x2e8] sm:$0xff]  ;;  %v2583_v49 = vld [vmem:[%s3384_s1 + $0x220] sm:$0xff] }
  0x27   :  { %1485 = vmatpush.bf16.msrb.mxu1 %v2561_v50  ;;  %v2591_v50 = vld [vmem:[%s3384_s1 + $0x260] sm:$0xff] }
  0x28   :  { %1504 = vmatpush.bf16.msrb.mxu2 %v2569_v48  ;;  %v2599_v48 = vld [vmem:[%s3384_s1 + $0x2a0] sm:$0xff] }
  0x29   :  { %1523 = vmatpush.bf16.msrb.mxu3 %v2577_v51  ;;  %v2607_v51 = vld [vmem:[%s3384_s1 + $0x2e0] sm:$0xff] }
  0x2a   :  { %1467 = vmatpush.bf16.msrb.mxu0 %v2552_v53  ;;  %v2508_v53 = vld [vmem:[%s3385_s0 + $0xe4] sm:$0xf0] }
  0x2b   :  { %1486 = vmatpush.bf16.msrb.mxu1 %v2560_v54  ;;  %v2598_v54 = vld [vmem:[%s3384_s1 + $0x298] sm:$0xff] }
  0x2c   :  { %1505 = vmatpush.bf16.msrb.mxu2 %v2568_v52  ;;  %v1849_v52 = vld [vmem:[%s3385_s0 + $0xa0] sm:$0xf] }
  0x2d   :  { %1524 = vmatpush.bf16.msrb.mxu3 %v2576_v55  ;;  %v2499_v55 = vld [vmem:[%s3385_s0 + $0xa4] sm:$0xf]  ;;  %v1850_v0 = vor.u32 %v2508_v53, %v1849_v52  ;;  %v2502_v52 = vld [vmem:[%s3385_s0 + $0xbc] sm:$0xf] }
  0x2e   :  { %1468 = vmatpush.bf16.msrb.mxu0 %v2551_v57  ;;  %v1857_v57 = vld [vmem:[%s3385_s0 + $0xa8] sm:$0xf]  ;;  %v2614_v53 = vld [vmem:[%s3384_s1 + $0x318] sm:$0xff] }
  0x2f   :  { %1487 = vmatpush.bf16.msrb.mxu1 %v2559_v58  ;;  %v2509_v58 = vld [vmem:[%s3385_s0 + $0xec] sm:$0xf0] }
  0x30   :  { %1506 = vmatpush.bf16.msrb.mxu2 %v2567_v56  ;;  %v1851_v56 = vld [vmem:[%s3385_s0 + $0xe8] sm:$0xf0]  ;;  %v1858_v3 = vor.u32 %v2509_v58, %v1857_v57  ;;  %v2621_v58 = vld [vmem:[%s3384_s1 + $0x350] sm:$0xff] }
  0x31   :  { %1525 = vmatpush.bf16.msrb.mxu3 %v2575_v59  ;;  %1402 = vmatmul.bf16.gmra.mxu0 %v1834_v6  ;;  %v2500_v59 = vld [vmem:[%s3385_s0 + $0xac] sm:$0xf]  ;;  %v1854_v2 = vor.u32 %v2499_v55, %v1851_v56  ;;  %v2589_v6 = vld [vmem:[%s3384_s1 + $0x250] sm:$0xff]  ;;  %v2638_v55 = vld [vmem:[%s3384_s1 + $0x3d8] sm:$0xff] }
  0x32   :  { %1469 = vmatpush.bf16.msrb.mxu0 %v2550_v5  ;;  %1421 = vmatmul.bf16.gmra.mxu1 %v1838_v7  ;;  %v2581_v5 = vld [vmem:[%s3384_s1 + $0x210] sm:$0xff] }
  0x33   :  { %1440 = vmatmul.bf16.gmra.mxu2 %v1842_v8  ;;  %1488 = vmatpush.bf16.msrb.mxu1 %v2558_v10  ;;  %v2605_v7 = vld [vmem:[%s3384_s1 + $0x2d0] sm:$0xff]  ;;  %v2596_v8 = vld [vmem:[%s3384_s1 + $0x288] sm:$0xff] }
  0x34   :  { %1507 = vmatpush.bf16.msrb.mxu2 %v2566_v4  ;;  %1459 = vmatmul.bf16.gmra.mxu3 %v1846_v9  ;;  %v1862_v4 = vor.u32 %v2500_v59, %v1859_v61  ;;  %v2580_v9 = vld [vmem:[%s3384_s1 + $0x208] sm:$0xff]  ;;  %v2629_v56 = vld [vmem:[%s3384_s1 + $0x390] sm:$0xff] }
  0x35   :  { %1526 = vmatpush.bf16.msrb.mxu3 %v2574_v11  ;;  %v2588_v10 = vld [vmem:[%s3384_s1 + $0x248] sm:$0xff] }
  0x36   :  { %1470 = vmatpush.bf16.msrb.mxu0 %v2549_v13  ;;  %v2604_v11 = vld [vmem:[%s3384_s1 + $0x2c8] sm:$0xff]  ;;  %v2634_v13 = vld [vmem:[%s3384_s1 + $0x3b8] sm:$0xff] }
  0x37   :  { %1489 = vmatpush.bf16.msrb.mxu1 %v2557_v14  ;;  %v2579_v14 = vld [vmem:[%s3384_s1 + $0x200] sm:$0xff] }
  0x38   :  { %1508 = vmatpush.bf16.msrb.mxu2 %v2565_v12  ;;  %v2595_v12 = vld [vmem:[%s3384_s1 + $0x280] sm:$0xff] }
  0x39   :  { %1527 = vmatpush.bf16.msrb.mxu3 %v2573_v15  ;;  %v2587_v15 = vld [vmem:[%s3384_s1 + $0x240] sm:$0xff] }
  0x3a   :  { %1471 = vmatpush.bf16.msrb.mxu0 %v2548_v17  ;;  %v1793_v17 = vld [vmem:[%s3385_s0 + $0x20] sm:$0xf] }
  0x3b   :  { %1490 = vmatpush.bf16.msrb.mxu1 %v2556_v18  ;;  %v2492_v18 = vld [vmem:[%s3385_s0 + $0x64] sm:$0xf0] }
  0x3c   :  { %1509 = vmatpush.bf16.msrb.mxu2 %v2564_v16  ;;  %v2603_v16 = vld [vmem:[%s3384_s1 + $0x2c0] sm:$0xff]  ;;  %v1794_v29 = vor.u32 %v2492_v18, %v1793_v17  ;;  %v2486_v18 = vld [vmem:[%s3385_s0 + $0x3c] sm:$0xf] }
  0x3d   :  { %1528 = vmatpush.bf16.msrb.mxu3 %v2572_v19  ;;  %v2618_v19 = vld [vmem:[%s3384_s1 + $0x338] sm:$0xff]  ;;  %v2495_v17 = vld [vmem:[%s3385_s0 + $0x7c] sm:$0xf0] }
  0x3e   :  { %1472 = vmatpush.bf16.msrb.mxu0 %v2547_v21  ;;  %v2483_v21 = vld [vmem:[%s3385_s0 + $0x24] sm:$0xf] }
  0x3f   :  { %1491 = vmatpush.bf16.msrb.mxu1 %v2555_v22  ;;  %v2642_v22 = vld [vmem:[%s3384_s1 + $0x3f8] sm:$0xff]  ;;  %v1798_v31 = vor.u32 %v2483_v21, %v1795_v24  ;;  %v2648_v24 = vld [vmem:[%s3384_s1 + $0x428] sm:$0xff] }
  0x40   :  { %1510 = vmatpush.bf16.msrb.mxu2 %v2563_v20  ;;  %v2626_v20 = vld [vmem:[%s3384_s1 + $0x378] sm:$0xff] }
  0x41   :  { %1529 = vmatpush.bf16.msrb.mxu3 %v2571_v23  ;;  %1473 = vmatmul.bf16.vlgmr.msrb.gmra.mxu0 %v1778_v36  ;;  %v2633_v23 = vld [vmem:[%s3384_s1 + $0x3b0] sm:$0xff]  ;;  %v2632_v36 = vld [vmem:[%s3384_s1 + $0x3a8] sm:$0xff] }
  0x42   :  { %1541 = vmatpush.bf16.msra.mxu0 %v2586_v26  ;;  %1492 = vmatmul.bf16.vlgmr.msrb.gmra.mxu1 %v1782_v38  ;;  %v2493_v26 = vld [vmem:[%s3385_s0 + $0x6c] sm:$0xf0]  ;;  %v2616_v38 = vld [vmem:[%s3384_s1 + $0x328] sm:$0xff] }
  0x43   :  { %1560 = vmatpush.bf16.msra.mxu1 %v2594_v34  ;;  %1511 = vmatmul.bf16.vlgmr.msrb.gmra.mxu2 %v1786_v39  ;;  %v2617_v34 = vld [vmem:[%s3384_s1 + $0x330] sm:$0xff]  ;;  %v2640_v39 = vld [vmem:[%s3384_s1 + $0x3e8] sm:$0xff] }
  0x44   :  { %1579 = vmatpush.bf16.msra.mxu2 %v2602_v25  ;;  %1530 = vmatmul.bf16.vlgmr.msrb.gmra.mxu3 %v1790_v40  ;;  %v1801_v25 = vld [vmem:[%s3385_s0 + $0x28] sm:$0xf]  ;;  %v2631_v40 = vld [vmem:[%s3384_s1 + $0x3a0] sm:$0xff] }
  0x45   :  { %1598 = vmatpush.bf16.msra.mxu3 %v2610_v35  ;;  %v1802_v32 = vor.u32 %v2493_v26, %v1801_v25  ;;  %v2641_v35 = vld [vmem:[%s3384_s1 + $0x3f0] sm:$0xff]  ;;  %v2656_v25 = vld [vmem:[%s3384_s1 + $0x468] sm:$0xff]  ;;  %v2647_v26 = vld [vmem:[%s3384_s1 + $0x420] sm:$0xff] }
  0x46   :  { %1542 = vmatpush.bf16.msra.mxu0 %v2585_v41  ;;  %v2623_v41 = vld [vmem:[%s3384_s1 + $0x360] sm:$0xff] }
  0x47   :  { %1561 = vmatpush.bf16.msra.mxu1 %v2593_v42  ;;  %v2615_v42 = vld [vmem:[%s3384_s1 + $0x320] sm:$0xff] }
  0x48   :  { %1580 = vmatpush.bf16.msra.mxu2 %v2601_v37  ;;  %v2624_v37 = vld [vmem:[%s3384_s1 + $0x368] sm:$0xff] }
  0x49   :  { %1599 = vmatpush.bf16.msra.mxu3 %v2609_v43  ;;  %v2639_v43 = vld [vmem:[%s3384_s1 + $0x3e0] sm:$0xff] }
  0x4a   :  { %1543 = vmatpush.bf16.msra.mxu0 %v2584_v45  ;;  %v1865_v45 = vld [vmem:[%s3385_s0 + $0xb0] sm:$0xf] }
  0x4b   :  { %1562 = vmatpush.bf16.msra.mxu1 %v2592_v46  ;;  %v2510_v46 = vld [vmem:[%s3385_s0 + $0xf4] sm:$0xf0] }
  0x4c   :  { %1581 = vmatpush.bf16.msra.mxu2 %v2600_v44  ;;  %v2630_v44 = vld [vmem:[%s3384_s1 + $0x398] sm:$0xff]  ;;  %v1866_v57 = vor.u32 %v2510_v46, %v1865_v45  ;;  %v2652_v45 = vld [vmem:[%s3384_s1 + $0x448] sm:$0xff]  ;;  %v2643_v46 = vld [vmem:[%s3384_s1 + $0x400] sm:$0xff] }
  0x4d   :  { %1600 = vmatpush.bf16.msra.mxu3 %v2608_v47  ;;  %v2622_v47 = vld [vmem:[%s3384_s1 + $0x358] sm:$0xff] }
  0x4e   :  { %1544 = vmatpush.bf16.msra.mxu0 %v2583_v49  ;;  %v1867_v49 = vld [vmem:[%s3385_s0 + $0xf8] sm:$0xf0] }
  0x4f   :  { %1563 = vmatpush.bf16.msra.mxu1 %v2591_v50  ;;  %v1873_v50 = vld [vmem:[%s3385_s0 + $0xb8] sm:$0xf] }
  0x50   :  { %1582 = vmatpush.bf16.msra.mxu2 %v2599_v48  ;;  %v2501_v48 = vld [vmem:[%s3385_s0 + $0xb4] sm:$0xf] }
  0x51   :  { %1601 = vmatpush.bf16.msra.mxu3 %v2607_v51  ;;  %1478 = vmatmul.bf16.gmra.mxu0 %v1850_v0  ;;  %v2511_v51 = vld [vmem:[%s3385_s0 + $0xfc] sm:$0xf0]  ;;  %v1870_v59 = vor.u32 %v2501_v48, %v1867_v49  ;;  %v2628_v0 = vld [vmem:[%s3384_s1 + $0x388] sm:$0xff] }
  0x52   :  { %1545 = vmatpush.bf16.msra.mxu0 %v2582_v60  ;;  %1497 = vmatmul.bf16.gmra.mxu1 %v1854_v2  ;;  %v1874_v60 = vor.u32 %v2511_v51, %v1873_v50  ;;  %v2612_v2 = vld [vmem:[%s3384_s1 + $0x308] sm:$0xff]  ;;  %v2695_v48 = vld [vmem:[%s3386_s2] ss:$0 sm:$0xff]  ;;  %v1897_v51 = vld [vmem:[%s3385_s0 + $0xd0] sm:$0xf] }
  0x53   :  { %1564 = vmatpush.bf16.msra.mxu1 %v2590_v62  ;;  %1516 = vmatmul.bf16.gmra.mxu2 %v1858_v3  ;;  %v2613_v62 = vld [vmem:[%s3384_s1 + $0x310] sm:$0xff]  ;;  %v2636_v3 = vld [vmem:[%s3384_s1 + $0x3c8] sm:$0xff]  ;;  %v1825_v49 = vld [vmem:[%s3385_s0 + $0x40] sm:$0xf] }
  0x54   :  { %1583 = vmatpush.bf16.msra.mxu2 %v2598_v54  ;;  %1535 = vmatmul.bf16.gmra.mxu3 %v1862_v4  ;;  %v1875_v54 = vld [vmem:[%s3385_s0 + $0x100] sm:$0xf0]  ;;  %v2496_v50 = vld [vmem:[%s3385_s0 + $0x84] sm:$0xf0] }
  0x55   :  { %1602 = vmatpush.bf16.msra.mxu3 %v2606_v63  ;;  %v1878_v61 = vor.u32 %v2502_v52, %v1875_v54  ;;  %v2637_v63 = vld [vmem:[%s3384_s1 + $0x3d0] sm:$0xff]  ;;  %v2627_v4 = vld [vmem:[%s3384_s1 + $0x380] sm:$0xff]  ;;  %v2514_v52 = vld [vmem:[%s3385_s0 + $0x114] sm:$0xf0] }
  0x56   :  { %1546 = vmatpush.bf16.msra.mxu0 %v2581_v5  ;;  %v2619_v5 = vld [vmem:[%s3384_s1 + $0x340] sm:$0xff]  ;;  %v1827_v54 = vld [vmem:[%s3385_s0 + $0x88] sm:$0xf0] }
  0x57   :  { %1565 = vmatpush.bf16.msra.mxu1 %v2589_v6  ;;  %v2650_v6 = vld [vmem:[%s3384_s1 + $0x438] sm:$0xff] }
  0x58   :  { %1584 = vmatpush.bf16.msra.mxu2 %v2597_v1  ;;  %v2620_v1 = vld [vmem:[%s3384_s1 + $0x348] sm:$0xff] }
  0x59   :  { %1603 = vmatpush.bf16.msra.mxu3 %v2605_v7  ;;  %v2658_v7 = vld [vmem:[%s3384_s1 + $0x478] sm:$0xff] }
  0x5a   :  { %1547 = vmatpush.bf16.msra.mxu0 %v2580_v9  ;;  %v2635_v9 = vld [vmem:[%s3384_s1 + $0x3c0] sm:$0xff] }
  0x5b   :  { %1566 = vmatpush.bf16.msra.mxu1 %v2588_v10  ;;  %v1809_v10 = vld [vmem:[%s3385_s0 + $0x30] sm:$0xf] }
  0x5c   :  { %1585 = vmatpush.bf16.msra.mxu2 %v2596_v8  ;;  %v2611_v8 = vld [vmem:[%s3384_s1 + $0x300] sm:$0xff] }
  0x5d   :  { %1604 = vmatpush.bf16.msra.mxu3 %v2604_v11  ;;  %v2649_v11 = vld [vmem:[%s3384_s1 + $0x430] sm:$0xff] }
  0x5e   :  { %1548 = vmatpush.bf16.msra.mxu0 %v2579_v14  ;;  %v2657_v14 = vld [vmem:[%s3384_s1 + $0x470] sm:$0xff] }
  0x5f   :  { %1567 = vmatpush.bf16.msra.mxu1 %v2587_v15  ;;  %v1811_v15 = vld [vmem:[%s3385_s0 + $0x78] sm:$0xf0] }
  0x60   :  { %1586 = vmatpush.bf16.msra.mxu2 %v2595_v12  ;;  %v2494_v12 = vld [vmem:[%s3385_s0 + $0x74] sm:$0xf0] }
  0x61   :  { %1605 = vmatpush.bf16.msra.mxu3 %v2603_v16  ;;  %1549 = vmatmul.bf16.vlgmr.msra.gmra.mxu0 %v1794_v29  ;;  %v1817_v16 = vld [vmem:[%s3385_s0 + $0x38] sm:$0xf] }
  0x62   :  { %1617 = vmatpush.bf16.msrb.mxu0 %v2618_v19  ;;  %1568 = vmatmul.bf16.vlgmr.msra.gmra.mxu1 %v1798_v31  ;;  %v1819_v19 = vld [vmem:[%s3385_s0 + $0x80] sm:$0xf0]  ;;  %v2654_v29 = vld [vmem:[%s3384_s1 + $0x458] sm:$0xff]  ;;  %v2512_v31 = vld [vmem:[%s3385_s0 + $0x104] sm:$0xf0] }
  0x63   :  { %1636 = vmatpush.bf16.msrb.mxu1 %v2626_v20  ;;  %1587 = vmatmul.bf16.vlgmr.msra.gmra.mxu2 %v1802_v32  ;;  %v1810_v20 = vor.u32 %v2494_v12, %v1809_v10  ;;  %v2503_v32 = vld [vmem:[%s3385_s0 + $0xc4] sm:$0xf] }
  0x64   :  { %1655 = vmatpush.bf16.msrb.mxu2 %v2634_v13  ;;  %1606 = vmatmul.bf16.vlgmr.msra.gmra.mxu3 %v1806_v33  ;;  %v2485_v13 = vld [vmem:[%s3385_s0 + $0x34] sm:$0xf]  ;;  %v1883_v33 = vld [vmem:[%s3385_s0 + $0x108] sm:$0xf0] }
  0x65   :  { %1674 = vmatpush.bf16.msrb.mxu3 %v2642_v22  ;;  %v1814_v21 = vor.u32 %v2485_v13, %v1811_v15  ;;  %v1818_v22 = vor.u32 %v2495_v17, %v1817_v16 }
  0x66   :  { %1618 = vmatpush.bf16.msrb.mxu0 %v2617_v34  ;;  %v1889_v34 = vld [vmem:[%s3385_s0 + $0xc8] sm:$0xf] }
  0x67   :  { %1637 = vmatpush.bf16.msrb.mxu1 %v2625_v30  ;;  %v1881_v30 = vld [vmem:[%s3385_s0 + $0xc0] sm:$0xf] }
  0x68   :  { %1656 = vmatpush.bf16.msrb.mxu2 %v2633_v23  ;;  %v1822_v23 = vor.u32 %v2486_v18, %v1819_v19 }
  0x69   :  { %1675 = vmatpush.bf16.msrb.mxu3 %v2641_v35  ;;  %v2513_v35 = vld [vmem:[%s3385_s0 + $0x10c] sm:$0xf0] }
  0x6a   :  { %1619 = vmatpush.bf16.msrb.mxu0 %v2616_v38  ;;  %v1891_v38 = vld [vmem:[%s3385_s0 + $0x110] sm:$0xf0] }
  0x6b   :  { %1638 = vmatpush.bf16.msrb.mxu1 %v2624_v37  ;;  %v2504_v37 = vld [vmem:[%s3385_s0 + $0xcc] sm:$0xf] }
  0x6c   :  { %1657 = vmatpush.bf16.msrb.mxu2 %v2632_v36  ;;  %v2645_v36 = vld [vmem:[%s3384_s1 + $0x410] sm:$0xff] }
  0x6d   :  { %1676 = vmatpush.bf16.msrb.mxu3 %v2640_v39  ;;  %v2653_v39 = vld [vmem:[%s3384_s1 + $0x450] sm:$0xff] }
  0x6e   :  { %1620 = vmatpush.bf16.msrb.mxu0 %v2615_v42  ;;  %v1890_v42 = vor.u32 %v2513_v35, %v1889_v34 }
  0x6f   :  { %1639 = vmatpush.bf16.msrb.mxu1 %v2623_v41  ;;  %v1886_v41 = vor.u32 %v2503_v32, %v1883_v33 }
  0x70   :  { %1658 = vmatpush.bf16.msrb.mxu2 %v2631_v40  ;;  %v1882_v40 = vor.u32 %v2512_v31, %v1881_v30 }
  0x71   :  { %1677 = vmatpush.bf16.msrb.mxu3 %v2639_v43  ;;  %1554 = vmatmul.bf16.gmra.mxu0 %v1866_v57  ;;  %v1894_v43 = vor.u32 %v2504_v37, %v1891_v38  ;;  %v1826_v57 = vor.u32 %v2496_v50, %v1825_v49 }
  0x72   :  { %1621 = vmatpush.bf16.msrb.mxu0 %v2614_v53  ;;  %1573 = vmatmul.bf16.gmra.mxu1 %v1870_v59  ;;  %v2487_v53 = vld [vmem:[%s3385_s0 + $0x44] sm:$0xf] }
  0x73   :  { %1640 = vmatpush.bf16.msrb.mxu1 %v2622_v47  ;;  %1592 = vmatmul.bf16.gmra.mxu2 %v1874_v60  ;;  %v2651_v47 = vld [vmem:[%s3384_s1 + $0x440] sm:$0xff]  ;;  %v1898_v60 = vor.u32 %v2514_v52, %v1897_v51 }
  0x74   :  { %1659 = vmatpush.bf16.msrb.mxu2 %v2630_v44  ;;  %1611 = vmatmul.bf16.gmra.mxu3 %v1878_v61  ;;  %v2644_v44 = vld [vmem:[%s3384_s1 + $0x408] sm:$0xff]  ;;  %v1830_v61 = vor.u32 %v2487_v53, %v1827_v54 }
  0x75   :  { %1678 = vmatpush.bf16.msrb.mxu3 %v2638_v55  ;;  %v2505_v55 = vld [vmem:[%s3385_s0 + $0xd4] sm:$0xf] }
  0x76   :  { %1622 = vmatpush.bf16.msrb.mxu0 %v2613_v62 }
  0x77   :  { %1641 = vmatpush.bf16.msrb.mxu1 %v2621_v58 }
  0x78   :  { %1660 = vmatpush.bf16.msrb.mxu2 %v2629_v56  ;;  %v1899_v56 = vld [vmem:[%s3385_s0 + $0x118] sm:$0xf0] }
  0x79   :  { %1679 = vmatpush.bf16.msrb.mxu3 %v2637_v63  ;;  %v1902_v63 = vor.u32 %v2505_v55, %v1899_v56 }
  0x7a   :  { %1623 = vmatpush.bf16.msrb.mxu0 %v2612_v2 }
  0x7b   :  { %1642 = vmatpush.bf16.msrb.mxu1 %v2620_v1 }
  0x7c   :  { %1661 = vmatpush.bf16.msrb.mxu2 %v2628_v0 }
  0x7d   :  { %1680 = vmatpush.bf16.msrb.mxu3 %v2636_v3 }
  0x7e   :  { %1624 = vmatpush.bf16.msrb.mxu0 %v2611_v8 }
  0x7f   :  { %1643 = vmatpush.bf16.msrb.mxu1 %v2619_v5 }
  0x80   :  { %1662 = vmatpush.bf16.msrb.mxu2 %v2627_v4 }
  0x81   :  { %1681 = vmatpush.bf16.msrb.mxu3 %v2635_v9  ;;  %1625 = vmatmul.bf16.vlgmr.msrb.gmra.mxu0 %v1810_v20 }
  0x82   :  { %1693 = vmatpush.bf16.msra.mxu0 %v2650_v6  ;;  %1644 = vmatmul.bf16.vlgmr.msrb.gmra.mxu1 %v1814_v21 }
  0x83   :  { %1712 = vmatpush.bf16.msra.mxu1 %v2658_v7  ;;  %1663 = vmatmul.bf16.vlgmr.msrb.gmra.mxu2 %v1818_v22 }
  0x84   :  { %2679 = vmatpush.bf16.msra.mxu2 %v2650_v6  ;;  %1682 = vmatmul.bf16.vlgmr.msrb.gmra.mxu3 %v1822_v23 }
  0x85   :  { %2687 = vmatpush.bf16.msra.mxu3 %v2658_v7 }
  0x86   :  { %1694 = vmatpush.bf16.msra.mxu0 %v2649_v11 }
  0x87   :  { %1713 = vmatpush.bf16.msra.mxu1 %v2657_v14 }
  0x88   :  { %2680 = vmatpush.bf16.msra.mxu2 %v2649_v11 }
  0x89   :  { %2688 = vmatpush.bf16.msra.mxu3 %v2657_v14 }
  0x8a   :  { %1695 = vmatpush.bf16.msra.mxu0 %v2648_v24 }
  0x8b   :  { %1714 = vmatpush.bf16.msra.mxu1 %v2656_v25 }
  0x8c   :  { %2681 = vmatpush.bf16.msra.mxu2 %v2648_v24 }
  0x8d   :  { %2689 = vmatpush.bf16.msra.mxu3 %v2656_v25 }
  0x8e   :  { %1696 = vmatpush.bf16.msra.mxu0 %v2647_v26 }
  0x8f   :  { %1715 = vmatpush.bf16.msra.mxu1 %v2655_v27 }
  0x90   :  { %2682 = vmatpush.bf16.msra.mxu2 %v2647_v26 }
  0x91   :  { %2690 = vmatpush.bf16.msra.mxu3 %v2655_v27  ;;  %1630 = vmatmul.bf16.gmra.mxu0 %v1882_v40 }
  0x92   :  { %1697 = vmatpush.bf16.msra.mxu0 %v2646_v28  ;;  %1649 = vmatmul.bf16.gmra.mxu1 %v1886_v41 }
  0x93   :  { %1716 = vmatpush.bf16.msra.mxu1 %v2654_v29  ;;  %1668 = vmatmul.bf16.gmra.mxu2 %v1890_v42 }
  0x94   :  { %2683 = vmatpush.bf16.msra.mxu2 %v2646_v28  ;;  %1687 = vmatmul.bf16.gmra.mxu3 %v1894_v43 }
  0x95   :  { %2691 = vmatpush.bf16.msra.mxu3 %v2654_v29 }
  0x96   :  { %1698 = vmatpush.bf16.msra.mxu0 %v2645_v36 }
  0x97   :  { %1717 = vmatpush.bf16.msra.mxu1 %v2653_v39 }
  0x98   :  { %2684 = vmatpush.bf16.msra.mxu2 %v2645_v36 }
  0x99   :  { %2692 = vmatpush.bf16.msra.mxu3 %v2653_v39 }
  0x9a   :  { %1699 = vmatpush.bf16.msra.mxu0 %v2644_v44 }
  0x9b   :  { %1718 = vmatpush.bf16.msra.mxu1 %v2652_v45 }
  0x9c   :  { %2685 = vmatpush.bf16.msra.mxu2 %v2644_v44 }
  0x9d   :  { %2693 = vmatpush.bf16.msra.mxu3 %v2652_v45 }
  0x9e   :  { %1700 = vmatpush.bf16.msra.mxu0 %v2643_v46  ;;  %v1398_v58 = vpop.f32.mrf.mxu0 }
  0x9f   :  { %1719 = vmatpush.bf16.msra.mxu1 %v2651_v47  ;;  %v1417_v59 = vpop.f32.mrf.mxu1  ;;  %v1399_v62 = vadd.f32 %v2695_v48, %v1398_v58 }
  0xa0   :  { %2686 = vmatpush.bf16.msra.mxu2 %v2643_v46 }
  0xa1   :  { %2694 = vmatpush.bf16.msra.mxu3 %v2651_v47  ;;  %v1418_v0 = vadd.f32 %v1417_v59, %v1399_v62  ;;  %1701 = vmatmul.bf16.vlgmr.msra.gmra.mxu0 %v1826_v57 }
  0xa2   :  { %1720 = vmatmul.bf16.vlgmr.msra.gmra.mxu1 %v1830_v61 }
  0xa3   :  { %1706 = vmatmul.bf16.vlgmr.msra.gmra.mxu2 %v1898_v60 }
  0xa4   :  { %1725 = vmatmul.bf16.vlgmr.msra.gmra.mxu3 %v1902_v63 }
  0xa6   :  { %v1436_v1 = vpop.f32.mrf.mxu2  ;;  %v1400_v4 = vpop.f32.mrf.mxu0 }
  0xa7   :  { %v1455_v2 = vpop.f32.mrf.mxu3  ;;  %v1437_v3 = vadd.f32 %v1436_v1, %v1418_v0  ;;  %v1419_v5 = vpop.f32.mrf.mxu1  ;;  %v1401_v6 = vadd.f32 %v2695_v48, %v1400_v4 }
  0xa9   :  { %v1456_v7 = vadd.f32 %v1455_v2, %v1437_v3  ;;  %v1420_v8 = vadd.f32 %v1419_v5, %v1401_v6 }
  0xae   :  { %v1438_v9 = vpop.f32.mrf.mxu2  ;;  %v1403_v12 = vpop.f32.mrf.mxu0 }
  0xaf   :  { %v1457_v10 = vpop.f32.mrf.mxu3  ;;  %v1439_v11 = vadd.f32 %v1438_v9, %v1420_v8  ;;  %v1422_v13 = vpop.f32.mrf.mxu1  ;;  %v1404_v14 = vadd.f32 %v2695_v48, %v1403_v12 }
  0xb1   :  { %v1458_v15 = vadd.f32 %v1457_v10, %v1439_v11  ;;  %v1423_v16 = vadd.f32 %v1422_v13, %v1404_v14 }
  0xb6   :  { %v1441_v17 = vpop.f32.mrf.mxu2  ;;  %v1405_v20 = vpop.f32.mrf.mxu0 }
  0xb7   :  { %v1460_v18 = vpop.f32.mrf.mxu3  ;;  %v1442_v19 = vadd.f32 %v1441_v17, %v1423_v16  ;;  %v1424_v21 = vpop.f32.mrf.mxu1  ;;  %v1406_v22 = vadd.f32 %v2695_v48, %v1405_v20 }
  0xb9   :  { %v1461_v23 = vadd.f32 %v1460_v18, %v1442_v19  ;;  %v1425_v24 = vadd.f32 %v1424_v21, %v1406_v22 }
  0xbe   :  { %v1443_v25 = vpop.f32.mrf.mxu2  ;;  %v1474_v28 = vpop.f32.mrf.mxu0 }
  0xbf   :  { %v1462_v26 = vpop.f32.mrf.mxu3  ;;  %v1444_v27 = vadd.f32 %v1443_v25, %v1425_v24  ;;  %v1475_v29 = vadd.f32 %v1474_v28, %v1456_v7  ;;  %v1493_v30 = vpop.f32.mrf.mxu1 }
  0xc1   :  { %v1463_v31 = vadd.f32 %v1462_v26, %v1444_v27  ;;  %v1494_v32 = vadd.f32 %v1493_v30, %v1475_v29 }
  0xc6   :  { %v1512_v33 = vpop.f32.mrf.mxu2  ;;  %v1476_v36 = vpop.f32.mrf.mxu0 }
  0xc7   :  { %v1513_v34 = vadd.f32 %v1512_v33, %v1494_v32  ;;  %v1531_v35 = vpop.f32.mrf.mxu3  ;;  %v1477_v37 = vadd.f32 %v1476_v36, %v1458_v15  ;;  %v1495_v38 = vpop.f32.mrf.mxu1 }
  0xc9   :  { %v1532_v39 = vadd.f32 %v1531_v35, %v1513_v34  ;;  %v1496_v40 = vadd.f32 %v1495_v38, %v1477_v37 }
  0xce   :  { %v1514_v41 = vpop.f32.mrf.mxu2  ;;  %v1479_v44 = vpop.f32.mrf.mxu0 }
  0xcf   :  { %v1515_v42 = vadd.f32 %v1514_v41, %v1496_v40  ;;  %v1533_v43 = vpop.f32.mrf.mxu3  ;;  %v1480_v45 = vadd.f32 %v1479_v44, %v1461_v23  ;;  %v1498_v46 = vpop.f32.mrf.mxu1 }
  0xd1   :  { %v1534_v47 = vadd.f32 %v1533_v43, %v1515_v42  ;;  %v1499_v48 = vadd.f32 %v1498_v46, %v1480_v45 }
  0xd6   :  { %v1517_v49 = vpop.f32.mrf.mxu2  ;;  %v1481_v52 = vpop.f32.mrf.mxu0 }
  0xd7   :  { %v1518_v50 = vadd.f32 %v1517_v49, %v1499_v48  ;;  %v1536_v51 = vpop.f32.mrf.mxu3  ;;  %v1500_v53 = vpop.f32.mrf.mxu1  ;;  %v1482_v16 = vadd.f32 %v1481_v52, %v1463_v31 }
  0xd9   :  { %v1537_v54 = vadd.f32 %v1536_v51, %v1518_v50  ;;  %v1501_v19 = vadd.f32 %v1500_v53, %v1482_v16 }
  0xde   :  { %v1519_v55 = vpop.f32.mrf.mxu2  ;;  %v1550_v57 = vpop.f32.mrf.mxu0 }
  0xdf   :  { %v1538_v56 = vpop.f32.mrf.mxu3  ;;  %v1569_v58 = vpop.f32.mrf.mxu1  ;;  %v1551_v15 = vadd.f32 %v1550_v57, %v1532_v39  ;;  %v1520_v25 = vadd.f32 %v1519_v55, %v1501_v19 }
  0xe1   :  { %v1570_v17 = vadd.f32 %v1569_v58, %v1551_v15  ;;  %v1539_v29 = vadd.f32 %v1538_v56, %v1520_v25 }
  0xe6   :  { %v1588_v59 = vpop.f32.mrf.mxu2  ;;  %v1552_v61 = vpop.f32.mrf.mxu0 }
  0xe7   :  { %v1607_v60 = vpop.f32.mrf.mxu3  ;;  %v1571_v62 = vpop.f32.mrf.mxu1  ;;  %v1589_v22 = vadd.f32 %v1588_v59, %v1570_v17  ;;  %v1553_v23 = vadd.f32 %v1552_v61, %v1534_v47  ;;  %v2660_v59 = vld [vmem:[%s3387_s3] sm:$0xff]  }
  0xe9   :  { %v1608_v27 = vadd.f32 %v1607_v60, %v1589_v22  ;;  %v1572_v28 = vadd.f32 %v1571_v62, %v1553_v23  ;;  %v2661_v62 = vunpack.c.l.bf16 %v2660_v59 }
  0xee   :  { %v1590_v63 = vpop.f32.mrf.mxu2  ;;  %v1555_v1 = vpop.f32.mrf.mxu0 }
  0xef   :  { %v1609_v0 = vpop.f32.mrf.mxu3  ;;  %v1574_v2 = vpop.f32.mrf.mxu1  ;;  %v1556_v26 = vadd.f32 %v1555_v1, %v1537_v54  ;;  %v1591_v32 = vadd.f32 %v1590_v63, %v1572_v28 }
  0xf1   :  { %v1575_v30 = vadd.f32 %v1574_v2, %v1556_v26  ;;  %v1610_v39 = vadd.f32 %v1609_v0, %v1591_v32 }
  0xf6   :  { %v1593_v3 = vpop.f32.mrf.mxu2  ;;  %v1557_v5 = vpop.f32.mrf.mxu0 }
  0xf7   :  { %v1612_v4 = vpop.f32.mrf.mxu3  ;;  %v1576_v6 = vpop.f32.mrf.mxu1  ;;  %v1594_v35 = vadd.f32 %v1593_v3, %v1575_v30  ;;  %v1558_v36 = vadd.f32 %v1557_v5, %v1539_v29  ;;  %v2662_v5 = vunpack.c.h.bf16 %v2660_v59 }
  0xf9   :  { %v1613_v41 = vadd.f32 %v1612_v4, %v1594_v35  ;;  %v1577_v42 = vadd.f32 %v1576_v6, %v1558_v36 }
  0xfe   :  { %v1595_v7 = vpop.f32.mrf.mxu2  ;;  %v1626_v9 = vpop.f32.mrf.mxu0 }
  0xff   :  { %v1614_v8 = vpop.f32.mrf.mxu3  ;;  %v1645_v10 = vpop.f32.mrf.mxu1  ;;  %v1627_v33 = vadd.f32 %v1626_v9, %v1608_v27  ;;  %v1596_v45 = vadd.f32 %v1595_v7, %v1577_v42 }
 0x101   :  { %v1646_v40 = vadd.f32 %v1645_v10, %v1627_v33  ;;  %v1615_v53 = vadd.f32 %v1614_v8, %v1596_v45  ;;  %v2677_v10 = vld [vmem:[%s3387_s3 + $0x8] sm:$0xff]  }
 0x102   :  { %v2665_v15 = vunpack.c.l.bf16 %v2677_v10 }
 0x106   :  { %v1664_v11 = vpop.f32.mrf.mxu2  ;;  %v1628_v13 = vpop.f32.mrf.mxu0 }
 0x107   :  { %v1683_v12 = vpop.f32.mrf.mxu3  ;;  %v1647_v14 = vpop.f32.mrf.mxu1  ;;  %v1665_v43 = vadd.f32 %v1664_v11, %v1646_v40  ;;  %v1629_v44 = vadd.f32 %v1628_v13, %v1610_v39 }
 0x109   :  { %v1684_v50 = vadd.f32 %v1683_v12, %v1665_v43  ;;  %v1648_v51 = vadd.f32 %v1647_v14, %v1629_v44 }
 0x10e   :  { %v1666_v18 = vpop.f32.mrf.mxu2  ;;  %v1631_v21 = vpop.f32.mrf.mxu0 }
 0x10f   :  { %v1685_v20 = vpop.f32.mrf.mxu3  ;;  %v1650_v24 = vpop.f32.mrf.mxu1  ;;  %v1632_v46 = vadd.f32 %v1631_v21, %v1613_v41  ;;  %v1667_v55 = vadd.f32 %v1666_v18, %v1648_v51 }
 0x111   :  { %v1651_v54 = vadd.f32 %v1650_v24, %v1632_v46  ;;  %v1686_v60 = vadd.f32 %v1685_v20, %v1667_v55  ;;  %v2666_v20 = vunpack.c.h.bf16 %v2677_v10 }
 0x116   :  { %v1669_v34 = vpop.f32.mrf.mxu2  ;;  %v1633_v37 = vpop.f32.mrf.mxu0 }
 0x117   :  { %v1688_v31 = vpop.f32.mrf.mxu3  ;;  %v1652_v38 = vpop.f32.mrf.mxu1  ;;  %v1670_v57 = vadd.f32 %v1669_v34, %v1651_v54  ;;  %v1634_v58 = vadd.f32 %v1633_v37, %v1615_v53 }
 0x119   :  { %v1689_v0 = vadd.f32 %v1688_v31, %v1670_v57  ;;  %v1653_v1 = vadd.f32 %v1652_v38, %v1634_v58 }
 0x11e   :  { %v1671_v47 = vpop.f32.mrf.mxu2  ;;  %v1702_v49 = vpop.f32.mrf.mxu0 }
 0x11f   :  { %v1690_v48 = vpop.f32.mrf.mxu3  ;;  %v1721_v52 = vpop.f32.mrf.mxu1  ;;  %v1703_v56 = vadd.f32 %v1702_v49, %v1684_v50  ;;  %v1672_v6 = vadd.f32 %v1671_v47, %v1653_v1 }
 0x121   :  { %v1722_v61 = vadd.f32 %v1721_v52, %v1703_v56  ;;  %v1691_v13 = vadd.f32 %v1690_v48, %v1672_v6 }
 0x123   :  { %v1739_v9 = vadd.f32 %v2661_v62, %v1722_v61 }
 0x125   :  { %v1743_v16 = vmax.f32 %v1739_v9, 0.0 }
 0x126   :  { %v1707_v63 = vpop.f32.mrf.mxu2  ;;  %v1704_v3 = vpop.f32.mrf.mxu0 }
 0x127   :  { %v1726_v2 = vpop.f32.mrf.mxu3  ;;  %v1705_v4 = vadd.f32 %v1704_v3, %v1686_v60  ;;  %v1708_v7 = vadd.f32 %v1707_v63, %v1689_v0  ;;  %v1723_v8 = vpop.f32.mrf.mxu1 }
 0x129   :  { %v1724_v11 = vadd.f32 %v1723_v8, %v1705_v4  ;;  %v1727_v14 = vadd.f32 %v1726_v2, %v1708_v7 }
 0x12b   :  { %v1740_v12 = vadd.f32 %v2662_v5, %v1724_v11  ;;  %v1741_v23 = vadd.f32 %v2665_v15, %v1727_v14 }
 0x12d   :  { %v1744_v17 = vmax.f32 %v1740_v12, 0.0  ;;  %v1745_v26 = vmax.f32 %v1741_v23, 0.0 }
 0x12e   :  { %v1709_v18 = vpop.f32.mrf.mxu2 }
 0x12f   :  { %v1710_v19 = vadd.f32 %v1709_v18, %v1691_v13  ;;  %v2670_v21 = vpack.c.bf16 %v1744_v17, %v1743_v16  ;;  %v1728_v22 = vpop.f32.mrf.mxu3 }
 0x131   :  { %v1729_v24 = vadd.f32 %v1728_v22, %v1710_v19  ;;  %2671 = vst [vmem:[%s3388_s4] sm:$0xff] %v2670_v21  }
 0x133   :  { %v1742_v25 = vadd.f32 %v2666_v20, %v1729_v24 }
 0x135   :  { %v1746_v27 = vmax.f32 %v1742_v25, 0.0 }
 0x137   :  { %v2675_v28 = vpack.c.bf16 %v1746_v27, %v1745_v26 }
 0x139   :  { %2678 = vst [vmem:[%s3388_s4 + $0x8] sm:$0xff] %v2675_v28  }

// kernel: psa_relit_pcnet_forward.35
= control target key start
LH: loop header
LB: loop body
LE: loop exit
PB: predicated region body
PF: predicated region fallthrough
CT: control target
= control target key end

     0   :  { %vm1744_vm0 = vcmask 23552   ;;  %s3836_s1 = inlined_call_operand.vmem [shape: bf16[384,3], index: 1, kind: input, shape index: {}]   ;;  %s3837_s2 = inlined_call_operand.vmem [shape: f32[1,3], index: 2, kind: input, shape index: {}]   ;;  %s3838_s0 = inlined_call_operand.vmem [shape: bf16[512,384], index: 0, kind: input, shape index: {}]   ;;  %s3839_s3 = inlined_call_operand.vmem [shape: bf16[512,3], index: 3, kind: input, shape index: {}]   ;;  %s3840_s4 = inlined_call_operand.vmem [shape: f32[512,3], index: 4, kind: output, shape index: {}]  }
   0x1   :  { %v2396_v0 = vld [vmem:[%s3836_s1 + $0x38] sm:$0xff]  ;;  %v2395_v3 = vld [vmem:[%s3836_s1 + $0x30] sm:$0xff]  ;;  %v2394_v6 = vld [vmem:[%s3836_s1 + $0x28] sm:$0xff] }
   0x2   :  { %v2630_v1 = vld [vmem:[%s3836_s1 + $0x78] sm:$0xff]  ;;  %853 = vmatpush.bf16.msra.mxu0 %v2396_v0  ;;  %2572 = vmatpush.bf16.msra.mxu3 %v2396_v0  ;;  %v2645_v4 = vld [vmem:[%s3836_s1 + $0x70] sm:$0xff]  ;;  %v2402_v7 = vld [vmem:[%s3836_s1 + $0x68] sm:$0xff] }
   0x3   :  { %v2635_v2 = vld [vmem:[%s3836_s1 + $0xb8] sm:$0xff]  ;;  %1022 = vmatpush.bf16.msra.mxu1 %v2630_v1  ;;  %v2650_v5 = vld [vmem:[%s3836_s1 + $0xb0] sm:$0xff]  ;;  %v2663_v8 = vld [vmem:[%s3836_s1 + $0xa8] sm:$0xff] }
   0x4   :  { %1191 = vmatpush.bf16.msra.mxu2 %v2635_v2  ;;  %v2393_v9 = vld [vmem:[%s3836_s1 + $0x20] sm:$0xff]  ;;  %v2392_v12 = vld [vmem:[%s3836_s1 + $0x18] sm:$0xff]  ;;  %v2391_v15 = vld [vmem:[%s3836_s1 + $0x10] sm:$0xff] }
   0x5   :  { %v2401_v10 = vld [vmem:[%s3836_s1 + $0x60] sm:$0xff]  ;;  %v2400_v13 = vld [vmem:[%s3836_s1 + $0x58] sm:$0xff]  ;;  %v2399_v16 = vld [vmem:[%s3836_s1 + $0x50] sm:$0xff] }
   0x6   :  { %854 = vmatpush.bf16.msra.mxu0 %v2395_v3  ;;  %2573 = vmatpush.bf16.msra.mxu3 %v2395_v3  ;;  %v2675_v11 = vld [vmem:[%s3836_s1 + $0xa0] sm:$0xff]  ;;  %v2687_v14 = vld [vmem:[%s3836_s1 + $0x98] sm:$0xff]  ;;  %v2699_v17 = vld [vmem:[%s3836_s1 + $0x90] sm:$0xff] }
   0x7   :  { %1023 = vmatpush.bf16.msra.mxu1 %v2645_v4  ;;  %v2390_v18 = vld [vmem:[%s3836_s1 + $0x8] sm:$0xff]  ;;  %v2389_v21 = vld [vmem:[%s3836_s1] sm:$0xff]  ;;  %v1817_v29 = vld [vmem:[%s3838_s0 + $0xc] sm:$0xf0] }
   0x8   :  { %1192 = vmatpush.bf16.msra.mxu2 %v2650_v5  ;;  %v2398_v19 = vld [vmem:[%s3836_s1 + $0x48] sm:$0xff]  ;;  %v2397_v22 = vld [vmem:[%s3836_s1 + $0x40] sm:$0xff]  ;;  %v2295_v31 = vld [vmem:[%s3838_s0 + $0x10] sm:$0xf0] }
   0x9   :  { %v2711_v20 = vld [vmem:[%s3836_s1 + $0x88] sm:$0xff]  ;;  %v2722_v23 = vld [vmem:[%s3836_s1 + $0x80] sm:$0xff]  ;;  %v1827_v36 = vld [vmem:[%s3838_s0 + $0x18] sm:$0xf] }
   0xa   :  { %855 = vmatpush.bf16.msra.mxu0 %v2394_v6  ;;  %2574 = vmatpush.bf16.msra.mxu3 %v2394_v6  ;;  %v1815_v24 = vld [vmem:[%s3838_s0] sm:$0xf]  ;;  %v2294_v25 = vld [vmem:[%s3838_s0 + $0x8] sm:$0xf0]  ;;  %v2293_v28 = vld [vmem:[%s3838_s0 + $0x4] sm:$0xf] }
   0xb   :  { %1024 = vmatpush.bf16.msra.mxu1 %v2402_v7  ;;  %v2103_v26 = vld [vmem:[%s3838_s0 + $0x240] sm:$0xf]  ;;  %v2366_v27 = vld [vmem:[%s3838_s0 + $0x248] sm:$0xf0]  ;;  %v1823_v30 = vld [vmem:[%s3838_s0 + $0x8] sm:$0xf]  ;;  %v1816_v32 = vor.u32 %v2294_v25, %v1815_v24  ;;  %v1820_v34 = vor.u32 %v2293_v28, %v1817_v29 }
   0xc   :  { %1193 = vmatpush.bf16.msra.mxu2 %v2663_v8  ;;  %v2104_v33 = vor.u32 %v2366_v27, %v2103_v26  ;;  %v1824_v35 = vor.u32 %v2295_v31, %v1823_v30  ;;  %v2297_v37 = vld [vmem:[%s3838_s0 + $0x20] sm:$0xf0]  ;;  %v2115_v38 = vld [vmem:[%s3838_s0 + $0x258] sm:$0xf]  ;;  %v2296_v40 = vld [vmem:[%s3838_s0 + $0x1c] sm:$0xf] }
   0xd   :  { %v2369_v39 = vld [vmem:[%s3838_s0 + $0x260] sm:$0xf0]  ;;  %v1829_v41 = vld [vmem:[%s3838_s0 + $0x24] sm:$0xf0]  ;;  %v1835_v42 = vld [vmem:[%s3838_s0 + $0x20] sm:$0xf]  ;;  %v1828_v44 = vor.u32 %v2297_v37, %v1827_v36 }
   0xe   :  { %856 = vmatpush.bf16.msra.mxu0 %v2393_v9  ;;  %2575 = vmatpush.bf16.msra.mxu3 %v2393_v9  ;;  %v2298_v43 = vld [vmem:[%s3838_s0 + $0x28] sm:$0xf0]  ;;  %v2116_v45 = vor.u32 %v2369_v39, %v2115_v38  ;;  %v1832_v46 = vor.u32 %v2296_v40, %v1829_v41  ;;  %v1839_v48 = vld [vmem:[%s3838_s0 + $0x30] sm:$0xf]  ;;  %v2300_v49 = vld [vmem:[%s3838_s0 + $0x38] sm:$0xf0] }
   0xf   :  { %1025 = vmatpush.bf16.msra.mxu1 %v2401_v10  ;;  %v1836_v47 = vor.u32 %v2298_v43, %v1835_v42  ;;  %v2127_v50 = vld [vmem:[%s3838_s0 + $0x270] sm:$0xf]  ;;  %v2372_v51 = vld [vmem:[%s3838_s0 + $0x278] sm:$0xf0]  ;;  %v2299_v52 = vld [vmem:[%s3838_s0 + $0x34] sm:$0xf]  ;;  %v1840_v56 = vor.u32 %v2300_v49, %v1839_v48 }
  0x10   :  { %1194 = vmatpush.bf16.msra.mxu2 %v2675_v11  ;;  %v1841_v53 = vld [vmem:[%s3838_s0 + $0x3c] sm:$0xf0]  ;;  %v1847_v54 = vld [vmem:[%s3838_s0 + $0x38] sm:$0xf]  ;;  %v2301_v55 = vld [vmem:[%s3838_s0 + $0x40] sm:$0xf0]  ;;  %v2128_v57 = vor.u32 %v2372_v51, %v2127_v50 }
  0x11   :  { %v1844_v58 = vor.u32 %v2299_v52, %v1841_v53  ;;  %v1848_v59 = vor.u32 %v2301_v55, %v1847_v54  ;;  %v1851_v60 = vld [vmem:[%s3838_s0 + $0x48] sm:$0xf]  ;;  %v2303_v61 = vld [vmem:[%s3838_s0 + $0x50] sm:$0xf0]  ;;  %v2302_v0 = vld [vmem:[%s3838_s0 + $0x4c] sm:$0xf] }
  0x12   :  { %857 = vmatpush.bf16.msra.mxu0 %v2392_v12  ;;  %2576 = vmatpush.bf16.msra.mxu3 %v2392_v12  ;;  %v2139_v62 = vld [vmem:[%s3838_s0 + $0x288] sm:$0xf]  ;;  %v2375_v63 = vld [vmem:[%s3838_s0 + $0x290] sm:$0xf0]  ;;  %v2304_v3 = vld [vmem:[%s3838_s0 + $0x58] sm:$0xf0] }
  0x13   :  { %1026 = vmatpush.bf16.msra.mxu1 %v2400_v13  ;;  %v2306_v9 = vld [vmem:[%s3838_s0 + $0x68] sm:$0xf0]  ;;  %v2305_v12 = vld [vmem:[%s3838_s0 + $0x64] sm:$0xf]  ;;  %v2308_v24 = vld [vmem:[%s3838_s0 + $0x7c] sm:$0xf] }
  0x14   :  { %1195 = vmatpush.bf16.msra.mxu2 %v2687_v14  ;;  %v1877_v25 = vld [vmem:[%s3838_s0 + $0x84] sm:$0xf0]  ;;  %v1883_v26 = vld [vmem:[%s3838_s0 + $0x80] sm:$0xf]  ;;  %v2310_v27 = vld [vmem:[%s3838_s0 + $0x88] sm:$0xf0] }
  0x15   :  { %v1880_v30 = vor.u32 %v2308_v24, %v1877_v25  ;;  %v1884_v31 = vor.u32 %v2310_v27, %v1883_v26  ;;  %v2311_v36 = vld [vmem:[%s3838_s0 + $0x94] sm:$0xf]  ;;  %v1889_v37 = vld [vmem:[%s3838_s0 + $0x9c] sm:$0xf0]  ;;  %v1895_v38 = vld [vmem:[%s3838_s0 + $0x98] sm:$0xf] }
  0x16   :  { %858 = vmatpush.bf16.msra.mxu0 %v2391_v15  ;;  %2577 = vmatpush.bf16.msra.mxu3 %v2391_v15  ;;  %v2307_v15 = vld [vmem:[%s3838_s0 + $0x70] sm:$0xf0]  ;;  %v2313_v39 = vld [vmem:[%s3838_s0 + $0xa0] sm:$0xf0]  ;;  %v1892_v42 = vor.u32 %v2311_v36, %v1889_v37  ;;  %v2314_v48 = vld [vmem:[%s3838_s0 + $0xac] sm:$0xf] }
  0x17   :  { %1027 = vmatpush.bf16.msra.mxu1 %v2399_v16  ;;  %v1896_v43 = vor.u32 %v2313_v39, %v1895_v38  ;;  %v1901_v49 = vld [vmem:[%s3838_s0 + $0xb4] sm:$0xf0]  ;;  %v1907_v50 = vld [vmem:[%s3838_s0 + $0xb0] sm:$0xf]  ;;  %v2316_v51 = vld [vmem:[%s3838_s0 + $0xb8] sm:$0xf0] }
  0x18   :  { %1196 = vmatpush.bf16.msra.mxu2 %v2699_v17  ;;  %v1904_v54 = vor.u32 %v2314_v48, %v1901_v49  ;;  %v1908_v55 = vor.u32 %v2316_v51, %v1907_v50  ;;  %v1925_v24 = vld [vmem:[%s3838_s0 + $0xe4] sm:$0xf0]  ;;  %v1931_v25 = vld [vmem:[%s3838_s0 + $0xe0] sm:$0xf]  ;;  %v2322_v26 = vld [vmem:[%s3838_s0 + $0xe8] sm:$0xf0] }
  0x19   :  { %v1932_v38 = vor.u32 %v2322_v26, %v1931_v25 }
  0x1a   :  { %859 = vmatpush.bf16.msra.mxu0 %v2390_v18  ;;  %2578 = vmatpush.bf16.msra.mxu3 %v2390_v18 }
  0x1b   :  { %1028 = vmatpush.bf16.msra.mxu1 %v2398_v19 }
  0x1c   :  { %1197 = vmatpush.bf16.msra.mxu2 %v2711_v20 }
  0x1e   :  { %860 = vmatpush.bf16.msra.mxu0 %v2389_v21  ;;  %2579 = vmatpush.bf16.msra.mxu3 %v2389_v21  ;;  %v2309_v21 = vld [vmem:[%s3838_s0 + $0x80] sm:$0xf0] }
  0x1f   :  { %1029 = vmatpush.bf16.msra.mxu1 %v2397_v22 }
  0x20   :  { %1198 = vmatpush.bf16.msra.mxu2 %v2722_v23 }
  0x21   :  { %861 = vmatmul.bf16.vlgmr.msra.gmra.mxu0 %v1816_v32  ;;  %981 = vmatmul.bf16.vlgmr.msra.gmra.mxu3 %v2104_v33  ;;  %v1887_v32 = vld [vmem:[%s3838_s0 + $0x90] sm:$0xf]  ;;  %v2312_v33 = vld [vmem:[%s3838_s0 + $0x98] sm:$0xf0] }
  0x22   :  { %2580 = vmatpush.bf16.msrb.mxu3 %v2630_v1  ;;  %1030 = vmatmul.bf16.vlgmr.msra.gmra.mxu1 %v1820_v34  ;;  %v1853_v1 = vld [vmem:[%s3838_s0 + $0x54] sm:$0xf0]  ;;  %v2175_v34 = vld [vmem:[%s3838_s0 + $0x2d0] sm:$0xf]  ;;  %v1888_v40 = vor.u32 %v2312_v33, %v1887_v32 }
  0x23   :  { %1199 = vmatmul.bf16.vlgmr.msra.gmra.mxu2 %v1824_v35  ;;  %v1856_v6 = vor.u32 %v2302_v0, %v1853_v1  ;;  %v2384_v35 = vld [vmem:[%s3838_s0 + $0x2d8] sm:$0xf0]  ;;  %v2319_v0 = vld [vmem:[%s3838_s0 + $0xd0] sm:$0xf0] }
  0x24   :  { %v2176_v41 = vor.u32 %v2384_v35, %v2175_v34 }
  0x26   :  { %2581 = vmatpush.bf16.msrb.mxu3 %v2645_v4  ;;  %v1852_v4 = vor.u32 %v2303_v61, %v1851_v60  ;;  %v2365_v60 = vld [vmem:[%s3838_s0 + $0x244] sm:$0xf]  ;;  %v2105_v61 = vld [vmem:[%s3838_s0 + $0x24c] sm:$0xf0] }
  0x2a   :  { %2582 = vmatpush.bf16.msrb.mxu3 %v2402_v7 }
  0x2e   :  { %2583 = vmatpush.bf16.msrb.mxu3 %v2401_v10  ;;  %v2151_v10 = vld [vmem:[%s3838_s0 + $0x2a0] sm:$0xf] }
  0x31   :  { %866 = vmatmul.bf16.gmra.mxu0 %v1828_v44  ;;  %986 = vmatmul.bf16.gmra.mxu3 %v2116_v45  ;;  %v1899_v44 = vld [vmem:[%s3838_s0 + $0xa8] sm:$0xf]  ;;  %v2315_v45 = vld [vmem:[%s3838_s0 + $0xb0] sm:$0xf0] }
  0x32   :  { %2584 = vmatpush.bf16.msrb.mxu3 %v2400_v13  ;;  %1035 = vmatmul.bf16.gmra.mxu1 %v1832_v46  ;;  %v1865_v13 = vld [vmem:[%s3838_s0 + $0x6c] sm:$0xf0]  ;;  %v2187_v46 = vld [vmem:[%s3838_s0 + $0x2e8] sm:$0xf]  ;;  %v1900_v52 = vor.u32 %v2315_v45, %v1899_v44 }
  0x33   :  { %1204 = vmatmul.bf16.gmra.mxu2 %v1836_v47  ;;  %v1868_v18 = vor.u32 %v2305_v12, %v1865_v13  ;;  %v2387_v47 = vld [vmem:[%s3838_s0 + $0x2f0] sm:$0xf0] }
  0x34   :  { %v2188_v53 = vor.u32 %v2387_v47, %v2187_v46 }
  0x36   :  { %2585 = vmatpush.bf16.msrb.mxu3 %v2399_v16 }
  0x3a   :  { %2586 = vmatpush.bf16.msrb.mxu3 %v2398_v19 }
  0x3e   :  { %2587 = vmatpush.bf16.msrb.mxu3 %v2397_v22  ;;  %v2163_v22 = vld [vmem:[%s3838_s0 + $0x2b8] sm:$0xf] }
  0x41   :  { %871 = vmatmul.bf16.gmra.mxu0 %v1840_v56  ;;  %991 = vmatmul.bf16.gmra.mxu3 %v2128_v57  ;;  %v2931_v56 = vld [vmem:[%s3837_s2] ss:$0 sm:$0xff] }
  0x42   :  { %2588 = vmatpush.bf16.msra.mxu3 %v2635_v2  ;;  %1040 = vmatmul.bf16.gmra.mxu1 %v1844_v58  ;;  %v1859_v2 = vld [vmem:[%s3838_s0 + $0x50] sm:$0xf]  ;;  %v1911_v57 = vld [vmem:[%s3838_s0 + $0xc0] sm:$0xf]  ;;  %v2318_v58 = vld [vmem:[%s3838_s0 + $0xc8] sm:$0xf0] }
  0x43   :  { %1209 = vmatmul.bf16.gmra.mxu2 %v1848_v59  ;;  %v1860_v7 = vor.u32 %v2304_v3, %v1859_v2  ;;  %v2317_v59 = vld [vmem:[%s3838_s0 + $0xc4] sm:$0xf]  ;;  %v1912_v1 = vor.u32 %v2318_v58, %v1911_v57  ;;  %v2108_v2 = vor.u32 %v2365_v60, %v2105_v61  ;;  %v2324_v57 = vld [vmem:[%s3838_s0 + $0xf8] sm:$0xf0]  ;;  %v2323_v58 = vld [vmem:[%s3838_s0 + $0xf4] sm:$0xf] }
  0x44   :  { %v2371_v60 = vld [vmem:[%s3838_s0 + $0x274] sm:$0xf]  ;;  %v2129_v61 = vld [vmem:[%s3838_s0 + $0x27c] sm:$0xf0] }
  0x46   :  { %2589 = vmatpush.bf16.msra.mxu3 %v2650_v5  ;;  %v2140_v5 = vor.u32 %v2375_v63, %v2139_v62  ;;  %v1913_v62 = vld [vmem:[%s3838_s0 + $0xcc] sm:$0xf0]  ;;  %v1919_v63 = vld [vmem:[%s3838_s0 + $0xc8] sm:$0xf] }
  0x4a   :  { %2590 = vmatpush.bf16.msra.mxu3 %v2663_v8  ;;  %v1863_v8 = vld [vmem:[%s3838_s0 + $0x60] sm:$0xf] }
  0x4b   :  { %v1864_v16 = vor.u32 %v2306_v9, %v1863_v8  ;;  %v2414_v8 = vld [vmem:[%s3839_s3] sm:$0xff]  }
  0x4e   :  { %2591 = vmatpush.bf16.msra.mxu3 %v2675_v11  ;;  %v2378_v11 = vld [vmem:[%s3838_s0 + $0x2a8] sm:$0xf0] }
  0x51   :  { %876 = vmatmul.bf16.gmra.mxu0 %v1852_v4  ;;  %996 = vmatmul.bf16.gmra.mxu3 %v2140_v5  ;;  %v1916_v4 = vor.u32 %v2317_v59, %v1913_v62  ;;  %v1920_v5 = vor.u32 %v2319_v0, %v1919_v63  ;;  %v1937_v62 = vld [vmem:[%s3838_s0 + $0xfc] sm:$0xf0]  ;;  %v1943_v63 = vld [vmem:[%s3838_s0 + $0xf8] sm:$0xf]  ;;  %v2325_v0 = vld [vmem:[%s3838_s0 + $0x100] sm:$0xf0] }
  0x52   :  { %2592 = vmatpush.bf16.msra.mxu3 %v2687_v14  ;;  %1045 = vmatmul.bf16.gmra.mxu1 %v1856_v6  ;;  %v1871_v14 = vld [vmem:[%s3838_s0 + $0x68] sm:$0xf] }
  0x53   :  { %1214 = vmatmul.bf16.gmra.mxu2 %v1860_v7  ;;  %v1872_v19 = vor.u32 %v2307_v15, %v1871_v14 }
  0x56   :  { %2593 = vmatpush.bf16.msra.mxu3 %v2699_v17  ;;  %v2152_v17 = vor.u32 %v2378_v11, %v2151_v10  ;;  %v2415_v11 = vunpack.c.l.bf16 %v2414_v8 }
  0x5a   :  { %2594 = vmatpush.bf16.msra.mxu3 %v2711_v20  ;;  %v1875_v20 = vld [vmem:[%s3838_s0 + $0x78] sm:$0xf] }
  0x5b   :  { %v1876_v28 = vor.u32 %v2309_v21, %v1875_v20  ;;  %v2320_v20 = vld [vmem:[%s3838_s0 + $0xdc] sm:$0xf] }
  0x5c   :  { %v1928_v37 = vor.u32 %v2320_v20, %v1925_v24 }
  0x5e   :  { %2595 = vmatpush.bf16.msra.mxu3 %v2722_v23  ;;  %v2381_v23 = vld [vmem:[%s3838_s0 + $0x2c0] sm:$0xf0] }
  0x5f   :  { %v2164_v29 = vor.u32 %v2381_v23, %v2163_v22  ;;  %v2368_v22 = vld [vmem:[%s3838_s0 + $0x25c] sm:$0xf]  ;;  %v2117_v23 = vld [vmem:[%s3838_s0 + $0x264] sm:$0xf0] }
  0x60   :  { %v2120_v33 = vor.u32 %v2368_v22, %v2117_v23 }
  0x61   :  { %881 = vmatmul.bf16.gmra.mxu0 %v1864_v16  ;;  %1001 = vmatmul.bf16.gmra.mxu3 %v2152_v17 }
  0x62   :  { %1050 = vmatmul.bf16.gmra.mxu1 %v1868_v18  ;;  %v1923_v18 = vld [vmem:[%s3838_s0 + $0xd8] sm:$0xf] }
  0x63   :  { %1219 = vmatmul.bf16.gmra.mxu2 %v1872_v19  ;;  %v2321_v19 = vld [vmem:[%s3838_s0 + $0xe0] sm:$0xf0] }
  0x64   :  { %v1924_v32 = vor.u32 %v2321_v19, %v1923_v18 }
  0x71   :  { %886 = vmatmul.bf16.gmra.mxu0 %v1876_v28  ;;  %1006 = vmatmul.bf16.gmra.mxu3 %v2164_v29 }
  0x72   :  { %1055 = vmatmul.bf16.gmra.mxu1 %v1880_v30  ;;  %v2416_v30 = vunpack.c.h.bf16 %v2414_v8 }
  0x73   :  { %1224 = vmatmul.bf16.gmra.mxu2 %v1884_v31 }
  0x81   :  { %891 = vmatmul.bf16.gmra.mxu0 %v1888_v40  ;;  %1011 = vmatmul.bf16.gmra.mxu3 %v2176_v41 }
  0x82   :  { %1060 = vmatmul.bf16.gmra.mxu1 %v1892_v42  ;;  %v2541_v42 = vld [vmem:[%s3839_s3 + $0x8] sm:$0xff]  }
  0x83   :  { %1229 = vmatmul.bf16.gmra.mxu2 %v1896_v43  ;;  %v2419_v47 = vunpack.c.l.bf16 %v2541_v42 }
  0x91   :  { %896 = vmatmul.bf16.gmra.mxu0 %v1900_v52  ;;  %1016 = vmatmul.bf16.gmra.mxu3 %v2188_v53 }
  0x92   :  { %1065 = vmatmul.bf16.gmra.mxu1 %v1904_v54 }
  0x93   :  { %1234 = vmatmul.bf16.gmra.mxu2 %v1908_v55  ;;  %v1935_v55 = vld [vmem:[%s3838_s0 + $0xf0] sm:$0xf] }
  0x9e   :  { %v862_v3 = vpop.f32.mrf.mxu0 }
  0x9f   :  { %v863_v6 = vadd.f32 %v2931_v56, %v862_v3  ;;  %v1031_v7 = vpop.f32.mrf.mxu1 }
  0xa1   :  { %901 = vmatmul.bf16.gmra.mxu0 %v1912_v1  ;;  %1150 = vmatmul.bf16.vlgmr.msrb.gmra.mxu3 %v2108_v2  ;;  %v1032_v9 = vadd.f32 %v1031_v7, %v863_v6  ;;  %v1936_v6 = vor.u32 %v2324_v57, %v1935_v55  ;;  %v2132_v7 = vor.u32 %v2371_v60, %v2129_v61  ;;  %v2543_v57 = vld [vmem:[%s3839_s3 + $0x18] sm:$0xff]  }
  0xa2   :  { %1070 = vmatmul.bf16.gmra.mxu1 %v1916_v4  ;;  %v2420_v4 = vunpack.c.h.bf16 %v2541_v42 }
  0xa3   :  { %1239 = vmatmul.bf16.gmra.mxu2 %v1920_v5 }
  0xa4   :  { %v2961_v10 = vpop.f32.mrf.mxu3 }
  0xa6   :  { %v1200_v12 = vpop.f32.mrf.mxu2  ;;  %v864_v14 = vpop.f32.mrf.mxu0 }
  0xa7   :  { %v1201_v13 = vadd.f32 %v1200_v12, %v1032_v9  ;;  %v1033_v15 = vpop.f32.mrf.mxu1  ;;  %v865_v17 = vadd.f32 %v2931_v56, %v864_v14  ;;  %v1940_v12 = vor.u32 %v2323_v58, %v1937_v62  ;;  %v2427_v62 = vunpack.c.l.bf16 %v2543_v57 }
  0xa9   :  { %v1488_v16 = vadd.f32 %v2415_v11, %v1201_v13  ;;  %v1034_v28 = vadd.f32 %v1033_v15, %v865_v17  ;;  %v1944_v13 = vor.u32 %v2325_v0, %v1943_v63  ;;  %v2542_v17 = vld [vmem:[%s3839_s3 + $0x10] sm:$0xff]  }
  0xaa   :  { %v2423_v22 = vunpack.c.l.bf16 %v2542_v17 }
  0xab   :  { %v1552_v21 = vmax.f32 %v1488_v16, 0.0 }
  0xac   :  { %v2988_v29 = vpop.f32.mrf.mxu3 }
  0xad   :  { %v1616_v27 = vmax.f32 %v1552_v21, 0.0 }
  0xae   :  { %v1202_v31 = vpop.f32.mrf.mxu2  ;;  %v867_v36 = vpop.f32.mrf.mxu0 }
  0xaf   :  { %v1680_v34 = vmin.f32 %v1616_v27, 1.0  ;;  %v1203_v35 = vadd.f32 %v1202_v31, %v1034_v28  ;;  %v868_v39 = vadd.f32 %v2931_v56, %v867_v36  ;;  %v1036_v40 = vpop.f32.mrf.mxu1  ;;  %v1947_v31 = vld [vmem:[%s3838_s0 + $0x108] sm:$0xf]  ;;  %v2141_v36 = vld [vmem:[%s3838_s0 + $0x294] sm:$0xf0] }
  0xb1   :  { %1745 = vst.msk [vmem:[%s3840_s4] sm:$0xff] %vm1744_vm0, %v1680_v34  ;;  %v1489_v41 = vadd.f32 %v2416_v30, %v1203_v35  ;;  %906 = vmatmul.bf16.gmra.mxu0 %v1924_v32  ;;  %1155 = vmatmul.bf16.gmra.mxu3 %v2120_v33  ;;  %v1037_v44 = vadd.f32 %v1036_v40, %v868_v39  ;;  %v2327_v32 = vld [vmem:[%s3838_s0 + $0x110] sm:$0xf0]  ;;  %v2326_v33 = vld [vmem:[%s3838_s0 + $0x10c] sm:$0xf] }
  0xb2   :  { %1075 = vmatmul.bf16.gmra.mxu1 %v1928_v37  ;;  %v2374_v35 = vld [vmem:[%s3838_s0 + $0x28c] sm:$0xf]  ;;  %v1949_v37 = vld [vmem:[%s3838_s0 + $0x114] sm:$0xf0]  ;;  %v2328_v39 = vld [vmem:[%s3838_s0 + $0x118] sm:$0xf0] }
  0xb3   :  { %v1553_v43 = vmax.f32 %v1489_v41, 0.0  ;;  %1244 = vmatmul.bf16.gmra.mxu2 %v1932_v38  ;;  %v1955_v38 = vld [vmem:[%s3838_s0 + $0x110] sm:$0xf] }
  0xb4   :  { %v2998_v46 = vpop.f32.mrf.mxu3 }
  0xb5   :  { %v1617_v45 = vmax.f32 %v1553_v43, 0.0  ;;  %v2424_v43 = vunpack.c.h.bf16 %v2542_v17 }
  0xb6   :  { %v1205_v48 = vpop.f32.mrf.mxu2  ;;  %v869_v51 = vpop.f32.mrf.mxu0 }
  0xb7   :  { %v1681_v49 = vmin.f32 %v1617_v45, 1.0  ;;  %v1206_v50 = vadd.f32 %v1205_v48, %v1037_v44  ;;  %v1038_v52 = vpop.f32.mrf.mxu1  ;;  %v870_v54 = vadd.f32 %v2931_v56, %v869_v51  ;;  %v1948_v45 = vor.u32 %v2327_v32, %v1947_v31 }
  0xb8   :  { %v1952_v51 = vor.u32 %v2326_v33, %v1949_v37 }
  0xb9   :  { %1746 = vst.msk [vmem:[%s3840_s4 + $0x8] sm:$0xff] %vm1744_vm0, %v1681_v49  ;;  %v1490_v53 = vadd.f32 %v2419_v47, %v1206_v50  ;;  %v1039_v2 = vadd.f32 %v1038_v52, %v870_v54  ;;  %v2144_v47 = vor.u32 %v2374_v35, %v2141_v36  ;;  %v1956_v52 = vor.u32 %v2328_v39, %v1955_v38 }
  0xbb   :  { %v1554_v59 = vmax.f32 %v1490_v53, 0.0 }
  0xbc   :  { %v3029_v3 = vpop.f32.mrf.mxu3 }
  0xbd   :  { %v1618_v1 = vmax.f32 %v1554_v59, 0.0 }
  0xbe   :  { %v1207_v5 = vpop.f32.mrf.mxu2  ;;  %v872_v11 = vpop.f32.mrf.mxu0 }
  0xbf   :  { %v1682_v8 = vmin.f32 %v1618_v1, 1.0  ;;  %v1208_v9 = vadd.f32 %v1207_v5, %v1039_v2  ;;  %v873_v14 = vadd.f32 %v2931_v56, %v872_v11  ;;  %v1041_v15 = vpop.f32.mrf.mxu1 }
  0xc1   :  { %1747 = vst.msk [vmem:[%s3840_s4 + $0x10] sm:$0xff] %vm1744_vm0, %v1682_v8  ;;  %v1491_v16 = vadd.f32 %v2420_v4, %v1208_v9  ;;  %911 = vmatmul.bf16.gmra.mxu0 %v1936_v6  ;;  %1160 = vmatmul.bf16.gmra.mxu3 %v2132_v7  ;;  %v1042_v19 = vadd.f32 %v1041_v15, %v873_v14  ;;  %v1959_v7 = vld [vmem:[%s3838_s0 + $0x120] sm:$0xf]  ;;  %v2330_v8 = vld [vmem:[%s3838_s0 + $0x128] sm:$0xf0] }
  0xc2   :  { %1080 = vmatmul.bf16.gmra.mxu1 %v1940_v12  ;;  %v2329_v9 = vld [vmem:[%s3838_s0 + $0x124] sm:$0xf]  ;;  %v1961_v14 = vld [vmem:[%s3838_s0 + $0x12c] sm:$0xf0]  ;;  %v1967_v15 = vld [vmem:[%s3838_s0 + $0x128] sm:$0xf] }
  0xc3   :  { %v1555_v18 = vmax.f32 %v1491_v16, 0.0  ;;  %1249 = vmatmul.bf16.gmra.mxu2 %v1944_v13  ;;  %v2377_v12 = vld [vmem:[%s3838_s0 + $0x2a4] sm:$0xf]  ;;  %v2153_v13 = vld [vmem:[%s3838_s0 + $0x2ac] sm:$0xf0] }
  0xc4   :  { %v3039_v21 = vpop.f32.mrf.mxu3  ;;  %v2331_v16 = vld [vmem:[%s3838_s0 + $0x130] sm:$0xf0] }
  0xc5   :  { %v1619_v20 = vmax.f32 %v1555_v18, 0.0 }
  0xc6   :  { %v1210_v23 = vpop.f32.mrf.mxu2  ;;  %v874_v26 = vpop.f32.mrf.mxu0 }
  0xc7   :  { %v1683_v24 = vmin.f32 %v1619_v20, 1.0  ;;  %v1211_v25 = vadd.f32 %v1210_v23, %v1042_v19  ;;  %v1043_v27 = vpop.f32.mrf.mxu1  ;;  %v875_v30 = vadd.f32 %v2931_v56, %v874_v26  ;;  %v2428_v20 = vunpack.c.h.bf16 %v2543_v57  ;;  %v1979_v57 = vld [vmem:[%s3838_s0 + $0x140] sm:$0xf] }
  0xc8   :  { %v1960_v23 = vor.u32 %v2330_v8, %v1959_v7 }
  0xc9   :  { %1748 = vst.msk [vmem:[%s3840_s4 + $0x18] sm:$0xff] %vm1744_vm0, %v1683_v24  ;;  %v1492_v28 = vadd.f32 %v2423_v22, %v1211_v25  ;;  %v1044_v41 = vadd.f32 %v1043_v27, %v875_v30  ;;  %v2156_v24 = vor.u32 %v2377_v12, %v2153_v13  ;;  %v1968_v30 = vor.u32 %v2331_v16, %v1967_v15  ;;  %v2545_v13 = vld [vmem:[%s3839_s3 + $0x28] sm:$0xff]  }
  0xcb   :  { %v1556_v34 = vmax.f32 %v1492_v28, 0.0  ;;  %v1964_v28 = vor.u32 %v2329_v9, %v1961_v14 }
  0xcc   :  { %v3070_v42 = vpop.f32.mrf.mxu3 }
  0xcd   :  { %v1620_v40 = vmax.f32 %v1556_v34, 0.0  ;;  %v2544_v34 = vld [vmem:[%s3839_s3 + $0x20] sm:$0xff]  }
  0xce   :  { %v1212_v44 = vpop.f32.mrf.mxu2  ;;  %v877_v50 = vpop.f32.mrf.mxu0  ;;  %v2431_v39 = vunpack.c.l.bf16 %v2544_v34 }
  0xcf   :  { %v1684_v48 = vmin.f32 %v1620_v40, 1.0  ;;  %v1213_v49 = vadd.f32 %v1212_v44, %v1044_v41  ;;  %v878_v53 = vadd.f32 %v2931_v56, %v877_v50  ;;  %v1046_v54 = vpop.f32.mrf.mxu1  ;;  %v2333_v50 = vld [vmem:[%s3838_s0 + $0x140] sm:$0xf0] }
  0xd1   :  { %1749 = vst.msk [vmem:[%s3840_s4 + $0x20] sm:$0xff] %vm1744_vm0, %v1684_v48  ;;  %v1493_v55 = vadd.f32 %v2424_v43, %v1213_v49  ;;  %916 = vmatmul.bf16.gmra.mxu0 %v1948_v45  ;;  %1165 = vmatmul.bf16.gmra.mxu3 %v2144_v47  ;;  %v1047_v59 = vadd.f32 %v1046_v54, %v878_v53  ;;  %v1971_v49 = vld [vmem:[%s3838_s0 + $0x138] sm:$0xf]  ;;  %v2380_v53 = vld [vmem:[%s3838_s0 + $0x2bc] sm:$0xf] }
  0xd2   :  { %1085 = vmatmul.bf16.gmra.mxu1 %v1952_v51  ;;  %v2332_v51 = vld [vmem:[%s3838_s0 + $0x13c] sm:$0xf]  ;;  %v2165_v54 = vld [vmem:[%s3838_s0 + $0x2c4] sm:$0xf0] }
  0xd3   :  { %v1557_v58 = vmax.f32 %v1493_v55, 0.0  ;;  %1254 = vmatmul.bf16.gmra.mxu2 %v1956_v52  ;;  %v1973_v55 = vld [vmem:[%s3838_s0 + $0x144] sm:$0xf0] }
  0xd4   :  { %v3080_v61 = vpop.f32.mrf.mxu3  ;;  %v1976_v7 = vor.u32 %v2332_v51, %v1973_v55 }
  0xd5   :  { %v1621_v60 = vmax.f32 %v1557_v58, 0.0  ;;  %v2334_v58 = vld [vmem:[%s3838_s0 + $0x148] sm:$0xf0] }
  0xd6   :  { %v1215_v63 = vpop.f32.mrf.mxu2  ;;  %v879_v2 = vpop.f32.mrf.mxu0  ;;  %v1980_v8 = vor.u32 %v2334_v58, %v1979_v57  ;;  %v2546_v57 = vld [vmem:[%s3839_s3 + $0x30] sm:$0xff]  }
  0xd7   :  { %v1685_v0 = vmin.f32 %v1621_v60, 1.0  ;;  %v1216_v1 = vadd.f32 %v1215_v63, %v1047_v59  ;;  %v1048_v4 = vpop.f32.mrf.mxu1  ;;  %v880_v6 = vadd.f32 %v2931_v56, %v879_v2  ;;  %v2432_v63 = vunpack.c.h.bf16 %v2544_v34  ;;  %v2177_v34 = vld [vmem:[%s3838_s0 + $0x2dc] sm:$0xf0] }
  0xd8   :  { %v2168_v2 = vor.u32 %v2380_v53, %v2165_v54 }
  0xd9   :  { %1750 = vst.msk [vmem:[%s3840_s4 + $0x28] sm:$0xff] %vm1744_vm0, %v1685_v0  ;;  %v1494_v5 = vadd.f32 %v2427_v62, %v1216_v1  ;;  %v1049_v18 = vadd.f32 %v1048_v4, %v880_v6  ;;  %v1972_v1 = vor.u32 %v2333_v50, %v1971_v49 }
  0xdb   :  { %v1558_v11 = vmax.f32 %v1494_v5, 0.0 }
  0xdc   :  { %v3111_v19 = vpop.f32.mrf.mxu3 }
  0xdd   :  { %v1622_v17 = vmax.f32 %v1558_v11, 0.0 }
  0xde   :  { %v1217_v22 = vpop.f32.mrf.mxu2  ;;  %v882_v27 = vpop.f32.mrf.mxu0 }
  0xdf   :  { %v1686_v25 = vmin.f32 %v1622_v17, 1.0  ;;  %v1218_v26 = vadd.f32 %v1217_v22, %v1049_v18  ;;  %v883_v31 = vadd.f32 %v2931_v56, %v882_v27  ;;  %v1051_v32 = vpop.f32.mrf.mxu1  ;;  %v2435_v18 = vunpack.c.l.bf16 %v2545_v13 }
  0xe1   :  { %1751 = vst.msk [vmem:[%s3840_s4 + $0x30] sm:$0xff] %vm1744_vm0, %v1686_v25  ;;  %v1495_v33 = vadd.f32 %v2428_v20, %v1218_v26  ;;  %921 = vmatmul.bf16.gmra.mxu0 %v1960_v23  ;;  %1170 = vmatmul.bf16.gmra.mxu3 %v2156_v24  ;;  %v1052_v36 = vadd.f32 %v1051_v32, %v883_v31  ;;  %v2335_v31 = vld [vmem:[%s3838_s0 + $0x154] sm:$0xf] }
  0xe2   :  { %1090 = vmatmul.bf16.gmra.mxu1 %v1964_v28  ;;  %v1983_v28 = vld [vmem:[%s3838_s0 + $0x150] sm:$0xf] }
  0xe3   :  { %v1559_v35 = vmax.f32 %v1495_v33, 0.0  ;;  %1259 = vmatmul.bf16.gmra.mxu2 %v1968_v30  ;;  %v2336_v30 = vld [vmem:[%s3838_s0 + $0x158] sm:$0xf0]  ;;  %v2383_v33 = vld [vmem:[%s3838_s0 + $0x2d4] sm:$0xf] }
  0xe4   :  { %v3121_v38 = vpop.f32.mrf.mxu3 }
  0xe5   :  { %v1623_v37 = vmax.f32 %v1559_v35, 0.0  ;;  %v1985_v35 = vld [vmem:[%s3838_s0 + $0x15c] sm:$0xf0] }
  0xe6   :  { %v1220_v40 = vpop.f32.mrf.mxu2  ;;  %v884_v44 = vpop.f32.mrf.mxu0  ;;  %v1988_v51 = vor.u32 %v2335_v31, %v1985_v35 }
  0xe7   :  { %v1687_v41 = vmin.f32 %v1623_v37, 1.0  ;;  %v1221_v43 = vadd.f32 %v1220_v40, %v1052_v36  ;;  %v1053_v45 = vpop.f32.mrf.mxu1  ;;  %v885_v48 = vadd.f32 %v2931_v56, %v884_v44  ;;  %v1991_v36 = vld [vmem:[%s3838_s0 + $0x158] sm:$0xf]  ;;  %v2337_v37 = vld [vmem:[%s3838_s0 + $0x160] sm:$0xf0] }
  0xe9   :  { %1752 = vst.msk [vmem:[%s3840_s4 + $0x38] sm:$0xff] %vm1744_vm0, %v1687_v41  ;;  %v1496_v47 = vadd.f32 %v2431_v39, %v1221_v43  ;;  %v1054_v60 = vadd.f32 %v1053_v45, %v885_v48  ;;  %v2436_v43 = vunpack.c.h.bf16 %v2545_v13  ;;  %v1984_v45 = vor.u32 %v2336_v30, %v1983_v28 }
  0xeb   :  { %v1560_v52 = vmax.f32 %v1496_v47, 0.0  ;;  %v2180_v47 = vor.u32 %v2383_v33, %v2177_v34 }
  0xec   :  { %v3152_v62 = vpop.f32.mrf.mxu3 }
  0xed   :  { %v1624_v59 = vmax.f32 %v1560_v52, 0.0  ;;  %v1992_v52 = vor.u32 %v2337_v37, %v1991_v36 }
  0xee   :  { %v1222_v0 = vpop.f32.mrf.mxu2  ;;  %v887_v6 = vpop.f32.mrf.mxu0 }
  0xef   :  { %v1688_v4 = vmin.f32 %v1624_v59, 1.0  ;;  %v1223_v5 = vadd.f32 %v1222_v0, %v1054_v60  ;;  %v888_v9 = vadd.f32 %v2931_v56, %v887_v6  ;;  %v1056_v11 = vpop.f32.mrf.mxu1  ;;  %v2439_v0 = vunpack.c.l.bf16 %v2546_v57 }
  0xf1   :  { %1753 = vst.msk [vmem:[%s3840_s4 + $0x40] sm:$0xff] %vm1744_vm0, %v1688_v4  ;;  %v1497_v12 = vadd.f32 %v2432_v63, %v1223_v5  ;;  %926 = vmatmul.bf16.gmra.mxu0 %v1972_v1  ;;  %1175 = vmatmul.bf16.gmra.mxu3 %v2168_v2  ;;  %v1057_v15 = vadd.f32 %v1056_v11, %v888_v9  ;;  %v1995_v9 = vld [vmem:[%s3838_s0 + $0x168] sm:$0xf]  ;;  %v2339_v11 = vld [vmem:[%s3838_s0 + $0x170] sm:$0xf0] }
  0xf2   :  { %1095 = vmatmul.bf16.gmra.mxu1 %v1976_v7 }
  0xf3   :  { %v1561_v14 = vmax.f32 %v1497_v12, 0.0  ;;  %1264 = vmatmul.bf16.gmra.mxu2 %v1980_v8  ;;  %v2338_v12 = vld [vmem:[%s3838_s0 + $0x16c] sm:$0xf] }
  0xf4   :  { %v3162_v17 = vpop.f32.mrf.mxu3 }
  0xf5   :  { %v1625_v16 = vmax.f32 %v1561_v14, 0.0  ;;  %v2386_v14 = vld [vmem:[%s3838_s0 + $0x2ec] sm:$0xf] }
  0xf6   :  { %v1225_v20 = vpop.f32.mrf.mxu2  ;;  %v889_v24 = vpop.f32.mrf.mxu0 }
  0xf7   :  { %v1689_v22 = vmin.f32 %v1625_v16, 1.0  ;;  %v1226_v23 = vadd.f32 %v1225_v20, %v1057_v15  ;;  %v1058_v25 = vpop.f32.mrf.mxu1  ;;  %v890_v27 = vadd.f32 %v2931_v56, %v889_v24  ;;  %v2189_v15 = vld [vmem:[%s3838_s0 + $0x2f4] sm:$0xf0]  ;;  %v2340_v20 = vld [vmem:[%s3838_s0 + $0x178] sm:$0xf0] }
  0xf8   :  { %v1997_v16 = vld [vmem:[%s3838_s0 + $0x174] sm:$0xf0]  ;;  %v2192_v28 = vor.u32 %v2386_v14, %v2189_v15 }
  0xf9   :  { %1754 = vst.msk [vmem:[%s3840_s4 + $0x48] sm:$0xff] %vm1744_vm0, %v1689_v22  ;;  %v1498_v26 = vadd.f32 %v2435_v18, %v1226_v23  ;;  %v1059_v40 = vadd.f32 %v1058_v25, %v890_v27  ;;  %v2003_v18 = vld [vmem:[%s3838_s0 + $0x170] sm:$0xf]  ;;  %v2440_v25 = vunpack.c.h.bf16 %v2546_v57  ;;  %v1996_v27 = vor.u32 %v2339_v11, %v1995_v9  ;;  %v2342_v57 = vld [vmem:[%s3838_s0 + $0x188] sm:$0xf0] }
  0xfa   :  { %v2000_v33 = vor.u32 %v2338_v12, %v1997_v16  ;;  %v2004_v34 = vor.u32 %v2340_v20, %v2003_v18 }
  0xfb   :  { %v1562_v32 = vmax.f32 %v1498_v26, 0.0 }
  0xfc   :  { %v3193_v41 = vpop.f32.mrf.mxu3 }
  0xfd   :  { %v1626_v39 = vmax.f32 %v1562_v32, 0.0 }
  0xfe   :  { %v1227_v44 = vpop.f32.mrf.mxu2  ;;  %v892_v50 = vpop.f32.mrf.mxu0 }
  0xff   :  { %v1690_v48 = vmin.f32 %v1626_v39, 1.0  ;;  %v1228_v49 = vadd.f32 %v1227_v44, %v1059_v40  ;;  %v893_v53 = vadd.f32 %v2931_v56, %v892_v50  ;;  %v1061_v54 = vpop.f32.mrf.mxu1  ;;  %v2547_v39 = vld [vmem:[%s3839_s3 + $0x38] sm:$0xff]  }
 0x101   :  { %1755 = vst.msk [vmem:[%s3840_s4 + $0x50] sm:$0xff] %vm1744_vm0, %v1690_v48  ;;  %v1499_v55 = vadd.f32 %v2436_v43, %v1228_v49  ;;  %931 = vmatmul.bf16.gmra.mxu0 %v1984_v45  ;;  %1180 = vmatmul.bf16.gmra.mxu3 %v2180_v47  ;;  %v1062_v59 = vadd.f32 %v1061_v54, %v893_v53  ;;  %v2443_v47 = vunpack.c.l.bf16 %v2547_v39 }
 0x102   :  { %1100 = vmatmul.bf16.gmra.mxu1 %v1988_v51 }
 0x103   :  { %v1563_v58 = vmax.f32 %v1499_v55, 0.0  ;;  %1269 = vmatmul.bf16.gmra.mxu2 %v1992_v52  ;;  %v2007_v55 = vld [vmem:[%s3838_s0 + $0x180] sm:$0xf] }
 0x104   :  { %v3203_v63 = vpop.f32.mrf.mxu3  ;;  %v2008_v11 = vor.u32 %v2342_v57, %v2007_v55 }
 0x105   :  { %v1627_v60 = vmax.f32 %v1563_v58, 0.0  ;;  %v2341_v58 = vld [vmem:[%s3838_s0 + $0x184] sm:$0xf] }
 0x106   :  { %v1230_v1 = vpop.f32.mrf.mxu2  ;;  %v894_v5 = vpop.f32.mrf.mxu0 }
 0x107   :  { %v1691_v2 = vmin.f32 %v1627_v60, 1.0  ;;  %v1231_v4 = vadd.f32 %v1230_v1, %v1062_v59  ;;  %v1063_v6 = vpop.f32.mrf.mxu1  ;;  %v895_v8 = vadd.f32 %v2931_v56, %v894_v5  ;;  %v2111_v60 = vld [vmem:[%s3838_s0 + $0x248] sm:$0xf]  ;;  %v2009_v1 = vld [vmem:[%s3838_s0 + $0x18c] sm:$0xf0] }
 0x108   :  { %v2012_v16 = vor.u32 %v2341_v58, %v2009_v1 }
 0x109   :  { %1756 = vst.msk [vmem:[%s3840_s4 + $0x58] sm:$0xff] %vm1744_vm0, %v1691_v2  ;;  %v1500_v7 = vadd.f32 %v2439_v0, %v1231_v4  ;;  %v1064_v23 = vadd.f32 %v1063_v6, %v895_v8  ;;  %v2367_v0 = vld [vmem:[%s3838_s0 + $0x250] sm:$0xf0]  ;;  %v2015_v2 = vld [vmem:[%s3838_s0 + $0x188] sm:$0xf]  ;;  %v2444_v8 = vunpack.c.h.bf16 %v2547_v39 }
 0x10a   :  { %v2343_v4 = vld [vmem:[%s3838_s0 + $0x190] sm:$0xf0]  ;;  %v2112_v12 = vor.u32 %v2367_v0, %v2111_v60 }
 0x10b   :  { %v1564_v13 = vmax.f32 %v1500_v7, 0.0  ;;  %v2016_v18 = vor.u32 %v2343_v4, %v2015_v2 }
 0x10c   :  { %v3234_v24 = vpop.f32.mrf.mxu3 }
 0x10d   :  { %v1628_v22 = vmax.f32 %v1564_v13, 0.0 }
 0x10e   :  { %v1232_v26 = vpop.f32.mrf.mxu2  ;;  %v897_v32 = vpop.f32.mrf.mxu0 }
 0x10f   :  { %v1692_v30 = vmin.f32 %v1628_v22, 1.0  ;;  %v1233_v31 = vadd.f32 %v1232_v26, %v1064_v23  ;;  %v898_v35 = vadd.f32 %v2931_v56, %v897_v32  ;;  %v1066_v36 = vpop.f32.mrf.mxu1 }
 0x111   :  { %1757 = vst.msk [vmem:[%s3840_s4 + $0x60] sm:$0xff] %vm1744_vm0, %v1692_v30  ;;  %v1501_v37 = vadd.f32 %v2440_v25, %v1233_v31  ;;  %936 = vmatmul.bf16.gmra.mxu0 %v1996_v27  ;;  %1185 = vmatmul.bf16.gmra.mxu3 %v2192_v28  ;;  %v1067_v43 = vadd.f32 %v1066_v36, %v898_v35  ;;  %v2548_v25 = vld [vmem:[%s3839_s3 + $0x40] sm:$0xff]  }
 0x112   :  { %1105 = vmatmul.bf16.gmra.mxu1 %v2000_v33  ;;  %v983_v28 = vadd.f32 %v2931_v56, %v2961_v10  ;;  %v2447_v32 = vunpack.c.l.bf16 %v2548_v25  ;;  %v2019_v10 = vld [vmem:[%s3838_s0 + $0x198] sm:$0xf] }
 0x113   :  { %v1565_v40 = vmax.f32 %v1501_v37, 0.0  ;;  %1274 = vmatmul.bf16.gmra.mxu2 %v2004_v34 }
 0x114   :  { %v3244_v45 = vpop.f32.mrf.mxu3 }
 0x115   :  { %v1629_v44 = vmax.f32 %v1565_v40, 0.0 }
 0x116   :  { %v1235_v48 = vpop.f32.mrf.mxu2  ;;  %v899_v51 = vpop.f32.mrf.mxu0 }
 0x117   :  { %v1693_v49 = vmin.f32 %v1629_v44, 1.0  ;;  %v1236_v50 = vadd.f32 %v1235_v48, %v1067_v43  ;;  %v1068_v52 = vpop.f32.mrf.mxu1  ;;  %v900_v54 = vadd.f32 %v2931_v56, %v899_v51  ;;  %v2345_v44 = vld [vmem:[%s3838_s0 + $0x1a0] sm:$0xf0]  ;;  %v985_v51 = vadd.f32 %v2931_v56, %v2988_v29 }
 0x118   :  { %v2020_v29 = vor.u32 %v2345_v44, %v2019_v10  ;;  %v2039_v10 = vld [vmem:[%s3838_s0 + $0x1b8] sm:$0xf]  ;;  %v2349_v44 = vld [vmem:[%s3838_s0 + $0x1c0] sm:$0xf0] }
 0x119   :  { %1758 = vst.msk [vmem:[%s3840_s4 + $0x68] sm:$0xff] %vm1744_vm0, %v1693_v49  ;;  %v1502_v53 = vadd.f32 %v2443_v47, %v1236_v50  ;;  %v1069_v6 = vadd.f32 %v1068_v52, %v900_v54  ;;  %v2344_v47 = vld [vmem:[%s3838_s0 + $0x19c] sm:$0xf]  ;;  %v2123_v49 = vld [vmem:[%s3838_s0 + $0x260] sm:$0xf] }
 0x11a   :  { %v2370_v50 = vld [vmem:[%s3838_s0 + $0x268] sm:$0xf0]  ;;  %v2021_v52 = vld [vmem:[%s3838_s0 + $0x1a4] sm:$0xf0] }
 0x11b   :  { %v1566_v59 = vmax.f32 %v1502_v53, 0.0  ;;  %v2027_v53 = vld [vmem:[%s3838_s0 + $0x1a0] sm:$0xf]  ;;  %v2346_v54 = vld [vmem:[%s3838_s0 + $0x1a8] sm:$0xf0]  ;;  %v2124_v1 = vor.u32 %v2370_v50, %v2123_v49 }
 0x11c   :  { %v3275_v7 = vpop.f32.mrf.mxu3 }
 0x11d   :  { %v1630_v5 = vmax.f32 %v1566_v59, 0.0  ;;  %v2448_v59 = vunpack.c.h.bf16 %v2548_v25 }
 0x11e   :  { %v1237_v9 = vpop.f32.mrf.mxu2  ;;  %v902_v15 = vpop.f32.mrf.mxu0 }
 0x11f   :  { %v1694_v13 = vmin.f32 %v1630_v5, 1.0  ;;  %v1238_v14 = vadd.f32 %v1237_v9, %v1069_v6  ;;  %v903_v20 = vadd.f32 %v2931_v56, %v902_v15  ;;  %v1071_v22 = vpop.f32.mrf.mxu1  ;;  %v2024_v6 = vor.u32 %v2344_v47, %v2021_v52 }
 0x121   :  { %1759 = vst.msk [vmem:[%s3840_s4 + $0x70] sm:$0xff] %vm1744_vm0, %v1694_v13  ;;  %v1503_v23 = vadd.f32 %v2444_v8, %v1238_v14  ;;  %941 = vmatmul.bf16.gmra.mxu0 %v2008_v11  ;;  %1319 = vmatmul.bf16.vlgmr.msra.gmra.mxu3 %v2112_v12  ;;  %v1072_v27 = vadd.f32 %v1071_v22, %v903_v20  ;;  %v2549_v13 = vld [vmem:[%s3839_s3 + $0x48] sm:$0xff]  }
 0x122   :  { %1110 = vmatmul.bf16.gmra.mxu1 %v2012_v16  ;;  %v2028_v8 = vor.u32 %v2346_v54, %v2027_v53  ;;  %v988_v16 = vadd.f32 %v2931_v56, %v2998_v46  ;;  %v2451_v22 = vunpack.c.l.bf16 %v2549_v13  ;;  %v2031_v46 = vld [vmem:[%s3838_s0 + $0x1b0] sm:$0xf]  ;;  %v2452_v50 = vunpack.c.h.bf16 %v2549_v13 }
 0x123   :  { %v1567_v26 = vmax.f32 %v1503_v23, 0.0  ;;  %1279 = vmatmul.bf16.gmra.mxu2 %v2016_v18 }
 0x124   :  { %v1151_v31 = vpop.f32.mrf.mxu3 }
 0x125   :  { %v1631_v30 = vmax.f32 %v1567_v26, 0.0  ;;  %v3287_v33 = vadd.f32 %v1151_v31, %v983_v28 }
 0x126   :  { %v1240_v34 = vpop.f32.mrf.mxu2  ;;  %v904_v37 = vpop.f32.mrf.mxu0 }
 0x127   :  { %v1695_v35 = vmin.f32 %v1631_v30, 1.0  ;;  %v1241_v36 = vadd.f32 %v1240_v34, %v1072_v27  ;;  %v1073_v39 = vpop.f32.mrf.mxu1  ;;  %v905_v43 = vadd.f32 %v2931_v56, %v904_v37  ;;  %v2348_v34 = vld [vmem:[%s3838_s0 + $0x1b8] sm:$0xf0]  ;;  %v2135_v37 = vld [vmem:[%s3838_s0 + $0x278] sm:$0xf] }
 0x129   :  { %1760 = vst.msk [vmem:[%s3840_s4 + $0x78] sm:$0xff] %vm1744_vm0, %v1695_v35  ;;  %v1504_v40 = vadd.f32 %v2447_v32, %v1241_v36  ;;  %v1074_v57 = vadd.f32 %v1073_v39, %v905_v43  ;;  %v2347_v35 = vld [vmem:[%s3838_s0 + $0x1b4] sm:$0xf]  ;;  %v2373_v39 = vld [vmem:[%s3838_s0 + $0x280] sm:$0xf0] }
 0x12a   :  { %v2033_v43 = vld [vmem:[%s3838_s0 + $0x1bc] sm:$0xf0]  ;;  %v2136_v53 = vor.u32 %v2373_v39, %v2135_v37 }
 0x12b   :  { %v1568_v48 = vmax.f32 %v1504_v40, 0.0  ;;  %v990_v40 = vadd.f32 %v2931_v56, %v3029_v3  ;;  %v2032_v3 = vor.u32 %v2348_v34, %v2031_v46  ;;  %v2051_v46 = vld [vmem:[%s3838_s0 + $0x1d0] sm:$0xf]  ;;  %v2352_v34 = vld [vmem:[%s3838_s0 + $0x1d8] sm:$0xf0] }
 0x12c   :  { %v1153_v58 = vpop.f32.mrf.mxu3 }
 0x12d   :  { %v1632_v55 = vmax.f32 %v1568_v48, 0.0  ;;  %v3320_v60 = vadd.f32 %v1153_v58, %v985_v51  ;;  %v2036_v58 = vor.u32 %v2347_v35, %v2033_v43 }
 0x12e   :  { %v1242_v0 = vpop.f32.mrf.mxu2  ;;  %v907_v5 = vpop.f32.mrf.mxu0 }
 0x12f   :  { %v1696_v2 = vmin.f32 %v1632_v55, 1.0  ;;  %v1243_v4 = vadd.f32 %v1242_v0, %v1074_v57  ;;  %v908_v9 = vadd.f32 %v2931_v56, %v907_v5  ;;  %v1076_v11 = vpop.f32.mrf.mxu1 }
 0x131   :  { %1761 = vst.msk [vmem:[%s3840_s4 + $0x80] sm:$0xff] %vm1744_vm0, %v1696_v2  ;;  %v1505_v12 = vadd.f32 %v2448_v59, %v1243_v4  ;;  %946 = vmatmul.bf16.gmra.mxu0 %v2020_v29  ;;  %1324 = vmatmul.bf16.gmra.mxu3 %v2124_v1  ;;  %v1077_v15 = vadd.f32 %v1076_v11, %v908_v9  ;;  %v2550_v2 = vld [vmem:[%s3839_s3 + $0x50] sm:$0xff]  }
 0x132   :  { %1115 = vmatmul.bf16.gmra.mxu1 %v2024_v6  ;;  %v2040_v59 = vor.u32 %v2349_v44, %v2039_v10  ;;  %v993_v6 = vadd.f32 %v2931_v56, %v3039_v21  ;;  %v2455_v11 = vunpack.c.l.bf16 %v2550_v2  ;;  %v2043_v21 = vld [vmem:[%s3838_s0 + $0x1c8] sm:$0xf]  ;;  %v2456_v39 = vunpack.c.h.bf16 %v2550_v2 }
 0x133   :  { %v1569_v14 = vmax.f32 %v1505_v12, 0.0  ;;  %1284 = vmatmul.bf16.gmra.mxu2 %v2028_v8 }
 0x134   :  { %v1156_v20 = vpop.f32.mrf.mxu3 }
 0x135   :  { %v1633_v18 = vmax.f32 %v1569_v14, 0.0  ;;  %v3332_v23 = vadd.f32 %v1156_v20, %v988_v16 }
 0x136   :  { %v1245_v25 = vpop.f32.mrf.mxu2  ;;  %v909_v28 = vpop.f32.mrf.mxu0 }
 0x137   :  { %v1697_v26 = vmin.f32 %v1633_v18, 1.0  ;;  %v1246_v27 = vadd.f32 %v1245_v25, %v1077_v15  ;;  %v1078_v30 = vpop.f32.mrf.mxu1  ;;  %v910_v32 = vadd.f32 %v2931_v56, %v909_v28  ;;  %v2351_v25 = vld [vmem:[%s3838_s0 + $0x1d0] sm:$0xf0]  ;;  %v2147_v28 = vld [vmem:[%s3838_s0 + $0x290] sm:$0xf] }
 0x139   :  { %1762 = vst.msk [vmem:[%s3840_s4 + $0x88] sm:$0xff] %vm1744_vm0, %v1697_v26  ;;  %v1506_v31 = vadd.f32 %v2451_v22, %v1246_v27  ;;  %v1079_v48 = vadd.f32 %v1078_v30, %v910_v32  ;;  %v2350_v26 = vld [vmem:[%s3838_s0 + $0x1cc] sm:$0xf]  ;;  %v2376_v30 = vld [vmem:[%s3838_s0 + $0x298] sm:$0xf0] }
 0x13a   :  { %v2045_v32 = vld [vmem:[%s3838_s0 + $0x1d4] sm:$0xf0]  ;;  %v2148_v10 = vor.u32 %v2376_v30, %v2147_v28 }
 0x13b   :  { %v1570_v36 = vmax.f32 %v1506_v31, 0.0  ;;  %v995_v31 = vadd.f32 %v2931_v56, %v3070_v42  ;;  %v2044_v42 = vor.u32 %v2351_v25, %v2043_v21  ;;  %v2063_v21 = vld [vmem:[%s3838_s0 + $0x1e8] sm:$0xf]  ;;  %v2355_v25 = vld [vmem:[%s3838_s0 + $0x1f0] sm:$0xf0] }
 0x13c   :  { %v1158_v49 = vpop.f32.mrf.mxu3 }
 0x13d   :  { %v1634_v47 = vmax.f32 %v1570_v36, 0.0  ;;  %v3365_v51 = vadd.f32 %v1158_v49, %v990_v40  ;;  %v2048_v49 = vor.u32 %v2350_v26, %v2045_v32 }
 0x13e   :  { %v1247_v52 = vpop.f32.mrf.mxu2  ;;  %v912_v57 = vpop.f32.mrf.mxu0 }
 0x13f   :  { %v1698_v54 = vmin.f32 %v1634_v47, 1.0  ;;  %v1248_v55 = vadd.f32 %v1247_v52, %v1079_v48  ;;  %v913_v0 = vadd.f32 %v2931_v56, %v912_v57  ;;  %v1081_v29 = vpop.f32.mrf.mxu1 }
 0x141   :  { %1763 = vst.msk [vmem:[%s3840_s4 + $0x90] sm:$0xff] %vm1744_vm0, %v1698_v54  ;;  %v1507_v1 = vadd.f32 %v2452_v50, %v1248_v55  ;;  %951 = vmatmul.bf16.gmra.mxu0 %v2032_v3  ;;  %1329 = vmatmul.bf16.gmra.mxu3 %v2136_v53  ;;  %v1082_v5 = vadd.f32 %v1081_v29, %v913_v0  ;;  %v2551_v54 = vld [vmem:[%s3839_s3 + $0x58] sm:$0xff]  }
 0x142   :  { %1120 = vmatmul.bf16.gmra.mxu1 %v2036_v58  ;;  %v2052_v50 = vor.u32 %v2352_v34, %v2051_v46  ;;  %v998_v58 = vadd.f32 %v2931_v56, %v3080_v61  ;;  %v2459_v29 = vunpack.c.l.bf16 %v2551_v54  ;;  %v2460_v30 = vunpack.c.h.bf16 %v2551_v54 }
 0x143   :  { %v1571_v4 = vmax.f32 %v1507_v1, 0.0  ;;  %1289 = vmatmul.bf16.gmra.mxu2 %v2040_v59 }
 0x144   :  { %v1161_v9 = vpop.f32.mrf.mxu3 }
 0x145   :  { %v1635_v8 = vmax.f32 %v1571_v4, 0.0  ;;  %v3377_v12 = vadd.f32 %v1161_v9, %v993_v6 }
 0x146   :  { %v1250_v13 = vpop.f32.mrf.mxu2  ;;  %v914_v16 = vpop.f32.mrf.mxu0 }
 0x147   :  { %v1699_v14 = vmin.f32 %v1635_v8, 1.0  ;;  %v1251_v15 = vadd.f32 %v1250_v13, %v1082_v5  ;;  %v1083_v18 = vpop.f32.mrf.mxu1  ;;  %v915_v22 = vadd.f32 %v2931_v56, %v914_v16  ;;  %v2354_v13 = vld [vmem:[%s3838_s0 + $0x1e8] sm:$0xf0]  ;;  %v2159_v16 = vld [vmem:[%s3838_s0 + $0x2a8] sm:$0xf] }
 0x149   :  { %1764 = vst.msk [vmem:[%s3840_s4 + $0x98] sm:$0xff] %vm1744_vm0, %v1699_v14  ;;  %v1508_v20 = vadd.f32 %v2455_v11, %v1251_v15  ;;  %v1084_v36 = vadd.f32 %v1083_v18, %v915_v22  ;;  %v2055_v11 = vld [vmem:[%s3838_s0 + $0x1e0] sm:$0xf]  ;;  %v2353_v14 = vld [vmem:[%s3838_s0 + $0x1e4] sm:$0xf] }
 0x14a   :  { %v2379_v18 = vld [vmem:[%s3838_s0 + $0x2b0] sm:$0xf0]  ;;  %v2057_v22 = vld [vmem:[%s3838_s0 + $0x1ec] sm:$0xf0] }
 0x14b   :  { %v1572_v27 = vmax.f32 %v1508_v20, 0.0  ;;  %v2160_v46 = vor.u32 %v2379_v18, %v2159_v16 }
 0x14c   :  { %v1163_v37 = vpop.f32.mrf.mxu3 }
 0x14d   :  { %v1636_v35 = vmax.f32 %v1572_v27, 0.0  ;;  %v3410_v40 = vadd.f32 %v1163_v37, %v995_v31  ;;  %v2060_v37 = vor.u32 %v2353_v14, %v2057_v22 }
 0x14e   :  { %v1252_v43 = vpop.f32.mrf.mxu2  ;;  %v917_v48 = vpop.f32.mrf.mxu0 }
 0x14f   :  { %v1700_v44 = vmin.f32 %v1636_v35, 1.0  ;;  %v1253_v47 = vadd.f32 %v1252_v43, %v1084_v36  ;;  %v918_v52 = vadd.f32 %v2931_v56, %v917_v48  ;;  %v1086_v3 = vpop.f32.mrf.mxu1  ;;  %v3431_v56 = vld [vmem:[%s3837_s2] ss:$0 sm:$0xff] }
 0x150   :  { %v1000_v20 = vadd.f32 %v3431_v56, %v3111_v19  ;;  %v2056_v19 = vor.u32 %v2354_v13, %v2055_v11  ;;  %v2075_v11 = vld [vmem:[%s3838_s0 + $0x200] sm:$0xf]  ;;  %v2358_v13 = vld [vmem:[%s3838_s0 + $0x208] sm:$0xf0] }
 0x151   :  { %1765 = vst.msk [vmem:[%s3840_s4 + $0xa0] sm:$0xff] %vm1744_vm0, %v1700_v44  ;;  %v1509_v53 = vadd.f32 %v2456_v39, %v1253_v47  ;;  %956 = vmatmul.bf16.gmra.mxu0 %v2044_v42  ;;  %1334 = vmatmul.bf16.gmra.mxu3 %v2148_v10  ;;  %v1087_v57 = vadd.f32 %v1086_v3, %v918_v52  ;;  %v2552_v44 = vld [vmem:[%s3839_s3 + $0x60] sm:$0xff]  }
 0x152   :  { %1125 = vmatmul.bf16.gmra.mxu1 %v2048_v49  ;;  %v2064_v39 = vor.u32 %v2355_v25, %v2063_v21  ;;  %v1003_v49 = vadd.f32 %v3431_v56, %v3121_v38  ;;  %v2463_v3 = vunpack.c.l.bf16 %v2552_v44  ;;  %v2067_v38 = vld [vmem:[%s3838_s0 + $0x1f8] sm:$0xf]  ;;  %v2464_v18 = vunpack.c.h.bf16 %v2552_v44 }
 0x153   :  { %v1573_v55 = vmax.f32 %v1509_v53, 0.0  ;;  %1294 = vmatmul.bf16.gmra.mxu2 %v2052_v50 }
 0x154   :  { %v1166_v0 = vpop.f32.mrf.mxu3 }
 0x155   :  { %v1637_v59 = vmax.f32 %v1573_v55, 0.0  ;;  %v3422_v1 = vadd.f32 %v1166_v0, %v998_v58 }
 0x156   :  { %v1255_v2 = vpop.f32.mrf.mxu2  ;;  %v919_v6 = vpop.f32.mrf.mxu0 }
 0x157   :  { %v1701_v4 = vmin.f32 %v1637_v59, 1.0  ;;  %v1256_v5 = vadd.f32 %v1255_v2, %v1087_v57  ;;  %v1088_v8 = vpop.f32.mrf.mxu1  ;;  %v920_v61 = vadd.f32 %v3431_v56, %v919_v6  ;;  %v2357_v2 = vld [vmem:[%s3838_s0 + $0x200] sm:$0xf0]  ;;  %v2171_v6 = vld [vmem:[%s3838_s0 + $0x2c0] sm:$0xf] }
 0x159   :  { %1766 = vst.msk [vmem:[%s3840_s4 + $0xa8] sm:$0xff] %vm1744_vm0, %v1701_v4  ;;  %v1510_v9 = vadd.f32 %v2459_v29, %v1256_v5  ;;  %v1089_v27 = vadd.f32 %v1088_v8, %v920_v61  ;;  %v2356_v4 = vld [vmem:[%s3838_s0 + $0x1fc] sm:$0xf]  ;;  %v2382_v8 = vld [vmem:[%s3838_s0 + $0x2c8] sm:$0xf0] }
 0x15a   :  { %v2069_v61 = vld [vmem:[%s3838_s0 + $0x204] sm:$0xf0]  ;;  %v2172_v21 = vor.u32 %v2382_v8, %v2171_v6 }
 0x15b   :  { %v1574_v15 = vmax.f32 %v1510_v9, 0.0  ;;  %v1005_v9 = vadd.f32 %v3431_v56, %v3152_v62  ;;  %v2068_v62 = vor.u32 %v2357_v2, %v2067_v38  ;;  %v2087_v38 = vld [vmem:[%s3838_s0 + $0x218] sm:$0xf]  ;;  %v2361_v2 = vld [vmem:[%s3838_s0 + $0x220] sm:$0xf0] }
 0x15c   :  { %v1168_v28 = vpop.f32.mrf.mxu3 }
 0x15d   :  { %v1638_v26 = vmax.f32 %v1574_v15, 0.0  ;;  %v3460_v31 = vadd.f32 %v1168_v28, %v1000_v20  ;;  %v2072_v28 = vor.u32 %v2356_v4, %v2069_v61 }
 0x15e   :  { %v1257_v32 = vpop.f32.mrf.mxu2  ;;  %v922_v36 = vpop.f32.mrf.mxu0 }
 0x15f   :  { %v1702_v34 = vmin.f32 %v1638_v26, 1.0  ;;  %v1258_v35 = vadd.f32 %v1257_v32, %v1089_v27  ;;  %v923_v43 = vadd.f32 %v3431_v56, %v922_v36  ;;  %v1091_v42 = vpop.f32.mrf.mxu1 }
 0x161   :  { %1767 = vst.msk [vmem:[%s3840_s4 + $0xb0] sm:$0xff] %vm1744_vm0, %v1702_v34  ;;  %v1511_v10 = vadd.f32 %v2460_v30, %v1258_v35  ;;  %961 = vmatmul.bf16.gmra.mxu0 %v2056_v19  ;;  %1339 = vmatmul.bf16.gmra.mxu3 %v2160_v46  ;;  %v1092_v48 = vadd.f32 %v1091_v42, %v923_v43  ;;  %v2553_v34 = vld [vmem:[%s3839_s3 + $0x68] sm:$0xff]  }
 0x162   :  { %1130 = vmatmul.bf16.gmra.mxu1 %v2060_v37  ;;  %v2076_v30 = vor.u32 %v2358_v13, %v2075_v11  ;;  %v1008_v37 = vadd.f32 %v3431_v56, %v3162_v17  ;;  %v2467_v42 = vunpack.c.l.bf16 %v2553_v34  ;;  %v2079_v17 = vld [vmem:[%s3838_s0 + $0x210] sm:$0xf]  ;;  %v2468_v8 = vunpack.c.h.bf16 %v2553_v34 }
 0x163   :  { %v1575_v47 = vmax.f32 %v1511_v10, 0.0  ;;  %1299 = vmatmul.bf16.gmra.mxu2 %v2064_v39 }
 0x164   :  { %v1171_v52 = vpop.f32.mrf.mxu3 }
 0x165   :  { %v1639_v50 = vmax.f32 %v1575_v47, 0.0  ;;  %v3472_v53 = vadd.f32 %v1171_v52, %v1003_v49 }
 0x166   :  { %v1260_v54 = vpop.f32.mrf.mxu2  ;;  %v924_v58 = vpop.f32.mrf.mxu0 }
 0x167   :  { %v1703_v55 = vmin.f32 %v1639_v50, 1.0  ;;  %v1261_v57 = vadd.f32 %v1260_v54, %v1092_v48  ;;  %v1093_v59 = vpop.f32.mrf.mxu1  ;;  %v925_v29 = vadd.f32 %v3431_v56, %v924_v58  ;;  %v2360_v54 = vld [vmem:[%s3838_s0 + $0x218] sm:$0xf0]  ;;  %v2183_v58 = vld [vmem:[%s3838_s0 + $0x2d8] sm:$0xf] }
 0x169   :  { %1768 = vst.msk [vmem:[%s3840_s4 + $0xb8] sm:$0xff] %vm1744_vm0, %v1703_v55  ;;  %v1512_v0 = vadd.f32 %v2463_v3, %v1261_v57  ;;  %v1094_v15 = vadd.f32 %v1093_v59, %v925_v29  ;;  %v2359_v55 = vld [vmem:[%s3838_s0 + $0x214] sm:$0xf]  ;;  %v2385_v59 = vld [vmem:[%s3838_s0 + $0x2e0] sm:$0xf0] }
 0x16a   :  { %v2081_v29 = vld [vmem:[%s3838_s0 + $0x21c] sm:$0xf0]  ;;  %v2184_v11 = vor.u32 %v2385_v59, %v2183_v58 }
 0x16b   :  { %v1576_v5 = vmax.f32 %v1512_v0, 0.0  ;;  %v1010_v0 = vadd.f32 %v3431_v56, %v3193_v41  ;;  %v2080_v41 = vor.u32 %v2360_v54, %v2079_v17  ;;  %v2099_v17 = vld [vmem:[%s3838_s0 + $0x230] sm:$0xf]  ;;  %v2364_v54 = vld [vmem:[%s3838_s0 + $0x238] sm:$0xf0] }
 0x16c   :  { %v1173_v16 = vpop.f32.mrf.mxu3 }
 0x16d   :  { %v1640_v14 = vmax.f32 %v1576_v5, 0.0  ;;  %v3505_v20 = vadd.f32 %v1173_v16, %v1005_v9  ;;  %v2084_v16 = vor.u32 %v2359_v55, %v2081_v29 }
 0x16e   :  { %v1262_v22 = vpop.f32.mrf.mxu2  ;;  %v927_v27 = vpop.f32.mrf.mxu0 }
 0x16f   :  { %v1704_v25 = vmin.f32 %v1640_v14, 1.0  ;;  %v1263_v26 = vadd.f32 %v1262_v22, %v1094_v15  ;;  %v928_v32 = vadd.f32 %v3431_v56, %v927_v27  ;;  %v1096_v19 = vpop.f32.mrf.mxu1 }
 0x171   :  { %1769 = vst.msk [vmem:[%s3840_s4 + $0xc0] sm:$0xff] %vm1744_vm0, %v1704_v25  ;;  %v1513_v46 = vadd.f32 %v2464_v18, %v1263_v26  ;;  %966 = vmatmul.bf16.gmra.mxu0 %v2068_v62  ;;  %1344 = vmatmul.bf16.gmra.mxu3 %v2172_v21  ;;  %v1097_v36 = vadd.f32 %v1096_v19, %v928_v32  ;;  %v2554_v25 = vld [vmem:[%s3839_s3 + $0x70] sm:$0xff]  }
 0x172   :  { %1135 = vmatmul.bf16.gmra.mxu1 %v2072_v28  ;;  %v2088_v18 = vor.u32 %v2361_v2, %v2087_v38  ;;  %v1013_v28 = vadd.f32 %v3431_v56, %v3203_v63  ;;  %v2471_v19 = vunpack.c.l.bf16 %v2554_v25  ;;  %v2091_v63 = vld [vmem:[%s3838_s0 + $0x228] sm:$0xf]  ;;  %v2472_v59 = vunpack.c.h.bf16 %v2554_v25 }
 0x173   :  { %v1577_v35 = vmax.f32 %v1513_v46, 0.0  ;;  %1304 = vmatmul.bf16.gmra.mxu2 %v2076_v30 }
 0x174   :  { %v1176_v43 = vpop.f32.mrf.mxu3 }
 0x175   :  { %v1641_v39 = vmax.f32 %v1577_v35, 0.0  ;;  %v3517_v10 = vadd.f32 %v1176_v43, %v1008_v37 }
 0x176   :  { %v1265_v44 = vpop.f32.mrf.mxu2  ;;  %v929_v49 = vpop.f32.mrf.mxu0 }
 0x177   :  { %v1705_v47 = vmin.f32 %v1641_v39, 1.0  ;;  %v1266_v48 = vadd.f32 %v1265_v44, %v1097_v36  ;;  %v1098_v50 = vpop.f32.mrf.mxu1  ;;  %v930_v3 = vadd.f32 %v3431_v56, %v929_v49  ;;  %v2363_v44 = vld [vmem:[%s3838_s0 + $0x230] sm:$0xf0]  ;;  %v2195_v49 = vld [vmem:[%s3838_s0 + $0x2f0] sm:$0xf] }
 0x179   :  { %1770 = vst.msk [vmem:[%s3840_s4 + $0xc8] sm:$0xff] %vm1744_vm0, %v1705_v47  ;;  %v1514_v52 = vadd.f32 %v2467_v42, %v1266_v48  ;;  %v1099_v5 = vadd.f32 %v1098_v50, %v930_v3  ;;  %v2362_v47 = vld [vmem:[%s3838_s0 + $0x22c] sm:$0xf]  ;;  %v2388_v50 = vld [vmem:[%s3838_s0 + $0x2f8] sm:$0xf0] }
 0x17a   :  { %v2093_v3 = vld [vmem:[%s3838_s0 + $0x234] sm:$0xf0]  ;;  %v2196_v38 = vor.u32 %v2388_v50, %v2195_v49 }
 0x17b   :  { %v1578_v57 = vmax.f32 %v1514_v52, 0.0  ;;  %v1015_v52 = vadd.f32 %v3431_v56, %v3234_v24  ;;  %v2092_v24 = vor.u32 %v2363_v44, %v2091_v63 }
 0x17c   :  { %v1178_v6 = vpop.f32.mrf.mxu3 }
 0x17d   :  { %v1642_v4 = vmax.f32 %v1578_v57, 0.0  ;;  %v3550_v9 = vadd.f32 %v1178_v6, %v1010_v0  ;;  %v2096_v6 = vor.u32 %v2362_v47, %v2093_v3 }
 0x17e   :  { %v1267_v61 = vpop.f32.mrf.mxu2  ;;  %v932_v15 = vpop.f32.mrf.mxu0 }
 0x17f   :  { %v1706_v13 = vmin.f32 %v1642_v4, 1.0  ;;  %v1268_v14 = vadd.f32 %v1267_v61, %v1099_v5  ;;  %v933_v22 = vadd.f32 %v3431_v56, %v932_v15  ;;  %v1101_v62 = vpop.f32.mrf.mxu1 }
 0x181   :  { %1771 = vst.msk [vmem:[%s3840_s4 + $0xd0] sm:$0xff] %vm1744_vm0, %v1706_v13  ;;  %v1515_v21 = vadd.f32 %v2468_v8, %v1268_v14  ;;  %971 = vmatmul.bf16.gmra.mxu0 %v2080_v41  ;;  %1349 = vmatmul.bf16.gmra.mxu3 %v2184_v11  ;;  %v1102_v27 = vadd.f32 %v1101_v62, %v933_v22  ;;  %v2555_v13 = vld [vmem:[%s3839_s3 + $0x78] sm:$0xff]  }
 0x182   :  { %1140 = vmatmul.bf16.gmra.mxu1 %v2084_v16  ;;  %v2100_v8 = vor.u32 %v2364_v54, %v2099_v17  ;;  %v1018_v16 = vadd.f32 %v3431_v56, %v3244_v45  ;;  %v2475_v62 = vunpack.c.l.bf16 %v2555_v13  ;;  %v1020_v45 = vadd.f32 %v3431_v56, %v3275_v7  ;;  %v2564_v7 = vld [vmem:[%s3839_s3 + $0xc0] sm:$0xff]  }
 0x183   :  { %v1579_v26 = vmax.f32 %v1515_v21, 0.0  ;;  %1309 = vmatmul.bf16.gmra.mxu2 %v2088_v18  ;;  %v2511_v54 = vunpack.c.l.bf16 %v2564_v7 }
 0x184   :  { %v1181_v32 = vpop.f32.mrf.mxu3 }
 0x185   :  { %v1643_v30 = vmax.f32 %v1579_v26, 0.0  ;;  %v3562_v46 = vadd.f32 %v1181_v32, %v1013_v28 }
 0x186   :  { %v1270_v34 = vpop.f32.mrf.mxu2  ;;  %v934_v37 = vpop.f32.mrf.mxu0 }
 0x187   :  { %v1707_v35 = vmin.f32 %v1643_v30, 1.0  ;;  %v1271_v36 = vadd.f32 %v1270_v34, %v1102_v27  ;;  %v1103_v39 = vpop.f32.mrf.mxu1  ;;  %v935_v42 = vadd.f32 %v3431_v56, %v934_v37 }
 0x189   :  { %1772 = vst.msk [vmem:[%s3840_s4 + $0xd8] sm:$0xff] %vm1744_vm0, %v1707_v35  ;;  %v1516_v43 = vadd.f32 %v2471_v19, %v1271_v36  ;;  %v1104_v57 = vadd.f32 %v1103_v39, %v935_v42  ;;  %v2476_v39 = vunpack.c.h.bf16 %v2555_v13  ;;  %v2512_v13 = vunpack.c.h.bf16 %v2564_v7 }
 0x18b   :  { %v1580_v48 = vmax.f32 %v1516_v43, 0.0 }
 0x18c   :  { %v1183_v58 = vpop.f32.mrf.mxu3 }
 0x18d   :  { %v1644_v55 = vmax.f32 %v1580_v48, 0.0  ;;  %v3595_v0 = vadd.f32 %v1183_v58, %v1015_v52  ;;  %v2556_v52 = vld [vmem:[%s3839_s3 + $0x80] sm:$0xff]  }
 0x18e   :  { %v1272_v29 = vpop.f32.mrf.mxu2  ;;  %v937_v5 = vpop.f32.mrf.mxu0 }
 0x18f   :  { %v1708_v2 = vmin.f32 %v1644_v55, 1.0  ;;  %v1273_v4 = vadd.f32 %v1272_v29, %v1104_v57  ;;  %v938_v61 = vadd.f32 %v3431_v56, %v937_v5  ;;  %v1106_v41 = vpop.f32.mrf.mxu1  ;;  %v2479_v57 = vunpack.c.l.bf16 %v2556_v52 }
 0x191   :  { %1773 = vst.msk [vmem:[%s3840_s4 + $0xe0] sm:$0xff] %vm1744_vm0, %v1708_v2  ;;  %v1517_v11 = vadd.f32 %v2472_v59, %v1273_v4  ;;  %976 = vmatmul.bf16.gmra.mxu0 %v2092_v24  ;;  %1354 = vmatmul.bf16.gmra.mxu3 %v2196_v38  ;;  %v1107_v15 = vadd.f32 %v1106_v41, %v938_v61 }
 0x192   :  { %1145 = vmatmul.bf16.gmra.mxu1 %v2096_v6 }
 0x193   :  { %v1581_v14 = vmax.f32 %v1517_v11, 0.0  ;;  %1314 = vmatmul.bf16.gmra.mxu2 %v2100_v8 }
 0x194   :  { %v1186_v22 = vpop.f32.mrf.mxu3 }
 0x195   :  { %v1645_v18 = vmax.f32 %v1581_v14, 0.0  ;;  %v3607_v21 = vadd.f32 %v1186_v22, %v1018_v16 }
 0x196   :  { %v1275_v25 = vpop.f32.mrf.mxu2  ;;  %v939_v28 = vpop.f32.mrf.mxu0 }
 0x197   :  { %v1709_v26 = vmin.f32 %v1645_v18, 1.0  ;;  %v1276_v27 = vadd.f32 %v1275_v25, %v1107_v15  ;;  %v1108_v30 = vpop.f32.mrf.mxu1  ;;  %v940_v19 = vadd.f32 %v3431_v56, %v939_v28 }
 0x199   :  { %1774 = vst.msk [vmem:[%s3840_s4 + $0xe8] sm:$0xff] %vm1744_vm0, %v1709_v26  ;;  %v1518_v32 = vadd.f32 %v2475_v62, %v1276_v27  ;;  %v1109_v36 = vadd.f32 %v1108_v30, %v940_v19 }
 0x19b   :  { %v1582_v34 = vmax.f32 %v1518_v32, 0.0 }
 0x19c   :  { %v1188_v37 = vpop.f32.mrf.mxu3 }
 0x19d   :  { %v1646_v35 = vmax.f32 %v1582_v34, 0.0  ;;  %v3616_v43 = vadd.f32 %v1188_v37, %v1020_v45  ;;  %v2557_v45 = vld [vmem:[%s3839_s3 + $0x88] sm:$0xff]  }
 0x19e   :  { %v1277_v42 = vpop.f32.mrf.mxu2  ;;  %v942_v47 = vpop.f32.mrf.mxu0 }
 0x19f   :  { %v1710_v63 = vmin.f32 %v1646_v35, 1.0  ;;  %v1278_v44 = vadd.f32 %v1277_v42, %v1109_v36  ;;  %v943_v48 = vadd.f32 %v3431_v56, %v942_v47  ;;  %v1111_v49 = vpop.f32.mrf.mxu1 }
 0x1a1   :  { %1775 = vst.msk [vmem:[%s3840_s4 + $0xf0] sm:$0xff] %vm1744_vm0, %v1710_v63  ;;  %v1519_v50 = vadd.f32 %v2476_v39, %v1278_v44  ;;  %v1112_v17 = vadd.f32 %v1111_v49, %v943_v48  ;;  %v2483_v63 = vunpack.c.l.bf16 %v2557_v45 }
 0x1a3   :  { %v1583_v3 = vmax.f32 %v1519_v50, 0.0 }
 0x1a4   :  { %v1320_v58 = vpop.f32.mrf.mxu3 }
 0x1a5   :  { %v1647_v55 = vmax.f32 %v1583_v3, 0.0  ;;  %v1321_v29 = vadd.f32 %v1320_v58, %v3287_v33  ;;  %v2480_v33 = vunpack.c.h.bf16 %v2556_v52 }
 0x1a6   :  { %v1280_v59 = vpop.f32.mrf.mxu2  ;;  %v944_v2 = vpop.f32.mrf.mxu0 }
 0x1a7   :  { %v1711_v24 = vmin.f32 %v1647_v55, 1.0  ;;  %v1281_v38 = vadd.f32 %v1280_v59, %v1112_v17  ;;  %v1536_v4 = vadd.f32 %v2511_v54, %v1321_v29  ;;  %v1113_v5 = vpop.f32.mrf.mxu1  ;;  %v945_v8 = vadd.f32 %v3431_v56, %v944_v2 }
 0x1a9   :  { %1776 = vst.msk [vmem:[%s3840_s4 + $0xf8] sm:$0xff] %vm1744_vm0, %v1711_v24  ;;  %v1520_v6 = vadd.f32 %v2479_v57, %v1281_v38  ;;  %v1600_v61 = vmax.f32 %v1536_v4, 0.0  ;;  %v1114_v15 = vadd.f32 %v1113_v5, %v945_v8  ;;  %v2484_v38 = vunpack.c.h.bf16 %v2557_v45 }
 0x1ab   :  { %v1584_v41 = vmax.f32 %v1520_v6, 0.0  ;;  %v1664_v11 = vmax.f32 %v1600_v61, 0.0 }
 0x1ac   :  { %v1322_v16 = vpop.f32.mrf.mxu3 }
 0x1ad   :  { %v1648_v14 = vmax.f32 %v1584_v41, 0.0  ;;  %v1728_v18 = vmin.f32 %v1664_v11, 1.0  ;;  %v1323_v62 = vadd.f32 %v1322_v16, %v3320_v60  ;;  %v2565_v60 = vld [vmem:[%s3839_s3 + $0xc8] sm:$0xff]   ;;  %v2558_v16 = vld [vmem:[%s3839_s3 + $0x90] sm:$0xff]  }
 0x1ae   :  { %v1282_v22 = vpop.f32.mrf.mxu2  ;;  %v947_v27 = vpop.f32.mrf.mxu0  ;;  %v2515_v39 = vunpack.c.l.bf16 %v2565_v60  ;;  %v2516_v59 = vunpack.c.h.bf16 %v2565_v60 }
 0x1af   :  { %v1712_v25 = vmin.f32 %v1648_v14, 1.0  ;;  %v1283_v26 = vadd.f32 %v1282_v22, %v1114_v15  ;;  %1793 = vst.msk [vmem:[%s3840_s4 + $0x180] sm:$0xff] %vm1744_vm0, %v1728_v18  ;;  %v1537_v28 = vadd.f32 %v2512_v13, %v1323_v62  ;;  %v948_v30 = vadd.f32 %v3431_v56, %v947_v27  ;;  %v1116_v32 = vpop.f32.mrf.mxu1 }
 0x1b0   :  { %v2487_v27 = vunpack.c.l.bf16 %v2558_v16 }
 0x1b1   :  { %1777 = vst.msk [vmem:[%s3840_s4 + $0x100] sm:$0xff] %vm1744_vm0, %v1712_v25  ;;  %v1521_v19 = vadd.f32 %v2480_v33, %v1283_v26  ;;  %v1601_v34 = vmax.f32 %v1537_v28, 0.0  ;;  %v1117_v36 = vadd.f32 %v1116_v32, %v948_v30 }
 0x1b3   :  { %v1585_v35 = vmax.f32 %v1521_v19, 0.0  ;;  %v1665_v37 = vmax.f32 %v1601_v34, 0.0 }
 0x1b4   :  { %v1325_v44 = vpop.f32.mrf.mxu3 }
 0x1b5   :  { %v1649_v42 = vmax.f32 %v1585_v35, 0.0  ;;  %v1729_v47 = vmin.f32 %v1665_v37, 1.0  ;;  %v1326_v49 = vadd.f32 %v1325_v44, %v3332_v23 }
 0x1b6   :  { %v1285_v48 = vpop.f32.mrf.mxu2  ;;  %v949_v52 = vpop.f32.mrf.mxu0 }
 0x1b7   :  { %v1713_v50 = vmin.f32 %v1649_v42, 1.0  ;;  %v1286_v7 = vadd.f32 %v1285_v48, %v1117_v36  ;;  %1794 = vst.msk [vmem:[%s3840_s4 + $0x188] sm:$0xff] %vm1744_vm0, %v1729_v47  ;;  %v1538_v3 = vadd.f32 %v2515_v39, %v1326_v49  ;;  %v1118_v17 = vpop.f32.mrf.mxu1  ;;  %v950_v55 = vadd.f32 %v3431_v56, %v949_v52 }
 0x1b8   :  { %v2488_v49 = vunpack.c.h.bf16 %v2558_v16 }
 0x1b9   :  { %1778 = vst.msk [vmem:[%s3840_s4 + $0x108] sm:$0xff] %vm1744_vm0, %v1713_v50  ;;  %v1522_v54 = vadd.f32 %v2483_v63, %v1286_v7  ;;  %v1602_v57 = vmax.f32 %v1538_v3, 0.0  ;;  %v1119_v24 = vadd.f32 %v1118_v17, %v950_v55 }
 0x1bb   :  { %v1586_v23 = vmax.f32 %v1522_v54, 0.0  ;;  %v1666_v58 = vmax.f32 %v1602_v57, 0.0 }
 0x1bc   :  { %v1327_v2 = vpop.f32.mrf.mxu3 }
 0x1bd   :  { %v1650_v29 = vmax.f32 %v1586_v23, 0.0  ;;  %v1730_v4 = vmin.f32 %v1666_v58, 1.0  ;;  %v1328_v6 = vadd.f32 %v1327_v2, %v3365_v51  ;;  %v2566_v51 = vld [vmem:[%s3839_s3 + $0xd0] sm:$0xff]  }
 0x1be   :  { %v1287_v5 = vpop.f32.mrf.mxu2  ;;  %v952_v41 = vpop.f32.mrf.mxu0  ;;  %v2519_v25 = vunpack.c.l.bf16 %v2566_v51  ;;  %v2520_v44 = vunpack.c.h.bf16 %v2566_v51 }
 0x1bf   :  { %v1714_v8 = vmin.f32 %v1650_v29, 1.0  ;;  %v1288_v61 = vadd.f32 %v1287_v5, %v1119_v24  ;;  %1795 = vst.msk [vmem:[%s3840_s4 + $0x190] sm:$0xff] %vm1744_vm0, %v1730_v4  ;;  %v1539_v11 = vadd.f32 %v2516_v59, %v1328_v6  ;;  %v953_v13 = vadd.f32 %v3431_v56, %v952_v41  ;;  %v1121_v14 = vpop.f32.mrf.mxu1  ;;  %v2559_v24 = vld [vmem:[%s3839_s3 + $0x98] sm:$0xff]  }
 0x1c1   :  { %1779 = vst.msk [vmem:[%s3840_s4 + $0x110] sm:$0xff] %vm1744_vm0, %v1714_v8  ;;  %v1523_v15 = vadd.f32 %v2484_v38, %v1288_v61  ;;  %v1603_v33 = vmax.f32 %v1539_v11, 0.0  ;;  %v1122_v22 = vadd.f32 %v1121_v14, %v953_v13  ;;  %v2491_v8 = vunpack.c.l.bf16 %v2559_v24 }
 0x1c3   :  { %v1587_v18 = vmax.f32 %v1523_v15, 0.0  ;;  %v1667_v62 = vmax.f32 %v1603_v33, 0.0 }
 0x1c4   :  { %v1330_v28 = vpop.f32.mrf.mxu3 }
 0x1c5   :  { %v1651_v26 = vmax.f32 %v1587_v18, 0.0  ;;  %v1731_v30 = vmin.f32 %v1667_v62, 1.0  ;;  %v1331_v19 = vadd.f32 %v1330_v28, %v3377_v12 }
 0x1c6   :  { %v1290_v32 = vpop.f32.mrf.mxu2  ;;  %v954_v45 = vpop.f32.mrf.mxu0 }
 0x1c7   :  { %v1715_v60 = vmin.f32 %v1651_v26, 1.0  ;;  %v1291_v34 = vadd.f32 %v1290_v32, %v1122_v22  ;;  %1796 = vst.msk [vmem:[%s3840_s4 + $0x198] sm:$0xff] %vm1744_vm0, %v1731_v30  ;;  %v1540_v35 = vadd.f32 %v2519_v25, %v1331_v19  ;;  %v1123_v36 = vpop.f32.mrf.mxu1  ;;  %v955_v39 = vadd.f32 %v3431_v56, %v954_v45 }
 0x1c8   :  { %v2492_v30 = vunpack.c.h.bf16 %v2559_v24 }
 0x1c9   :  { %1780 = vst.msk [vmem:[%s3840_s4 + $0x118] sm:$0xff] %vm1744_vm0, %v1715_v60  ;;  %v1524_v37 = vadd.f32 %v2487_v27, %v1291_v34  ;;  %v1604_v42 = vmax.f32 %v1540_v35, 0.0  ;;  %v1124_v48 = vadd.f32 %v1123_v36, %v955_v39 }
 0x1cb   :  { %v1588_v12 = vmax.f32 %v1524_v37, 0.0  ;;  %v1668_v63 = vmax.f32 %v1604_v42, 0.0 }
 0x1cc   :  { %v1332_v50 = vpop.f32.mrf.mxu3 }
 0x1cd   :  { %v1652_v47 = vmax.f32 %v1588_v12, 0.0  ;;  %v1732_v7 = vmin.f32 %v1668_v63, 1.0  ;;  %v1333_v3 = vadd.f32 %v1332_v50, %v3410_v40  ;;  %v2567_v40 = vld [vmem:[%s3839_s3 + $0xd8] sm:$0xff]  }
 0x1ce   :  { %v1292_v52 = vpop.f32.mrf.mxu2  ;;  %v957_v55 = vpop.f32.mrf.mxu0  ;;  %v2523_v5 = vunpack.c.l.bf16 %v2567_v40  ;;  %v2524_v26 = vunpack.c.h.bf16 %v2567_v40 }
 0x1cf   :  { %v1716_v17 = vmin.f32 %v1652_v47, 1.0  ;;  %v1293_v54 = vadd.f32 %v1292_v52, %v1124_v48  ;;  %1797 = vst.msk [vmem:[%s3840_s4 + $0x1a0] sm:$0xff] %vm1744_vm0, %v1732_v7  ;;  %v1541_v57 = vadd.f32 %v2520_v44, %v1333_v3  ;;  %v958_v23 = vadd.f32 %v3431_v56, %v957_v55  ;;  %v1126_v58 = vpop.f32.mrf.mxu1  ;;  %v2560_v44 = vld [vmem:[%s3839_s3 + $0xa0] sm:$0xff]  }
 0x1d0   :  { %v2495_v52 = vunpack.c.l.bf16 %v2560_v44 }
 0x1d1   :  { %1781 = vst.msk [vmem:[%s3840_s4 + $0x120] sm:$0xff] %vm1744_vm0, %v1716_v17  ;;  %v1525_v59 = vadd.f32 %v2488_v49, %v1293_v54  ;;  %v1605_v29 = vmax.f32 %v1541_v57, 0.0  ;;  %v1127_v2 = vadd.f32 %v1126_v58, %v958_v23 }
 0x1d3   :  { %v1589_v38 = vmax.f32 %v1525_v59, 0.0  ;;  %v1669_v4 = vmax.f32 %v1605_v29, 0.0 }
 0x1d4   :  { %v1335_v61 = vpop.f32.mrf.mxu3 }
 0x1d5   :  { %v1653_v6 = vmax.f32 %v1589_v38, 0.0  ;;  %v1733_v41 = vmin.f32 %v1669_v4, 1.0  ;;  %v1336_v13 = vadd.f32 %v1335_v61, %v3422_v1 }
 0x1d6   :  { %v1295_v11 = vpop.f32.mrf.mxu2  ;;  %v959_v51 = vpop.f32.mrf.mxu0 }
 0x1d7   :  { %v1717_v14 = vmin.f32 %v1653_v6, 1.0  ;;  %v1296_v15 = vadd.f32 %v1295_v11, %v1127_v2  ;;  %1798 = vst.msk [vmem:[%s3840_s4 + $0x1a8] sm:$0xff] %vm1744_vm0, %v1733_v41  ;;  %v1542_v33 = vadd.f32 %v2523_v5, %v1336_v13  ;;  %v1128_v16 = vpop.f32.mrf.mxu1  ;;  %v960_v22 = vadd.f32 %v3431_v56, %v959_v51 }
 0x1d9   :  { %1782 = vst.msk [vmem:[%s3840_s4 + $0x128] sm:$0xff] %vm1744_vm0, %v1717_v14  ;;  %v1526_v18 = vadd.f32 %v2491_v8, %v1296_v15  ;;  %v1606_v62 = vmax.f32 %v1542_v33, 0.0  ;;  %v1129_v28 = vadd.f32 %v1128_v16, %v960_v22  ;;  %v2496_v8 = vunpack.c.h.bf16 %v2560_v44 }
 0x1db   :  { %v1590_v1 = vmax.f32 %v1526_v18, 0.0  ;;  %v1670_v25 = vmax.f32 %v1606_v62, 0.0 }
 0x1dc   :  { %v1337_v32 = vpop.f32.mrf.mxu3 }
 0x1dd   :  { %v1654_v27 = vmax.f32 %v1590_v1, 0.0  ;;  %v1734_v19 = vmin.f32 %v1670_v25, 1.0  ;;  %v1338_v34 = vadd.f32 %v1337_v32, %v3460_v31  ;;  %v2568_v31 = vld [vmem:[%s3839_s3 + $0xe0] sm:$0xff]   ;;  %v2561_v1 = vld [vmem:[%s3839_s3 + $0xa8] sm:$0xff]  }
 0x1de   :  { %v1297_v60 = vpop.f32.mrf.mxu2  ;;  %v962_v36 = vpop.f32.mrf.mxu0  ;;  %v2527_v50 = vunpack.c.l.bf16 %v2568_v31  ;;  %v2528_v4 = vunpack.c.h.bf16 %v2568_v31  ;;  %v2499_v32 = vunpack.c.l.bf16 %v2561_v1 }
 0x1df   :  { %v1718_v45 = vmin.f32 %v1654_v27, 1.0  ;;  %v1298_v35 = vadd.f32 %v1297_v60, %v1129_v28  ;;  %1799 = vst.msk [vmem:[%s3840_s4 + $0x1b0] sm:$0xff] %vm1744_vm0, %v1734_v19  ;;  %v1543_v37 = vadd.f32 %v2524_v26, %v1338_v34  ;;  %v963_v39 = vadd.f32 %v3431_v56, %v962_v36  ;;  %v1131_v42 = vpop.f32.mrf.mxu1 }
 0x1e1   :  { %1783 = vst.msk [vmem:[%s3840_s4 + $0x130] sm:$0xff] %vm1744_vm0, %v1718_v45  ;;  %v1527_v12 = vadd.f32 %v2492_v30, %v1298_v35  ;;  %v1607_v63 = vmax.f32 %v1543_v37, 0.0  ;;  %v1132_v48 = vadd.f32 %v1131_v42, %v963_v39 }
 0x1e3   :  { %v1591_v47 = vmax.f32 %v1527_v12, 0.0  ;;  %v1671_v49 = vmax.f32 %v1607_v63, 0.0 }
 0x1e4   :  { %v1340_v3 = vpop.f32.mrf.mxu3 }
 0x1e5   :  { %v1655_v7 = vmax.f32 %v1591_v47, 0.0  ;;  %v1735_v17 = vmin.f32 %v1671_v49, 1.0  ;;  %v1341_v55 = vadd.f32 %v1340_v3, %v3472_v53 }
 0x1e6   :  { %v1300_v54 = vpop.f32.mrf.mxu2  ;;  %v964_v58 = vpop.f32.mrf.mxu0 }
 0x1e7   :  { %v1719_v57 = vmin.f32 %v1655_v7, 1.0  ;;  %v1301_v23 = vadd.f32 %v1300_v54, %v1132_v48  ;;  %1800 = vst.msk [vmem:[%s3840_s4 + $0x1b8] sm:$0xff] %vm1744_vm0, %v1735_v17  ;;  %v1544_v59 = vadd.f32 %v2527_v50, %v1341_v55  ;;  %v1133_v40 = vpop.f32.mrf.mxu1  ;;  %v965_v24 = vadd.f32 %v3431_v56, %v964_v58 }
 0x1e8   :  { %v2500_v50 = vunpack.c.h.bf16 %v2561_v1 }
 0x1e9   :  { %1784 = vst.msk [vmem:[%s3840_s4 + $0x138] sm:$0xff] %vm1744_vm0, %v1719_v57  ;;  %v1528_v29 = vadd.f32 %v2495_v52, %v1301_v23  ;;  %v1608_v38 = vmax.f32 %v1544_v59, 0.0  ;;  %v1134_v6 = vadd.f32 %v1133_v40, %v965_v24  ;;  %v2562_v24 = vld [vmem:[%s3839_s3 + $0xb0] sm:$0xff]  }
 0x1eb   :  { %v1592_v53 = vmax.f32 %v1528_v29, 0.0  ;;  %v1672_v2 = vmax.f32 %v1608_v38, 0.0 }
 0x1ec   :  { %v1342_v61 = vpop.f32.mrf.mxu3 }
 0x1ed   :  { %v1656_v5 = vmax.f32 %v1592_v53, 0.0  ;;  %v1736_v41 = vmin.f32 %v1672_v2, 1.0  ;;  %v1343_v13 = vadd.f32 %v1342_v61, %v3505_v20  ;;  %v2569_v20 = vld [vmem:[%s3839_s3 + $0xe8] sm:$0xff]  }
 0x1ee   :  { %v1302_v11 = vpop.f32.mrf.mxu2  ;;  %v967_v51 = vpop.f32.mrf.mxu0  ;;  %v2531_v28 = vunpack.c.l.bf16 %v2569_v20  ;;  %v2532_v47 = vunpack.c.h.bf16 %v2569_v20 }
 0x1ef   :  { %v1720_v14 = vmin.f32 %v1656_v5, 1.0  ;;  %v1303_v15 = vadd.f32 %v1302_v11, %v1134_v6  ;;  %1801 = vst.msk [vmem:[%s3840_s4 + $0x1c0] sm:$0xff] %vm1744_vm0, %v1736_v41  ;;  %v1545_v33 = vadd.f32 %v2528_v4, %v1343_v13  ;;  %v968_v16 = vadd.f32 %v3431_v56, %v967_v51  ;;  %v1136_v18 = vpop.f32.mrf.mxu1 }
 0x1f0   :  { %v2503_v6 = vunpack.c.l.bf16 %v2562_v24 }
 0x1f1   :  { %1785 = vst.msk [vmem:[%s3840_s4 + $0x140] sm:$0xff] %vm1744_vm0, %v1720_v14  ;;  %v1529_v22 = vadd.f32 %v2496_v8, %v1303_v15  ;;  %v1609_v62 = vmax.f32 %v1545_v33, 0.0  ;;  %v1137_v26 = vadd.f32 %v1136_v18, %v968_v16 }
 0x1f3   :  { %v1593_v25 = vmax.f32 %v1529_v22, 0.0  ;;  %v1673_v27 = vmax.f32 %v1609_v62, 0.0 }
 0x1f4   :  { %v1345_v19 = vpop.f32.mrf.mxu3 }
 0x1f5   :  { %v1657_v30 = vmax.f32 %v1593_v25, 0.0  ;;  %v1737_v60 = vmin.f32 %v1673_v27, 1.0  ;;  %v1346_v45 = vadd.f32 %v1345_v19, %v3517_v10 }
 0x1f6   :  { %v1305_v34 = vpop.f32.mrf.mxu2  ;;  %v969_v37 = vpop.f32.mrf.mxu0 }
 0x1f7   :  { %v1721_v35 = vmin.f32 %v1657_v30, 1.0  ;;  %v1306_v36 = vadd.f32 %v1305_v34, %v1137_v26  ;;  %1802 = vst.msk [vmem:[%s3840_s4 + $0x1c8] sm:$0xff] %vm1744_vm0, %v1737_v60  ;;  %v1546_v39 = vadd.f32 %v2531_v28, %v1346_v45  ;;  %v1138_v42 = vpop.f32.mrf.mxu1  ;;  %v970_v31 = vadd.f32 %v3431_v56, %v969_v37 }
 0x1f8   :  { %v2504_v26 = vunpack.c.h.bf16 %v2562_v24 }
 0x1f9   :  { %1786 = vst.msk [vmem:[%s3840_s4 + $0x148] sm:$0xff] %vm1744_vm0, %v1721_v35  ;;  %v1530_v12 = vadd.f32 %v2499_v32, %v1306_v36  ;;  %v1610_v63 = vmax.f32 %v1546_v39, 0.0  ;;  %v1139_v49 = vadd.f32 %v1138_v42, %v970_v31  ;;  %v2563_v42 = vld [vmem:[%s3839_s3 + $0xb8] sm:$0xff]  }
 0x1fa   :  { %v2508_v24 = vunpack.c.h.bf16 %v2563_v42 }
 0x1fb   :  { %v1594_v10 = vmax.f32 %v1530_v12, 0.0  ;;  %v1674_v44 = vmax.f32 %v1610_v63, 0.0 }
 0x1fc   :  { %v1347_v7 = vpop.f32.mrf.mxu3 }
 0x1fd   :  { %v1658_v48 = vmax.f32 %v1594_v10, 0.0  ;;  %v1738_v52 = vmin.f32 %v1674_v44, 1.0  ;;  %v1348_v17 = vadd.f32 %v1347_v7, %v3550_v9  ;;  %v2570_v9 = vld [vmem:[%s3839_s3 + $0xf0] sm:$0xff]   ;;  %v2507_v44 = vunpack.c.l.bf16 %v2563_v42 }
 0x1fe   :  { %v1307_v3 = vpop.f32.mrf.mxu2  ;;  %v972_v57 = vpop.f32.mrf.mxu0  ;;  %v2535_v4 = vunpack.c.l.bf16 %v2570_v9  ;;  %v2536_v62 = vunpack.c.h.bf16 %v2570_v9 }
 0x1ff   :  { %v1722_v54 = vmin.f32 %v1658_v48, 1.0  ;;  %v1308_v55 = vadd.f32 %v1307_v3, %v1139_v49  ;;  %1803 = vst.msk [vmem:[%s3840_s4 + $0x1d0] sm:$0xff] %vm1744_vm0, %v1738_v52  ;;  %v1547_v23 = vadd.f32 %v2532_v47, %v1348_v17  ;;  %v973_v58 = vadd.f32 %v3431_v56, %v972_v57  ;;  %v1141_v59 = vpop.f32.mrf.mxu1 }
 0x201   :  { %1787 = vst.msk [vmem:[%s3840_s4 + $0x150] sm:$0xff] %vm1744_vm0, %v1722_v54  ;;  %v1531_v40 = vadd.f32 %v2500_v50, %v1308_v55  ;;  %v1611_v29 = vmax.f32 %v1547_v23, 0.0  ;;  %v1142_v53 = vadd.f32 %v1141_v59, %v973_v58  ;;  %v2598_v55 = vld [vmem:[%s3837_s2] ss:$0 sm:$0xff] }
 0x203   :  { %v1595_v38 = vmax.f32 %v1531_v40, 0.0  ;;  %v1675_v2 = vmax.f32 %v1611_v29, 0.0 }
 0x204   :  { %v1350_v8 = vpop.f32.mrf.mxu3 }
 0x205   :  { %v1659_v5 = vmax.f32 %v1595_v38, 0.0  ;;  %v1739_v61 = vmin.f32 %v1675_v2, 1.0  ;;  %v1351_v11 = vadd.f32 %v1350_v8, %v3562_v46 }
 0x206   :  { %v1310_v41 = vpop.f32.mrf.mxu2  ;;  %v974_v15 = vpop.f32.mrf.mxu0 }
 0x207   :  { %v1723_v13 = vmin.f32 %v1659_v5, 1.0  ;;  %v1311_v14 = vadd.f32 %v1310_v41, %v1142_v53  ;;  %1804 = vst.msk [vmem:[%s3840_s4 + $0x1d8] sm:$0xff] %vm1744_vm0, %v1739_v61  ;;  %v1548_v51 = vadd.f32 %v2535_v4, %v1351_v11  ;;  %v1143_v33 = vpop.f32.mrf.mxu1  ;;  %v975_v18 = vadd.f32 %v3431_v56, %v974_v15 }
 0x209   :  { %1788 = vst.msk [vmem:[%s3840_s4 + $0x158] sm:$0xff] %vm1744_vm0, %v1723_v13  ;;  %v1532_v16 = vadd.f32 %v2503_v6, %v1311_v14  ;;  %v1612_v22 = vmax.f32 %v1548_v51, 0.0  ;;  %v1144_v25 = vadd.f32 %v1143_v33, %v975_v18 }
 0x20b   :  { %v1596_v46 = vmax.f32 %v1532_v16, 0.0  ;;  %v1676_v20 = vmax.f32 %v1612_v22, 0.0 }
 0x20c   :  { %v1352_v27 = vpop.f32.mrf.mxu3 }
 0x20d   :  { %v1660_v1 = vmax.f32 %v1596_v46, 0.0  ;;  %v1740_v28 = vmin.f32 %v1676_v20, 1.0  ;;  %v1353_v32 = vadd.f32 %v1352_v27, %v3595_v0  ;;  %v2571_v0 = vld [vmem:[%s3839_s3 + $0xf8] sm:$0xff]  }
 0x20e   :  { %v1312_v30 = vpop.f32.mrf.mxu2  ;;  %v977_v34 = vpop.f32.mrf.mxu0  ;;  %v2540_v40 = vunpack.c.h.bf16 %v2571_v0 }
 0x20f   :  { %v1724_v19 = vmin.f32 %v1660_v1, 1.0  ;;  %v1313_v60 = vadd.f32 %v1312_v30, %v1144_v25  ;;  %1805 = vst.msk [vmem:[%s3840_s4 + $0x1e0] sm:$0xff] %vm1744_vm0, %v1740_v28  ;;  %v1549_v45 = vadd.f32 %v2536_v62, %v1353_v32  ;;  %v978_v35 = vadd.f32 %v3431_v56, %v977_v34  ;;  %v1146_v39 = vpop.f32.mrf.mxu1 }
 0x210   :  { %v2539_v56 = vunpack.c.l.bf16 %v2571_v0 }
 0x211   :  { %1789 = vst.msk [vmem:[%s3840_s4 + $0x160] sm:$0xff] %vm1744_vm0, %v1724_v19  ;;  %v1533_v36 = vadd.f32 %v2504_v26, %v1313_v60  ;;  %v1613_v37 = vmax.f32 %v1549_v45, 0.0  ;;  %v1147_v31 = vadd.f32 %v1146_v39, %v978_v35 }
 0x213   :  { %v1597_v12 = vmax.f32 %v1533_v36, 0.0  ;;  %v1677_v63 = vmax.f32 %v1613_v37, 0.0 }
 0x214   :  { %v1355_v47 = vpop.f32.mrf.mxu3 }
 0x215   :  { %v1661_v10 = vmax.f32 %v1597_v12, 0.0  ;;  %v1741_v48 = vmin.f32 %v1677_v63, 1.0  ;;  %v1356_v50 = vadd.f32 %v1355_v47, %v3607_v21 }
 0x216   :  { %v1315_v49 = vpop.f32.mrf.mxu2  ;;  %v979_v3 = vpop.f32.mrf.mxu0 }
 0x217   :  { %v1725_v7 = vmin.f32 %v1661_v10, 1.0  ;;  %v1316_v52 = vadd.f32 %v1315_v49, %v1147_v31  ;;  %1806 = vst.msk [vmem:[%s3840_s4 + $0x1e8] sm:$0xff] %vm1744_vm0, %v1741_v48  ;;  %v1550_v17 = vadd.f32 %v2539_v56, %v1356_v50  ;;  %v980_v21 = vadd.f32 %v2598_v55, %v979_v3  ;;  %v1148_v59 = vpop.f32.mrf.mxu1 }
 0x219   :  { %1790 = vst.msk [vmem:[%s3840_s4 + $0x168] sm:$0xff] %vm1744_vm0, %v1725_v7  ;;  %v1534_v54 = vadd.f32 %v2507_v44, %v1316_v52  ;;  %v1614_v57 = vmax.f32 %v1550_v17, 0.0  ;;  %v1149_v29 = vadd.f32 %v1148_v59, %v980_v21 }
 0x21b   :  { %v1598_v23 = vmax.f32 %v1534_v54, 0.0  ;;  %v1678_v58 = vmax.f32 %v1614_v57, 0.0 }
 0x21c   :  { %v1357_v38 = vpop.f32.mrf.mxu3 }
 0x21d   :  { %v1662_v9 = vmax.f32 %v1598_v23, 0.0  ;;  %v1742_v53 = vmin.f32 %v1678_v58, 1.0  ;;  %v1358_v4 = vadd.f32 %v1357_v38, %v3616_v43 }
 0x21e   :  { %v1317_v2 = vpop.f32.mrf.mxu2 }
 0x21f   :  { %v1726_v5 = vmin.f32 %v1662_v9, 1.0  ;;  %v1318_v6 = vadd.f32 %v1317_v2, %v1149_v29  ;;  %1807 = vst.msk [vmem:[%s3840_s4 + $0x1f0] sm:$0xff] %vm1744_vm0, %v1742_v53  ;;  %v1551_v8 = vadd.f32 %v2540_v40, %v1358_v4 }
 0x221   :  { %1791 = vst.msk [vmem:[%s3840_s4 + $0x170] sm:$0xff] %vm1744_vm0, %v1726_v5  ;;  %v1535_v61 = vadd.f32 %v2508_v24, %v1318_v6  ;;  %v1615_v41 = vmax.f32 %v1551_v8, 0.0 }
 0x223   :  { %v1599_v11 = vmax.f32 %v1535_v61, 0.0  ;;  %v1679_v13 = vmax.f32 %v1615_v41, 0.0 }
 0x225   :  { %v1663_v14 = vmax.f32 %v1599_v11, 0.0  ;;  %v1743_v15 = vmin.f32 %v1679_v13, 1.0 }
 0x227   :  { %v1727_v43 = vmin.f32 %v1663_v14, 1.0  ;;  %1808 = vst.msk [vmem:[%s3840_s4 + $0x1f8] sm:$0xff] %vm1744_vm0, %v1743_v15 }
 0x229   :  { %1792 = vst.msk [vmem:[%s3840_s4 + $0x178] sm:$0xff] %vm1744_vm0, %v1727_v43 }

</bundles_post_ra>
